<compile_context>
chip_gen: v7x
topology: tpu7x:2x2x1
jax: 0.10.0
libtpu: 0.0.40
codegen_flags: <defaults>
</compile_context>

<pallas_src>
import functools

import jax
import jax.numpy as jnp
from jax.experimental import pallas as pl
from jax.experimental.pallas import tpu as pltpu

F32_EPS = float(jnp.finfo(jnp.float32).eps)


def _round_up(x, m):
    return (x + m - 1) // m * m


def _svq_kernel(x_ref, et_ref, q_ref, sse_ref, *, m_total, distance_precision):
    # x_ref: (tm, N) input rows; et_ref: (N, K) lane-dense transposed codebook.
    x = x_ref[...]
    et = et_ref[...]
    tm = x.shape[0]
    K = et.shape[1]

    # dots[m, k] = <x_m, e_k>  -- canonical (tm, N) @ (N, K) MXU matmul.
    dots = jax.lax.dot_general(
        x, et, (((1,), (0,)), ((), ())),
        preferred_element_type=jnp.float32,
        precision=distance_precision)

    # First-occurrence argmax over codes (== torch.argmin(2 - 2*dots) semantics).
    maxval = jnp.max(dots, axis=-1, keepdims=True)                  # (tm, 1)
    k_iota = jax.lax.broadcasted_iota(jnp.int32, dots.shape, 1)     # (tm, K)
    cand = jnp.where(dots >= maxval, k_iota, K)
    idx = jnp.min(cand, axis=-1, keepdims=True)                     # (tm, 1)

    onehot = (k_iota == idx).astype(jnp.float32)                    # (tm, K)

    # q[m, :] = E[idx_m, :] via onehot @ Et^T (trans_b matmul). HIGHEST keeps the
    # gathered codebook rows bit-exact in f32 (onehot is exactly representable).
    q = jax.lax.dot_general(
        onehot, et, (((1,), (1,)), ((), ())),
        preferred_element_type=jnp.float32,
        precision=jax.lax.Precision.HIGHEST)                        # (tm, N)

    # Straight-through forward value: (q - x).detach() + x.
    q_st = (q - x) + x
    q_ref[...] = q_st

    # Per-program, per-lane SSE partial; padded tail rows (>= m_total) masked out.
    rows = pl.program_id(0) * tm + jax.lax.broadcasted_iota(jnp.int32, (tm, 1), 0)
    d = x - q_st
    d2 = jnp.where(rows < m_total, d * d, 0.0)
    sse_ref[...] = jnp.sum(d2, axis=0)[None, None, :]               # (1, 1, N)


@functools.partial(jax.jit, static_argnames=("tm", "distance_precision"))
def svq_forward(x, embedding, tm=256,
                distance_precision=jax.lax.Precision.HIGHEST):
    """SVQ.forward (eval mode). x: (B, N, T), embedding: (K, N).

    tm: rows of the flattened (B*T, N) view per grid step (sweep 256-512; at 512
        raise vmem_limit_bytes, carefully on v7x).
    distance_precision: precision of the distance matmul. It only feeds an argmax,
        so jax.lax.Precision.DEFAULT (single bf16 MXU pass) is a v5e-leaning speedup;
        it may pick a different-but-equally-near code on near-ties vs. torch f32.
    """
    B, N, T = x.shape
    K = embedding.shape[0]
    M = B * T

    # TODO(synk): accept/emit a (B, T, N) activation layout upstream to skip these
    # two full-HBM transpose passes; the kernel only sees the flattened (M, N) view.
    xr = jnp.transpose(x, (0, 2, 1)).reshape(M, N).astype(jnp.float32)
    et = jnp.transpose(embedding.astype(jnp.float32))               # (N, K) lane-dense

    tm_eff = min(tm, _round_up(M, 8))        # multiple of 8, never larger than needed
    grid = (M + tm_eff - 1) // tm_eff
    m_pad = grid * tm_eff
    if m_pad != M:
        xr = jnp.pad(xr, ((0, m_pad - M), (0, 0)))

    kernel = functools.partial(_svq_kernel, m_total=M,
                               distance_precision=distance_precision)

    q_flat, sse_parts = pl.pallas_call(
        kernel,
        out_shape=(jax.ShapeDtypeStruct((m_pad, N), jnp.float32),
                   jax.ShapeDtypeStruct((grid, 1, N), jnp.float32)),
        grid_spec=pltpu.PrefetchScalarGridSpec(
            num_scalar_prefetch=0,
            grid=(grid,),
            in_specs=[pl.BlockSpec((tm_eff, N), lambda i: (i, 0)),
                      # Constant index_map: the codebook is DMA'd once and stays
                      # resident across the grid.
                      pl.BlockSpec((N, K), lambda i: (0, 0))],
            out_specs=(pl.BlockSpec((tm_eff, N), lambda i: (i, 0)),
                       pl.BlockSpec((1, 1, N), lambda i: (i, 0, 0)))),
        compiler_params=pltpu.CompilerParams(
            # No cross-step state (per-program q + SSE partials), so the row axis
            # can be sharded across TensorCores (2x on v7x; no-op on v5e/v6e).
            dimension_semantics=("parallel",),
            vmem_limit_bytes=32 * 1024 * 1024),
    )(xr, et)

    quantized = q_flat[:M].reshape(B, T, N).transpose(0, 2, 1)      # (B, N, T)
    latent_loss = jnp.sum(sse_parts) / (M * N)                      # F.mse_loss
    return quantized, latent_loss


def init_quantizer_params(key, code_dim, bit=(12,)):
    """Deterministic parameter init mirroring SVQ.__init__ (first/only stage)."""
    num_code = 2 ** bit[0]
    emb = jax.random.normal(key, (num_code, code_dim), dtype=jnp.float32)
    emb = emb / jnp.sqrt(jnp.sum(emb * emb, axis=-1, keepdims=True) + F32_EPS)
    return {"embedding": emb}


def quantizer_forward(x, params):
    """Quantizer.forward with default bit=[12] (single SVQ stage)."""
    q0, loss0 = svq_forward(x, params["embedding"])
    quantized = q0[..., None]                 # torch.stack([q], -1) -> (B, N, T, 1)
    latent_loss = jnp.stack([loss0], -1)      # (1,)
    return quantized, latent_loss


def _reference_forward(x, embedding):
    """Pure-JAX reference of the same forward (torch semantics) for validation."""
    B, N, T = x.shape
    M = B * T
    xr = jnp.transpose(x, (0, 2, 1)).reshape(M, N)
    eu = 2.0 - 2.0 * jnp.dot(xr, embedding.T, precision=jax.lax.Precision.HIGHEST)
    idx = jnp.argmin(eu, axis=-1)
    q = embedding[idx]
    q_st = (q - xr) + xr
    quantized = q_st.reshape(B, T, N).transpose(0, 2, 1)
    loss = jnp.mean((x - quantized) ** 2)
    return quantized[..., None], jnp.stack([loss], -1)


if __name__ == "__main__":
    B, code_dim, T = 2, 32, 16
    key = jax.random.PRNGKey(0)
    k_emb, k_x = jax.random.split(key)

    params = init_quantizer_params(k_emb, code_dim, bit=(12,))
    x = jax.random.normal(k_x, (B, code_dim, T), dtype=jnp.float32)

    quantized, latent_loss = quantizer_forward(x, params)
    quantized = jax.block_until_ready(quantized)
    latent_loss = jax.block_until_ready(latent_loss)

    assert quantized.shape == (B, code_dim, T, 1)
    assert latent_loss.shape == (1,)

    q_ref, l_ref = _reference_forward(x, params["embedding"])
    assert jnp.allclose(quantized, q_ref, atol=1e-5), "quantized mismatch vs reference"
    assert jnp.allclose(latent_loss, l_ref, atol=1e-5), "loss mismatch vs reference"

    print("KERNEL_OK")
</pallas_src>

<mosaic_0001>
module attributes {stable_mosaic.version = 11 : i64} {
  func.func @_svq_kernel(%arg0: i32, %arg1: memref<32x32xf32, #tpu.memory_space<vmem>>, %arg2: memref<32x4096xf32, #tpu.memory_space<vmem>>, %arg3: memref<32x32xf32, #tpu.memory_space<vmem>>, %arg4: memref<1x1x32xf32, #tpu.memory_space<vmem>>) attributes {dimension_semantics = [#tpu.dimension_semantics<parallel>], iteration_bounds = array<i64: 1>, scalar_prefetch = 0 : i64, scratch_operands = 0 : i64, tpu.core_type = #tpu.core_type<tc>, window_params = [{transform_indices = @transform_0, window_bounds = array<i64: 32, 32>}, {pipeline_mode = #tpu.pipeline_mode<synchronous>, transform_indices = @transform_1, window_bounds = array<i64: 32, 4096>}, {transform_indices = @transform_2, window_bounds = array<i64: 32, 32>}, {transform_indices = @transform_3, window_bounds = array<i64: 1, 1, 32>}]} {
    %c0 = arith.constant 0 : index
    %c0_0 = arith.constant 0 : index
    %0 = vector.load %arg1[%c0, %c0_0] : memref<32x32xf32, #tpu.memory_space<vmem>>, vector<32x32xf32>
    %c0_1 = arith.constant 0 : index
    %c0_2 = arith.constant 0 : index
    %1 = vector.load %arg2[%c0_1, %c0_2] : memref<32x4096xf32, #tpu.memory_space<vmem>>, vector<32x4096xf32>
    %cst = arith.constant dense<0.000000e+00> : vector<32x4096xf32>
    %2 = tpu.matmul %0, %1, %cst {dimension_numbers = #tpu.dot_dimension_numbers<[1], [0], [0], [1], [0, 0, 1, 1], [], []>, precision = #tpu.contract_precision<fp32>} : vector<32x32xf32>, vector<32x4096xf32>, vector<32x4096xf32> -> vector<32x4096xf32>
    %cst_3 = arith.constant dense<0xFF800000> : vector<32xf32>
    %3 = vector.multi_reduction <maximumf>, %2, %cst_3 [1] : vector<32x4096xf32> to vector<32xf32>
    %4 = vector.shape_cast %3 : vector<32xf32> to vector<32x1xf32>
    %5 = tpu.iota {dimensions = array<i32: 1>} : vector<32x4096xi32>
    %6 = vector.broadcast %4 : vector<32x1xf32> to vector<32x4096xf32>
    %7 = arith.cmpf oge, %2, %6 : vector<32x4096xf32>
    %c4096_i32 = arith.constant 4096 : i32
    %8 = vector.broadcast %c4096_i32 : i32 to vector<32x4096xi32>
    %9 = arith.select %7, %5, %8 : vector<32x4096xi1>, vector<32x4096xi32>
    %cst_4 = arith.constant dense<2147483647> : vector<32xi32>
    %10 = vector.multi_reduction <minsi>, %9, %cst_4 [1] : vector<32x4096xi32> to vector<32xi32>
    %11 = vector.shape_cast %10 : vector<32xi32> to vector<32x1xi32>
    %12 = vector.broadcast %11 : vector<32x1xi32> to vector<32x4096xi32>
    %13 = arith.cmpi eq, %5, %12 : vector<32x4096xi32>
    %14 = arith.extui %13 : vector<32x4096xi1> to vector<32x4096xi32>
    %15 = arith.sitofp %14 : vector<32x4096xi32> to vector<32x4096xf32>
    %cst_5 = arith.constant dense<0.000000e+00> : vector<32x32xf32>
    %16 = tpu.matmul %15, %1, %cst_5 {dimension_numbers = #tpu.dot_dimension_numbers<[1], [1], [0], [0], [0, 0, 1, 0], [], []>, precision = #tpu.contract_precision<fp32>} : vector<32x4096xf32>, vector<32x4096xf32>, vector<32x32xf32> -> vector<32x32xf32>
    %17 = arith.subf %16, %0 : vector<32x32xf32>
    %18 = arith.addf %17, %0 : vector<32x32xf32>
    %c0_6 = arith.constant 0 : index
    %c0_7 = arith.constant 0 : index
    %19 = vector.load %arg3[%c0_6, %c0_7] : memref<32x32xf32, #tpu.memory_space<vmem>>, vector<32x32xf32>
    tpu.vector_store %arg3[%c0_6, %c0_7], %18 {strides = array<i32>} : memref<32x32xf32, #tpu.memory_space<vmem>>, vector<32x32xf32>,
    %c32_i32 = arith.constant 32 : i32
    %20 = arith.muli %arg0, %c32_i32 : i32
    %21 = tpu.iota {dimensions = array<i32: 0>} : vector<32x1xi32>
    %22 = vector.broadcast %20 : i32 to vector<32x1xi32>
    %23 = arith.addi %22, %21 : vector<32x1xi32>
    %24 = arith.subf %0, %18 : vector<32x32xf32>
    %c32_i32_8 = arith.constant 32 : i32
    %25 = vector.broadcast %c32_i32_8 : i32 to vector<32x1xi32>
    %26 = arith.cmpi slt, %23, %25 : vector<32x1xi32>
    %27 = arith.mulf %24, %24 : vector<32x32xf32>
    %cst_9 = arith.constant 0.000000e+00 : f32
    %28 = vector.shape_cast %26 : vector<32x1xi1> to vector<32x1xi1>
    %29 = vector.broadcast %28 : vector<32x1xi1> to vector<32x32xi1>
    %30 = vector.broadcast %cst_9 : f32 to vector<32x32xf32>
    %31 = arith.select %29, %27, %30 : vector<32x32xi1>, vector<32x32xf32>
    %cst_10 = arith.constant dense<0.000000e+00> : vector<32xf32>
    %32 = vector.multi_reduction <add>, %31, %cst_10 [0] : vector<32x32xf32> to vector<32xf32>
    %33 = vector.shape_cast %32 : vector<32xf32> to vector<1x1x32xf32>
    %c0_11 = arith.constant 0 : index
    %c0_12 = arith.constant 0 : index
    %c0_13 = arith.constant 0 : index
    %34 = vector.load %arg4[%c0_11, %c0_12, %c0_13] : memref<1x1x32xf32, #tpu.memory_space<vmem>>, vector<1x1x32xf32>
    tpu.vector_store %arg4[%c0_11, %c0_12, %c0_13], %33 {strides = array<i32>} : memref<1x1x32xf32, #tpu.memory_space<vmem>>, vector<1x1x32xf32>,
    return
  }
  func.func @transform_0(%arg0: i32) -> (i32, i32) {
    %c0_i32 = arith.constant 0 : i32
    %c0_i32_0 = arith.constant 0 : i32
    return %arg0, %c0_i32 : i32, i32
  }
  func.func @transform_1(%arg0: i32) -> (i32, i32) {
    %c0_i32 = arith.constant 0 : i32
    %c0_i32_0 = arith.constant 0 : i32
    %c0_i32_1 = arith.constant 0 : i32
    return %c0_i32, %c0_i32_0 : i32, i32
  }
  func.func @transform_2(%arg0: i32) -> (i32, i32) {
    %c0_i32 = arith.constant 0 : i32
    %c0_i32_0 = arith.constant 0 : i32
    return %arg0, %c0_i32 : i32, i32
  }
  func.func @transform_3(%arg0: i32) -> (i32, i32, i32) {
    %c0_i32 = arith.constant 0 : i32
    %c0_i32_0 = arith.constant 0 : i32
    %c0_i32_1 = arith.constant 0 : i32
    return %arg0, %c0_i32, %c0_i32_0 : i32, i32, i32
  }
}

</mosaic_0001>

<bundles_post_ra>
// kernel: svq_forward.1
= control target key start
LH: loop header
LB: loop body
LE: loop exit
PB: predicated region body
PF: predicated region fallthrough
CT: control target
= control target key end

     0   :  { %9 = vsyncpa [#allocation3], 0  ;;  %s35230_s0 = inlined_call_operand.hbm [shape: f32[32,32], index: 0, kind: input, shape index: {}]   ;;  %s35231_s1 = inlined_call_operand.hbm [shape: f32[32,4096], index: 1, kind: input, shape index: {}]   ;;  %s35232_s2 = inlined_call_operand.hbm [shape: f32[32,32], index: 2, kind: output, shape index: {0}]   ;;  %s35233_s3 = inlined_call_operand.vmem [shape: f32[1,1,32], index: 3, kind: output, shape index: {1}]  }
   0x1   :  { %10 = vsyncpa [#allocation6], 0 }
   0x2   :  { %11 = vsyncpa [#allocation4], 0  ;;  %s27437_s12 = smov [#allocation2]   ;;  %s27365_s16 = scalar_lea.hbm %s35230_s0, 512 }
   0x3   :  { %s17_s13 = sshll.u32 %s27437_s12, 4  ;;  %p27366_p0 = scmp.ne.s32.totalorder %s35230_s0, %s27365_s16  ;;  %s18_s13 = int_to_ptr.vmem [resolvable:$true] %s17_s13 }
   0x4   :  { %p27369_p1 = scmp.lt.u32.totalorder %s27365_s16, %s35230_s0 }
   0x6   :  { %p27371_p2 = pnand %p27369_p1, %p27366_p0 }
   0x8   :  { %27374 = shalt.err (!%p27371_p2)
}
   0x9   :  { %s27375_s21 = scalar_lea.vmem %s18_s13, 512  ;;  %p27380_p4 = scmp.lt.s32.totalorder %s18_s13, %s18_s13 }
   0xa   :  { %p27376_p3 = scmp.ne.s32.totalorder %s18_s13, %s27375_s21  ;;  %p27381_p5 = scmp.lt.s32.totalorder %s27375_s21, %s27375_s21 }
   0xc   :  { %p27382_p6 = por %p27381_p5, %p27380_p4 }
   0xe   :  { %p27383_p7 = pnand %p27382_p6, %p27376_p3 }
  0x10   :  { %27386 = shalt.err (!%p27383_p7)
}
  0x11   :  { %s27438_s22 = smov 128   ;;  %s27439_s23 = smov 8  }
  0x12   :  { %23 = dma.hbm_to_vmem [thread:$0]  %s35230_s0, 512, %s18_s13, [#allocation3], %s27438_s22, %s27438_s22, %s27439_s23  }
  0x13   :  { %s27440_s26 = smov [#allocation5]   ;;  %s27387_s30 = scalar_lea.hbm %s35231_s1, 16384 }
  0x14   :  { %s29_s27 = sshll.u32 %s27440_s26, 4  ;;  %p27388_p8 = scmp.ne.s32.totalorder %s35231_s1, %s27387_s30  ;;  %s30_s27 = int_to_ptr.vmem [resolvable:$true] %s29_s27 }
  0x15   :  { %p27391_p9 = scmp.lt.u32.totalorder %s27387_s30, %s35231_s1 }
  0x17   :  { %p27393_p10 = pnand %p27391_p9, %p27388_p8 }
  0x19   :  { %27396 = shalt.err (!%p27393_p10)
}
  0x1a   :  { %s27397_s8 = scalar_lea.vmem %s30_s27, 16384  ;;  %p27402_p12 = scmp.lt.s32.totalorder %s30_s27, %s30_s27 }
  0x1b   :  { %p27398_p11 = scmp.ne.s32.totalorder %s30_s27, %s27397_s8  ;;  %p27403_p13 = scmp.lt.s32.totalorder %s27397_s8, %s27397_s8 }
  0x1d   :  { %p27404_p0 = por %p27403_p13, %p27402_p12 }
  0x1f   :  { %p27405_p1 = pnand %p27404_p0, %p27398_p11 }
  0x21   :  { %27408 = shalt.err (!%p27405_p1)
}
  0x22   :  { %s27441_s0 = smov 4096   ;;  %s27442_s9 = smov 256  }
  0x23   :  { %35 = dma.hbm_to_vmem [thread:$0]  %s35231_s1, 16384, %s30_s27, [#allocation6], %s27441_s0, %s27441_s0, %s27442_s9  }
  0x24   :  { %27431 = dma.done.wait [#allocation3], 512  }
  0x25   :  { %27432 = vsyncadd [#allocation3], 4294966784 }
  0x26   :  { %27433 = dma.done.wait [#allocation6], 16384  }
  0x27   :  { %27434 = vsyncadd [#allocation6], 4294950912  ;;  %v35328_v0 = vmov 0.0   ;;  %v47_v1 = vld [vmem:[#allocation5 + $0x8] sm:$0xff]  ;;  %v46_v3 = vld [vmem:[#allocation5] sm:$0xff]  ;;  %vm35797_vm0 = vcmask 261120  }
  0x28   :  { %259 = vmatprep.mubr.f32.mxu1 %v35328_v0  ;;  %10508 = vmatprep.mubr.f32.mxu0 %v35328_v0  ;;  %v79_v2 = vld [vmem:[#allocation5 + $0x108] sm:$0xff]  ;;  %v187_v4 = vand.u32 4294901760, %v47_v1  ;;  %v78_v6 = vld [vmem:[#allocation5 + $0x100] sm:$0xff]  ;;  %v189_v7 = vand.u32 4294901760, %v46_v3  ;;  %v44_v21 = vld [vmem:[#allocation2 + $0x10] sm:$0xff]  ;;  %s27445_s1 = smov [#allocation7]  }
  0x29   :  { %v191_v5 = vand.u32 4294901760, %v79_v2  ;;  %v111_v8 = vld [vmem:[#allocation5 + $0x208] sm:$0xff]  ;;  %v193_v10 = vand.u32 4294901760, %v78_v6  ;;  %v110_v13 = vld [vmem:[#allocation5 + $0x200] sm:$0xff]  ;;  %v182_v33 = vsel %vm35797_vm0, %v44_v21, 0  ;;  %v45_v58 = vld [vmem:[#allocation2 + $0x18] sm:$0xff] }
  0x2a   :  { %v143_v9 = vld [vmem:[#allocation5 + $0x308] sm:$0xff]  ;;  %v195_v11 = vand.u32 4294901760, %v111_v8  ;;  %v142_v14 = vld [vmem:[#allocation5 + $0x300] sm:$0xff]  ;;  %v197_v17 = vand.u32 4294901760, %v110_v13  ;;  %v27504_v25 = vsub.f32 %v47_v1, %v187_v4  ;;  %v27511_v28 = vsub.f32 %v46_v3, %v189_v7  ;;  %s23891_s12 = sshll.u32 %s27445_s1, 4  ;;  %s23892_s12 = int_to_ptr.vmem [resolvable:$true] %s23891_s12 }
  0x2b   :  { %v199_v12 = vand.u32 4294901760, %v143_v9  ;;  %v42_v15 = vld [vmem:[#allocation2] sm:$0xff]  ;;  %v27495_v16 = vpack.c.bf16 %v191_v5, %v187_v4  ;;  %v201_v18 = vand.u32 4294901760, %v142_v14  ;;  %v43_v20 = vld [vmem:[#allocation2 + $0x8] sm:$0xff]  ;;  %v27498_v22 = vpack.c.bf16 %v193_v10, %v189_v7  ;;  %s27409_s13 = scalar_lea.vmem %s23892_s12, 512  ;;  %p27414_p3 = scmp.lt.s32.totalorder %s23892_s12, %s23892_s12 }
  0x2c   :  { %v176_v19 = vsel %vm35797_vm0, %v42_v15, 0  ;;  %v27509_v27 = vsub.f32 %v79_v2, %v191_v5  ;;  %v27513_v29 = vsub.f32 %v78_v6, %v193_v10  ;;  %v306_v31 = vand.u32 4294901760, %v27504_v25  ;;  %p27410_p2 = scmp.ne.s32.totalorder %s23892_s12, %s27409_s13  ;;  %p27415_p4 = scmp.lt.s32.totalorder %s27409_s13, %s27409_s13 }
  0x2d   :  { %35819 = vst [vmem:[#allocation11_spill] sm:$0xff] %v27495_v16  ;;  %35820 = vst [vmem:[#allocation12_spill] sm:$0xff] %v27498_v22  ;;  %v27500_v23 = vpack.c.bf16 %v199_v12, %v195_v11  ;;  %v27502_v24 = vand.u32 4294901760, %v176_v19  ;;  %24421 = vmatprep.subr.bf16.mxu1 %v27495_v16  ;;  %v27507_v26 = vpack.c.bf16 %v201_v18, %v197_v17  ;;  %v179_v32 = vsel %vm35797_vm0, %v43_v20, 0 }
  0x2e   :  { %24423 = vmatpush1.bf16.msra.mxu1 %v27498_v22  ;;  %v318_v34 = vand.u32 4294901760, %v27509_v27  ;;  %v312_v35 = vand.u32 4294901760, %v27511_v28  ;;  %v324_v36 = vand.u32 4294901760, %v27513_v29  ;;  %v27526_v37 = vand.u32 4294901760, %v179_v32  ;;  %p27416_p5 = por %p27415_p4, %p27414_p3 }
  0x2f   :  { %35821 = vst [vmem:[#allocation13_spill] sm:$0xff] %v27500_v23  ;;  %35822 = vst [vmem:[#allocation14_spill] sm:$0xff] %v27507_v26  ;;  %v27517_v30 = vsub.f32 %v176_v19, %v27502_v24  ;;  %24425 = vmatprep.subr.bf16.mxu1 %v27500_v23  ;;  %v307_v39 = vsub.f32 %v27504_v25, %v306_v31  ;;  %v27534_v40 = vand.u32 4294901760, %v182_v33  ;;  %v185_v5 = vsel %vm35797_vm0, %v45_v58, 0 }
  0x30   :  { %v27536_v41 = vsub.f32 %v111_v8, %v195_v11  ;;  %v319_v42 = vsub.f32 %v27509_v27, %v318_v34  ;;  %v313_v43 = vsub.f32 %v27511_v28, %v312_v35  ;;  %v325_v44 = vsub.f32 %v27513_v29, %v324_v36  ;;  %p27417_p6 = pnand %p27416_p5, %p27410_p2 }
  0x31   :  { %v27529_v38 = vand.u32 4294901760, %v27517_v30  ;;  %v27548_v45 = vsub.f32 %v179_v32, %v27526_v37  ;;  %v308_v47 = vand.u32 4294901760, %v307_v39  ;;  %v27554_v48 = vsub.f32 %v182_v33, %v27534_v40 }
  0x32   :  { %24427 = vmatpush1.bf16.msra.mxu1 %v27507_v26  ;;  %v330_v49 = vand.u32 4294901760, %v27536_v41  ;;  %v320_v50 = vand.u32 4294901760, %v319_v42  ;;  %v314_v51 = vand.u32 4294901760, %v313_v43  ;;  %v326_v52 = vand.u32 4294901760, %v325_v44 }
  0x33   :  { %v263_v46 = vsub.f32 %v27517_v30, %v27529_v38  ;;  %v27558_v53 = vand.u32 4294901760, %v27548_v45  ;;  %v27563_v55 = vand.u32 4294901760, %v27554_v48  ;;  %v27568_v57 = vsub.f32 %v143_v9, %v199_v12 }
  0x34   :  { %v331_v56 = vsub.f32 %v27536_v41, %v330_v49  ;;  %v27570_v59 = vpack.c.bf16 %v320_v50, %v308_v47  ;;  %v27572_v60 = vpack.c.bf16 %v326_v52, %v314_v51  ;;  %v27576_v62 = vsub.f32 %v110_v13, %v197_v17  ;;  %v48_v47 = vld [vmem:[#allocation5 + $0x10] sm:$0xff]  ;;  %v113_v50 = vld [vmem:[#allocation5 + $0x218] sm:$0xff] }
  0x35   :  { %v27560_v54 = vand.u32 4294901760, %v263_v46  ;;  %v274_v61 = vsub.f32 %v27548_v45, %v27558_v53  ;;  %v285_v63 = vsub.f32 %v27554_v48, %v27563_v55  ;;  %v342_v1 = vand.u32 4294901760, %v27568_v57  ;;  %v145_v51 = vld [vmem:[#allocation5 + $0x318] sm:$0xff] }
  0x36   :  { %v27582_v2 = vsub.f32 %v142_v14, %v201_v18  ;;  %24429 = vmatprep.subr.bf16.mxu1 %v27570_v59  ;;  %v336_v4 = vand.u32 4294901760, %v27576_v62  ;;  %v332_v6 = vand.u32 4294901760, %v331_v56  ;;  %v27595_v9 = vand.u32 4294901760, %v185_v5 }
  0x37   :  { %265 = vmatmul.mubr.f32.vlgmr.msra.gmra.mrb[0].mxu1 %v27560_v54  ;;  %v27586_v3 = vand.u32 4294901760, %v274_v61  ;;  %v343_v7 = vsub.f32 %v27568_v57, %v342_v1  ;;  %v27599_v11 = vand.u32 4294901760, %v285_v63  ;;  %v27613_v20 = vpack.c.bf16 %v27509_v27, %v27504_v25  ;;  %v112_v63 = vld [vmem:[#allocation5 + $0x210] sm:$0xff] }
  0x38   :  { %270 = vmatprep.mubr.f32.mxu1 %v35328_v0  ;;  %24431 = vmatpush1.bf16.msra.mxu1 %v27572_v60  ;;  %v348_v8 = vand.u32 4294901760, %v27582_v2  ;;  %v337_v10 = vsub.f32 %v27576_v62, %v336_v4  ;;  %v27603_v14 = vsub.f32 %v185_v5, %v27595_v9  ;;  %v27630_v39 = vpack.c.bf16 %v27513_v29, %v27511_v28  ;;  %v49_v28 = vld [vmem:[#allocation5 + $0x18] sm:$0xff] }
  0x39   :  { %v344_v12 = vand.u32 4294901760, %v343_v7  ;;  %v27634_v42 = vpack.c.bf16 %v27568_v57, %v27536_v41  ;;  %v27641_v43 = vpack.c.bf16 %v27582_v2, %v27576_v62  ;;  %v27660_v44 = vpack.c.bf16 %v318_v34, %v306_v31  ;;  %v81_v29 = vld [vmem:[#allocation5 + $0x118] sm:$0xff] }
  0x3a   :  { %v349_v13 = vsub.f32 %v27582_v2, %v348_v8  ;;  %v338_v15 = vand.u32 4294901760, %v337_v10  ;;  %v27609_v19 = vand.u32 4294901760, %v27603_v14  ;;  %35823 = vst [vmem:[#allocation15_spill] sm:$0xff] %v27630_v39  ;;  %v27674_v25 = vpack.c.bf16 %v324_v36, %v312_v35 }
  0x3b   :  { %276 = vmatmul.mubr.f32.gmra.mrb[2].mxu1 %v27586_v3  ;;  %v27606_v17 = vpack.c.bf16 %v344_v12, %v332_v6  ;;  %35824 = vst [vmem:[#allocation16_spill] sm:$0xff] %v27634_v42  ;;  %35825 = vst [vmem:[#allocation17_spill] sm:$0xff] %v27641_v43  ;;  %v27680_v27 = vpack.c.bf16 %v342_v1, %v330_v49  ;;  %v27685_v31 = vpack.c.bf16 %v348_v8, %v336_v4  ;;  %v80_v49 = vld [vmem:[#allocation5 + $0x110] sm:$0xff] }
  0x3c   :  { %281 = vmatprep.mubr.f32.mxu1 %v35328_v0  ;;  %v350_v18 = vand.u32 4294901760, %v349_v13  ;;  %v296_v32 = vsub.f32 %v27603_v14, %v27609_v19  ;;  %35826 = vst [vmem:[#allocation18_spill] sm:$0xff] %v27660_v44  ;;  %35827 = vst [vmem:[#allocation19_spill] sm:$0xff] %v27674_v25  ;;  %v877_v34 = vand.u32 4294901760, %v49_v28  ;;  %v881_v35 = vand.u32 4294901760, %v81_v29  ;;  %v144_v1 = vld [vmem:[#allocation5 + $0x310] sm:$0xff] }
  0x3d   :  { %24433 = vmatprep.subr.bf16.mxu1 %v27606_v17  ;;  %35828 = vst [vmem:[#allocation20_spill] sm:$0xff] %v27680_v27  ;;  %35829 = vst [vmem:[#allocation21_spill] sm:$0xff] %v27685_v31  ;;  %v879_v57 = vand.u32 4294901760, %v48_v47  ;;  %v883_v58 = vand.u32 4294901760, %v80_v49  ;;  %v885_v61 = vand.u32 4294901760, %v113_v50  ;;  %v889_v62 = vand.u32 4294901760, %v145_v51 }
  0x3e   :  { %v27617_v21 = vpack.c.bf16 %v350_v18, %v338_v15  ;;  %v27623_v33 = vand.u32 4294901760, %v296_v32  ;;  %v27700_v36 = vpack.c.bf16 %v881_v35, %v877_v34  ;;  %v27702_v41 = vsub.f32 %v49_v28, %v877_v34 }
  0x3f   :  { %287 = vmatmul.mubr.f32.gmra.mrb[4].mxu1 %v27599_v11  ;;  %v27704_v46 = vsub.f32 %v81_v29, %v881_v35  ;;  %v887_v5 = vand.u32 4294901760, %v112_v63  ;;  %v891_v6 = vand.u32 4294901760, %v144_v1  ;;  %v27722_v7 = vpack.c.bf16 %v883_v58, %v879_v57 }
  0x40   :  { %292 = vmatprep.mubr.f32.mxu1 %v35328_v0  ;;  %24435 = vmatpush1.bf16.msra.mxu1 %v27617_v21  ;;  %35830 = vst [vmem:[#allocation22_spill] sm:$0xff] %v27700_v36  ;;  %v996_v52 = vand.u32 4294901760, %v27702_v41  ;;  %v27724_v8 = vpack.c.bf16 %v889_v62, %v885_v61  ;;  %v27726_v10 = vsub.f32 %v48_v47, %v879_v57 }
  0x41   :  { %24437 = vmatprep.subr.bf16.mxu1 %v27613_v20  ;;  %v1008_v56 = vand.u32 4294901760, %v27704_v46  ;;  %35831 = vst [vmem:[#allocation23_spill] sm:$0xff] %v27722_v7  ;;  %v27728_v12 = vsub.f32 %v80_v49, %v883_v58  ;;  %v27730_v18 = vsub.f32 %v113_v50, %v885_v61  ;;  %v27732_v32 = vsub.f32 %v145_v51, %v889_v62 }
  0x42   :  { %v997_v2 = vsub.f32 %v27702_v41, %v996_v52  ;;  %35832 = vst [vmem:[#allocation24_spill] sm:$0xff] %v27724_v8  ;;  %v27735_v28 = vpack.c.bf16 %v891_v6, %v887_v5  ;;  %v1002_v29 = vand.u32 4294901760, %v27726_v10  ;;  %v27741_v35 = vsub.f32 %v112_v63, %v887_v5 }
  0x43   :  { %298 = vmatmul.mubr.f32.gmra.mrb[6].mxu1 %v27623_v33  ;;  %v1009_v4 = vsub.f32 %v27704_v46, %v1008_v56  ;;  %v35236_v34 = vand.u32 4294901760, %v27728_v12  ;;  %v27743_v47 = vsub.f32 %v144_v1, %v891_v6  ;;  %v35235_v50 = vand.u32 4294901760, %v27730_v18 }
  0x44   :  { %408 = vmatprep.mubr.f32.mxu1 %v35328_v0  ;;  %v998_v13 = vand.u32 4294901760, %v997_v2  ;;  %35833 = vst [vmem:[#allocation25_spill] sm:$0xff] %v27735_v28  ;;  %v35234_v51 = vand.u32 4294901760, %v27732_v32  ;;  %v1003_v57 = vsub.f32 %v27726_v10, %v1002_v29  ;;  %v1026_v61 = vand.u32 4294901760, %v27741_v35 }
  0x45   :  { %v1010_v15 = vand.u32 4294901760, %v1009_v4  ;;  %v1015_v58 = vsub.f32 %v27728_v12, %v35236_v34  ;;  %v1038_v62 = vand.u32 4294901760, %v27743_v47  ;;  %v1021_v63 = vsub.f32 %v27730_v18, %v35235_v50 }
  0x46   :  { %v1033_v1 = vsub.f32 %v27732_v32, %v35234_v51  ;;  %v1004_v2 = vand.u32 4294901760, %v1003_v57  ;;  %v1027_v5 = vsub.f32 %v27741_v35, %v1026_v61 }
  0x47   :  { %410 = vmatmul.mubr.f32.vlgmr.msra.gmra.mrb[0].mxu1 %v27502_v24  ;;  %v27746_v49 = vpack.c.bf16 %v1010_v15, %v998_v13  ;;  %v1016_v4 = vand.u32 4294901760, %v1015_v58  ;;  %v1039_v6 = vsub.f32 %v27743_v47, %v1038_v62  ;;  %v1022_v13 = vand.u32 4294901760, %v1021_v63 }
  0x48   :  { %24439 = vmatpush1.bf16.msra.mxu1 %v27630_v39  ;;  %415 = vmatprep.mubr.f32.mxu1 %v35328_v0  ;;  %v1034_v15 = vand.u32 4294901760, %v1033_v1  ;;  %v1028_v50 = vand.u32 4294901760, %v1027_v5  ;;  %v27790_v63 = vpack.c.bf16 %v27704_v46, %v27702_v41  ;;  %v27813_v1 = vpack.c.bf16 %v27743_v47, %v27741_v35  ;;  %v82_v5 = vld [vmem:[#allocation5 + $0x120] sm:$0xff] }
  0x49   :  { %24441 = vmatprep.subr.bf16.mxu1 %v27634_v42  ;;  %35834 = vst [vmem:[#allocation26_spill] sm:$0xff] %v27746_v49  ;;  %v27778_v51 = vpack.c.bf16 %v1016_v4, %v1004_v2  ;;  %v1040_v34 = vand.u32 4294901760, %v1039_v6  ;;  %v27832_v2 = vpack.c.bf16 %v1008_v56, %v996_v52  ;;  %v35843_v41 = vand.u32 4294901760, %v27728_v12  ;;  %v115_v6 = vld [vmem:[#allocation5 + $0x228] sm:$0xff] }
  0x4a   :  { %v27780_v57 = vpack.c.bf16 %v1034_v15, %v1022_v13  ;;  %35838 = vst [vmem:[#allocation30_spill] sm:$0xff] %v27790_v63  ;;  %35841 = vst [vmem:[#allocation33_spill] sm:$0xff] %v27813_v1  ;;  %v35845_v52 = vand.u32 4294901760, %v27730_v18  ;;  %v35846_v56 = vand.u32 4294901760, %v27732_v32  ;;  %v147_v13 = vld [vmem:[#allocation5 + $0x328] sm:$0xff] }
  0x4b   :  { %417 = vmatmul.mubr.f32.gmra.mrb[2].mxu1 %v27526_v37  ;;  %35835 = vst [vmem:[#allocation27_spill] sm:$0xff] %v27778_v51  ;;  %v27785_v58 = vpack.c.bf16 %v1040_v34, %v1028_v50  ;;  %v27802_v34 = vpack.c.bf16 %v27728_v12, %v27726_v10  ;;  %v27806_v50 = vpack.c.bf16 %v27732_v32, %v27730_v18  ;;  %35842 = vst [vmem:[#allocation34_spill] sm:$0xff] %v27832_v2  ;;  %v51_v12 = vld [vmem:[#allocation5 + $0x28] sm:$0xff] }
  0x4c   :  { %422 = vmatprep.mubr.f32.mxu1 %v35328_v0  ;;  %24443 = vmatpush1.bf16.msra.mxu1 %v27641_v43  ;;  %35836 = vst [vmem:[#allocation28_spill] sm:$0xff] %v27780_v57  ;;  %v27846_v46 = vpack.c.bf16 %v35843_v41, %v1002_v29  ;;  %v27852_v4 = vpack.c.bf16 %v35846_v56, %v35845_v52  ;;  %v83_v18 = vld [vmem:[#allocation5 + $0x128] sm:$0xff]  ;;  %v1567_v32 = vand.u32 4294901760, %v51_v12  ;;  %v1573_v56 = vand.u32 4294901760, %v82_v5 }
  0x4d   :  { %24445 = vmatprep.subr.bf16.mxu1 %v27495_v16  ;;  %35837 = vst [vmem:[#allocation29_spill] sm:$0xff] %v27785_v58  ;;  %35839 = vst [vmem:[#allocation31_spill] sm:$0xff] %v27802_v34  ;;  %v27861_v10 = vpack.c.bf16 %v1038_v62, %v1026_v61  ;;  %v1571_v29 = vand.u32 4294901760, %v83_v18  ;;  %v50_v62 = vld [vmem:[#allocation5 + $0x20] sm:$0xff]  ;;  %v35926_v43 = vmov 0.0  }
  0x4e   :  { %35840 = vst [vmem:[#allocation32_spill] sm:$0xff] %v27806_v50  ;;  %35844 = vst [vmem:[#allocation35_spill] sm:$0xff] %v27846_v46  ;;  %v27878_v47 = vsub.f32 %v51_v12, %v1567_v32  ;;  %v1569_v52 = vand.u32 4294901760, %v50_v62  ;;  %v1575_v12 = vand.u32 4294901760, %v115_v6 }
  0x4f   :  { %424 = vmatmul.mubr.f32.gmra.mrb[4].mxu1 %v27534_v40  ;;  %35847 = vst [vmem:[#allocation36_spill] sm:$0xff] %v27852_v4  ;;  %35848 = vst [vmem:[#allocation37_spill] sm:$0xff] %v27861_v10  ;;  %v27876_v35 = vpack.c.bf16 %v1571_v29, %v1567_v32  ;;  %v27880_v61 = vsub.f32 %v83_v18, %v1571_v29  ;;  %v1579_v18 = vand.u32 4294901760, %v147_v13  ;;  %v114_v32 = vld [vmem:[#allocation5 + $0x220] sm:$0xff] }
  0x50   :  { %429 = vmatprep.mubr.f32.mxu1 %v35328_v0  ;;  %v35246_v15 = vand.u32 4294901760, %v27878_v47  ;;  %v146_v29 = vld [vmem:[#allocation5 + $0x320] sm:$0xff] }
  0x51   :  { %35849 = vst [vmem:[#allocation38_spill] sm:$0xff] %v27876_v35  ;;  %v35249_v41 = vand.u32 4294901760, %v27880_v61 }
  0x53   :  { %431 = vmatmul.mubr.f32.gmra.mrb[6].mxu1 %v27595_v9 }
  0x54   :  { %517 = vmatprep.mubr.f32.mxu1 %v35328_v0 }
  0x57   :  { %520 = vmatmul.mubr.f32.vlgmr.msra.gmra.mrb[0].mxu1 %v27517_v30 }
  0x58   :  { %24447 = vmatpush1.bf16.msra.mxu1 %v27498_v22  ;;  %525 = vmatprep.mubr.f32.mxu1 %v35328_v0 }
  0x59   :  { %24449 = vmatprep.subr.bf16.mxu1 %v27500_v23 }
  0x5b   :  { %528 = vmatmul.mubr.f32.gmra.mrb[2].mxu1 %v27548_v45 }
  0x5c   :  { %533 = vmatprep.mubr.f32.mxu1 %v35328_v0  ;;  %24451 = vmatpush1.bf16.msra.mxu1 %v27507_v26 }
  0x5d   :  { %24453 = vmatprep.subr.bf16.mxu1 %v27660_v44 }
  0x5f   :  { %536 = vmatmul.mubr.f32.gmra.mrb[4].mxu1 %v27554_v48 }
  0x60   :  { %541 = vmatprep.mubr.f32.mxu1 %v35328_v0 }
  0x63   :  { %544 = vmatmul.mubr.f32.gmra.mrb[6].mxu1 %v27603_v14 }
  0x64   :  { %622 = vmatprep.mubr.f32.mxu1 %v35328_v0 }
  0x67   :  { %626 = vmatmul.mubr.f32.vlgmr.msra.gmra.mrb[0].mxu1 %v27529_v38 }
  0x68   :  { %24455 = vmatpush1.bf16.msra.mxu1 %v27674_v25  ;;  %631 = vmatprep.mubr.f32.mxu1 %v35328_v0 }
  0x69   :  { %24457 = vmatprep.subr.bf16.mxu1 %v27680_v27 }
  0x6b   :  { %635 = vmatmul.mubr.f32.gmra.mrb[2].mxu1 %v27558_v53 }
  0x6c   :  { %640 = vmatprep.mubr.f32.mxu1 %v35328_v0  ;;  %24459 = vmatpush1.bf16.msra.mxu1 %v27685_v31 }
  0x6d   :  { %24461 = vmatprep.subr.bf16.mxu1 %v27495_v16 }
  0x6f   :  { %644 = vmatmul.mubr.f32.gmra.mrb[4].mxu1 %v27563_v55 }
  0x70   :  { %649 = vmatprep.mubr.f32.mxu1 %v35328_v0 }
  0x73   :  { %653 = vmatmul.mubr.f32.gmra.mrb[6].mxu1 %v27609_v19 }
  0x74   :  { %747 = vmatprep.mubr.f32.mxu1 %v35328_v0 }
  0x77   :  { %749 = vmatmul.mubr.f32.vlgmr.msra.gmra.mrb[0].mxu1 %v27502_v24 }
  0x78   :  { %24463 = vmatpush1.bf16.msra.mxu1 %v27498_v22  ;;  %754 = vmatprep.mubr.f32.mxu1 %v35328_v0 }
  0x79   :  { %24465 = vmatprep.subr.bf16.mxu1 %v27500_v23 }
  0x7b   :  { %756 = vmatmul.mubr.f32.gmra.mrb[2].mxu1 %v27526_v37 }
  0x7c   :  { %761 = vmatprep.mubr.f32.mxu1 %v35328_v0  ;;  %24467 = vmatpush1.bf16.msra.mxu1 %v27507_v26 }
  0x7d   :  { %24469 = vmatprep.subr.bf16.mxu1 %v27700_v36 }
  0x7f   :  { %763 = vmatmul.mubr.f32.gmra.mrb[4].mxu1 %v27534_v40 }
  0x80   :  { %768 = vmatprep.mubr.f32.mxu1 %v35328_v0 }
  0x83   :  { %770 = vmatmul.mubr.f32.gmra.mrb[6].mxu1 %v27595_v9 }
  0x84   :  { %848 = vmatprep.mubr.f32.mxu1 %v35328_v0 }
  0x87   :  { %850 = vmatmul.mubr.f32.vlgmr.msra.gmra.mrb[0].mxu1 %v27502_v24 }
  0x88   :  { %24471 = vmatpush1.bf16.msra.mxu1 %v27722_v7  ;;  %855 = vmatprep.mubr.f32.mxu1 %v35328_v0 }
  0x89   :  { %24473 = vmatprep.subr.bf16.mxu1 %v27724_v8 }
  0x8b   :  { %857 = vmatmul.mubr.f32.gmra.mrb[2].mxu1 %v27526_v37 }
  0x8c   :  { %862 = vmatprep.mubr.f32.mxu1 %v35328_v0  ;;  %24475 = vmatpush1.bf16.msra.mxu1 %v27735_v28 }
  0x8d   :  { %24477 = vmatprep.subr.bf16.mxu1 %v27746_v49 }
  0x8f   :  { %864 = vmatmul.mubr.f32.gmra.mrb[4].mxu1 %v27534_v40 }
  0x90   :  { %869 = vmatprep.mubr.f32.mxu1 %v35328_v0 }
  0x93   :  { %871 = vmatmul.mubr.f32.gmra.mrb[6].mxu1 %v27595_v9 }
  0x94   :  { %949 = vmatprep.mubr.f32.mxu1 %v35328_v0 }
  0x97   :  { %955 = vmatmul.mubr.f32.vlgmr.msra.gmra.mrb[8].mxu1 %v27560_v54 }
  0x98   :  { %24479 = vmatpush1.bf16.msra.mxu1 %v27778_v51  ;;  %960 = vmatprep.mubr.f32.mxu1 %v35328_v0  ;;  %v27908_v51 = vsub.f32 %v147_v13, %v1579_v18 }
  0x99   :  { %24481 = vmatprep.subr.bf16.mxu1 %v27780_v57  ;;  %v27906_v57 = vsub.f32 %v115_v6, %v1575_v12 }
  0x9a   :  { %v35253_v13 = vand.u32 4294901760, %v27908_v51 }
  0x9b   :  { %966 = vmatmul.mubr.f32.gmra.mrb[10].mxu1 %v27586_v3  ;;  %v35252_v6 = vand.u32 4294901760, %v27906_v57 }
  0x9c   :  { %971 = vmatprep.mubr.f32.mxu1 %v35328_v0  ;;  %24483 = vmatpush1.bf16.msra.mxu1 %v27785_v58 }
  0x9d   :  { %24485 = vmatprep.subr.bf16.mxu1 %v27790_v63  ;;  %v27904_v63 = vsub.f32 %v82_v5, %v1573_v56 }
  0x9f   :  { %977 = vmatmul.mubr.f32.gmra.mrb[12].mxu1 %v27599_v11 }
  0xa0   :  { %982 = vmatprep.mubr.f32.mxu1 %v35328_v0 }
  0xa3   :  { %988 = vmatmul.mubr.f32.gmra.mrb[14].mxu1 %v27623_v33 }
  0xa4   :  { %1098 = vmatprep.mubr.f32.mxu1 %v35328_v0 }
  0xa7   :  { %1100 = vmatmul.mubr.f32.vlgmr.msra.gmra.mrb[8].mxu1 %v27502_v24 }
  0xa8   :  { %24487 = vmatpush1.bf16.msra.mxu1 %v27802_v34  ;;  %1105 = vmatprep.mubr.f32.mxu1 %v35328_v0  ;;  %v27902_v34 = vsub.f32 %v50_v62, %v1569_v52  ;;  %v35251_v62 = vand.u32 4294901760, %v27904_v63 }
  0xa9   :  { %24489 = vmatprep.subr.bf16.mxu1 %v27806_v50  ;;  %v27900_v50 = vpack.c.bf16 %v1579_v18, %v1575_v12 }
  0xaa   :  { %v35254_v49 = vand.u32 4294901760, %v27902_v34 }
  0xab   :  { %1107 = vmatmul.mubr.f32.gmra.mrb[10].mxu1 %v27526_v37  ;;  %35851 = vst [vmem:[#allocation40_spill] sm:$0xff] %v27900_v50 }
  0xac   :  { %1112 = vmatprep.mubr.f32.mxu1 %v35328_v0  ;;  %24491 = vmatpush1.bf16.msra.mxu1 %v27813_v1  ;;  %v27898_v1 = vpack.c.bf16 %v1573_v56, %v1569_v52  ;;  %v1711_v52 = vsub.f32 %v27906_v57, %v35252_v6  ;;  %v1723_v56 = vsub.f32 %v27908_v51, %v35253_v13 }
  0xad   :  { %24493 = vmatprep.subr.bf16.mxu1 %v27700_v36 }
  0xae   :  { %35850 = vst [vmem:[#allocation39_spill] sm:$0xff] %v27898_v1  ;;  %v1724_v6 = vand.u32 4294901760, %v1723_v56  ;;  %v35862_v56 = vand.u32 4294901760, %v27880_v61 }
  0xaf   :  { %1114 = vmatmul.mubr.f32.gmra.mrb[12].mxu1 %v27534_v40 }
  0xb0   :  { %1119 = vmatprep.mubr.f32.mxu1 %v35328_v0 }
  0xb3   :  { %1121 = vmatmul.mubr.f32.gmra.mrb[14].mxu1 %v27595_v9 }
  0xb4   :  { %1207 = vmatprep.mubr.f32.mxu1 %v35328_v0 }
  0xb7   :  { %1210 = vmatmul.mubr.f32.vlgmr.msra.gmra.mrb[8].mxu1 %v27517_v30 }
  0xb8   :  { %24495 = vmatpush1.bf16.msra.mxu1 %v27722_v7  ;;  %1215 = vmatprep.mubr.f32.mxu1 %v35328_v0 }
  0xb9   :  { %24497 = vmatprep.subr.bf16.mxu1 %v27724_v8 }
  0xbb   :  { %1218 = vmatmul.mubr.f32.gmra.mrb[10].mxu1 %v27548_v45 }
  0xbc   :  { %1223 = vmatprep.mubr.f32.mxu1 %v35328_v0  ;;  %24499 = vmatpush1.bf16.msra.mxu1 %v27735_v28 }
  0xbd   :  { %24501 = vmatprep.subr.bf16.mxu1 %v27832_v2  ;;  %v1581_v2 = vand.u32 4294901760, %v146_v29 }
  0xbf   :  { %1226 = vmatmul.mubr.f32.gmra.mrb[12].mxu1 %v27554_v48 }
  0xc0   :  { %1231 = vmatprep.mubr.f32.mxu1 %v35328_v0 }
  0xc3   :  { %1234 = vmatmul.mubr.f32.gmra.mrb[14].mxu1 %v27603_v14 }
  0xc4   :  { %1312 = vmatprep.mubr.f32.mxu1 %v35328_v0 }
  0xc7   :  { %1316 = vmatmul.mubr.f32.vlgmr.msra.gmra.mrb[8].mxu1 %v27529_v38 }
  0xc8   :  { %24503 = vmatpush1.bf16.msra.mxu1 %v27846_v46  ;;  %1321 = vmatprep.mubr.f32.mxu1 %v35328_v0  ;;  %v1577_v46 = vand.u32 4294901760, %v114_v32 }
  0xc9   :  { %24505 = vmatprep.subr.bf16.mxu1 %v27852_v4  ;;  %v1699_v4 = vsub.f32 %v27880_v61, %v35249_v41 }
  0xca   :  { %v27911_v41 = vpack.c.bf16 %v1581_v2, %v1577_v46  ;;  %v27917_v5 = vsub.f32 %v114_v32, %v1577_v46  ;;  %v1693_v46 = vsub.f32 %v27902_v34, %v35254_v49 }
  0xcb   :  { %1325 = vmatmul.mubr.f32.gmra.mrb[10].mxu1 %v27558_v53 }
  0xcc   :  { %1330 = vmatprep.mubr.f32.mxu1 %v35328_v0  ;;  %24507 = vmatpush1.bf16.msra.mxu1 %v27861_v10  ;;  %v1687_v10 = vsub.f32 %v27878_v47, %v35246_v15  ;;  %v1700_v15 = vand.u32 4294901760, %v1699_v4  ;;  %35852 = vst [vmem:[#allocation41_spill] sm:$0xff] %v27911_v41  ;;  %v1694_v12 = vand.u32 4294901760, %v1693_v46 }
  0xcd   :  { %24509 = vmatprep.subr.bf16.mxu1 %v27700_v36 }
  0xce   :  { %v1688_v58 = vand.u32 4294901760, %v1687_v10  ;;  %v27919_v10 = vsub.f32 %v146_v29, %v1581_v2  ;;  %v1705_v2 = vsub.f32 %v27904_v63, %v35251_v62  ;;  %v1712_v62 = vand.u32 4294901760, %v1711_v52 }
  0xcf   :  { %1334 = vmatmul.mubr.f32.gmra.mrb[12].mxu1 %v27563_v55  ;;  %v27966_v52 = vpack.c.bf16 %v27880_v61, %v27878_v47  ;;  %v35865_v61 = vand.u32 4294901760, %v27904_v63 }
  0xd0   :  { %1339 = vmatprep.mubr.f32.mxu1 %v35328_v0  ;;  %v27922_v4 = vpack.c.bf16 %v1700_v15, %v1688_v58  ;;  %v1716_v58 = vand.u32 4294901760, %v27917_v5  ;;  %v1728_v15 = vand.u32 4294901760, %v27919_v10  ;;  %v1706_v18 = vand.u32 4294901760, %v1705_v2 }
  0xd1   :  { %v27956_v46 = vpack.c.bf16 %v1724_v6, %v1712_v62  ;;  %35857 = vst [vmem:[#allocation46_spill] sm:$0xff] %v27966_v52  ;;  %v27982_v62 = vpack.c.bf16 %v27908_v51, %v27906_v57  ;;  %v35861_v6 = vand.u32 4294901760, %v27878_v47  ;;  %v35864_v47 = vand.u32 4294901760, %v27902_v34 }
  0xd2   :  { %35853 = vst [vmem:[#allocation42_spill] sm:$0xff] %v27922_v4  ;;  %v1717_v32 = vsub.f32 %v27917_v5, %v1716_v58  ;;  %v1729_v29 = vsub.f32 %v27919_v10, %v1728_v15  ;;  %v27954_v13 = vpack.c.bf16 %v1706_v18, %v1694_v12 }
  0xd3   :  { %1343 = vmatmul.mubr.f32.gmra.mrb[14].mxu1 %v27609_v19  ;;  %35855 = vst [vmem:[#allocation44_spill] sm:$0xff] %v27956_v46  ;;  %35859 = vst [vmem:[#allocation48_spill] sm:$0xff] %v27982_v62  ;;  %v28008_v12 = vpack.c.bf16 %v35862_v56, %v35861_v6  ;;  %v28022_v18 = vpack.c.bf16 %v35865_v61, %v35864_v47  ;;  %v52_v56 = vld [vmem:[#allocation5 + $0x30] sm:$0xff]  ;;  %v117_v61 = vld [vmem:[#allocation5 + $0x238] sm:$0xff] }
  0xd4   :  { %1437 = vmatprep.mubr.f32.mxu1 %v35328_v0  ;;  %35854 = vst [vmem:[#allocation43_spill] sm:$0xff] %v27954_v13  ;;  %v1718_v49 = vand.u32 4294901760, %v1717_v32  ;;  %v35867_v32 = vand.u32 4294901760, %v27906_v57  ;;  %v85_v57 = vld [vmem:[#allocation5 + $0x138] sm:$0xff]  ;;  %v84_v47 = vld [vmem:[#allocation5 + $0x130] sm:$0xff] }
  0xd5   :  { %35863 = vst [vmem:[#allocation50_spill] sm:$0xff] %v28008_v12  ;;  %35866 = vst [vmem:[#allocation51_spill] sm:$0xff] %v28022_v18 }
  0xd7   :  { %1439 = vmatmul.mubr.f32.vlgmr.msra.gmra.mrb[8].mxu1 %v27502_v24 }
  0xd8   :  { %24511 = vmatpush1.bf16.msra.mxu1 %v27722_v7  ;;  %1444 = vmatprep.mubr.f32.mxu1 %v35328_v0 }
  0xd9   :  { %24513 = vmatprep.subr.bf16.mxu1 %v27724_v8 }
  0xdb   :  { %1446 = vmatmul.mubr.f32.gmra.mrb[10].mxu1 %v27526_v37 }
  0xdc   :  { %1451 = vmatprep.mubr.f32.mxu1 %v35328_v0  ;;  %24515 = vmatpush1.bf16.msra.mxu1 %v27735_v28 }
  0xdd   :  { %24517 = vmatprep.subr.bf16.mxu1 %v27876_v35 }
  0xdf   :  { %1453 = vmatmul.mubr.f32.gmra.mrb[12].mxu1 %v27534_v40 }
  0xe0   :  { %1458 = vmatprep.mubr.f32.mxu1 %v35328_v0 }
  0xe3   :  { %1460 = vmatmul.mubr.f32.gmra.mrb[14].mxu1 %v27595_v9 }
  0xe4   :  { %1538 = vmatprep.mubr.f32.mxu1 %v35328_v0 }
  0xe7   :  { %1540 = vmatmul.mubr.f32.vlgmr.msra.gmra.mrb[8].mxu1 %v27502_v24 }
  0xe8   :  { %24519 = vmatpush1.bf16.msra.mxu1 %v27898_v1  ;;  %1545 = vmatprep.mubr.f32.mxu1 %v35328_v0 }
  0xe9   :  { %24521 = vmatprep.subr.bf16.mxu1 %v27900_v50 }
  0xeb   :  { %1547 = vmatmul.mubr.f32.gmra.mrb[10].mxu1 %v27526_v37 }
  0xec   :  { %1552 = vmatprep.mubr.f32.mxu1 %v35328_v0  ;;  %24523 = vmatpush1.bf16.msra.mxu1 %v27911_v41 }
  0xed   :  { %24525 = vmatprep.subr.bf16.mxu1 %v27922_v4  ;;  %v1730_v4 = vand.u32 4294901760, %v1729_v29  ;;  %v35868_v29 = vand.u32 4294901760, %v27908_v51  ;;  %v53_v51 = vld [vmem:[#allocation5 + $0x38] sm:$0xff] }
  0xef   :  { %1554 = vmatmul.mubr.f32.gmra.mrb[12].mxu1 %v27534_v40  ;;  %v27961_v2 = vpack.c.bf16 %v1730_v4, %v1718_v49  ;;  %v27978_v49 = vpack.c.bf16 %v27904_v63, %v27902_v34  ;;  %v27989_v4 = vpack.c.bf16 %v27919_v10, %v27917_v5  ;;  %v28028_v6 = vpack.c.bf16 %v35868_v29, %v35867_v32  ;;  %v149_v32 = vld [vmem:[#allocation5 + $0x338] sm:$0xff] }
  0xf0   :  { %1559 = vmatprep.mubr.f32.mxu1 %v35328_v0  ;;  %v28037_v34 = vpack.c.bf16 %v1728_v15, %v1716_v58  ;;  %v2257_v63 = vand.u32 4294901760, %v53_v51  ;;  %v2261_v5 = vand.u32 4294901760, %v85_v57 }
  0xf1   :  { %35856 = vst [vmem:[#allocation45_spill] sm:$0xff] %v27961_v2  ;;  %35858 = vst [vmem:[#allocation47_spill] sm:$0xff] %v27978_v49 }
  0xf2   :  { %35860 = vst [vmem:[#allocation49_spill] sm:$0xff] %v27989_v4  ;;  %35869 = vst [vmem:[#allocation52_spill] sm:$0xff] %v28028_v6  ;;  %v28052_v10 = vpack.c.bf16 %v2261_v5, %v2257_v63  ;;  %v28054_v58 = vsub.f32 %v53_v51, %v2257_v63  ;;  %v28056_v15 = vsub.f32 %v85_v57, %v2261_v5  ;;  %v2259_v51 = vand.u32 4294901760, %v52_v56 }
  0xf3   :  { %1561 = vmatmul.mubr.f32.gmra.mrb[14].mxu1 %v27595_v9  ;;  %35870 = vst [vmem:[#allocation53_spill] sm:$0xff] %v28037_v34  ;;  %v2263_v57 = vand.u32 4294901760, %v84_v47  ;;  %v2265_v63 = vand.u32 4294901760, %v117_v61  ;;  %v2269_v5 = vand.u32 4294901760, %v149_v32 }
  0xf4   :  { %1639 = vmatprep.mubr.f32.mxu1 %v35328_v0  ;;  %35871 = vst [vmem:[#allocation54_spill] sm:$0xff] %v28052_v10  ;;  %v35269_v29 = vand.u32 4294901760, %v28054_v58 }
  0xf7   :  { %1645 = vmatmul.mubr.f32.vlgmr.msra.gmra.mrb[16].mxu1 %v27560_v54 }
  0xf8   :  { %24527 = vmatpush1.bf16.msra.mxu1 %v27954_v13  ;;  %1650 = vmatprep.mubr.f32.mxu1 %v35328_v0  ;;  %v28080_v13 = vsub.f32 %v84_v47, %v2263_v57 }
  0xf9   :  { %24529 = vmatprep.subr.bf16.mxu1 %v27956_v46  ;;  %v28078_v46 = vsub.f32 %v52_v56, %v2259_v51 }
  0xfa   :  { %v35277_v56 = vand.u32 4294901760, %v28080_v13 }
  0xfb   :  { %1656 = vmatmul.mubr.f32.gmra.mrb[18].mxu1 %v27586_v3 }
  0xfc   :  { %1661 = vmatprep.mubr.f32.mxu1 %v35328_v0  ;;  %24531 = vmatpush1.bf16.msra.mxu1 %v27961_v2  ;;  %v28076_v2 = vpack.c.bf16 %v2269_v5, %v2265_v63 }
  0xfd   :  { %24533 = vmatprep.subr.bf16.mxu1 %v27966_v52  ;;  %v28074_v52 = vpack.c.bf16 %v2263_v57, %v2259_v51 }
  0xfe   :  { %35873 = vst [vmem:[#allocation56_spill] sm:$0xff] %v28076_v2 }
  0xff   :  { %1667 = vmatmul.mubr.f32.gmra.mrb[20].mxu1 %v27599_v11  ;;  %35872 = vst [vmem:[#allocation55_spill] sm:$0xff] %v28074_v52 }
 0x100   :  { %1672 = vmatprep.mubr.f32.mxu1 %v35328_v0 }
 0x103   :  { %1678 = vmatmul.mubr.f32.gmra.mrb[22].mxu1 %v27623_v33 }
 0x104   :  { %1788 = vmatprep.mubr.f32.mxu1 %v35328_v0 }
 0x107   :  { %1790 = vmatmul.mubr.f32.vlgmr.msra.gmra.mrb[16].mxu1 %v27502_v24 }
 0x108   :  { %24535 = vmatpush1.bf16.msra.mxu1 %v27978_v49  ;;  %1795 = vmatprep.mubr.f32.mxu1 %v35328_v0 }
 0x109   :  { %24537 = vmatprep.subr.bf16.mxu1 %v27982_v62 }
 0x10b   :  { %1797 = vmatmul.mubr.f32.gmra.mrb[18].mxu1 %v27526_v37 }
 0x10c   :  { %1802 = vmatprep.mubr.f32.mxu1 %v35328_v0  ;;  %24539 = vmatpush1.bf16.msra.mxu1 %v27989_v4 }
 0x10d   :  { %24541 = vmatprep.subr.bf16.mxu1 %v27876_v35 }
 0x10f   :  { %1804 = vmatmul.mubr.f32.gmra.mrb[20].mxu1 %v27534_v40 }
 0x110   :  { %1809 = vmatprep.mubr.f32.mxu1 %v35328_v0 }
 0x113   :  { %1811 = vmatmul.mubr.f32.gmra.mrb[22].mxu1 %v27595_v9 }
 0x114   :  { %1897 = vmatprep.mubr.f32.mxu1 %v35328_v0 }
 0x117   :  { %1900 = vmatmul.mubr.f32.vlgmr.msra.gmra.mrb[16].mxu1 %v27517_v30 }
 0x118   :  { %24543 = vmatpush1.bf16.msra.mxu1 %v27898_v1  ;;  %1905 = vmatprep.mubr.f32.mxu1 %v35328_v0 }
 0x119   :  { %24545 = vmatprep.subr.bf16.mxu1 %v27900_v50 }
 0x11b   :  { %1908 = vmatmul.mubr.f32.gmra.mrb[18].mxu1 %v27548_v45 }
 0x11c   :  { %1913 = vmatprep.mubr.f32.mxu1 %v35328_v0  ;;  %24547 = vmatpush1.bf16.msra.mxu1 %v27911_v41 }
 0x11d   :  { %24549 = vmatprep.subr.bf16.mxu1 %v28008_v12  ;;  %v2377_v12 = vsub.f32 %v28054_v58, %v35269_v29 }
 0x11f   :  { %1916 = vmatmul.mubr.f32.gmra.mrb[20].mxu1 %v27554_v48 }
 0x120   :  { %1921 = vmatprep.mubr.f32.mxu1 %v35328_v0 }
 0x123   :  { %1924 = vmatmul.mubr.f32.gmra.mrb[22].mxu1 %v27603_v14 }
 0x124   :  { %2002 = vmatprep.mubr.f32.mxu1 %v35328_v0 }
 0x127   :  { %2006 = vmatmul.mubr.f32.vlgmr.msra.gmra.mrb[16].mxu1 %v27529_v38 }
 0x128   :  { %24551 = vmatpush1.bf16.msra.mxu1 %v28022_v18  ;;  %2011 = vmatprep.mubr.f32.mxu1 %v35328_v0  ;;  %v148_v18 = vld [vmem:[#allocation5 + $0x330] sm:$0xff] }
 0x129   :  { %24553 = vmatprep.subr.bf16.mxu1 %v28028_v6  ;;  %v116_v6 = vld [vmem:[#allocation5 + $0x230] sm:$0xff]  ;;  %v2271_v49 = vand.u32 4294901760, %v148_v18 }
 0x12a   :  { %v2267_v62 = vand.u32 4294901760, %v116_v6 }
 0x12b   :  { %2015 = vmatmul.mubr.f32.gmra.mrb[18].mxu1 %v27558_v53 }
 0x12c   :  { %2020 = vmatprep.mubr.f32.mxu1 %v35328_v0  ;;  %24555 = vmatpush1.bf16.msra.mxu1 %v28037_v34  ;;  %v35274_v34 = vand.u32 4294901760, %v28056_v15  ;;  %v28093_v47 = vsub.f32 %v116_v6, %v2267_v62 }
 0x12d   :  { %24557 = vmatprep.subr.bf16.mxu1 %v27876_v35  ;;  %v35280_v35 = vand.u32 4294901760, %v28078_v46 }
 0x12e   :  { %v2389_v4 = vsub.f32 %v28056_v15, %v35274_v34  ;;  %v28087_v34 = vpack.c.bf16 %v2271_v49, %v2267_v62 }
 0x12f   :  { %2024 = vmatmul.mubr.f32.gmra.mrb[20].mxu1 %v27563_v55  ;;  %v2383_v62 = vsub.f32 %v28078_v46, %v35280_v35 }
 0x130   :  { %2029 = vmatprep.mubr.f32.mxu1 %v35328_v0  ;;  %v2390_v29 = vand.u32 4294901760, %v2389_v4  ;;  %35874 = vst [vmem:[#allocation57_spill] sm:$0xff] %v28087_v34 }
 0x131   :  { %v2384_v51 = vand.u32 4294901760, %v2383_v62 }
 0x133   :  { %2033 = vmatmul.mubr.f32.gmra.mrb[22].mxu1 %v27609_v19 }
 0x134   :  { %2127 = vmatprep.mubr.f32.mxu1 %v35328_v0 }
 0x137   :  { %2129 = vmatmul.mubr.f32.vlgmr.msra.gmra.mrb[16].mxu1 %v27502_v24 }
 0x138   :  { %24559 = vmatpush1.bf16.msra.mxu1 %v27898_v1  ;;  %2134 = vmatprep.mubr.f32.mxu1 %v35328_v0  ;;  %v28084_v1 = vsub.f32 %v149_v32, %v2269_v5 }
 0x139   :  { %24561 = vmatprep.subr.bf16.mxu1 %v27900_v50  ;;  %v28082_v50 = vsub.f32 %v117_v61, %v2265_v63 }
 0x13a   :  { %v35279_v32 = vand.u32 4294901760, %v28084_v1 }
 0x13b   :  { %2136 = vmatmul.mubr.f32.gmra.mrb[18].mxu1 %v27526_v37  ;;  %v35278_v61 = vand.u32 4294901760, %v28082_v50 }
 0x13c   :  { %2141 = vmatprep.mubr.f32.mxu1 %v35328_v0  ;;  %24563 = vmatpush1.bf16.msra.mxu1 %v27911_v41  ;;  %v2378_v41 = vand.u32 4294901760, %v2377_v12  ;;  %v28095_v12 = vsub.f32 %v148_v18, %v2271_v49  ;;  %v2395_v49 = vsub.f32 %v28080_v13, %v35277_v56 }
 0x13d   :  { %24565 = vmatprep.subr.bf16.mxu1 %v28052_v10  ;;  %v2401_v6 = vsub.f32 %v28082_v50, %v35278_v61 }
 0x13e   :  { %v28098_v4 = vpack.c.bf16 %v2390_v29, %v2378_v41  ;;  %v35283_v41 = vand.u32 4294901760, %v28093_v47  ;;  %v35282_v18 = vand.u32 4294901760, %v28095_v12  ;;  %v2413_v29 = vsub.f32 %v28084_v1, %v35279_v32 }
 0x13f   :  { %2143 = vmatmul.mubr.f32.gmra.mrb[20].mxu1 %v27534_v40  ;;  %v2396_v57 = vand.u32 4294901760, %v2395_v49  ;;  %v2402_v56 = vand.u32 4294901760, %v2401_v6  ;;  %v28142_v6 = vpack.c.bf16 %v28056_v15, %v28054_v58 }
 0x140   :  { %2148 = vmatprep.mubr.f32.mxu1 %v35328_v0  ;;  %35875 = vst [vmem:[#allocation58_spill] sm:$0xff] %v28098_v4  ;;  %v2407_v63 = vsub.f32 %v28093_v47, %v35283_v41  ;;  %v2419_v5 = vsub.f32 %v28095_v12, %v35282_v18  ;;  %v2414_v61 = vand.u32 4294901760, %v2413_v29 }
 0x141   :  { %v28130_v32 = vpack.c.bf16 %v2396_v57, %v2384_v51  ;;  %35879 = vst [vmem:[#allocation62_spill] sm:$0xff] %v28142_v6 }
 0x142   :  { %v2408_v35 = vand.u32 4294901760, %v2407_v63  ;;  %v28132_v62 = vpack.c.bf16 %v2414_v61, %v2402_v56  ;;  %v28172_v56 = vpack.c.bf16 %v28080_v13, %v28078_v46  ;;  %v28176_v61 = vpack.c.bf16 %v28084_v1, %v28082_v50 }
 0x143   :  { %2150 = vmatmul.mubr.f32.gmra.mrb[22].mxu1 %v27595_v9  ;;  %35876 = vst [vmem:[#allocation59_spill] sm:$0xff] %v28130_v32 }
 0x144   :  { %2228 = vmatprep.mubr.f32.mxu1 %v35328_v0  ;;  %35877 = vst [vmem:[#allocation60_spill] sm:$0xff] %v28132_v62  ;;  %35886 = vst [vmem:[#allocation69_spill] sm:$0xff] %v28172_v56 }
 0x145   :  { %35887 = vst [vmem:[#allocation70_spill] sm:$0xff] %v28176_v61 }
 0x147   :  { %2230 = vmatmul.mubr.f32.vlgmr.msra.gmra.mrb[16].mxu1 %v27502_v24 }
 0x148   :  { %24567 = vmatpush1.bf16.msra.mxu1 %v28074_v52  ;;  %2235 = vmatprep.mubr.f32.mxu1 %v35328_v0 }
 0x149   :  { %24569 = vmatprep.subr.bf16.mxu1 %v28076_v2 }
 0x14b   :  { %2237 = vmatmul.mubr.f32.gmra.mrb[18].mxu1 %v27526_v37 }
 0x14c   :  { %2242 = vmatprep.mubr.f32.mxu1 %v35328_v0  ;;  %24571 = vmatpush1.bf16.msra.mxu1 %v28087_v34 }
 0x14d   :  { %24573 = vmatprep.subr.bf16.mxu1 %v28098_v4  ;;  %v2420_v4 = vand.u32 4294901760, %v2419_v5  ;;  %v28189_v5 = vpack.c.bf16 %v28095_v12, %v28093_v47 }
 0x14f   :  { %2244 = vmatmul.mubr.f32.gmra.mrb[20].mxu1 %v27534_v40  ;;  %v28137_v49 = vpack.c.bf16 %v2420_v4, %v2408_v35  ;;  %35890 = vst [vmem:[#allocation73_spill] sm:$0xff] %v28189_v5 }
 0x150   :  { %2249 = vmatprep.mubr.f32.mxu1 %v35328_v0 }
 0x151   :  { %35878 = vst [vmem:[#allocation61_spill] sm:$0xff] %v28137_v49 }
 0x153   :  { %2251 = vmatmul.mubr.f32.gmra.mrb[22].mxu1 %v27595_v9 }
 0x154   :  { %2329 = vmatprep.mubr.f32.mxu1 %v35328_v0 }
 0x157   :  { %2335 = vmatmul.mubr.f32.vlgmr.msra.gmra.mrb[24].mxu1 %v27560_v54 }
 0x158   :  { %24575 = vmatpush1.bf16.msra.mxu1 %v28130_v32  ;;  %2340 = vmatprep.mubr.f32.mxu1 %v35328_v0  ;;  %v150_v32 = vld [vmem:[#allocation5 + $0x340] sm:$0xff] }
 0x159   :  { %24577 = vmatprep.subr.bf16.mxu1 %v28132_v62 }
 0x15a   :  { %v28144_v29 = vpop.f32.mrb[0].mxu1 }
 0x15b   :  { %35880 = vst [vmem:[#allocation63_spill] sm:$0xff] %v28144_v29  ;;  %v28146_v51 = vpop.f32.mrb[1].mxu1  ;;  %2346 = vmatmul.mubr.f32.gmra.mrb[26].mxu1 %v27586_v3 }
 0x15c   :  { %35881 = vst [vmem:[#allocation64_spill] sm:$0xff] %v28146_v51  ;;  %2351 = vmatprep.mubr.f32.mxu1 %v35328_v0  ;;  %24579 = vmatpush1.bf16.msra.mxu1 %v28137_v49 }
 0x15d   :  { %24581 = vmatprep.subr.bf16.mxu1 %v28142_v6  ;;  %v35891_v6 = vand.u32 4294901760, %v28054_v58  ;;  %v35894_v58 = vand.u32 4294901760, %v28078_v46  ;;  %v35901_v46 = vand.u32 4294901760, %v28095_v12 }
 0x15e   :  { %v28154_v35 = vpop.f32.mrb[2].mxu1 }
 0x15f   :  { %35882 = vst [vmem:[#allocation65_spill] sm:$0xff] %v28154_v35  ;;  %v28156_v4 = vpop.f32.mrb[3].mxu1  ;;  %2357 = vmatmul.mubr.f32.gmra.mrb[28].mxu1 %v27599_v11 }
 0x160   :  { %35883 = vst [vmem:[#allocation66_spill] sm:$0xff] %v28156_v4  ;;  %2362 = vmatprep.mubr.f32.mxu1 %v35328_v0 }
 0x162   :  { %v28162_v57 = vpop.f32.mrb[4].mxu1 }
 0x163   :  { %35884 = vst [vmem:[#allocation67_spill] sm:$0xff] %v28162_v57  ;;  %v28164_v63 = vpop.f32.mrb[5].mxu1  ;;  %2368 = vmatmul.mubr.f32.gmra.mrb[30].mxu1 %v27623_v33 }
 0x164   :  { %35885 = vst [vmem:[#allocation68_spill] sm:$0xff] %v28164_v63  ;;  %2478 = vmatprep.mubr.f32.mxu1 %v35328_v0 }
 0x166   :  { %v28178_v18 = vpop.f32.mrb[6].mxu1 }
 0x167   :  { %35888 = vst [vmem:[#allocation71_spill] sm:$0xff] %v28178_v18  ;;  %v28180_v41 = vpop.f32.mrb[7].mxu1  ;;  %2480 = vmatmul.mubr.f32.vlgmr.msra.gmra.mrb[24].mxu1 %v27502_v24 }
 0x168   :  { %35889 = vst [vmem:[#allocation72_spill] sm:$0xff] %v28180_v41  ;;  %24583 = vmatpush1.bf16.msra.mxu1 %v28172_v56  ;;  %2485 = vmatprep.mubr.f32.mxu1 %v35328_v0  ;;  %v35898_v56 = vand.u32 4294901760, %v28084_v1  ;;  %v87_v1 = vld [vmem:[#allocation5 + $0x148] sm:$0xff] }
 0x169   :  { %24585 = vmatprep.subr.bf16.mxu1 %v28176_v61 }
 0x16b   :  { %2487 = vmatmul.mubr.f32.gmra.mrb[26].mxu1 %v27526_v37 }
 0x16c   :  { %2492 = vmatprep.mubr.f32.mxu1 %v35328_v0  ;;  %24587 = vmatpush1.bf16.msra.mxu1 %v28189_v5  ;;  %v35892_v5 = vand.u32 4294901760, %v28056_v15  ;;  %v35895_v15 = vand.u32 4294901760, %v28080_v13 }
 0x16d   :  { %24589 = vmatprep.subr.bf16.mxu1 %v28052_v10 }
 0x16e   :  { %v28208_v61 = vpack.c.bf16 %v35892_v5, %v35891_v6  ;;  %v28222_v6 = vpack.c.bf16 %v35895_v15, %v35894_v58  ;;  %v35897_v5 = vand.u32 4294901760, %v28082_v50  ;;  %v55_v50 = vld [vmem:[#allocation5 + $0x48] sm:$0xff]  ;;  %v54_v58 = vld [vmem:[#allocation5 + $0x40] sm:$0xff] }
 0x16f   :  { %2494 = vmatmul.mubr.f32.gmra.mrb[28].mxu1 %v27534_v40  ;;  %v2947_v13 = vand.u32 4294901760, %v55_v50  ;;  %v86_v15 = vld [vmem:[#allocation5 + $0x140] sm:$0xff] }
 0x170   :  { %2499 = vmatprep.mubr.f32.mxu1 %v35328_v0  ;;  %35893 = vst [vmem:[#allocation74_spill] sm:$0xff] %v28208_v61  ;;  %35896 = vst [vmem:[#allocation75_spill] sm:$0xff] %v28222_v6  ;;  %v28228_v49 = vpack.c.bf16 %v35898_v56, %v35897_v5  ;;  %v119_v5 = vld [vmem:[#allocation5 + $0x248] sm:$0xff] }
 0x171   :  { %v28254_v56 = vsub.f32 %v55_v50, %v2947_v13  ;;  %v2949_v50 = vand.u32 4294901760, %v54_v58 }
 0x172   :  { %35899 = vst [vmem:[#allocation76_spill] sm:$0xff] %v28228_v49 }
 0x173   :  { %2501 = vmatmul.mubr.f32.gmra.mrb[30].mxu1 %v27595_v9  ;;  %v28278_v7 = vsub.f32 %v54_v58, %v2949_v50 }
 0x174   :  { %2587 = vmatprep.mubr.f32.mxu1 %v35328_v0 }
 0x175   :  { %v35320_v44 = vand.u32 4294901760, %v28278_v7 }
 0x177   :  { %2590 = vmatmul.mubr.f32.vlgmr.msra.gmra.mrb[24].mxu1 %v27517_v30 }
 0x178   :  { %24591 = vmatpush1.bf16.msra.mxu1 %v28074_v52  ;;  %2595 = vmatprep.mubr.f32.mxu1 %v35328_v0 }
 0x179   :  { %24593 = vmatprep.subr.bf16.mxu1 %v28076_v2 }
 0x17b   :  { %2598 = vmatmul.mubr.f32.gmra.mrb[26].mxu1 %v27548_v45 }
 0x17c   :  { %2603 = vmatprep.mubr.f32.mxu1 %v35328_v0  ;;  %24595 = vmatpush1.bf16.msra.mxu1 %v28087_v34 }
 0x17d   :  { %24597 = vmatprep.subr.bf16.mxu1 %v28208_v61  ;;  %v35900_v61 = vand.u32 4294901760, %v28093_v47  ;;  %v2951_v47 = vand.u32 4294901760, %v87_v1 }
 0x17f   :  { %2606 = vmatmul.mubr.f32.gmra.mrb[28].mxu1 %v27554_v48  ;;  %v28237_v62 = vpack.c.bf16 %v35901_v46, %v35900_v61  ;;  %v28252_v12 = vpack.c.bf16 %v2951_v47, %v2947_v13  ;;  %v28256_v61 = vsub.f32 %v87_v1, %v2951_v47  ;;  %v151_v46 = vld [vmem:[#allocation5 + $0x348] sm:$0xff]  ;;  %v2953_v1 = vand.u32 4294901760, %v86_v15 }
 0x180   :  { %2611 = vmatprep.mubr.f32.mxu1 %v35328_v0  ;;  %v2955_v13 = vand.u32 4294901760, %v119_v5  ;;  %v2959_v47 = vand.u32 4294901760, %v151_v46 }
 0x181   :  { %35902 = vst [vmem:[#allocation77_spill] sm:$0xff] %v28237_v62  ;;  %35903 = vst [vmem:[#allocation78_spill] sm:$0xff] %v28252_v12  ;;  %v28274_v28 = vpack.c.bf16 %v2953_v1, %v2949_v50  ;;  %v28280_v36 = vsub.f32 %v86_v15, %v2953_v1  ;;  %v35929_v42 = vand.u32 4294901760, %v28256_v61 }
 0x182   :  { %v28276_v8 = vpack.c.bf16 %v2959_v47, %v2955_v13  ;;  %v28282_v27 = vsub.f32 %v119_v5, %v2955_v13  ;;  %v28284_v25 = vsub.f32 %v151_v46, %v2959_v47 }
 0x183   :  { %2614 = vmatmul.mubr.f32.gmra.mrb[30].mxu1 %v27603_v14  ;;  %35904 = vst [vmem:[#allocation79_spill] sm:$0xff] %v28274_v28  ;;  %v35317_v58 = vand.u32 4294901760, %v28280_v36 }
 0x184   :  { %2692 = vmatprep.mubr.f32.mxu1 %v35328_v0  ;;  %35905 = vst [vmem:[#allocation80_spill] sm:$0xff] %v28276_v8  ;;  %v35318_v5 = vand.u32 4294901760, %v28282_v27  ;;  %v35319_v46 = vand.u32 4294901760, %v28284_v25 }
 0x187   :  { %2696 = vmatmul.mubr.f32.vlgmr.msra.gmra.mrb[24].mxu1 %v27529_v38 }
 0x188   :  { %24599 = vmatpush1.bf16.msra.mxu1 %v28222_v6  ;;  %2701 = vmatprep.mubr.f32.mxu1 %v35328_v0  ;;  %v118_v6 = vld [vmem:[#allocation5 + $0x240] sm:$0xff] }
 0x189   :  { %24601 = vmatprep.subr.bf16.mxu1 %v28228_v49  ;;  %v35315_v49 = vand.u32 4294901760, %v28256_v61 }
 0x18b   :  { %2705 = vmatmul.mubr.f32.gmra.mrb[26].mxu1 %v27558_v53 }
 0x18c   :  { %2710 = vmatprep.mubr.f32.mxu1 %v35328_v0  ;;  %24603 = vmatpush1.bf16.msra.mxu1 %v28237_v62  ;;  %v35312_v62 = vand.u32 4294901760, %v28254_v56 }
 0x18d   :  { %24605 = vmatprep.subr.bf16.mxu1 %v28052_v10  ;;  %v2961_v10 = vand.u32 4294901760, %v150_v32 }
 0x18f   :  { %2714 = vmatmul.mubr.f32.gmra.mrb[28].mxu1 %v27563_v55 }
 0x190   :  { %2719 = vmatprep.mubr.f32.mxu1 %v35328_v0 }
 0x193   :  { %2723 = vmatmul.mubr.f32.gmra.mrb[30].mxu1 %v27609_v19 }
 0x194   :  { %2817 = vmatprep.mubr.f32.mxu1 %v35328_v0 }
 0x197   :  { %2819 = vmatmul.mubr.f32.vlgmr.msra.gmra.mrb[24].mxu1 %v27502_v24 }
 0x198   :  { %24607 = vmatpush1.bf16.msra.mxu1 %v28074_v52  ;;  %2824 = vmatprep.mubr.f32.mxu1 %v35328_v0  ;;  %v2957_v52 = vand.u32 4294901760, %v118_v6 }
 0x199   :  { %24609 = vmatprep.subr.bf16.mxu1 %v28076_v2  ;;  %v3079_v2 = vsub.f32 %v28256_v61, %v35315_v49 }
 0x19a   :  { %v28287_v49 = vpack.c.bf16 %v2961_v10, %v2957_v52  ;;  %v28293_v15 = vsub.f32 %v118_v6, %v2957_v52  ;;  %v3073_v52 = vsub.f32 %v28278_v7, %v35320_v44  ;;  %v3103_v6 = vsub.f32 %v28284_v25, %v35319_v46 }
 0x19b   :  { %2826 = vmatmul.mubr.f32.gmra.mrb[26].mxu1 %v27526_v37 }
 0x19c   :  { %2831 = vmatprep.mubr.f32.mxu1 %v35328_v0  ;;  %24611 = vmatpush1.bf16.msra.mxu1 %v28087_v34  ;;  %v3067_v34 = vsub.f32 %v28254_v56, %v35312_v62  ;;  %v3080_v62 = vand.u32 4294901760, %v3079_v2  ;;  %35906 = vst [vmem:[#allocation81_spill] sm:$0xff] %v28287_v49  ;;  %v3074_v50 = vand.u32 4294901760, %v3073_v52 }
 0x19d   :  { %24613 = vmatprep.subr.bf16.mxu1 %v28252_v12 }
 0x19e   :  { %v3068_v31 = vand.u32 4294901760, %v3067_v34  ;;  %v28295_v34 = vsub.f32 %v150_v32, %v2961_v10  ;;  %v3085_v10 = vsub.f32 %v28280_v36, %v35317_v58 }
 0x19f   :  { %2833 = vmatmul.mubr.f32.gmra.mrb[28].mxu1 %v27534_v40 }
 0x1a0   :  { %2838 = vmatprep.mubr.f32.mxu1 %v35328_v0  ;;  %v28298_v2 = vpack.c.bf16 %v3080_v62, %v3068_v31  ;;  %v35323_v31 = vand.u32 4294901760, %v28293_v15  ;;  %v35322_v32 = vand.u32 4294901760, %v28295_v34  ;;  %v3091_v62 = vsub.f32 %v28282_v27, %v35318_v5 }
 0x1a1   :  { %v3086_v1 = vand.u32 4294901760, %v3085_v10  ;;  %v3104_v5 = vand.u32 4294901760, %v3103_v6 }
 0x1a2   :  { %35907 = vst [vmem:[#allocation82_spill] sm:$0xff] %v28298_v2  ;;  %v3097_v13 = vsub.f32 %v28293_v15, %v35323_v31  ;;  %v3109_v47 = vsub.f32 %v28295_v34, %v35322_v32  ;;  %v3092_v58 = vand.u32 4294901760, %v3091_v62  ;;  %v28342_v62 = vpack.c.bf16 %v28256_v61, %v28254_v56 }
 0x1a3   :  { %2840 = vmatmul.mubr.f32.gmra.mrb[30].mxu1 %v27595_v9  ;;  %v28330_v46 = vpack.c.bf16 %v3086_v1, %v3074_v50  ;;  %v35916_v1 = vmax.f32 %v28154_v35, %v28156_v4  ;;  %v35919_v32 = vmax.f32 %v28162_v57, %v28164_v63 }
 0x1a4   :  { %2918 = vmatprep.mubr.f32.mxu1 %v35328_v0  ;;  %v3098_v44 = vand.u32 4294901760, %v3097_v13  ;;  %v28332_v52 = vpack.c.bf16 %v3104_v5, %v3092_v58  ;;  %35911 = vst [vmem:[#allocation86_spill] sm:$0xff] %v28342_v62  ;;  %v35913_v58 = vmax.f32 %v28144_v29, %v28146_v51 }
 0x1a5   :  { %35908 = vst [vmem:[#allocation83_spill] sm:$0xff] %v28330_v46 }
 0x1a6   :  { %35909 = vst [vmem:[#allocation84_spill] sm:$0xff] %v28332_v52 }
 0x1a7   :  { %2920 = vmatmul.mubr.f32.vlgmr.msra.gmra.mrb[24].mxu1 %v27502_v24 }
 0x1a8   :  { %24615 = vmatpush1.bf16.msra.mxu1 %v28274_v28  ;;  %2925 = vmatprep.mubr.f32.mxu1 %v35328_v0 }
 0x1a9   :  { %24617 = vmatprep.subr.bf16.mxu1 %v28276_v8 }
 0x1ab   :  { %2927 = vmatmul.mubr.f32.gmra.mrb[26].mxu1 %v27526_v37 }
 0x1ac   :  { %2932 = vmatprep.mubr.f32.mxu1 %v35328_v0  ;;  %24619 = vmatpush1.bf16.msra.mxu1 %v28287_v49 }
 0x1ad   :  { %24621 = vmatprep.subr.bf16.mxu1 %v28298_v2  ;;  %v3110_v2 = vand.u32 4294901760, %v3109_v47 }
 0x1af   :  { %2934 = vmatmul.mubr.f32.gmra.mrb[28].mxu1 %v27534_v40  ;;  %v28337_v10 = vpack.c.bf16 %v3110_v2, %v3098_v44 }
 0x1b0   :  { %2939 = vmatprep.mubr.f32.mxu1 %v35328_v0 }
 0x1b1   :  { %35910 = vst [vmem:[#allocation85_spill] sm:$0xff] %v28337_v10 }
 0x1b3   :  { %2941 = vmatmul.mubr.f32.gmra.mrb[30].mxu1 %v27595_v9 }
 0x1b4   :  { %3019 = vmatprep.mubr.f32.mxu1 %v35328_v0 }
 0x1b7   :  { %3025 = vmatmul.mubr.f32.vlgmr.msra.gmra.mrb[32].mxu1 %v27560_v54 }
 0x1b8   :  { %24623 = vmatpush1.bf16.msra.mxu1 %v28330_v46  ;;  %3030 = vmatprep.mubr.f32.mxu1 %v35328_v0 }
 0x1b9   :  { %24625 = vmatprep.subr.bf16.mxu1 %v28332_v52 }
 0x1ba   :  { %v28344_v6 = vpop.f32.mrb[8].mxu1 }
 0x1bb   :  { %35912 = vst [vmem:[#allocation87_spill] sm:$0xff] %v28344_v6  ;;  %v28350_v5 = vmax.f32 %v35913_v58, %v28344_v6  ;;  %v28352_v50 = vpop.f32.mrb[9].mxu1  ;;  %3036 = vmatmul.mubr.f32.gmra.mrb[34].mxu1 %v27586_v3  ;;  %v28411_v58 = vpack.c.bf16 %v28295_v34, %v28293_v15 }
 0x1bc   :  { %35914 = vst [vmem:[#allocation88_spill] sm:$0xff] %v28352_v50  ;;  %3041 = vmatprep.mubr.f32.mxu1 %v35328_v0  ;;  %24627 = vmatpush1.bf16.msra.mxu1 %v28337_v10  ;;  %v28394_v10 = vpack.c.bf16 %v28284_v25, %v28282_v27 }
 0x1bd   :  { %24629 = vmatprep.subr.bf16.mxu1 %v28342_v62  ;;  %35927 = vst [vmem:[#allocation97_spill] sm:$0xff] %v28411_v58 }
 0x1be   :  { %v28360_v2 = vpop.f32.mrb[10].mxu1  ;;  %35922 = vst [vmem:[#allocation94_spill] sm:$0xff] %v28394_v10 }
 0x1bf   :  { %35915 = vst [vmem:[#allocation89_spill] sm:$0xff] %v28360_v2  ;;  %v28366_v13 = vmax.f32 %v35916_v1, %v28360_v2  ;;  %v28368_v47 = vpop.f32.mrb[11].mxu1  ;;  %3047 = vmatmul.mubr.f32.gmra.mrb[36].mxu1 %v27599_v11  ;;  %v28388_v1 = vpack.c.bf16 %v28280_v36, %v28278_v7 }
 0x1c0   :  { %35917 = vst [vmem:[#allocation90_spill] sm:$0xff] %v28368_v47  ;;  %3052 = vmatprep.mubr.f32.mxu1 %v35328_v0 }
 0x1c1   :  { %35921 = vst [vmem:[#allocation93_spill] sm:$0xff] %v28388_v1 }
 0x1c2   :  { %v28374_v44 = vpop.f32.mrb[12].mxu1 }
 0x1c3   :  { %35918 = vst [vmem:[#allocation91_spill] sm:$0xff] %v28374_v44  ;;  %v28380_v31 = vmax.f32 %v35919_v32, %v28374_v44  ;;  %v28382_v62 = vpop.f32.mrb[13].mxu1  ;;  %3058 = vmatmul.mubr.f32.gmra.mrb[38].mxu1 %v27623_v33  ;;  %v35924_v32 = vmax.f32 %v28178_v18, %v28180_v41 }
 0x1c4   :  { %35920 = vst [vmem:[#allocation92_spill] sm:$0xff] %v28382_v62  ;;  %3168 = vmatprep.mubr.f32.mxu1 %v35328_v0 }
 0x1c6   :  { %v28396_v52 = vpop.f32.mrb[14].mxu1 }
 0x1c7   :  { %35923 = vst [vmem:[#allocation95_spill] sm:$0xff] %v28396_v52  ;;  %v28402_v46 = vmax.f32 %v35924_v32, %v28396_v52  ;;  %v28404_v0 = vpop.f32.mrb[15].mxu1  ;;  %3170 = vmatmul.mubr.f32.vlgmr.msra.gmra.mrb[32].mxu1 %v27502_v24  ;;  %v35928_v32 = vand.u32 4294901760, %v28254_v56  ;;  %v35931_v56 = vand.u32 4294901760, %v28278_v7  ;;  %v35938_v7 = vand.u32 4294901760, %v28295_v34 }
 0x1c8   :  { %35925 = vst [vmem:[#allocation96_spill] sm:$0xff] %v28404_v0  ;;  %24631 = vmatpush1.bf16.msra.mxu1 %v28388_v1  ;;  %3175 = vmatprep.mubr.f32.mxu1 %v35926_v43 }
 0x1c9   :  { %24633 = vmatprep.subr.bf16.mxu1 %v28394_v10  ;;  %v35935_v10 = vand.u32 4294901760, %v28284_v25  ;;  %v57_v25 = vld [vmem:[#allocation5 + $0x58] sm:$0xff] }
 0x1cb   :  { %3177 = vmatmul.mubr.f32.gmra.mrb[34].mxu1 %v27526_v37 }
 0x1cc   :  { %3182 = vmatprep.mubr.f32.mxu1 %v35926_v43  ;;  %24635 = vmatpush1.bf16.msra.mxu1 %v28411_v58  ;;  %v28432_v58 = vpack.c.bf16 %v35929_v42, %v35928_v32  ;;  %v35932_v42 = vand.u32 4294901760, %v28280_v36  ;;  %v35934_v32 = vand.u32 4294901760, %v28282_v27  ;;  %v89_v27 = vld [vmem:[#allocation5 + $0x158] sm:$0xff]  ;;  %v3637_v36 = vand.u32 4294901760, %v57_v25 }
 0x1cd   :  { %24637 = vmatprep.subr.bf16.mxu1 %v28252_v12 }
 0x1ce   :  { %35930 = vst [vmem:[#allocation98_spill] sm:$0xff] %v28432_v58  ;;  %v28446_v61 = vpack.c.bf16 %v35932_v42, %v35931_v56  ;;  %v28452_v1 = vpack.c.bf16 %v35935_v10, %v35934_v32  ;;  %v28478_v10 = vsub.f32 %v57_v25, %v3637_v36  ;;  %v56_v56 = vld [vmem:[#allocation5 + $0x50] sm:$0xff]  ;;  %v121_v32 = vld [vmem:[#allocation5 + $0x258] sm:$0xff] }
 0x1cf   :  { %3184 = vmatmul.mubr.f32.gmra.mrb[36].mxu1 %v27534_v40  ;;  %v88_v42 = vld [vmem:[#allocation5 + $0x150] sm:$0xff]  ;;  %v3639_v25 = vand.u32 4294901760, %v56_v56 }
 0x1d0   :  { %3189 = vmatprep.mubr.f32.mxu1 %v35926_v43  ;;  %35933 = vst [vmem:[#allocation99_spill] sm:$0xff] %v28446_v61  ;;  %35936 = vst [vmem:[#allocation100_spill] sm:$0xff] %v28452_v1 }
 0x1d1   :  { %v28502_v44 = vsub.f32 %v56_v56, %v3639_v25 }
 0x1d3   :  { %3191 = vmatmul.mubr.f32.gmra.mrb[38].mxu1 %v27595_v9  ;;  %v35362_v35 = vand.u32 4294901760, %v28502_v44 }
 0x1d4   :  { %3277 = vmatprep.mubr.f32.mxu1 %v35926_v43 }
 0x1d7   :  { %3280 = vmatmul.mubr.f32.vlgmr.msra.gmra.mrb[32].mxu1 %v27517_v30 }
 0x1d8   :  { %24639 = vmatpush1.bf16.msra.mxu1 %v28274_v28  ;;  %3285 = vmatprep.mubr.f32.mxu1 %v35926_v43 }
 0x1d9   :  { %24641 = vmatprep.subr.bf16.mxu1 %v28276_v8 }
 0x1db   :  { %3288 = vmatmul.mubr.f32.gmra.mrb[34].mxu1 %v27548_v45 }
 0x1dc   :  { %3293 = vmatprep.mubr.f32.mxu1 %v35926_v43  ;;  %24643 = vmatpush1.bf16.msra.mxu1 %v28287_v49 }
 0x1dd   :  { %24645 = vmatprep.subr.bf16.mxu1 %v28432_v58  ;;  %v35937_v58 = vand.u32 4294901760, %v28293_v15  ;;  %v3641_v15 = vand.u32 4294901760, %v89_v27 }
 0x1df   :  { %3296 = vmatmul.mubr.f32.gmra.mrb[36].mxu1 %v27554_v48  ;;  %v28461_v39 = vpack.c.bf16 %v35938_v7, %v35937_v58  ;;  %v28476_v34 = vpack.c.bf16 %v3641_v15, %v3637_v36  ;;  %v28480_v58 = vsub.f32 %v89_v27, %v3641_v15  ;;  %v153_v7 = vld [vmem:[#allocation5 + $0x358] sm:$0xff]  ;;  %v3643_v27 = vand.u32 4294901760, %v88_v42 }
 0x1e0   :  { %3301 = vmatprep.mubr.f32.mxu1 %v35926_v43  ;;  %v3645_v36 = vand.u32 4294901760, %v121_v32  ;;  %v3649_v15 = vand.u32 4294901760, %v153_v7 }
 0x1e1   :  { %35939 = vst [vmem:[#allocation101_spill] sm:$0xff] %v28461_v39  ;;  %35940 = vst [vmem:[#allocation102_spill] sm:$0xff] %v28476_v34  ;;  %v28498_v41 = vpack.c.bf16 %v3643_v27, %v3639_v25  ;;  %v28504_v63 = vsub.f32 %v88_v42, %v3643_v27 }
 0x1e2   :  { %v28500_v18 = vpack.c.bf16 %v3649_v15, %v3645_v36  ;;  %v28506_v2 = vsub.f32 %v121_v32, %v3645_v36  ;;  %v28508_v4 = vsub.f32 %v153_v7, %v3649_v15 }
 0x1e3   :  { %3304 = vmatmul.mubr.f32.gmra.mrb[38].mxu1 %v27603_v14  ;;  %35941 = vst [vmem:[#allocation103_spill] sm:$0xff] %v28498_v41  ;;  %v35359_v56 = vand.u32 4294901760, %v28504_v63 }
 0x1e4   :  { %3382 = vmatprep.mubr.f32.mxu1 %v35926_v43  ;;  %35942 = vst [vmem:[#allocation104_spill] sm:$0xff] %v28500_v18  ;;  %v35360_v32 = vand.u32 4294901760, %v28506_v2  ;;  %v35361_v7 = vand.u32 4294901760, %v28508_v4 }
 0x1e7   :  { %3386 = vmatmul.mubr.f32.vlgmr.msra.gmra.mrb[32].mxu1 %v27529_v38 }
 0x1e8   :  { %24647 = vmatpush1.bf16.msra.mxu1 %v28446_v61  ;;  %3391 = vmatprep.mubr.f32.mxu1 %v35926_v43  ;;  %v120_v61 = vld [vmem:[#allocation5 + $0x250] sm:$0xff] }
 0x1e9   :  { %24649 = vmatprep.subr.bf16.mxu1 %v28452_v1  ;;  %v35357_v1 = vand.u32 4294901760, %v28480_v58 }
 0x1eb   :  { %3395 = vmatmul.mubr.f32.gmra.mrb[34].mxu1 %v27558_v53 }
 0x1ec   :  { %3400 = vmatprep.mubr.f32.mxu1 %v35926_v43  ;;  %24651 = vmatpush1.bf16.msra.mxu1 %v28461_v39  ;;  %v35354_v39 = vand.u32 4294901760, %v28478_v10 }
 0x1ed   :  { %24653 = vmatprep.subr.bf16.mxu1 %v28252_v12  ;;  %v3647_v12 = vand.u32 4294901760, %v120_v61 }
 0x1ef   :  { %3404 = vmatmul.mubr.f32.gmra.mrb[36].mxu1 %v27563_v55  ;;  %v28517_v42 = vsub.f32 %v120_v61, %v3647_v12  ;;  %v3793_v61 = vsub.f32 %v28508_v4, %v35361_v7 }
 0x1f0   :  { %3409 = vmatprep.mubr.f32.mxu1 %v35926_v43 }
 0x1f3   :  { %3413 = vmatmul.mubr.f32.gmra.mrb[38].mxu1 %v27609_v19 }
 0x1f4   :  { %3507 = vmatprep.mubr.f32.mxu1 %v35926_v43 }
 0x1f7   :  { %3509 = vmatmul.mubr.f32.vlgmr.msra.gmra.mrb[32].mxu1 %v27502_v24 }
 0x1f8   :  { %24655 = vmatpush1.bf16.msra.mxu1 %v28274_v28  ;;  %3514 = vmatprep.mubr.f32.mxu1 %v35926_v43  ;;  %v3769_v28 = vsub.f32 %v28480_v58, %v35357_v1 }
 0x1f9   :  { %24657 = vmatprep.subr.bf16.mxu1 %v28276_v8  ;;  %v3757_v8 = vsub.f32 %v28478_v10, %v35354_v39 }
 0x1fa   :  { %v3770_v39 = vand.u32 4294901760, %v3769_v28 }
 0x1fb   :  { %3516 = vmatmul.mubr.f32.gmra.mrb[34].mxu1 %v27526_v37  ;;  %v3758_v57 = vand.u32 4294901760, %v3757_v8 }
 0x1fc   :  { %3521 = vmatprep.mubr.f32.mxu1 %v35926_v43  ;;  %24659 = vmatpush1.bf16.msra.mxu1 %v28287_v49  ;;  %v152_v49 = vld [vmem:[#allocation5 + $0x350] sm:$0xff] }
 0x1fd   :  { %24661 = vmatprep.subr.bf16.mxu1 %v28476_v34  ;;  %v3651_v52 = vand.u32 4294901760, %v152_v49  ;;  %v28522_v28 = vpack.c.bf16 %v3770_v39, %v3758_v57  ;;  %v35365_v39 = vand.u32 4294901760, %v28517_v42 }
 0x1ff   :  { %3523 = vmatmul.mubr.f32.gmra.mrb[36].mxu1 %v27534_v40  ;;  %v28511_v1 = vpack.c.bf16 %v3651_v52, %v3647_v12  ;;  %v28519_v8 = vsub.f32 %v152_v49, %v3651_v52  ;;  %35944 = vst [vmem:[#allocation106_spill] sm:$0xff] %v28522_v28  ;;  %v3763_v12 = vsub.f32 %v28502_v44, %v35362_v35 }
 0x200   :  { %3528 = vmatprep.mubr.f32.mxu1 %v35926_v43  ;;  %v3775_v49 = vsub.f32 %v28504_v63, %v35359_v56  ;;  %v3781_v52 = vsub.f32 %v28506_v2, %v35360_v32  ;;  %v3787_v36 = vsub.f32 %v28517_v42, %v35365_v39  ;;  %v3794_v32 = vand.u32 4294901760, %v3793_v61 }
 0x201   :  { %35943 = vst [vmem:[#allocation105_spill] sm:$0xff] %v28511_v1  ;;  %v35364_v57 = vand.u32 4294901760, %v28519_v8  ;;  %v3764_v25 = vand.u32 4294901760, %v3763_v12  ;;  %v28618_v39 = vpack.c.bf16 %v28508_v4, %v28506_v2 }
 0x202   :  { %v3776_v27 = vand.u32 4294901760, %v3775_v49  ;;  %v3782_v56 = vand.u32 4294901760, %v3781_v52  ;;  %v3788_v35 = vand.u32 4294901760, %v3787_v36  ;;  %v28566_v52 = vpack.c.bf16 %v28480_v58, %v28478_v10 }
 0x203   :  { %3530 = vmatmul.mubr.f32.gmra.mrb[38].mxu1 %v27595_v9  ;;  %v3799_v15 = vsub.f32 %v28519_v8, %v35364_v57  ;;  %35959 = vst [vmem:[#allocation118_spill] sm:$0xff] %v28618_v39 }
 0x204   :  { %3608 = vmatprep.mubr.f32.mxu1 %v35926_v43  ;;  %v28554_v7 = vpack.c.bf16 %v3776_v27, %v3764_v25  ;;  %v28556_v12 = vpack.c.bf16 %v3794_v32, %v3782_v56  ;;  %35948 = vst [vmem:[#allocation110_spill] sm:$0xff] %v28566_v52  ;;  %v35950_v56 = vmax.f32 %v28350_v5, %v28352_v50 }
 0x205   :  { %v35953_v5 = vmax.f32 %v28366_v13, %v28368_v47 }
 0x206   :  { %35945 = vst [vmem:[#allocation107_spill] sm:$0xff] %v28554_v7  ;;  %35946 = vst [vmem:[#allocation108_spill] sm:$0xff] %v28556_v12 }
 0x207   :  { %3610 = vmatmul.mubr.f32.vlgmr.msra.gmra.mrb[32].mxu1 %v27502_v24 }
 0x208   :  { %24663 = vmatpush1.bf16.msra.mxu1 %v28498_v41  ;;  %3615 = vmatprep.mubr.f32.mxu1 %v35926_v43 }
 0x209   :  { %24665 = vmatprep.subr.bf16.mxu1 %v28500_v18 }
 0x20b   :  { %3617 = vmatmul.mubr.f32.gmra.mrb[34].mxu1 %v27526_v37 }
 0x20c   :  { %3622 = vmatprep.mubr.f32.mxu1 %v35926_v43  ;;  %24667 = vmatpush1.bf16.msra.mxu1 %v28511_v1 }
 0x20d   :  { %24669 = vmatprep.subr.bf16.mxu1 %v28522_v28  ;;  %v3800_v28 = vand.u32 4294901760, %v3799_v15  ;;  %v28635_v15 = vpack.c.bf16 %v28519_v8, %v28517_v42 }
 0x20f   :  { %3624 = vmatmul.mubr.f32.gmra.mrb[36].mxu1 %v27534_v40  ;;  %v28561_v49 = vpack.c.bf16 %v3800_v28, %v3788_v35  ;;  %v35956_v35 = vmax.f32 %v28380_v31, %v28382_v62  ;;  %35963 = vst [vmem:[#allocation121_spill] sm:$0xff] %v28635_v15 }
 0x210   :  { %3629 = vmatprep.mubr.f32.mxu1 %v35926_v43 }
 0x211   :  { %35947 = vst [vmem:[#allocation109_spill] sm:$0xff] %v28561_v49 }
 0x213   :  { %3631 = vmatmul.mubr.f32.gmra.mrb[38].mxu1 %v27595_v9 }
 0x214   :  { %3709 = vmatprep.mubr.f32.mxu1 %v35926_v43 }
 0x217   :  { %3715 = vmatmul.mubr.f32.vlgmr.msra.gmra.mrb[40].mxu1 %v27560_v54 }
 0x218   :  { %24671 = vmatpush1.bf16.msra.mxu1 %v28554_v7  ;;  %3720 = vmatprep.mubr.f32.mxu1 %v35926_v43  ;;  %v154_v7 = vld [vmem:[#allocation5 + $0x360] sm:$0xff] }
 0x219   :  { %24673 = vmatprep.subr.bf16.mxu1 %v28556_v12 }
 0x21a   :  { %v28568_v61 = vpop.f32.mrb[16].mxu1 }
 0x21b   :  { %35949 = vst [vmem:[#allocation111_spill] sm:$0xff] %v28568_v61  ;;  %v28574_v32 = vmax.f32 %v35950_v56, %v28568_v61  ;;  %v28576_v25 = vpop.f32.mrb[17].mxu1  ;;  %3726 = vmatmul.mubr.f32.gmra.mrb[42].mxu1 %v27586_v3 }
 0x21c   :  { %35951 = vst [vmem:[#allocation112_spill] sm:$0xff] %v28576_v25  ;;  %3731 = vmatprep.mubr.f32.mxu1 %v35926_v43  ;;  %24675 = vmatpush1.bf16.msra.mxu1 %v28561_v49 }
 0x21d   :  { %24677 = vmatprep.subr.bf16.mxu1 %v28566_v52 }
 0x21e   :  { %v28584_v28 = vpop.f32.mrb[18].mxu1 }
 0x21f   :  { %35952 = vst [vmem:[#allocation113_spill] sm:$0xff] %v28584_v28  ;;  %v28590_v27 = vmax.f32 %v35953_v5, %v28584_v28  ;;  %v28592_v36 = vpop.f32.mrb[19].mxu1  ;;  %3737 = vmatmul.mubr.f32.gmra.mrb[44].mxu1 %v27599_v11  ;;  %v28612_v5 = vpack.c.bf16 %v28504_v63, %v28502_v44 }
 0x220   :  { %35954 = vst [vmem:[#allocation114_spill] sm:$0xff] %v28592_v36  ;;  %3742 = vmatprep.mubr.f32.mxu1 %v35926_v43 }
 0x221   :  { %35958 = vst [vmem:[#allocation117_spill] sm:$0xff] %v28612_v5 }
 0x222   :  { %v28598_v56 = vpop.f32.mrb[20].mxu1 }
 0x223   :  { %35955 = vst [vmem:[#allocation115_spill] sm:$0xff] %v28598_v56  ;;  %v28604_v57 = vmax.f32 %v35956_v35, %v28598_v56  ;;  %v28606_v13 = vpop.f32.mrb[21].mxu1  ;;  %3748 = vmatmul.mubr.f32.gmra.mrb[46].mxu1 %v27623_v33  ;;  %v35961_v35 = vmax.f32 %v28402_v46, %v28404_v0  ;;  %v35964_v46 = vand.u32 4294901760, %v28478_v10  ;;  %v35967_v10 = vand.u32 4294901760, %v28502_v44 }
 0x224   :  { %35957 = vst [vmem:[#allocation116_spill] sm:$0xff] %v28606_v13  ;;  %3858 = vmatprep.mubr.f32.mxu1 %v35926_v43  ;;  %v35974_v44 = vand.u32 4294901760, %v28519_v8 }
 0x226   :  { %v28620_v31 = vpop.f32.mrb[22].mxu1 }
 0x227   :  { %35960 = vst [vmem:[#allocation119_spill] sm:$0xff] %v28620_v31  ;;  %v28626_v52 = vmax.f32 %v35961_v35, %v28620_v31  ;;  %v28628_v49 = vpop.f32.mrb[23].mxu1  ;;  %3860 = vmatmul.mubr.f32.vlgmr.msra.gmra.mrb[40].mxu1 %v27502_v24  ;;  %v35965_v35 = vand.u32 4294901760, %v28480_v58  ;;  %v35968_v58 = vand.u32 4294901760, %v28504_v63  ;;  %v91_v63 = vld [vmem:[#allocation5 + $0x168] sm:$0xff] }
 0x228   :  { %35962 = vst [vmem:[#allocation120_spill] sm:$0xff] %v28628_v49  ;;  %24679 = vmatpush1.bf16.msra.mxu1 %v28612_v5  ;;  %3865 = vmatprep.mubr.f32.mxu1 %v35926_v43 }
 0x229   :  { %24681 = vmatprep.subr.bf16.mxu1 %v28618_v39  ;;  %v28656_v12 = vpack.c.bf16 %v35965_v35, %v35964_v46  ;;  %v28670_v46 = vpack.c.bf16 %v35968_v58, %v35967_v10  ;;  %v35970_v35 = vand.u32 4294901760, %v28506_v2  ;;  %v58_v10 = vld [vmem:[#allocation5 + $0x60] sm:$0xff] }
 0x22a   :  { %v90_v58 = vld [vmem:[#allocation5 + $0x160] sm:$0xff] }
 0x22b   :  { %3867 = vmatmul.mubr.f32.gmra.mrb[42].mxu1 %v27526_v37  ;;  %35966 = vst [vmem:[#allocation122_spill] sm:$0xff] %v28656_v12  ;;  %35969 = vst [vmem:[#allocation123_spill] sm:$0xff] %v28670_v46 }
 0x22c   :  { %3872 = vmatprep.mubr.f32.mxu1 %v35926_v43  ;;  %24683 = vmatpush1.bf16.msra.mxu1 %v28635_v15  ;;  %v35971_v15 = vand.u32 4294901760, %v28508_v4  ;;  %v59_v4 = vld [vmem:[#allocation5 + $0x68] sm:$0xff] }
 0x22d   :  { %24685 = vmatprep.subr.bf16.mxu1 %v28476_v34  ;;  %v4327_v2 = vand.u32 4294901760, %v59_v4 }
 0x22e   :  { %v28676_v39 = vpack.c.bf16 %v35971_v15, %v35970_v35  ;;  %v123_v35 = vld [vmem:[#allocation5 + $0x268] sm:$0xff] }
 0x22f   :  { %3874 = vmatmul.mubr.f32.gmra.mrb[44].mxu1 %v27534_v40 }
 0x230   :  { %3879 = vmatprep.mubr.f32.mxu1 %v35926_v43  ;;  %35972 = vst [vmem:[#allocation124_spill] sm:$0xff] %v28676_v39 }
 0x233   :  { %3881 = vmatmul.mubr.f32.gmra.mrb[46].mxu1 %v27595_v9 }
 0x234   :  { %3967 = vmatprep.mubr.f32.mxu1 %v35926_v43 }
 0x237   :  { %3970 = vmatmul.mubr.f32.vlgmr.msra.gmra.mrb[40].mxu1 %v27517_v30 }
 0x238   :  { %24687 = vmatpush1.bf16.msra.mxu1 %v28498_v41  ;;  %3975 = vmatprep.mubr.f32.mxu1 %v35926_v43 }
 0x239   :  { %24689 = vmatprep.subr.bf16.mxu1 %v28500_v18 }
 0x23b   :  { %3978 = vmatmul.mubr.f32.gmra.mrb[42].mxu1 %v27548_v45 }
 0x23c   :  { %3983 = vmatprep.mubr.f32.mxu1 %v35926_v43  ;;  %24691 = vmatpush1.bf16.msra.mxu1 %v28511_v1 }
 0x23d   :  { %24693 = vmatprep.subr.bf16.mxu1 %v28656_v12  ;;  %v35973_v12 = vand.u32 4294901760, %v28517_v42  ;;  %v4331_v42 = vand.u32 4294901760, %v91_v63 }
 0x23f   :  { %3986 = vmatmul.mubr.f32.gmra.mrb[44].mxu1 %v27554_v48  ;;  %v28685_v5 = vpack.c.bf16 %v35974_v44, %v35973_v12  ;;  %v28700_v8 = vpack.c.bf16 %v4331_v42, %v4327_v2  ;;  %v28702_v12 = vsub.f32 %v59_v4, %v4327_v2  ;;  %v28704_v15 = vsub.f32 %v91_v63, %v4331_v42  ;;  %v155_v44 = vld [vmem:[#allocation5 + $0x368] sm:$0xff] }
 0x240   :  { %3991 = vmatprep.mubr.f32.mxu1 %v35926_v43  ;;  %v4329_v4 = vand.u32 4294901760, %v58_v10  ;;  %v4333_v63 = vand.u32 4294901760, %v90_v58  ;;  %v4335_v2 = vand.u32 4294901760, %v123_v35  ;;  %v4339_v42 = vand.u32 4294901760, %v155_v44 }
 0x241   :  { %35975 = vst [vmem:[#allocation125_spill] sm:$0xff] %v28685_v5  ;;  %35976 = vst [vmem:[#allocation126_spill] sm:$0xff] %v28700_v8 }
 0x242   :  { %v28722_v31 = vpack.c.bf16 %v4333_v63, %v4329_v4  ;;  %v28724_v0 = vpack.c.bf16 %v4339_v42, %v4335_v2  ;;  %v28726_v56 = vsub.f32 %v58_v10, %v4329_v4  ;;  %v28728_v62 = vsub.f32 %v90_v58, %v4333_v63 }
 0x243   :  { %3994 = vmatmul.mubr.f32.gmra.mrb[46].mxu1 %v27603_v14  ;;  %v28730_v47 = vsub.f32 %v123_v35, %v4335_v2  ;;  %v28732_v61 = vsub.f32 %v155_v44, %v4339_v42 }
 0x244   :  { %4072 = vmatprep.mubr.f32.mxu1 %v35926_v43  ;;  %35977 = vst [vmem:[#allocation127_spill] sm:$0xff] %v28722_v31  ;;  %35978 = vst [vmem:[#allocation128_spill] sm:$0xff] %v28724_v0  ;;  %v35398_v50 = vand.u32 4294901760, %v28726_v56  ;;  %v35395_v10 = vand.u32 4294901760, %v28728_v62 }
 0x245   :  { %v35396_v35 = vand.u32 4294901760, %v28730_v47  ;;  %v35397_v44 = vand.u32 4294901760, %v28732_v61 }
 0x247   :  { %4076 = vmatmul.mubr.f32.vlgmr.msra.gmra.mrb[40].mxu1 %v27529_v38 }
 0x248   :  { %24695 = vmatpush1.bf16.msra.mxu1 %v28670_v46  ;;  %4081 = vmatprep.mubr.f32.mxu1 %v35926_v43  ;;  %v122_v46 = vld [vmem:[#allocation5 + $0x260] sm:$0xff] }
 0x249   :  { %24697 = vmatprep.subr.bf16.mxu1 %v28676_v39  ;;  %v35393_v39 = vand.u32 4294901760, %v28704_v15 }
 0x24b   :  { %4085 = vmatmul.mubr.f32.gmra.mrb[42].mxu1 %v27558_v53 }
 0x24c   :  { %4090 = vmatprep.mubr.f32.mxu1 %v35926_v43  ;;  %24699 = vmatpush1.bf16.msra.mxu1 %v28685_v5  ;;  %v35390_v5 = vand.u32 4294901760, %v28702_v12 }
 0x24d   :  { %24701 = vmatprep.subr.bf16.mxu1 %v28476_v34  ;;  %v4341_v34 = vand.u32 4294901760, %v154_v7 }
 0x24f   :  { %4094 = vmatmul.mubr.f32.gmra.mrb[44].mxu1 %v27563_v55 }
 0x250   :  { %4099 = vmatprep.mubr.f32.mxu1 %v35926_v43 }
 0x253   :  { %4103 = vmatmul.mubr.f32.gmra.mrb[46].mxu1 %v27609_v19 }
 0x254   :  { %4197 = vmatprep.mubr.f32.mxu1 %v35926_v43 }
 0x257   :  { %4199 = vmatmul.mubr.f32.vlgmr.msra.gmra.mrb[40].mxu1 %v27502_v24 }
 0x258   :  { %24703 = vmatpush1.bf16.msra.mxu1 %v28498_v41  ;;  %4204 = vmatprep.mubr.f32.mxu1 %v35926_v43  ;;  %v4337_v41 = vand.u32 4294901760, %v122_v46 }
 0x259   :  { %24705 = vmatprep.subr.bf16.mxu1 %v28500_v18  ;;  %v4459_v18 = vsub.f32 %v28704_v15, %v35393_v39 }
 0x25a   :  { %v28735_v39 = vpack.c.bf16 %v4341_v34, %v4337_v41  ;;  %v28741_v58 = vsub.f32 %v122_v46, %v4337_v41  ;;  %v4453_v41 = vsub.f32 %v28726_v56, %v35398_v50  ;;  %v4483_v46 = vsub.f32 %v28732_v61, %v35397_v44 }
 0x25b   :  { %4206 = vmatmul.mubr.f32.gmra.mrb[42].mxu1 %v27526_v37 }
 0x25c   :  { %4211 = vmatprep.mubr.f32.mxu1 %v35926_v43  ;;  %24707 = vmatpush1.bf16.msra.mxu1 %v28511_v1  ;;  %v4447_v1 = vsub.f32 %v28702_v12, %v35390_v5  ;;  %v4460_v5 = vand.u32 4294901760, %v4459_v18  ;;  %35979 = vst [vmem:[#allocation129_spill] sm:$0xff] %v28735_v39  ;;  %v4454_v4 = vand.u32 4294901760, %v4453_v41 }
 0x25d   :  { %24709 = vmatprep.subr.bf16.mxu1 %v28700_v8 }
 0x25e   :  { %v4448_v28 = vand.u32 4294901760, %v4447_v1  ;;  %v28743_v1 = vsub.f32 %v154_v7, %v4341_v34  ;;  %v4465_v34 = vsub.f32 %v28728_v62, %v35395_v10  ;;  %v35401_v7 = vand.u32 4294901760, %v28741_v58 }
 0x25f   :  { %4213 = vmatmul.mubr.f32.gmra.mrb[44].mxu1 %v27534_v40 }
 0x260   :  { %4218 = vmatprep.mubr.f32.mxu1 %v35926_v43  ;;  %v28746_v18 = vpack.c.bf16 %v4460_v5, %v4448_v28  ;;  %v35400_v28 = vand.u32 4294901760, %v28743_v1  ;;  %v4471_v5 = vsub.f32 %v28730_v47, %v35396_v35  ;;  %v4466_v63 = vand.u32 4294901760, %v4465_v34 }
 0x261   :  { %v4477_v2 = vsub.f32 %v28741_v58, %v35401_v7  ;;  %v4484_v35 = vand.u32 4294901760, %v4483_v46  ;;  %v28842_v7 = vpack.c.bf16 %v28732_v61, %v28730_v47 }
 0x262   :  { %35980 = vst [vmem:[#allocation130_spill] sm:$0xff] %v28746_v18  ;;  %v4489_v42 = vsub.f32 %v28743_v1, %v35400_v28  ;;  %v4472_v10 = vand.u32 4294901760, %v4471_v5  ;;  %v28778_v44 = vpack.c.bf16 %v4466_v63, %v4454_v4  ;;  %v28790_v5 = vpack.c.bf16 %v28704_v15, %v28702_v12 }
 0x263   :  { %4220 = vmatmul.mubr.f32.gmra.mrb[46].mxu1 %v27595_v9  ;;  %v4478_v50 = vand.u32 4294901760, %v4477_v2  ;;  %35995 = vst [vmem:[#allocation142_spill] sm:$0xff] %v28842_v7 }
 0x264   :  { %4298 = vmatprep.mubr.f32.mxu1 %v35926_v43  ;;  %35981 = vst [vmem:[#allocation131_spill] sm:$0xff] %v28778_v44  ;;  %v28780_v41 = vpack.c.bf16 %v4484_v35, %v4472_v10  ;;  %35984 = vst [vmem:[#allocation134_spill] sm:$0xff] %v28790_v5  ;;  %v35986_v10 = vmax.f32 %v28574_v32, %v28576_v25  ;;  %v35989_v32 = vmax.f32 %v28590_v27, %v28592_v36 }
 0x266   :  { %35982 = vst [vmem:[#allocation132_spill] sm:$0xff] %v28780_v41 }
 0x267   :  { %4300 = vmatmul.mubr.f32.vlgmr.msra.gmra.mrb[40].mxu1 %v27502_v24 }
 0x268   :  { %24711 = vmatpush1.bf16.msra.mxu1 %v28722_v31  ;;  %4305 = vmatprep.mubr.f32.mxu1 %v35926_v43 }
 0x269   :  { %24713 = vmatprep.subr.bf16.mxu1 %v28724_v0 }
 0x26b   :  { %4307 = vmatmul.mubr.f32.gmra.mrb[42].mxu1 %v27526_v37 }
 0x26c   :  { %4312 = vmatprep.mubr.f32.mxu1 %v35926_v43  ;;  %24715 = vmatpush1.bf16.msra.mxu1 %v28735_v39 }
 0x26d   :  { %24717 = vmatprep.subr.bf16.mxu1 %v28746_v18  ;;  %v4490_v18 = vand.u32 4294901760, %v4489_v42  ;;  %v28859_v42 = vpack.c.bf16 %v28743_v1, %v28741_v58 }
 0x26f   :  { %4314 = vmatmul.mubr.f32.gmra.mrb[44].mxu1 %v27534_v40  ;;  %v28785_v34 = vpack.c.bf16 %v4490_v18, %v4478_v50  ;;  %v35992_v50 = vmax.f32 %v28604_v57, %v28606_v13  ;;  %35999 = vst [vmem:[#allocation145_spill] sm:$0xff] %v28859_v42 }
 0x270   :  { %4319 = vmatprep.mubr.f32.mxu1 %v35926_v43 }
 0x271   :  { %35983 = vst [vmem:[#allocation133_spill] sm:$0xff] %v28785_v34 }
 0x273   :  { %4321 = vmatmul.mubr.f32.gmra.mrb[46].mxu1 %v27595_v9 }
 0x274   :  { %4399 = vmatprep.mubr.f32.mxu1 %v35926_v43 }
 0x277   :  { %4405 = vmatmul.mubr.f32.vlgmr.msra.gmra.mrb[48].mxu1 %v27560_v54 }
 0x278   :  { %24719 = vmatpush1.bf16.msra.mxu1 %v28778_v44  ;;  %4410 = vmatprep.mubr.f32.mxu1 %v35926_v43  ;;  %v156_v44 = vld [vmem:[#allocation5 + $0x370] sm:$0xff] }
 0x279   :  { %24721 = vmatprep.subr.bf16.mxu1 %v28780_v41 }
 0x27a   :  { %v28792_v46 = vpop.f32.mrb[24].mxu1 }
 0x27b   :  { %35985 = vst [vmem:[#allocation135_spill] sm:$0xff] %v28792_v46  ;;  %v28798_v35 = vmax.f32 %v35986_v10, %v28792_v46  ;;  %v28800_v4 = vpop.f32.mrb[25].mxu1  ;;  %4416 = vmatmul.mubr.f32.gmra.mrb[50].mxu1 %v27586_v3 }
 0x27c   :  { %35987 = vst [vmem:[#allocation136_spill] sm:$0xff] %v28800_v4  ;;  %4421 = vmatprep.mubr.f32.mxu1 %v35926_v43  ;;  %24723 = vmatpush1.bf16.msra.mxu1 %v28785_v34 }
 0x27d   :  { %24725 = vmatprep.subr.bf16.mxu1 %v28790_v5 }
 0x27e   :  { %v28808_v18 = vpop.f32.mrb[26].mxu1 }
 0x27f   :  { %35988 = vst [vmem:[#allocation137_spill] sm:$0xff] %v28808_v18  ;;  %v28814_v63 = vmax.f32 %v35989_v32, %v28808_v18  ;;  %v28816_v2 = vpop.f32.mrb[27].mxu1  ;;  %4427 = vmatmul.mubr.f32.gmra.mrb[52].mxu1 %v27599_v11  ;;  %v28836_v32 = vpack.c.bf16 %v28728_v62, %v28726_v56 }
 0x280   :  { %35990 = vst [vmem:[#allocation138_spill] sm:$0xff] %v28816_v2  ;;  %4432 = vmatprep.mubr.f32.mxu1 %v35926_v43 }
 0x281   :  { %35994 = vst [vmem:[#allocation141_spill] sm:$0xff] %v28836_v32 }
 0x282   :  { %v28822_v10 = vpop.f32.mrb[28].mxu1 }
 0x283   :  { %35991 = vst [vmem:[#allocation139_spill] sm:$0xff] %v28822_v10  ;;  %v28828_v28 = vmax.f32 %v35992_v50, %v28822_v10  ;;  %v28830_v27 = vpop.f32.mrb[29].mxu1  ;;  %4438 = vmatmul.mubr.f32.gmra.mrb[54].mxu1 %v27623_v33  ;;  %v35997_v50 = vmax.f32 %v28626_v52, %v28628_v49  ;;  %v36000_v52 = vand.u32 4294901760, %v28702_v12  ;;  %v36003_v12 = vand.u32 4294901760, %v28726_v56 }
 0x284   :  { %35993 = vst [vmem:[#allocation140_spill] sm:$0xff] %v28830_v27  ;;  %4548 = vmatprep.mubr.f32.mxu1 %v35926_v43  ;;  %v36010_v56 = vand.u32 4294901760, %v28743_v1 }
 0x286   :  { %v28844_v57 = vpop.f32.mrb[30].mxu1 }
 0x287   :  { %35996 = vst [vmem:[#allocation143_spill] sm:$0xff] %v28844_v57  ;;  %v28850_v5 = vmax.f32 %v35997_v50, %v28844_v57  ;;  %v28852_v34 = vpop.f32.mrb[31].mxu1  ;;  %4550 = vmatmul.mubr.f32.vlgmr.msra.gmra.mrb[48].mxu1 %v27502_v24  ;;  %v36001_v50 = vand.u32 4294901760, %v28704_v15  ;;  %v36004_v15 = vand.u32 4294901760, %v28728_v62  ;;  %v61_v62 = vld [vmem:[#allocation5 + $0x78] sm:$0xff] }
 0x288   :  { %35998 = vst [vmem:[#allocation144_spill] sm:$0xff] %v28852_v34  ;;  %24727 = vmatpush1.bf16.msra.mxu1 %v28836_v32  ;;  %4555 = vmatprep.mubr.f32.mxu1 %v35926_v43 }
 0x289   :  { %24729 = vmatprep.subr.bf16.mxu1 %v28842_v7  ;;  %v28880_v41 = vpack.c.bf16 %v36001_v50, %v36000_v52  ;;  %v28894_v52 = vpack.c.bf16 %v36004_v15, %v36003_v12  ;;  %v36006_v50 = vand.u32 4294901760, %v28730_v47  ;;  %v93_v47 = vld [vmem:[#allocation5 + $0x178] sm:$0xff]  ;;  %v60_v12 = vld [vmem:[#allocation5 + $0x70] sm:$0xff] }
 0x28a   :  { %v92_v15 = vld [vmem:[#allocation5 + $0x170] sm:$0xff] }
 0x28b   :  { %4557 = vmatmul.mubr.f32.gmra.mrb[50].mxu1 %v27526_v37  ;;  %36002 = vst [vmem:[#allocation146_spill] sm:$0xff] %v28880_v41  ;;  %36005 = vst [vmem:[#allocation147_spill] sm:$0xff] %v28894_v52 }
 0x28c   :  { %4562 = vmatprep.mubr.f32.mxu1 %v35926_v43  ;;  %24731 = vmatpush1.bf16.msra.mxu1 %v28859_v42  ;;  %v36007_v42 = vand.u32 4294901760, %v28732_v61  ;;  %v5017_v61 = vand.u32 4294901760, %v61_v62 }
 0x28d   :  { %24733 = vmatprep.subr.bf16.mxu1 %v28700_v8 }
 0x28e   :  { %v28900_v7 = vpack.c.bf16 %v36007_v42, %v36006_v50  ;;  %v125_v50 = vld [vmem:[#allocation5 + $0x278] sm:$0xff] }
 0x28f   :  { %4564 = vmatmul.mubr.f32.gmra.mrb[52].mxu1 %v27534_v40 }
 0x290   :  { %4569 = vmatprep.mubr.f32.mxu1 %v35926_v43  ;;  %36008 = vst [vmem:[#allocation148_spill] sm:$0xff] %v28900_v7 }
 0x293   :  { %4571 = vmatmul.mubr.f32.gmra.mrb[54].mxu1 %v27595_v9 }
 0x294   :  { %4657 = vmatprep.mubr.f32.mxu1 %v35926_v43 }
 0x297   :  { %4660 = vmatmul.mubr.f32.vlgmr.msra.gmra.mrb[48].mxu1 %v27517_v30 }
 0x298   :  { %24735 = vmatpush1.bf16.msra.mxu1 %v28722_v31  ;;  %4665 = vmatprep.mubr.f32.mxu1 %v35926_v43 }
 0x299   :  { %24737 = vmatprep.subr.bf16.mxu1 %v28724_v0 }
 0x29b   :  { %4668 = vmatmul.mubr.f32.gmra.mrb[50].mxu1 %v27548_v45 }
 0x29c   :  { %4673 = vmatprep.mubr.f32.mxu1 %v35926_v43  ;;  %24739 = vmatpush1.bf16.msra.mxu1 %v28735_v39 }
 0x29d   :  { %24741 = vmatprep.subr.bf16.mxu1 %v28880_v41  ;;  %v36009_v41 = vand.u32 4294901760, %v28741_v58  ;;  %v5021_v58 = vand.u32 4294901760, %v93_v47 }
 0x29f   :  { %4676 = vmatmul.mubr.f32.gmra.mrb[52].mxu1 %v27554_v48  ;;  %v28909_v32 = vpack.c.bf16 %v36010_v56, %v36009_v41  ;;  %v28924_v1 = vpack.c.bf16 %v5021_v58, %v5017_v61  ;;  %v28926_v41 = vsub.f32 %v61_v62, %v5017_v61  ;;  %v28928_v42 = vsub.f32 %v93_v47, %v5021_v58  ;;  %v157_v56 = vld [vmem:[#allocation5 + $0x378] sm:$0xff] }
 0x2a0   :  { %4681 = vmatprep.mubr.f32.mxu1 %v35926_v43  ;;  %v5019_v62 = vand.u32 4294901760, %v60_v12  ;;  %v5023_v47 = vand.u32 4294901760, %v92_v15  ;;  %v5025_v61 = vand.u32 4294901760, %v125_v50  ;;  %v5029_v58 = vand.u32 4294901760, %v157_v56 }
 0x2a1   :  { %36011 = vst [vmem:[#allocation149_spill] sm:$0xff] %v28909_v32  ;;  %36012 = vst [vmem:[#allocation150_spill] sm:$0xff] %v28924_v1 }
 0x2a2   :  { %v28946_v57 = vpack.c.bf16 %v5023_v47, %v5019_v62  ;;  %v28948_v49 = vpack.c.bf16 %v5029_v58, %v5025_v61  ;;  %v28950_v10 = vsub.f32 %v60_v12, %v5019_v62  ;;  %v28952_v13 = vsub.f32 %v92_v15, %v5023_v47 }
 0x2a3   :  { %4684 = vmatmul.mubr.f32.gmra.mrb[54].mxu1 %v27603_v14  ;;  %v28954_v36 = vsub.f32 %v125_v50, %v5025_v61  ;;  %v28956_v46 = vsub.f32 %v157_v56, %v5029_v58 }
 0x2a4   :  { %4762 = vmatprep.mubr.f32.mxu1 %v35926_v43  ;;  %36013 = vst [vmem:[#allocation151_spill] sm:$0xff] %v28946_v57  ;;  %36014 = vst [vmem:[#allocation152_spill] sm:$0xff] %v28948_v49  ;;  %v35434_v25 = vand.u32 4294901760, %v28950_v10  ;;  %v35431_v12 = vand.u32 4294901760, %v28952_v13 }
 0x2a5   :  { %v35432_v50 = vand.u32 4294901760, %v28954_v36  ;;  %v35433_v56 = vand.u32 4294901760, %v28956_v46 }
 0x2a7   :  { %4766 = vmatmul.mubr.f32.vlgmr.msra.gmra.mrb[48].mxu1 %v27529_v38 }
 0x2a8   :  { %24743 = vmatpush1.bf16.msra.mxu1 %v28894_v52  ;;  %4771 = vmatprep.mubr.f32.mxu1 %v35926_v43  ;;  %v124_v52 = vld [vmem:[#allocation5 + $0x270] sm:$0xff] }
 0x2a9   :  { %24745 = vmatprep.subr.bf16.mxu1 %v28900_v7  ;;  %v35429_v7 = vand.u32 4294901760, %v28928_v42 }
 0x2ab   :  { %4775 = vmatmul.mubr.f32.gmra.mrb[50].mxu1 %v27558_v53 }
 0x2ac   :  { %4780 = vmatprep.mubr.f32.mxu1 %v35926_v43  ;;  %24747 = vmatpush1.bf16.msra.mxu1 %v28909_v32  ;;  %v35426_v32 = vand.u32 4294901760, %v28926_v41 }
 0x2ad   :  { %24749 = vmatprep.subr.bf16.mxu1 %v28700_v8  ;;  %v5031_v8 = vand.u32 4294901760, %v156_v44 }
 0x2af   :  { %4784 = vmatmul.mubr.f32.gmra.mrb[52].mxu1 %v27563_v55 }
 0x2b0   :  { %4789 = vmatprep.mubr.f32.mxu1 %v35926_v43 }
 0x2b3   :  { %4793 = vmatmul.mubr.f32.gmra.mrb[54].mxu1 %v27609_v19 }
 0x2b4   :  { %4887 = vmatprep.mubr.f32.mxu1 %v35926_v43 }
 0x2b7   :  { %4889 = vmatmul.mubr.f32.vlgmr.msra.gmra.mrb[48].mxu1 %v27502_v24 }
 0x2b8   :  { %24751 = vmatpush1.bf16.msra.mxu1 %v28722_v31  ;;  %4894 = vmatprep.mubr.f32.mxu1 %v35926_v43  ;;  %v5027_v31 = vand.u32 4294901760, %v124_v52 }
 0x2b9   :  { %24753 = vmatprep.subr.bf16.mxu1 %v28724_v0  ;;  %v5149_v0 = vsub.f32 %v28928_v42, %v35429_v7 }
 0x2ba   :  { %v28959_v7 = vpack.c.bf16 %v5031_v8, %v5027_v31  ;;  %v28965_v15 = vsub.f32 %v124_v52, %v5027_v31  ;;  %v5143_v31 = vsub.f32 %v28950_v10, %v35434_v25  ;;  %v5173_v52 = vsub.f32 %v28956_v46, %v35433_v56 }
 0x2bb   :  { %4896 = vmatmul.mubr.f32.gmra.mrb[50].mxu1 %v27526_v37 }
 0x2bc   :  { %4901 = vmatprep.mubr.f32.mxu1 %v35926_v43  ;;  %24755 = vmatpush1.bf16.msra.mxu1 %v28735_v39  ;;  %v5137_v39 = vsub.f32 %v28926_v41, %v35426_v32  ;;  %v5150_v32 = vand.u32 4294901760, %v5149_v0  ;;  %36015 = vst [vmem:[#allocation153_spill] sm:$0xff] %v28959_v7  ;;  %v5144_v62 = vand.u32 4294901760, %v5143_v31 }
 0x2bd   :  { %24757 = vmatprep.subr.bf16.mxu1 %v28924_v1 }
 0x2be   :  { %v5138_v18 = vand.u32 4294901760, %v5137_v39  ;;  %v28967_v39 = vsub.f32 %v156_v44, %v5031_v8  ;;  %v5155_v8 = vsub.f32 %v28952_v13, %v35431_v12  ;;  %v35437_v44 = vand.u32 4294901760, %v28965_v15 }
 0x2bf   :  { %4903 = vmatmul.mubr.f32.gmra.mrb[52].mxu1 %v27534_v40 }
 0x2c0   :  { %4908 = vmatprep.mubr.f32.mxu1 %v35926_v43  ;;  %v28970_v0 = vpack.c.bf16 %v5150_v32, %v5138_v18  ;;  %v35436_v18 = vand.u32 4294901760, %v28967_v39  ;;  %v5161_v32 = vsub.f32 %v28954_v36, %v35432_v50  ;;  %v5156_v47 = vand.u32 4294901760, %v5155_v8 }
 0x2c1   :  { %v5167_v61 = vsub.f32 %v28965_v15, %v35437_v44  ;;  %v5174_v50 = vand.u32 4294901760, %v5173_v52  ;;  %v29066_v44 = vpack.c.bf16 %v28956_v46, %v28954_v36 }
 0x2c2   :  { %36016 = vst [vmem:[#allocation154_spill] sm:$0xff] %v28970_v0  ;;  %v5179_v58 = vsub.f32 %v28967_v39, %v35436_v18  ;;  %v5162_v12 = vand.u32 4294901760, %v5161_v32  ;;  %v29002_v56 = vpack.c.bf16 %v5156_v47, %v5144_v62  ;;  %v29014_v32 = vpack.c.bf16 %v28928_v42, %v28926_v41 }
 0x2c3   :  { %4910 = vmatmul.mubr.f32.gmra.mrb[54].mxu1 %v27595_v9  ;;  %v5168_v25 = vand.u32 4294901760, %v5167_v61  ;;  %36031 = vst [vmem:[#allocation166_spill] sm:$0xff] %v29066_v44 }
 0x2c4   :  { %4988 = vmatprep.mubr.f32.mxu1 %v35926_v43  ;;  %36017 = vst [vmem:[#allocation155_spill] sm:$0xff] %v29002_v56  ;;  %v29004_v31 = vpack.c.bf16 %v5174_v50, %v5162_v12  ;;  %36020 = vst [vmem:[#allocation158_spill] sm:$0xff] %v29014_v32  ;;  %v36022_v12 = vmax.f32 %v28798_v35, %v28800_v4  ;;  %v36025_v35 = vmax.f32 %v28814_v63, %v28816_v2 }
 0x2c6   :  { %36018 = vst [vmem:[#allocation156_spill] sm:$0xff] %v29004_v31 }
 0x2c7   :  { %4990 = vmatmul.mubr.f32.vlgmr.msra.gmra.mrb[48].mxu1 %v27502_v24 }
 0x2c8   :  { %24759 = vmatpush1.bf16.msra.mxu1 %v28946_v57  ;;  %4995 = vmatprep.mubr.f32.mxu1 %v35926_v43 }
 0x2c9   :  { %24761 = vmatprep.subr.bf16.mxu1 %v28948_v49 }
 0x2cb   :  { %4997 = vmatmul.mubr.f32.gmra.mrb[50].mxu1 %v27526_v37 }
 0x2cc   :  { %5002 = vmatprep.mubr.f32.mxu1 %v35926_v43  ;;  %24763 = vmatpush1.bf16.msra.mxu1 %v28959_v7 }
 0x2cd   :  { %24765 = vmatprep.subr.bf16.mxu1 %v28970_v0  ;;  %v5180_v0 = vand.u32 4294901760, %v5179_v58  ;;  %v29083_v58 = vpack.c.bf16 %v28967_v39, %v28965_v15 }
 0x2cf   :  { %5004 = vmatmul.mubr.f32.gmra.mrb[52].mxu1 %v27534_v40  ;;  %v29009_v8 = vpack.c.bf16 %v5180_v0, %v5168_v25  ;;  %v36028_v25 = vmax.f32 %v28828_v28, %v28830_v27  ;;  %36035 = vst [vmem:[#allocation169_spill] sm:$0xff] %v29083_v58 }
 0x2d0   :  { %5009 = vmatprep.mubr.f32.mxu1 %v35926_v43 }
 0x2d1   :  { %36019 = vst [vmem:[#allocation157_spill] sm:$0xff] %v29009_v8 }
 0x2d3   :  { %5011 = vmatmul.mubr.f32.gmra.mrb[54].mxu1 %v27595_v9 }
 0x2d4   :  { %5089 = vmatprep.mubr.f32.mxu1 %v35926_v43 }
 0x2d7   :  { %5095 = vmatmul.mubr.f32.vlgmr.msra.gmra.mrb[56].mxu1 %v27560_v54 }
 0x2d8   :  { %24767 = vmatpush1.bf16.msra.mxu1 %v29002_v56  ;;  %5100 = vmatprep.mubr.f32.mxu1 %v35926_v43  ;;  %v158_v56 = vld [vmem:[#allocation5 + $0x380] sm:$0xff] }
 0x2d9   :  { %24769 = vmatprep.subr.bf16.mxu1 %v29004_v31 }
 0x2da   :  { %v29016_v52 = vpop.f32.mrb[32].mxu1 }
 0x2db   :  { %36021 = vst [vmem:[#allocation159_spill] sm:$0xff] %v29016_v52  ;;  %v29022_v50 = vmax.f32 %v36022_v12, %v29016_v52  ;;  %v29024_v62 = vpop.f32.mrb[33].mxu1  ;;  %5106 = vmatmul.mubr.f32.gmra.mrb[58].mxu1 %v27586_v3 }
 0x2dc   :  { %36023 = vst [vmem:[#allocation160_spill] sm:$0xff] %v29024_v62  ;;  %5111 = vmatprep.mubr.f32.mxu1 %v35926_v43  ;;  %24771 = vmatpush1.bf16.msra.mxu1 %v29009_v8 }
 0x2dd   :  { %24773 = vmatprep.subr.bf16.mxu1 %v29014_v32 }
 0x2de   :  { %v29032_v0 = vpop.f32.mrb[34].mxu1 }
 0x2df   :  { %36024 = vst [vmem:[#allocation161_spill] sm:$0xff] %v29032_v0  ;;  %v29038_v47 = vmax.f32 %v36025_v35, %v29032_v0  ;;  %v29040_v61 = vpop.f32.mrb[35].mxu1  ;;  %5117 = vmatmul.mubr.f32.gmra.mrb[60].mxu1 %v27599_v11  ;;  %v29060_v35 = vpack.c.bf16 %v28952_v13, %v28950_v10 }
 0x2e0   :  { %36026 = vst [vmem:[#allocation162_spill] sm:$0xff] %v29040_v61  ;;  %5122 = vmatprep.mubr.f32.mxu1 %v35926_v43 }
 0x2e1   :  { %36030 = vst [vmem:[#allocation165_spill] sm:$0xff] %v29060_v35 }
 0x2e2   :  { %v29046_v12 = vpop.f32.mrb[36].mxu1 }
 0x2e3   :  { %36027 = vst [vmem:[#allocation163_spill] sm:$0xff] %v29046_v12  ;;  %v29052_v18 = vmax.f32 %v36028_v25, %v29046_v12  ;;  %v29054_v63 = vpop.f32.mrb[37].mxu1  ;;  %5128 = vmatmul.mubr.f32.gmra.mrb[62].mxu1 %v27623_v33  ;;  %v36033_v25 = vmax.f32 %v28850_v5, %v28852_v34  ;;  %v36036_v5 = vand.u32 4294901760, %v28926_v41  ;;  %v36039_v41 = vand.u32 4294901760, %v28950_v10 }
 0x2e4   :  { %36029 = vst [vmem:[#allocation164_spill] sm:$0xff] %v29054_v63  ;;  %5238 = vmatprep.mubr.f32.mxu1 %v35926_v43  ;;  %v36046_v10 = vand.u32 4294901760, %v28967_v39 }
 0x2e6   :  { %v29068_v28 = vpop.f32.mrb[38].mxu1 }
 0x2e7   :  { %36032 = vst [vmem:[#allocation167_spill] sm:$0xff] %v29068_v28  ;;  %v29074_v32 = vmax.f32 %v36033_v25, %v29068_v28  ;;  %v29076_v8 = vpop.f32.mrb[39].mxu1  ;;  %5240 = vmatmul.mubr.f32.vlgmr.msra.gmra.mrb[56].mxu1 %v27502_v24  ;;  %v36037_v25 = vand.u32 4294901760, %v28928_v42  ;;  %v36040_v42 = vand.u32 4294901760, %v28952_v13  ;;  %v95_v13 = vld [vmem:[#allocation5 + $0x188] sm:$0xff] }
 0x2e8   :  { %36034 = vst [vmem:[#allocation168_spill] sm:$0xff] %v29076_v8  ;;  %24775 = vmatpush1.bf16.msra.mxu1 %v29060_v35  ;;  %5245 = vmatprep.mubr.f32.mxu1 %v35926_v43 }
 0x2e9   :  { %24777 = vmatprep.subr.bf16.mxu1 %v29066_v44  ;;  %v29104_v31 = vpack.c.bf16 %v36037_v25, %v36036_v5  ;;  %v29118_v5 = vpack.c.bf16 %v36040_v42, %v36039_v41  ;;  %v36042_v25 = vand.u32 4294901760, %v28954_v36  ;;  %v63_v36 = vld [vmem:[#allocation5 + $0x88] sm:$0xff]  ;;  %v62_v41 = vld [vmem:[#allocation5 + $0x80] sm:$0xff] }
 0x2ea   :  { %v94_v42 = vld [vmem:[#allocation5 + $0x180] sm:$0xff] }
 0x2eb   :  { %5247 = vmatmul.mubr.f32.gmra.mrb[58].mxu1 %v27526_v37  ;;  %36038 = vst [vmem:[#allocation170_spill] sm:$0xff] %v29104_v31  ;;  %36041 = vst [vmem:[#allocation171_spill] sm:$0xff] %v29118_v5 }
 0x2ec   :  { %5252 = vmatprep.mubr.f32.mxu1 %v35926_v43  ;;  %24779 = vmatpush1.bf16.msra.mxu1 %v29083_v58  ;;  %v36043_v58 = vand.u32 4294901760, %v28956_v46  ;;  %v5707_v46 = vand.u32 4294901760, %v63_v36 }
 0x2ed   :  { %24781 = vmatprep.subr.bf16.mxu1 %v28924_v1 }
 0x2ee   :  { %v29124_v44 = vpack.c.bf16 %v36043_v58, %v36042_v25  ;;  %v127_v25 = vld [vmem:[#allocation5 + $0x288] sm:$0xff] }
 0x2ef   :  { %5254 = vmatmul.mubr.f32.gmra.mrb[60].mxu1 %v27534_v40 }
 0x2f0   :  { %5259 = vmatprep.mubr.f32.mxu1 %v35926_v43  ;;  %36044 = vst [vmem:[#allocation172_spill] sm:$0xff] %v29124_v44 }
 0x2f3   :  { %5261 = vmatmul.mubr.f32.gmra.mrb[62].mxu1 %v27595_v9 }
 0x2f4   :  { %5347 = vmatprep.mubr.f32.mxu1 %v35926_v43 }
 0x2f7   :  { %5350 = vmatmul.mubr.f32.vlgmr.msra.gmra.mrb[56].mxu1 %v27517_v30 }
 0x2f8   :  { %24783 = vmatpush1.bf16.msra.mxu1 %v28946_v57  ;;  %5355 = vmatprep.mubr.f32.mxu1 %v35926_v43 }
 0x2f9   :  { %24785 = vmatprep.subr.bf16.mxu1 %v28948_v49 }
 0x2fb   :  { %5358 = vmatmul.mubr.f32.gmra.mrb[58].mxu1 %v27548_v45 }
 0x2fc   :  { %5363 = vmatprep.mubr.f32.mxu1 %v35926_v43  ;;  %24787 = vmatpush1.bf16.msra.mxu1 %v28959_v7 }
 0x2fd   :  { %24789 = vmatprep.subr.bf16.mxu1 %v29104_v31  ;;  %v36045_v31 = vand.u32 4294901760, %v28965_v15  ;;  %v5711_v15 = vand.u32 4294901760, %v95_v13 }
 0x2ff   :  { %5366 = vmatmul.mubr.f32.gmra.mrb[60].mxu1 %v27554_v48  ;;  %v29133_v35 = vpack.c.bf16 %v36046_v10, %v36045_v31  ;;  %v29148_v39 = vpack.c.bf16 %v5711_v15, %v5707_v46  ;;  %v29150_v31 = vsub.f32 %v63_v36, %v5707_v46  ;;  %v29152_v58 = vsub.f32 %v95_v13, %v5711_v15  ;;  %v159_v10 = vld [vmem:[#allocation5 + $0x388] sm:$0xff] }
 0x300   :  { %5371 = vmatprep.mubr.f32.mxu1 %v35926_v43  ;;  %v5709_v36 = vand.u32 4294901760, %v62_v41  ;;  %v5713_v13 = vand.u32 4294901760, %v94_v42  ;;  %v5715_v46 = vand.u32 4294901760, %v127_v25  ;;  %v5719_v15 = vand.u32 4294901760, %v159_v10 }
 0x301   :  { %36047 = vst [vmem:[#allocation173_spill] sm:$0xff] %v29133_v35  ;;  %36048 = vst [vmem:[#allocation174_spill] sm:$0xff] %v29148_v39 }
 0x302   :  { %v29170_v28 = vpack.c.bf16 %v5713_v13, %v5709_v36  ;;  %v29172_v34 = vpack.c.bf16 %v5719_v15, %v5715_v46  ;;  %v29174_v12 = vsub.f32 %v62_v41, %v5709_v36  ;;  %v29176_v27 = vsub.f32 %v94_v42, %v5713_v13 }
 0x303   :  { %5374 = vmatmul.mubr.f32.gmra.mrb[62].mxu1 %v27603_v14  ;;  %v29178_v2 = vsub.f32 %v127_v25, %v5715_v46  ;;  %v29180_v52 = vsub.f32 %v159_v10, %v5719_v15 }
 0x304   :  { %5452 = vmatprep.mubr.f32.mxu1 %v35926_v43  ;;  %36049 = vst [vmem:[#allocation175_spill] sm:$0xff] %v29170_v28  ;;  %36050 = vst [vmem:[#allocation176_spill] sm:$0xff] %v29172_v34  ;;  %v35470_v4 = vand.u32 4294901760, %v29174_v12  ;;  %v35467_v41 = vand.u32 4294901760, %v29176_v27 }
 0x305   :  { %v35468_v25 = vand.u32 4294901760, %v29178_v2  ;;  %v35469_v10 = vand.u32 4294901760, %v29180_v52 }
 0x307   :  { %5456 = vmatmul.mubr.f32.vlgmr.msra.gmra.mrb[56].mxu1 %v27529_v38 }
 0x308   :  { %24791 = vmatpush1.bf16.msra.mxu1 %v29118_v5  ;;  %5461 = vmatprep.mubr.f32.mxu1 %v35926_v43  ;;  %v126_v5 = vld [vmem:[#allocation5 + $0x280] sm:$0xff] }
 0x309   :  { %24793 = vmatprep.subr.bf16.mxu1 %v29124_v44  ;;  %v35465_v44 = vand.u32 4294901760, %v29152_v58 }
 0x30b   :  { %5465 = vmatmul.mubr.f32.gmra.mrb[58].mxu1 %v27558_v53 }
 0x30c   :  { %5470 = vmatprep.mubr.f32.mxu1 %v35926_v43  ;;  %24795 = vmatpush1.bf16.msra.mxu1 %v29133_v35  ;;  %v35462_v35 = vand.u32 4294901760, %v29150_v31 }
 0x30d   :  { %24797 = vmatprep.subr.bf16.mxu1 %v28924_v1  ;;  %v5721_v1 = vand.u32 4294901760, %v158_v56 }
 0x30f   :  { %5474 = vmatmul.mubr.f32.gmra.mrb[60].mxu1 %v27563_v55 }
 0x310   :  { %5479 = vmatprep.mubr.f32.mxu1 %v35926_v43 }
 0x313   :  { %5483 = vmatmul.mubr.f32.gmra.mrb[62].mxu1 %v27609_v19 }
 0x314   :  { %5577 = vmatprep.mubr.f32.mxu1 %v35926_v43 }
 0x317   :  { %5579 = vmatmul.mubr.f32.vlgmr.msra.gmra.mrb[56].mxu1 %v27502_v24 }
 0x318   :  { %24799 = vmatpush1.bf16.msra.mxu1 %v28946_v57  ;;  %5584 = vmatprep.mubr.f32.mxu1 %v35926_v43  ;;  %v5717_v57 = vand.u32 4294901760, %v126_v5 }
 0x319   :  { %24801 = vmatprep.subr.bf16.mxu1 %v28948_v49  ;;  %v5839_v49 = vsub.f32 %v29152_v58, %v35465_v44 }
 0x31a   :  { %v29183_v44 = vpack.c.bf16 %v5721_v1, %v5717_v57  ;;  %v29189_v42 = vsub.f32 %v126_v5, %v5717_v57  ;;  %v5833_v57 = vsub.f32 %v29174_v12, %v35470_v4  ;;  %v5863_v5 = vsub.f32 %v29180_v52, %v35469_v10 }
 0x31b   :  { %5586 = vmatmul.mubr.f32.gmra.mrb[58].mxu1 %v27526_v37 }
 0x31c   :  { %5591 = vmatprep.mubr.f32.mxu1 %v35926_v43  ;;  %24803 = vmatpush1.bf16.msra.mxu1 %v28959_v7  ;;  %v5827_v7 = vsub.f32 %v29150_v31, %v35462_v35  ;;  %v5840_v35 = vand.u32 4294901760, %v5839_v49  ;;  %36051 = vst [vmem:[#allocation177_spill] sm:$0xff] %v29183_v44  ;;  %v5834_v36 = vand.u32 4294901760, %v5833_v57 }
 0x31d   :  { %24805 = vmatprep.subr.bf16.mxu1 %v29148_v39 }
 0x31e   :  { %v5828_v0 = vand.u32 4294901760, %v5827_v7  ;;  %v29191_v7 = vsub.f32 %v158_v56, %v5721_v1  ;;  %v5845_v1 = vsub.f32 %v29176_v27, %v35467_v41  ;;  %v35473_v56 = vand.u32 4294901760, %v29189_v42 }
 0x31f   :  { %5593 = vmatmul.mubr.f32.gmra.mrb[60].mxu1 %v27534_v40 }
 0x320   :  { %5598 = vmatprep.mubr.f32.mxu1 %v35926_v43  ;;  %v29194_v49 = vpack.c.bf16 %v5840_v35, %v5828_v0  ;;  %v35472_v0 = vand.u32 4294901760, %v29191_v7  ;;  %v5851_v35 = vsub.f32 %v29178_v2, %v35468_v25  ;;  %v5846_v13 = vand.u32 4294901760, %v5845_v1 }
 0x321   :  { %v5857_v46 = vsub.f32 %v29189_v42, %v35473_v56  ;;  %v5864_v25 = vand.u32 4294901760, %v5863_v5  ;;  %v29290_v56 = vpack.c.bf16 %v29180_v52, %v29178_v2 }
 0x322   :  { %36052 = vst [vmem:[#allocation178_spill] sm:$0xff] %v29194_v49  ;;  %v5869_v15 = vsub.f32 %v29191_v7, %v35472_v0  ;;  %v5852_v41 = vand.u32 4294901760, %v5851_v35  ;;  %v29226_v10 = vpack.c.bf16 %v5846_v13, %v5834_v36  ;;  %v29238_v35 = vpack.c.bf16 %v29152_v58, %v29150_v31 }
 0x323   :  { %5600 = vmatmul.mubr.f32.gmra.mrb[62].mxu1 %v27595_v9  ;;  %v5858_v4 = vand.u32 4294901760, %v5857_v46  ;;  %36067 = vst [vmem:[#allocation190_spill] sm:$0xff] %v29290_v56 }
 0x324   :  { %5678 = vmatprep.mubr.f32.mxu1 %v35926_v43  ;;  %36053 = vst [vmem:[#allocation179_spill] sm:$0xff] %v29226_v10  ;;  %v29228_v57 = vpack.c.bf16 %v5864_v25, %v5852_v41  ;;  %36056 = vst [vmem:[#allocation182_spill] sm:$0xff] %v29238_v35  ;;  %v36058_v41 = vmax.f32 %v29022_v50, %v29024_v62  ;;  %v36061_v50 = vmax.f32 %v29038_v47, %v29040_v61 }
 0x326   :  { %36054 = vst [vmem:[#allocation180_spill] sm:$0xff] %v29228_v57 }
 0x327   :  { %5680 = vmatmul.mubr.f32.vlgmr.msra.gmra.mrb[56].mxu1 %v27502_v24 }
 0x328   :  { %24807 = vmatpush1.bf16.msra.mxu1 %v29170_v28  ;;  %5685 = vmatprep.mubr.f32.mxu1 %v35926_v43 }
 0x329   :  { %24809 = vmatprep.subr.bf16.mxu1 %v29172_v34 }
 0x32b   :  { %5687 = vmatmul.mubr.f32.gmra.mrb[58].mxu1 %v27526_v37 }
 0x32c   :  { %5692 = vmatprep.mubr.f32.mxu1 %v35926_v43  ;;  %24811 = vmatpush1.bf16.msra.mxu1 %v29183_v44 }
 0x32d   :  { %24813 = vmatprep.subr.bf16.mxu1 %v29194_v49  ;;  %v5870_v49 = vand.u32 4294901760, %v5869_v15  ;;  %v29307_v15 = vpack.c.bf16 %v29191_v7, %v29189_v42 }
 0x32f   :  { %5694 = vmatmul.mubr.f32.gmra.mrb[60].mxu1 %v27534_v40  ;;  %v29233_v1 = vpack.c.bf16 %v5870_v49, %v5858_v4  ;;  %v36064_v4 = vmax.f32 %v29052_v18, %v29054_v63  ;;  %36071 = vst [vmem:[#allocation193_spill] sm:$0xff] %v29307_v15 }
 0x330   :  { %5699 = vmatprep.mubr.f32.mxu1 %v35926_v43 }
 0x331   :  { %36055 = vst [vmem:[#allocation181_spill] sm:$0xff] %v29233_v1 }
 0x333   :  { %5701 = vmatmul.mubr.f32.gmra.mrb[62].mxu1 %v27595_v9 }
 0x334   :  { %5779 = vmatprep.mubr.f32.mxu1 %v35926_v43 }
 0x337   :  { %5785 = vmatmul.mubr.f32.vlgmr.msra.gmra.mrb[64].mxu1 %v27560_v54 }
 0x338   :  { %24815 = vmatpush1.bf16.msra.mxu1 %v29226_v10  ;;  %5790 = vmatprep.mubr.f32.mxu1 %v35926_v43  ;;  %v160_v10 = vld [vmem:[#allocation5 + $0x390] sm:$0xff] }
 0x339   :  { %24817 = vmatprep.subr.bf16.mxu1 %v29228_v57 }
 0x33a   :  { %v29240_v5 = vpop.f32.mrb[40].mxu1 }
 0x33b   :  { %36057 = vst [vmem:[#allocation183_spill] sm:$0xff] %v29240_v5  ;;  %v29246_v25 = vmax.f32 %v36058_v41, %v29240_v5  ;;  %v29248_v36 = vpop.f32.mrb[41].mxu1  ;;  %5796 = vmatmul.mubr.f32.gmra.mrb[66].mxu1 %v27586_v3 }
 0x33c   :  { %36059 = vst [vmem:[#allocation184_spill] sm:$0xff] %v29248_v36  ;;  %5801 = vmatprep.mubr.f32.mxu1 %v35926_v43  ;;  %24819 = vmatpush1.bf16.msra.mxu1 %v29233_v1 }
 0x33d   :  { %24821 = vmatprep.subr.bf16.mxu1 %v29238_v35 }
 0x33e   :  { %v29256_v49 = vpop.f32.mrb[42].mxu1 }
 0x33f   :  { %36060 = vst [vmem:[#allocation185_spill] sm:$0xff] %v29256_v49  ;;  %v29262_v13 = vmax.f32 %v36061_v50, %v29256_v49  ;;  %v29264_v46 = vpop.f32.mrb[43].mxu1  ;;  %5807 = vmatmul.mubr.f32.gmra.mrb[68].mxu1 %v27599_v11  ;;  %v29284_v50 = vpack.c.bf16 %v29176_v27, %v29174_v12 }
 0x340   :  { %36062 = vst [vmem:[#allocation186_spill] sm:$0xff] %v29264_v46  ;;  %5812 = vmatprep.mubr.f32.mxu1 %v35926_v43 }
 0x341   :  { %36066 = vst [vmem:[#allocation189_spill] sm:$0xff] %v29284_v50 }
 0x342   :  { %v29270_v41 = vpop.f32.mrb[44].mxu1 }
 0x343   :  { %36063 = vst [vmem:[#allocation187_spill] sm:$0xff] %v29270_v41  ;;  %v29276_v0 = vmax.f32 %v36064_v4, %v29270_v41  ;;  %v29278_v47 = vpop.f32.mrb[45].mxu1  ;;  %5818 = vmatmul.mubr.f32.gmra.mrb[70].mxu1 %v27623_v33  ;;  %v36069_v4 = vmax.f32 %v29074_v32, %v29076_v8  ;;  %v36072_v32 = vand.u32 4294901760, %v29150_v31  ;;  %v36075_v31 = vand.u32 4294901760, %v29174_v12 }
 0x344   :  { %36065 = vst [vmem:[#allocation188_spill] sm:$0xff] %v29278_v47  ;;  %5928 = vmatprep.mubr.f32.mxu1 %v35926_v43  ;;  %v36082_v12 = vand.u32 4294901760, %v29191_v7 }
 0x346   :  { %v29292_v18 = vpop.f32.mrb[46].mxu1 }
 0x347   :  { %36068 = vst [vmem:[#allocation191_spill] sm:$0xff] %v29292_v18  ;;  %v29298_v35 = vmax.f32 %v36069_v4, %v29292_v18  ;;  %v29300_v1 = vpop.f32.mrb[47].mxu1  ;;  %5930 = vmatmul.mubr.f32.vlgmr.msra.gmra.mrb[64].mxu1 %v27502_v24  ;;  %v36073_v4 = vand.u32 4294901760, %v29152_v58  ;;  %v36076_v58 = vand.u32 4294901760, %v29176_v27  ;;  %v97_v27 = vld [vmem:[#allocation5 + $0x198] sm:$0xff] }
 0x348   :  { %36070 = vst [vmem:[#allocation192_spill] sm:$0xff] %v29300_v1  ;;  %24823 = vmatpush1.bf16.msra.mxu1 %v29284_v50  ;;  %5935 = vmatprep.mubr.f32.mxu1 %v35926_v43 }
 0x349   :  { %24825 = vmatprep.subr.bf16.mxu1 %v29290_v56  ;;  %v29328_v57 = vpack.c.bf16 %v36073_v4, %v36072_v32  ;;  %v29342_v32 = vpack.c.bf16 %v36076_v58, %v36075_v31  ;;  %v36078_v4 = vand.u32 4294901760, %v29178_v2  ;;  %v65_v2 = vld [vmem:[#allocation5 + $0x98] sm:$0xff]  ;;  %v64_v31 = vld [vmem:[#allocation5 + $0x90] sm:$0xff] }
 0x34a   :  { %v96_v58 = vld [vmem:[#allocation5 + $0x190] sm:$0xff] }
 0x34b   :  { %5937 = vmatmul.mubr.f32.gmra.mrb[66].mxu1 %v27526_v37  ;;  %36074 = vst [vmem:[#allocation194_spill] sm:$0xff] %v29328_v57  ;;  %36077 = vst [vmem:[#allocation195_spill] sm:$0xff] %v29342_v32 }
 0x34c   :  { %5942 = vmatprep.mubr.f32.mxu1 %v35926_v43  ;;  %24827 = vmatpush1.bf16.msra.mxu1 %v29307_v15  ;;  %v36079_v15 = vand.u32 4294901760, %v29180_v52  ;;  %v6397_v52 = vand.u32 4294901760, %v65_v2 }
 0x34d   :  { %24829 = vmatprep.subr.bf16.mxu1 %v29148_v39 }
 0x34e   :  { %v29348_v56 = vpack.c.bf16 %v36079_v15, %v36078_v4  ;;  %v129_v4 = vld [vmem:[#allocation5 + $0x298] sm:$0xff] }
 0x34f   :  { %5944 = vmatmul.mubr.f32.gmra.mrb[68].mxu1 %v27534_v40 }
 0x350   :  { %5949 = vmatprep.mubr.f32.mxu1 %v35926_v43  ;;  %36080 = vst [vmem:[#allocation196_spill] sm:$0xff] %v29348_v56 }
 0x353   :  { %5951 = vmatmul.mubr.f32.gmra.mrb[70].mxu1 %v27595_v9 }
 0x354   :  { %6037 = vmatprep.mubr.f32.mxu1 %v35926_v43 }
 0x357   :  { %6040 = vmatmul.mubr.f32.vlgmr.msra.gmra.mrb[64].mxu1 %v27517_v30 }
 0x358   :  { %24831 = vmatpush1.bf16.msra.mxu1 %v29170_v28  ;;  %6045 = vmatprep.mubr.f32.mxu1 %v35926_v43 }
 0x359   :  { %24833 = vmatprep.subr.bf16.mxu1 %v29172_v34 }
 0x35b   :  { %6048 = vmatmul.mubr.f32.gmra.mrb[66].mxu1 %v27548_v45 }
 0x35c   :  { %6053 = vmatprep.mubr.f32.mxu1 %v35926_v43  ;;  %24835 = vmatpush1.bf16.msra.mxu1 %v29183_v44 }
 0x35d   :  { %24837 = vmatprep.subr.bf16.mxu1 %v29328_v57  ;;  %v36081_v57 = vand.u32 4294901760, %v29189_v42  ;;  %v6401_v42 = vand.u32 4294901760, %v97_v27 }
 0x35f   :  { %6056 = vmatmul.mubr.f32.gmra.mrb[68].mxu1 %v27554_v48  ;;  %v29357_v50 = vpack.c.bf16 %v36082_v12, %v36081_v57  ;;  %v29372_v7 = vpack.c.bf16 %v6401_v42, %v6397_v52  ;;  %v29374_v57 = vsub.f32 %v65_v2, %v6397_v52  ;;  %v29376_v15 = vsub.f32 %v97_v27, %v6401_v42  ;;  %v161_v12 = vld [vmem:[#allocation5 + $0x398] sm:$0xff] }
 0x360   :  { %6061 = vmatprep.mubr.f32.mxu1 %v35926_v43  ;;  %v6399_v2 = vand.u32 4294901760, %v64_v31  ;;  %v6403_v27 = vand.u32 4294901760, %v96_v58  ;;  %v6405_v52 = vand.u32 4294901760, %v129_v4  ;;  %v6409_v42 = vand.u32 4294901760, %v161_v12 }
 0x361   :  { %36083 = vst [vmem:[#allocation197_spill] sm:$0xff] %v29357_v50  ;;  %36084 = vst [vmem:[#allocation198_spill] sm:$0xff] %v29372_v7 }
 0x362   :  { %v29394_v18 = vpack.c.bf16 %v6403_v27, %v6399_v2  ;;  %v29396_v8 = vpack.c.bf16 %v6409_v42, %v6405_v52  ;;  %v29398_v41 = vsub.f32 %v64_v31, %v6399_v2  ;;  %v29400_v63 = vsub.f32 %v96_v58, %v6403_v27 }
 0x363   :  { %6064 = vmatmul.mubr.f32.gmra.mrb[70].mxu1 %v27603_v14  ;;  %v29402_v61 = vsub.f32 %v129_v4, %v6405_v52  ;;  %v29404_v5 = vsub.f32 %v161_v12, %v6409_v42 }
 0x364   :  { %6142 = vmatprep.mubr.f32.mxu1 %v35926_v43  ;;  %36085 = vst [vmem:[#allocation199_spill] sm:$0xff] %v29394_v18  ;;  %36086 = vst [vmem:[#allocation200_spill] sm:$0xff] %v29396_v8  ;;  %v35507_v62 = vand.u32 4294901760, %v29398_v41  ;;  %v35504_v31 = vand.u32 4294901760, %v29400_v63 }
 0x365   :  { %v35505_v4 = vand.u32 4294901760, %v29402_v61  ;;  %v35506_v12 = vand.u32 4294901760, %v29404_v5 }
 0x367   :  { %6146 = vmatmul.mubr.f32.vlgmr.msra.gmra.mrb[64].mxu1 %v27529_v38 }
 0x368   :  { %24839 = vmatpush1.bf16.msra.mxu1 %v29342_v32  ;;  %6151 = vmatprep.mubr.f32.mxu1 %v35926_v43  ;;  %v128_v32 = vld [vmem:[#allocation5 + $0x290] sm:$0xff] }
 0x369   :  { %24841 = vmatprep.subr.bf16.mxu1 %v29348_v56  ;;  %v35502_v56 = vand.u32 4294901760, %v29376_v15 }
 0x36b   :  { %6155 = vmatmul.mubr.f32.gmra.mrb[66].mxu1 %v27558_v53 }
 0x36c   :  { %6160 = vmatprep.mubr.f32.mxu1 %v35926_v43  ;;  %24843 = vmatpush1.bf16.msra.mxu1 %v29357_v50  ;;  %v35498_v50 = vand.u32 4294901760, %v29374_v57 }
 0x36d   :  { %24845 = vmatprep.subr.bf16.mxu1 %v29148_v39  ;;  %v6411_v39 = vand.u32 4294901760, %v160_v10 }
 0x36f   :  { %6164 = vmatmul.mubr.f32.gmra.mrb[68].mxu1 %v27563_v55 }
 0x370   :  { %6169 = vmatprep.mubr.f32.mxu1 %v35926_v43 }
 0x373   :  { %6173 = vmatmul.mubr.f32.gmra.mrb[70].mxu1 %v27609_v19 }
 0x374   :  { %6267 = vmatprep.mubr.f32.mxu1 %v35926_v43 }
 0x377   :  { %6269 = vmatmul.mubr.f32.vlgmr.msra.gmra.mrb[64].mxu1 %v27502_v24 }
 0x378   :  { %24847 = vmatpush1.bf16.msra.mxu1 %v29170_v28  ;;  %6274 = vmatprep.mubr.f32.mxu1 %v35926_v43  ;;  %v6407_v28 = vand.u32 4294901760, %v128_v32 }
 0x379   :  { %24849 = vmatprep.subr.bf16.mxu1 %v29172_v34  ;;  %v6529_v34 = vsub.f32 %v29376_v15, %v35502_v56 }
 0x37a   :  { %v29407_v56 = vpack.c.bf16 %v6411_v39, %v6407_v28  ;;  %v29413_v58 = vsub.f32 %v128_v32, %v6407_v28  ;;  %v6523_v28 = vsub.f32 %v29398_v41, %v35507_v62  ;;  %v6553_v32 = vsub.f32 %v29404_v5, %v35506_v12 }
 0x37b   :  { %6276 = vmatmul.mubr.f32.gmra.mrb[66].mxu1 %v27526_v37 }
 0x37c   :  { %6281 = vmatprep.mubr.f32.mxu1 %v35926_v43  ;;  %24851 = vmatpush1.bf16.msra.mxu1 %v29183_v44  ;;  %v6517_v44 = vsub.f32 %v29374_v57, %v35498_v50  ;;  %v6530_v50 = vand.u32 4294901760, %v6529_v34  ;;  %36087 = vst [vmem:[#allocation201_spill] sm:$0xff] %v29407_v56  ;;  %v6524_v2 = vand.u32 4294901760, %v6523_v28 }
 0x37d   :  { %24853 = vmatprep.subr.bf16.mxu1 %v29372_v7 }
 0x37e   :  { %v6518_v49 = vand.u32 4294901760, %v6517_v44  ;;  %v29415_v44 = vsub.f32 %v160_v10, %v6411_v39  ;;  %v6535_v39 = vsub.f32 %v29400_v63, %v35504_v31  ;;  %v35510_v10 = vand.u32 4294901760, %v29413_v58 }
 0x37f   :  { %6283 = vmatmul.mubr.f32.gmra.mrb[68].mxu1 %v27534_v40 }
 0x380   :  { %6288 = vmatprep.mubr.f32.mxu1 %v35926_v43  ;;  %v29418_v34 = vpack.c.bf16 %v6530_v50, %v6518_v49  ;;  %v35509_v49 = vand.u32 4294901760, %v29415_v44  ;;  %v6541_v50 = vsub.f32 %v29402_v61, %v35505_v4  ;;  %v6536_v27 = vand.u32 4294901760, %v6535_v39 }
 0x381   :  { %v6547_v52 = vsub.f32 %v29413_v58, %v35510_v10  ;;  %v6554_v4 = vand.u32 4294901760, %v6553_v32  ;;  %v29514_v10 = vpack.c.bf16 %v29404_v5, %v29402_v61 }
 0x382   :  { %36088 = vst [vmem:[#allocation202_spill] sm:$0xff] %v29418_v34  ;;  %v6559_v42 = vsub.f32 %v29415_v44, %v35509_v49  ;;  %v6542_v31 = vand.u32 4294901760, %v6541_v50  ;;  %v29450_v12 = vpack.c.bf16 %v6536_v27, %v6524_v2  ;;  %v29462_v50 = vpack.c.bf16 %v29376_v15, %v29374_v57 }
 0x383   :  { %6290 = vmatmul.mubr.f32.gmra.mrb[70].mxu1 %v27595_v9  ;;  %v6548_v62 = vand.u32 4294901760, %v6547_v52  ;;  %36103 = vst [vmem:[#allocation214_spill] sm:$0xff] %v29514_v10 }
 0x384   :  { %6368 = vmatprep.mubr.f32.mxu1 %v35926_v43  ;;  %36089 = vst [vmem:[#allocation203_spill] sm:$0xff] %v29450_v12  ;;  %v29452_v28 = vpack.c.bf16 %v6554_v4, %v6542_v31  ;;  %36092 = vst [vmem:[#allocation206_spill] sm:$0xff] %v29462_v50  ;;  %v36094_v31 = vmax.f32 %v29246_v25, %v29248_v36  ;;  %v36097_v25 = vmax.f32 %v29262_v13, %v29264_v46 }
 0x386   :  { %36090 = vst [vmem:[#allocation204_spill] sm:$0xff] %v29452_v28 }
 0x387   :  { %6370 = vmatmul.mubr.f32.vlgmr.msra.gmra.mrb[64].mxu1 %v27502_v24 }
 0x388   :  { %24855 = vmatpush1.bf16.msra.mxu1 %v29394_v18  ;;  %6375 = vmatprep.mubr.f32.mxu1 %v35926_v43 }
 0x389   :  { %24857 = vmatprep.subr.bf16.mxu1 %v29396_v8 }
 0x38b   :  { %6377 = vmatmul.mubr.f32.gmra.mrb[66].mxu1 %v27526_v37 }
 0x38c   :  { %6382 = vmatprep.mubr.f32.mxu1 %v35926_v43  ;;  %24859 = vmatpush1.bf16.msra.mxu1 %v29407_v56 }
 0x38d   :  { %24861 = vmatprep.subr.bf16.mxu1 %v29418_v34  ;;  %v6560_v34 = vand.u32 4294901760, %v6559_v42  ;;  %v29531_v42 = vpack.c.bf16 %v29415_v44, %v29413_v58 }
 0x38f   :  { %6384 = vmatmul.mubr.f32.gmra.mrb[68].mxu1 %v27534_v40  ;;  %v29457_v39 = vpack.c.bf16 %v6560_v34, %v6548_v62  ;;  %v36100_v62 = vmax.f32 %v29276_v0, %v29278_v47  ;;  %36107 = vst [vmem:[#allocation217_spill] sm:$0xff] %v29531_v42 }
 0x390   :  { %6389 = vmatprep.mubr.f32.mxu1 %v35926_v43 }
 0x391   :  { %36091 = vst [vmem:[#allocation205_spill] sm:$0xff] %v29457_v39 }
 0x393   :  { %6391 = vmatmul.mubr.f32.gmra.mrb[70].mxu1 %v27595_v9 }
 0x394   :  { %6469 = vmatprep.mubr.f32.mxu1 %v35926_v43 }
 0x397   :  { %6475 = vmatmul.mubr.f32.vlgmr.msra.gmra.mrb[72].mxu1 %v27560_v54 }
 0x398   :  { %24863 = vmatpush1.bf16.msra.mxu1 %v29450_v12  ;;  %6480 = vmatprep.mubr.f32.mxu1 %v35926_v43  ;;  %v162_v12 = vld [vmem:[#allocation5 + $0x3a0] sm:$0xff] }
 0x399   :  { %24865 = vmatprep.subr.bf16.mxu1 %v29452_v28 }
 0x39a   :  { %v29464_v32 = vpop.f32.mrb[48].mxu1 }
 0x39b   :  { %36093 = vst [vmem:[#allocation207_spill] sm:$0xff] %v29464_v32  ;;  %v29470_v4 = vmax.f32 %v36094_v31, %v29464_v32  ;;  %v29472_v2 = vpop.f32.mrb[49].mxu1  ;;  %6486 = vmatmul.mubr.f32.gmra.mrb[74].mxu1 %v27586_v3 }
 0x39c   :  { %36095 = vst [vmem:[#allocation208_spill] sm:$0xff] %v29472_v2  ;;  %6491 = vmatprep.mubr.f32.mxu1 %v35926_v43  ;;  %24867 = vmatpush1.bf16.msra.mxu1 %v29457_v39 }
 0x39d   :  { %24869 = vmatprep.subr.bf16.mxu1 %v29462_v50 }
 0x39e   :  { %v29480_v34 = vpop.f32.mrb[50].mxu1 }
 0x39f   :  { %36096 = vst [vmem:[#allocation209_spill] sm:$0xff] %v29480_v34  ;;  %v29486_v27 = vmax.f32 %v36097_v25, %v29480_v34  ;;  %v29488_v52 = vpop.f32.mrb[51].mxu1  ;;  %6497 = vmatmul.mubr.f32.gmra.mrb[76].mxu1 %v27599_v11  ;;  %v29508_v25 = vpack.c.bf16 %v29400_v63, %v29398_v41 }
 0x3a0   :  { %36098 = vst [vmem:[#allocation210_spill] sm:$0xff] %v29488_v52  ;;  %6502 = vmatprep.mubr.f32.mxu1 %v35926_v43 }
 0x3a1   :  { %36102 = vst [vmem:[#allocation213_spill] sm:$0xff] %v29508_v25 }
 0x3a2   :  { %v29494_v31 = vpop.f32.mrb[52].mxu1 }
 0x3a3   :  { %36099 = vst [vmem:[#allocation211_spill] sm:$0xff] %v29494_v31  ;;  %v29500_v49 = vmax.f32 %v36100_v62, %v29494_v31  ;;  %v29502_v13 = vpop.f32.mrb[53].mxu1  ;;  %6508 = vmatmul.mubr.f32.gmra.mrb[78].mxu1 %v27623_v33  ;;  %v36105_v62 = vmax.f32 %v29298_v35, %v29300_v1  ;;  %v36108_v35 = vand.u32 4294901760, %v29374_v57  ;;  %v36111_v57 = vand.u32 4294901760, %v29398_v41 }
 0x3a4   :  { %36101 = vst [vmem:[#allocation212_spill] sm:$0xff] %v29502_v13  ;;  %6618 = vmatprep.mubr.f32.mxu1 %v35926_v43  ;;  %v36118_v41 = vand.u32 4294901760, %v29415_v44 }
 0x3a6   :  { %v29516_v0 = vpop.f32.mrb[54].mxu1 }
 0x3a7   :  { %36104 = vst [vmem:[#allocation215_spill] sm:$0xff] %v29516_v0  ;;  %v29522_v50 = vmax.f32 %v36105_v62, %v29516_v0  ;;  %v29524_v39 = vpop.f32.mrb[55].mxu1  ;;  %6620 = vmatmul.mubr.f32.vlgmr.msra.gmra.mrb[72].mxu1 %v27502_v24  ;;  %v36109_v62 = vand.u32 4294901760, %v29376_v15  ;;  %v36112_v15 = vand.u32 4294901760, %v29400_v63  ;;  %v99_v63 = vld [vmem:[#allocation5 + $0x1a8] sm:$0xff] }
 0x3a8   :  { %36106 = vst [vmem:[#allocation216_spill] sm:$0xff] %v29524_v39  ;;  %24871 = vmatpush1.bf16.msra.mxu1 %v29508_v25  ;;  %6625 = vmatprep.mubr.f32.mxu1 %v35926_v43 }
 0x3a9   :  { %24873 = vmatprep.subr.bf16.mxu1 %v29514_v10  ;;  %v29552_v28 = vpack.c.bf16 %v36109_v62, %v36108_v35  ;;  %v29566_v35 = vpack.c.bf16 %v36112_v15, %v36111_v57  ;;  %v36114_v62 = vand.u32 4294901760, %v29402_v61  ;;  %v67_v61 = vld [vmem:[#allocation5 + $0xa8] sm:$0xff]  ;;  %v66_v57 = vld [vmem:[#allocation5 + $0xa0] sm:$0xff] }
 0x3aa   :  { %v98_v15 = vld [vmem:[#allocation5 + $0x1a0] sm:$0xff] }
 0x3ab   :  { %6627 = vmatmul.mubr.f32.gmra.mrb[74].mxu1 %v27526_v37  ;;  %36110 = vst [vmem:[#allocation218_spill] sm:$0xff] %v29552_v28  ;;  %36113 = vst [vmem:[#allocation219_spill] sm:$0xff] %v29566_v35 }
 0x3ac   :  { %6632 = vmatprep.mubr.f32.mxu1 %v35926_v43  ;;  %24875 = vmatpush1.bf16.msra.mxu1 %v29531_v42  ;;  %v36115_v42 = vand.u32 4294901760, %v29404_v5  ;;  %v7087_v5 = vand.u32 4294901760, %v67_v61 }
 0x3ad   :  { %24877 = vmatprep.subr.bf16.mxu1 %v29372_v7 }
 0x3ae   :  { %v29572_v10 = vpack.c.bf16 %v36115_v42, %v36114_v62  ;;  %v131_v62 = vld [vmem:[#allocation5 + $0x2a8] sm:$0xff] }
 0x3af   :  { %6634 = vmatmul.mubr.f32.gmra.mrb[76].mxu1 %v27534_v40 }
 0x3b0   :  { %6639 = vmatprep.mubr.f32.mxu1 %v35926_v43  ;;  %36116 = vst [vmem:[#allocation220_spill] sm:$0xff] %v29572_v10 }
 0x3b3   :  { %6641 = vmatmul.mubr.f32.gmra.mrb[78].mxu1 %v27595_v9 }
 0x3b4   :  { %6727 = vmatprep.mubr.f32.mxu1 %v35926_v43 }
 0x3b7   :  { %6730 = vmatmul.mubr.f32.vlgmr.msra.gmra.mrb[72].mxu1 %v27517_v30 }
 0x3b8   :  { %24879 = vmatpush1.bf16.msra.mxu1 %v29394_v18  ;;  %6735 = vmatprep.mubr.f32.mxu1 %v35926_v43 }
 0x3b9   :  { %24881 = vmatprep.subr.bf16.mxu1 %v29396_v8 }
 0x3bb   :  { %6738 = vmatmul.mubr.f32.gmra.mrb[74].mxu1 %v27548_v45 }
 0x3bc   :  { %6743 = vmatprep.mubr.f32.mxu1 %v35926_v43  ;;  %24883 = vmatpush1.bf16.msra.mxu1 %v29407_v56 }
 0x3bd   :  { %24885 = vmatprep.subr.bf16.mxu1 %v29552_v28  ;;  %v36117_v28 = vand.u32 4294901760, %v29413_v58  ;;  %v7091_v58 = vand.u32 4294901760, %v99_v63 }
 0x3bf   :  { %6746 = vmatmul.mubr.f32.gmra.mrb[76].mxu1 %v27554_v48  ;;  %v29581_v25 = vpack.c.bf16 %v36118_v41, %v36117_v28  ;;  %v29596_v44 = vpack.c.bf16 %v7091_v58, %v7087_v5  ;;  %v29598_v28 = vsub.f32 %v67_v61, %v7087_v5  ;;  %v29600_v42 = vsub.f32 %v99_v63, %v7091_v58  ;;  %v163_v41 = vld [vmem:[#allocation5 + $0x3a8] sm:$0xff] }
 0x3c0   :  { %6751 = vmatprep.mubr.f32.mxu1 %v35926_v43  ;;  %v7089_v61 = vand.u32 4294901760, %v66_v57  ;;  %v7093_v63 = vand.u32 4294901760, %v98_v15  ;;  %v7095_v5 = vand.u32 4294901760, %v131_v62  ;;  %v7099_v58 = vand.u32 4294901760, %v163_v41 }
 0x3c1   :  { %36119 = vst [vmem:[#allocation221_spill] sm:$0xff] %v29581_v25  ;;  %36120 = vst [vmem:[#allocation222_spill] sm:$0xff] %v29596_v44 }
 0x3c2   :  { %v29618_v0 = vpack.c.bf16 %v7093_v63, %v7089_v61  ;;  %v29620_v1 = vpack.c.bf16 %v7099_v58, %v7095_v5  ;;  %v29622_v31 = vsub.f32 %v66_v57, %v7089_v61  ;;  %v29624_v47 = vsub.f32 %v98_v15, %v7093_v63 }
 0x3c3   :  { %6754 = vmatmul.mubr.f32.gmra.mrb[78].mxu1 %v27603_v14  ;;  %v29626_v46 = vsub.f32 %v131_v62, %v7095_v5  ;;  %v29628_v32 = vsub.f32 %v163_v41, %v7099_v58 }
 0x3c4   :  { %6832 = vmatprep.mubr.f32.mxu1 %v35926_v43  ;;  %36121 = vst [vmem:[#allocation223_spill] sm:$0xff] %v29618_v0  ;;  %36122 = vst [vmem:[#allocation224_spill] sm:$0xff] %v29620_v1  ;;  %v35545_v36 = vand.u32 4294901760, %v29622_v31  ;;  %v35542_v57 = vand.u32 4294901760, %v29624_v47 }
 0x3c5   :  { %v35543_v62 = vand.u32 4294901760, %v29626_v46  ;;  %v35544_v41 = vand.u32 4294901760, %v29628_v32 }
 0x3c7   :  { %6836 = vmatmul.mubr.f32.vlgmr.msra.gmra.mrb[72].mxu1 %v27529_v38 }
 0x3c8   :  { %24887 = vmatpush1.bf16.msra.mxu1 %v29566_v35  ;;  %6841 = vmatprep.mubr.f32.mxu1 %v35926_v43  ;;  %v130_v35 = vld [vmem:[#allocation5 + $0x2a0] sm:$0xff] }
 0x3c9   :  { %24889 = vmatprep.subr.bf16.mxu1 %v29572_v10  ;;  %v35539_v10 = vand.u32 4294901760, %v29600_v42 }
 0x3cb   :  { %6845 = vmatmul.mubr.f32.gmra.mrb[74].mxu1 %v27558_v53 }
 0x3cc   :  { %6850 = vmatprep.mubr.f32.mxu1 %v35926_v43  ;;  %24891 = vmatpush1.bf16.msra.mxu1 %v29581_v25  ;;  %v35535_v25 = vand.u32 4294901760, %v29598_v28 }
 0x3cd   :  { %24893 = vmatprep.subr.bf16.mxu1 %v29372_v7  ;;  %v7101_v7 = vand.u32 4294901760, %v162_v12 }
 0x3cf   :  { %6854 = vmatmul.mubr.f32.gmra.mrb[76].mxu1 %v27563_v55 }
 0x3d0   :  { %6859 = vmatprep.mubr.f32.mxu1 %v35926_v43 }
 0x3d3   :  { %6863 = vmatmul.mubr.f32.gmra.mrb[78].mxu1 %v27609_v19 }
 0x3d4   :  { %6957 = vmatprep.mubr.f32.mxu1 %v35926_v43 }
 0x3d7   :  { %6959 = vmatmul.mubr.f32.vlgmr.msra.gmra.mrb[72].mxu1 %v27502_v24 }
 0x3d8   :  { %24895 = vmatpush1.bf16.msra.mxu1 %v29394_v18  ;;  %6964 = vmatprep.mubr.f32.mxu1 %v35926_v43  ;;  %v7097_v18 = vand.u32 4294901760, %v130_v35 }
 0x3d9   :  { %24897 = vmatprep.subr.bf16.mxu1 %v29396_v8  ;;  %v7219_v8 = vsub.f32 %v29600_v42, %v35539_v10 }
 0x3da   :  { %v29631_v10 = vpack.c.bf16 %v7101_v7, %v7097_v18  ;;  %v29637_v15 = vsub.f32 %v130_v35, %v7097_v18  ;;  %v7213_v18 = vsub.f32 %v29622_v31, %v35545_v36  ;;  %v7243_v35 = vsub.f32 %v29628_v32, %v35544_v41 }
 0x3db   :  { %6966 = vmatmul.mubr.f32.gmra.mrb[74].mxu1 %v27526_v37 }
 0x3dc   :  { %6971 = vmatprep.mubr.f32.mxu1 %v35926_v43  ;;  %24899 = vmatpush1.bf16.msra.mxu1 %v29407_v56  ;;  %v7207_v56 = vsub.f32 %v29598_v28, %v35535_v25  ;;  %v7220_v25 = vand.u32 4294901760, %v7219_v8  ;;  %36123 = vst [vmem:[#allocation225_spill] sm:$0xff] %v29631_v10  ;;  %v7214_v61 = vand.u32 4294901760, %v7213_v18 }
 0x3dd   :  { %24901 = vmatprep.subr.bf16.mxu1 %v29596_v44 }
 0x3de   :  { %v7208_v34 = vand.u32 4294901760, %v7207_v56  ;;  %v29639_v56 = vsub.f32 %v162_v12, %v7101_v7  ;;  %v7225_v7 = vsub.f32 %v29624_v47, %v35542_v57  ;;  %v35548_v12 = vand.u32 4294901760, %v29637_v15 }
 0x3df   :  { %6973 = vmatmul.mubr.f32.gmra.mrb[76].mxu1 %v27534_v40 }
 0x3e0   :  { %6978 = vmatprep.mubr.f32.mxu1 %v35926_v43  ;;  %v29642_v8 = vpack.c.bf16 %v7220_v25, %v7208_v34  ;;  %v35547_v34 = vand.u32 4294901760, %v29639_v56  ;;  %v7231_v25 = vsub.f32 %v29626_v46, %v35543_v62  ;;  %v7226_v63 = vand.u32 4294901760, %v7225_v7 }
 0x3e1   :  { %v7237_v5 = vsub.f32 %v29637_v15, %v35548_v12  ;;  %v7244_v62 = vand.u32 4294901760, %v7243_v35  ;;  %v29738_v12 = vpack.c.bf16 %v29628_v32, %v29626_v46 }
 0x3e2   :  { %36124 = vst [vmem:[#allocation226_spill] sm:$0xff] %v29642_v8  ;;  %v7249_v58 = vsub.f32 %v29639_v56, %v35547_v34  ;;  %v7232_v57 = vand.u32 4294901760, %v7231_v25  ;;  %v29674_v41 = vpack.c.bf16 %v7226_v63, %v7214_v61  ;;  %v29686_v25 = vpack.c.bf16 %v29600_v42, %v29598_v28 }
 0x3e3   :  { %6980 = vmatmul.mubr.f32.gmra.mrb[78].mxu1 %v27595_v9  ;;  %v7238_v36 = vand.u32 4294901760, %v7237_v5  ;;  %36139 = vst [vmem:[#allocation238_spill] sm:$0xff] %v29738_v12 }
 0x3e4   :  { %7058 = vmatprep.mubr.f32.mxu1 %v35926_v43  ;;  %36125 = vst [vmem:[#allocation227_spill] sm:$0xff] %v29674_v41  ;;  %v29676_v18 = vpack.c.bf16 %v7244_v62, %v7232_v57  ;;  %36128 = vst [vmem:[#allocation230_spill] sm:$0xff] %v29686_v25  ;;  %v36130_v57 = vmax.f32 %v29470_v4, %v29472_v2  ;;  %v36133_v4 = vmax.f32 %v29486_v27, %v29488_v52 }
 0x3e6   :  { %36126 = vst [vmem:[#allocation228_spill] sm:$0xff] %v29676_v18 }
 0x3e7   :  { %7060 = vmatmul.mubr.f32.vlgmr.msra.gmra.mrb[72].mxu1 %v27502_v24 }
 0x3e8   :  { %24903 = vmatpush1.bf16.msra.mxu1 %v29618_v0  ;;  %7065 = vmatprep.mubr.f32.mxu1 %v35926_v43 }
 0x3e9   :  { %24905 = vmatprep.subr.bf16.mxu1 %v29620_v1 }
 0x3eb   :  { %7067 = vmatmul.mubr.f32.gmra.mrb[74].mxu1 %v27526_v37 }
 0x3ec   :  { %7072 = vmatprep.mubr.f32.mxu1 %v35926_v43  ;;  %24907 = vmatpush1.bf16.msra.mxu1 %v29631_v10 }
 0x3ed   :  { %24909 = vmatprep.subr.bf16.mxu1 %v29642_v8  ;;  %v7250_v8 = vand.u32 4294901760, %v7249_v58  ;;  %v29755_v58 = vpack.c.bf16 %v29639_v56, %v29637_v15 }
 0x3ef   :  { %7074 = vmatmul.mubr.f32.gmra.mrb[76].mxu1 %v27534_v40  ;;  %v29681_v7 = vpack.c.bf16 %v7250_v8, %v7238_v36  ;;  %v36136_v36 = vmax.f32 %v29500_v49, %v29502_v13  ;;  %36143 = vst [vmem:[#allocation241_spill] sm:$0xff] %v29755_v58 }
 0x3f0   :  { %7079 = vmatprep.mubr.f32.mxu1 %v35926_v43 }
 0x3f1   :  { %36127 = vst [vmem:[#allocation229_spill] sm:$0xff] %v29681_v7 }
 0x3f3   :  { %7081 = vmatmul.mubr.f32.gmra.mrb[78].mxu1 %v27595_v9 }
 0x3f4   :  { %7159 = vmatprep.mubr.f32.mxu1 %v35926_v43 }
 0x3f7   :  { %7165 = vmatmul.mubr.f32.vlgmr.msra.gmra.mrb[80].mxu1 %v27560_v54 }
 0x3f8   :  { %24911 = vmatpush1.bf16.msra.mxu1 %v29674_v41  ;;  %7170 = vmatprep.mubr.f32.mxu1 %v35926_v43  ;;  %v164_v41 = vld [vmem:[#allocation5 + $0x3b0] sm:$0xff] }
 0x3f9   :  { %24913 = vmatprep.subr.bf16.mxu1 %v29676_v18 }
 0x3fa   :  { %v29688_v35 = vpop.f32.mrb[56].mxu1 }
 0x3fb   :  { %36129 = vst [vmem:[#allocation231_spill] sm:$0xff] %v29688_v35  ;;  %v29694_v62 = vmax.f32 %v36130_v57, %v29688_v35  ;;  %v29696_v61 = vpop.f32.mrb[57].mxu1  ;;  %7176 = vmatmul.mubr.f32.gmra.mrb[82].mxu1 %v27586_v3 }
 0x3fc   :  { %36131 = vst [vmem:[#allocation232_spill] sm:$0xff] %v29696_v61  ;;  %7181 = vmatprep.mubr.f32.mxu1 %v35926_v43  ;;  %24915 = vmatpush1.bf16.msra.mxu1 %v29681_v7 }
 0x3fd   :  { %24917 = vmatprep.subr.bf16.mxu1 %v29686_v25 }
 0x3fe   :  { %v29704_v8 = vpop.f32.mrb[58].mxu1 }
 0x3ff   :  { %36132 = vst [vmem:[#allocation233_spill] sm:$0xff] %v29704_v8  ;;  %v29710_v63 = vmax.f32 %v36133_v4, %v29704_v8  ;;  %v29712_v5 = vpop.f32.mrb[59].mxu1  ;;  %7187 = vmatmul.mubr.f32.gmra.mrb[84].mxu1 %v27599_v11  ;;  %v29732_v4 = vpack.c.bf16 %v29624_v47, %v29622_v31 }
 0x400   :  { %36134 = vst [vmem:[#allocation234_spill] sm:$0xff] %v29712_v5  ;;  %7192 = vmatprep.mubr.f32.mxu1 %v35926_v43 }
 0x401   :  { %36138 = vst [vmem:[#allocation237_spill] sm:$0xff] %v29732_v4 }
 0x402   :  { %v29718_v57 = vpop.f32.mrb[60].mxu1 }
 0x403   :  { %36135 = vst [vmem:[#allocation235_spill] sm:$0xff] %v29718_v57  ;;  %v29724_v34 = vmax.f32 %v36136_v36, %v29718_v57  ;;  %v29726_v27 = vpop.f32.mrb[61].mxu1  ;;  %7198 = vmatmul.mubr.f32.gmra.mrb[86].mxu1 %v27623_v33  ;;  %v36141_v36 = vmax.f32 %v29522_v50, %v29524_v39  ;;  %v36144_v50 = vand.u32 4294901760, %v29598_v28  ;;  %v36147_v28 = vand.u32 4294901760, %v29622_v31 }
 0x404   :  { %36137 = vst [vmem:[#allocation236_spill] sm:$0xff] %v29726_v27  ;;  %7308 = vmatprep.mubr.f32.mxu1 %v35926_v43  ;;  %v36154_v31 = vand.u32 4294901760, %v29639_v56 }
 0x406   :  { %v29740_v49 = vpop.f32.mrb[62].mxu1 }
 0x407   :  { %36140 = vst [vmem:[#allocation239_spill] sm:$0xff] %v29740_v49  ;;  %v29746_v25 = vmax.f32 %v36141_v36, %v29740_v49  ;;  %v29748_v7 = vpop.f32.mrb[63].mxu1  ;;  %7310 = vmatmul.mubr.f32.vlgmr.msra.gmra.mrb[80].mxu1 %v27502_v24  ;;  %v36145_v36 = vand.u32 4294901760, %v29600_v42  ;;  %v36148_v42 = vand.u32 4294901760, %v29624_v47  ;;  %v101_v47 = vld [vmem:[#allocation5 + $0x1b8] sm:$0xff] }
 0x408   :  { %36142 = vst [vmem:[#allocation240_spill] sm:$0xff] %v29748_v7  ;;  %24919 = vmatpush1.bf16.msra.mxu1 %v29732_v4  ;;  %7315 = vmatprep.mubr.f32.mxu1 %v35926_v43 }
 0x409   :  { %24921 = vmatprep.subr.bf16.mxu1 %v29738_v12  ;;  %v29776_v18 = vpack.c.bf16 %v36145_v36, %v36144_v50  ;;  %v29790_v50 = vpack.c.bf16 %v36148_v42, %v36147_v28  ;;  %v36150_v36 = vand.u32 4294901760, %v29626_v46  ;;  %v69_v46 = vld [vmem:[#allocation5 + $0xb8] sm:$0xff]  ;;  %v68_v28 = vld [vmem:[#allocation5 + $0xb0] sm:$0xff] }
 0x40a   :  { %v100_v42 = vld [vmem:[#allocation5 + $0x1b0] sm:$0xff] }
 0x40b   :  { %7317 = vmatmul.mubr.f32.gmra.mrb[82].mxu1 %v27526_v37  ;;  %36146 = vst [vmem:[#allocation242_spill] sm:$0xff] %v29776_v18  ;;  %36149 = vst [vmem:[#allocation243_spill] sm:$0xff] %v29790_v50 }
 0x40c   :  { %7322 = vmatprep.mubr.f32.mxu1 %v35926_v43  ;;  %24923 = vmatpush1.bf16.msra.mxu1 %v29755_v58  ;;  %v36151_v58 = vand.u32 4294901760, %v29628_v32  ;;  %v7777_v32 = vand.u32 4294901760, %v69_v46 }
 0x40d   :  { %24925 = vmatprep.subr.bf16.mxu1 %v29596_v44 }
 0x40e   :  { %v29796_v12 = vpack.c.bf16 %v36151_v58, %v36150_v36  ;;  %v133_v36 = vld [vmem:[#allocation5 + $0x2b8] sm:$0xff] }
 0x40f   :  { %7324 = vmatmul.mubr.f32.gmra.mrb[84].mxu1 %v27534_v40 }
 0x410   :  { %7329 = vmatprep.mubr.f32.mxu1 %v35926_v43  ;;  %36152 = vst [vmem:[#allocation244_spill] sm:$0xff] %v29796_v12 }
 0x413   :  { %7331 = vmatmul.mubr.f32.gmra.mrb[86].mxu1 %v27595_v9 }
 0x414   :  { %7417 = vmatprep.mubr.f32.mxu1 %v35926_v43 }
 0x417   :  { %7420 = vmatmul.mubr.f32.vlgmr.msra.gmra.mrb[80].mxu1 %v27517_v30 }
 0x418   :  { %24927 = vmatpush1.bf16.msra.mxu1 %v29618_v0  ;;  %7425 = vmatprep.mubr.f32.mxu1 %v35926_v43 }
 0x419   :  { %24929 = vmatprep.subr.bf16.mxu1 %v29620_v1 }
 0x41b   :  { %7428 = vmatmul.mubr.f32.gmra.mrb[82].mxu1 %v27548_v45 }
 0x41c   :  { %7433 = vmatprep.mubr.f32.mxu1 %v35926_v43  ;;  %24931 = vmatpush1.bf16.msra.mxu1 %v29631_v10 }
 0x41d   :  { %24933 = vmatprep.subr.bf16.mxu1 %v29776_v18  ;;  %v36153_v18 = vand.u32 4294901760, %v29637_v15  ;;  %v7781_v15 = vand.u32 4294901760, %v101_v47 }
 0x41f   :  { %7436 = vmatmul.mubr.f32.gmra.mrb[84].mxu1 %v27554_v48  ;;  %v29805_v4 = vpack.c.bf16 %v36154_v31, %v36153_v18  ;;  %v29820_v56 = vpack.c.bf16 %v7781_v15, %v7777_v32  ;;  %v29822_v18 = vsub.f32 %v69_v46, %v7777_v32  ;;  %v29824_v58 = vsub.f32 %v101_v47, %v7781_v15  ;;  %v165_v31 = vld [vmem:[#allocation5 + $0x3b8] sm:$0xff] }
 0x420   :  { %7441 = vmatprep.mubr.f32.mxu1 %v35926_v43  ;;  %v7779_v46 = vand.u32 4294901760, %v68_v28  ;;  %v7783_v47 = vand.u32 4294901760, %v100_v42  ;;  %v7785_v32 = vand.u32 4294901760, %v133_v36  ;;  %v7789_v15 = vand.u32 4294901760, %v165_v31 }
 0x421   :  { %36155 = vst [vmem:[#allocation245_spill] sm:$0xff] %v29805_v4  ;;  %36156 = vst [vmem:[#allocation246_spill] sm:$0xff] %v29820_v56 }
 0x422   :  { %v29842_v49 = vpack.c.bf16 %v7783_v47, %v7779_v46  ;;  %v29844_v39 = vpack.c.bf16 %v7789_v15, %v7785_v32  ;;  %v29846_v57 = vsub.f32 %v68_v28, %v7779_v46  ;;  %v29848_v13 = vsub.f32 %v100_v42, %v7783_v47 }
 0x423   :  { %7444 = vmatmul.mubr.f32.gmra.mrb[86].mxu1 %v27603_v14  ;;  %v29850_v52 = vsub.f32 %v133_v36, %v7785_v32  ;;  %v29852_v35 = vsub.f32 %v165_v31, %v7789_v15 }
 0x424   :  { %7522 = vmatprep.mubr.f32.mxu1 %v35926_v43  ;;  %36157 = vst [vmem:[#allocation247_spill] sm:$0xff] %v29842_v49  ;;  %36158 = vst [vmem:[#allocation248_spill] sm:$0xff] %v29844_v39  ;;  %v35585_v2 = vand.u32 4294901760, %v29846_v57  ;;  %v35582_v28 = vand.u32 4294901760, %v29848_v13 }
 0x425   :  { %v35583_v36 = vand.u32 4294901760, %v29850_v52  ;;  %v35584_v31 = vand.u32 4294901760, %v29852_v35 }
 0x427   :  { %7526 = vmatmul.mubr.f32.vlgmr.msra.gmra.mrb[80].mxu1 %v27529_v38 }
 0x428   :  { %24935 = vmatpush1.bf16.msra.mxu1 %v29790_v50  ;;  %7531 = vmatprep.mubr.f32.mxu1 %v35926_v43  ;;  %v132_v50 = vld [vmem:[#allocation5 + $0x2b0] sm:$0xff] }
 0x429   :  { %24937 = vmatprep.subr.bf16.mxu1 %v29796_v12  ;;  %v35579_v12 = vand.u32 4294901760, %v29824_v58 }
 0x42b   :  { %7535 = vmatmul.mubr.f32.gmra.mrb[82].mxu1 %v27558_v53 }
 0x42c   :  { %7540 = vmatprep.mubr.f32.mxu1 %v35926_v43  ;;  %24939 = vmatpush1.bf16.msra.mxu1 %v29805_v4  ;;  %v35574_v4 = vand.u32 4294901760, %v29822_v18 }
 0x42d   :  { %24941 = vmatprep.subr.bf16.mxu1 %v29596_v44  ;;  %v7791_v44 = vand.u32 4294901760, %v164_v41 }
 0x42f   :  { %7544 = vmatmul.mubr.f32.gmra.mrb[84].mxu1 %v27563_v55 }
 0x430   :  { %7549 = vmatprep.mubr.f32.mxu1 %v35926_v43 }
 0x433   :  { %7553 = vmatmul.mubr.f32.gmra.mrb[86].mxu1 %v27609_v19 }
 0x434   :  { %7647 = vmatprep.mubr.f32.mxu1 %v35926_v43 }
 0x437   :  { %7649 = vmatmul.mubr.f32.vlgmr.msra.gmra.mrb[80].mxu1 %v27502_v24 }
 0x438   :  { %24943 = vmatpush1.bf16.msra.mxu1 %v29618_v0  ;;  %7654 = vmatprep.mubr.f32.mxu1 %v35926_v43  ;;  %v7787_v0 = vand.u32 4294901760, %v132_v50 }
 0x439   :  { %24945 = vmatprep.subr.bf16.mxu1 %v29620_v1  ;;  %v7909_v1 = vsub.f32 %v29824_v58, %v35579_v12 }
 0x43a   :  { %v29855_v12 = vpack.c.bf16 %v7791_v44, %v7787_v0  ;;  %v29861_v42 = vsub.f32 %v132_v50, %v7787_v0  ;;  %v7903_v0 = vsub.f32 %v29846_v57, %v35585_v2  ;;  %v7933_v50 = vsub.f32 %v29852_v35, %v35584_v31 }
 0x43b   :  { %7656 = vmatmul.mubr.f32.gmra.mrb[82].mxu1 %v27526_v37 }
 0x43c   :  { %7661 = vmatprep.mubr.f32.mxu1 %v35926_v43  ;;  %24947 = vmatpush1.bf16.msra.mxu1 %v29631_v10  ;;  %v7897_v10 = vsub.f32 %v29822_v18, %v35574_v4  ;;  %v7910_v4 = vand.u32 4294901760, %v7909_v1  ;;  %36159 = vst [vmem:[#allocation249_spill] sm:$0xff] %v29855_v12  ;;  %v7904_v46 = vand.u32 4294901760, %v7903_v0 }
 0x43d   :  { %24949 = vmatprep.subr.bf16.mxu1 %v29820_v56 }
 0x43e   :  { %v7898_v8 = vand.u32 4294901760, %v7897_v10  ;;  %v29863_v10 = vsub.f32 %v164_v41, %v7791_v44  ;;  %v7915_v44 = vsub.f32 %v29848_v13, %v35582_v28  ;;  %v35588_v41 = vand.u32 4294901760, %v29861_v42 }
 0x43f   :  { %7663 = vmatmul.mubr.f32.gmra.mrb[84].mxu1 %v27534_v40 }
 0x440   :  { %7668 = vmatprep.mubr.f32.mxu1 %v35926_v43  ;;  %v29866_v1 = vpack.c.bf16 %v7910_v4, %v7898_v8  ;;  %v35587_v8 = vand.u32 4294901760, %v29863_v10  ;;  %v7921_v4 = vsub.f32 %v29850_v52, %v35583_v36  ;;  %v7916_v47 = vand.u32 4294901760, %v7915_v44 }
 0x441   :  { %v7927_v32 = vsub.f32 %v29861_v42, %v35588_v41  ;;  %v7934_v36 = vand.u32 4294901760, %v7933_v50  ;;  %v29962_v41 = vpack.c.bf16 %v29852_v35, %v29850_v52 }
 0x442   :  { %36160 = vst [vmem:[#allocation250_spill] sm:$0xff] %v29866_v1  ;;  %v7939_v15 = vsub.f32 %v29863_v10, %v35587_v8  ;;  %v7922_v28 = vand.u32 4294901760, %v7921_v4  ;;  %v29898_v31 = vpack.c.bf16 %v7916_v47, %v7904_v46  ;;  %v29910_v4 = vpack.c.bf16 %v29824_v58, %v29822_v18 }
 0x443   :  { %7670 = vmatmul.mubr.f32.gmra.mrb[86].mxu1 %v27595_v9  ;;  %v7928_v2 = vand.u32 4294901760, %v7927_v32  ;;  %36175 = vst [vmem:[#allocation262_spill] sm:$0xff] %v29962_v41 }
 0x444   :  { %7748 = vmatprep.mubr.f32.mxu1 %v35926_v43  ;;  %36161 = vst [vmem:[#allocation251_spill] sm:$0xff] %v29898_v31  ;;  %v29900_v0 = vpack.c.bf16 %v7934_v36, %v7922_v28  ;;  %36164 = vst [vmem:[#allocation254_spill] sm:$0xff] %v29910_v4  ;;  %v36166_v28 = vmax.f32 %v29694_v62, %v29696_v61  ;;  %v36169_v62 = vmax.f32 %v29710_v63, %v29712_v5 }
 0x446   :  { %36162 = vst [vmem:[#allocation252_spill] sm:$0xff] %v29900_v0 }
 0x447   :  { %7750 = vmatmul.mubr.f32.vlgmr.msra.gmra.mrb[80].mxu1 %v27502_v24 }
 0x448   :  { %24951 = vmatpush1.bf16.msra.mxu1 %v29842_v49  ;;  %7755 = vmatprep.mubr.f32.mxu1 %v35926_v43 }
 0x449   :  { %24953 = vmatprep.subr.bf16.mxu1 %v29844_v39 }
 0x44b   :  { %7757 = vmatmul.mubr.f32.gmra.mrb[82].mxu1 %v27526_v37 }
 0x44c   :  { %7762 = vmatprep.mubr.f32.mxu1 %v35926_v43  ;;  %24955 = vmatpush1.bf16.msra.mxu1 %v29855_v12 }
 0x44d   :  { %24957 = vmatprep.subr.bf16.mxu1 %v29866_v1  ;;  %v7940_v1 = vand.u32 4294901760, %v7939_v15  ;;  %v29979_v15 = vpack.c.bf16 %v29863_v10, %v29861_v42 }
 0x44f   :  { %7764 = vmatmul.mubr.f32.gmra.mrb[84].mxu1 %v27534_v40  ;;  %v29905_v44 = vpack.c.bf16 %v7940_v1, %v7928_v2  ;;  %v36172_v2 = vmax.f32 %v29724_v34, %v29726_v27  ;;  %36179 = vst [vmem:[#allocation265_spill] sm:$0xff] %v29979_v15 }
 0x450   :  { %7769 = vmatprep.mubr.f32.mxu1 %v35926_v43 }
 0x451   :  { %36163 = vst [vmem:[#allocation253_spill] sm:$0xff] %v29905_v44 }
 0x453   :  { %7771 = vmatmul.mubr.f32.gmra.mrb[86].mxu1 %v27595_v9 }
 0x454   :  { %7849 = vmatprep.mubr.f32.mxu1 %v35926_v43 }
 0x457   :  { %7855 = vmatmul.mubr.f32.vlgmr.msra.gmra.mrb[88].mxu1 %v27560_v54 }
 0x458   :  { %24959 = vmatpush1.bf16.msra.mxu1 %v29898_v31  ;;  %7860 = vmatprep.mubr.f32.mxu1 %v35926_v43  ;;  %v166_v31 = vld [vmem:[#allocation5 + $0x3c0] sm:$0xff] }
 0x459   :  { %24961 = vmatprep.subr.bf16.mxu1 %v29900_v0 }
 0x45a   :  { %v29912_v50 = vpop.f32.mrb[64].mxu1 }
 0x45b   :  { %36165 = vst [vmem:[#allocation255_spill] sm:$0xff] %v29912_v50  ;;  %v29918_v36 = vmax.f32 %v36166_v28, %v29912_v50  ;;  %v29920_v46 = vpop.f32.mrb[65].mxu1  ;;  %7866 = vmatmul.mubr.f32.gmra.mrb[90].mxu1 %v27586_v3 }
 0x45c   :  { %36167 = vst [vmem:[#allocation256_spill] sm:$0xff] %v29920_v46  ;;  %7871 = vmatprep.mubr.f32.mxu1 %v35926_v43  ;;  %24963 = vmatpush1.bf16.msra.mxu1 %v29905_v44 }
 0x45d   :  { %24965 = vmatprep.subr.bf16.mxu1 %v29910_v4 }
 0x45e   :  { %v29928_v1 = vpop.f32.mrb[66].mxu1 }
 0x45f   :  { %36168 = vst [vmem:[#allocation257_spill] sm:$0xff] %v29928_v1  ;;  %v29934_v47 = vmax.f32 %v36169_v62, %v29928_v1  ;;  %v29936_v32 = vpop.f32.mrb[67].mxu1  ;;  %7877 = vmatmul.mubr.f32.gmra.mrb[92].mxu1 %v27599_v11  ;;  %v29956_v62 = vpack.c.bf16 %v29848_v13, %v29846_v57 }
 0x460   :  { %36170 = vst [vmem:[#allocation258_spill] sm:$0xff] %v29936_v32  ;;  %7882 = vmatprep.mubr.f32.mxu1 %v35926_v43 }
 0x461   :  { %36174 = vst [vmem:[#allocation261_spill] sm:$0xff] %v29956_v62 }
 0x462   :  { %v29942_v28 = vpop.f32.mrb[68].mxu1 }
 0x463   :  { %36171 = vst [vmem:[#allocation259_spill] sm:$0xff] %v29942_v28  ;;  %v29948_v8 = vmax.f32 %v36172_v2, %v29942_v28  ;;  %v29950_v63 = vpop.f32.mrb[69].mxu1  ;;  %7888 = vmatmul.mubr.f32.gmra.mrb[94].mxu1 %v27623_v33  ;;  %v36177_v2 = vmax.f32 %v29746_v25, %v29748_v7  ;;  %v36180_v25 = vand.u32 4294901760, %v29822_v18  ;;  %v36183_v18 = vand.u32 4294901760, %v29846_v57 }
 0x464   :  { %36173 = vst [vmem:[#allocation260_spill] sm:$0xff] %v29950_v63  ;;  %7998 = vmatprep.mubr.f32.mxu1 %v35926_v43  ;;  %v36190_v57 = vand.u32 4294901760, %v29863_v10 }
 0x466   :  { %v29964_v34 = vpop.f32.mrb[70].mxu1 }
 0x467   :  { %36176 = vst [vmem:[#allocation263_spill] sm:$0xff] %v29964_v34  ;;  %v29970_v4 = vmax.f32 %v36177_v2, %v29964_v34  ;;  %v29972_v44 = vpop.f32.mrb[71].mxu1  ;;  %8000 = vmatmul.mubr.f32.vlgmr.msra.gmra.mrb[88].mxu1 %v27502_v24  ;;  %v36181_v2 = vand.u32 4294901760, %v29824_v58  ;;  %v36184_v58 = vand.u32 4294901760, %v29848_v13  ;;  %v103_v13 = vld [vmem:[#allocation5 + $0x1c8] sm:$0xff] }
 0x468   :  { %36178 = vst [vmem:[#allocation264_spill] sm:$0xff] %v29972_v44  ;;  %24967 = vmatpush1.bf16.msra.mxu1 %v29956_v62  ;;  %8005 = vmatprep.mubr.f32.mxu1 %v35926_v43 }
 0x469   :  { %24969 = vmatprep.subr.bf16.mxu1 %v29962_v41  ;;  %v30000_v0 = vpack.c.bf16 %v36181_v2, %v36180_v25  ;;  %v30014_v25 = vpack.c.bf16 %v36184_v58, %v36183_v18  ;;  %v36186_v2 = vand.u32 4294901760, %v29850_v52  ;;  %v71_v52 = vld [vmem:[#allocation5 + $0xc8] sm:$0xff]  ;;  %v70_v18 = vld [vmem:[#allocation5 + $0xc0] sm:$0xff] }
 0x46a   :  { %v102_v58 = vld [vmem:[#allocation5 + $0x1c0] sm:$0xff] }
 0x46b   :  { %8007 = vmatmul.mubr.f32.gmra.mrb[90].mxu1 %v27526_v37  ;;  %36182 = vst [vmem:[#allocation266_spill] sm:$0xff] %v30000_v0  ;;  %36185 = vst [vmem:[#allocation267_spill] sm:$0xff] %v30014_v25 }
 0x46c   :  { %8012 = vmatprep.mubr.f32.mxu1 %v35926_v43  ;;  %24971 = vmatpush1.bf16.msra.mxu1 %v29979_v15  ;;  %v36187_v15 = vand.u32 4294901760, %v29852_v35  ;;  %v8467_v35 = vand.u32 4294901760, %v71_v52 }
 0x46d   :  { %24973 = vmatprep.subr.bf16.mxu1 %v29820_v56 }
 0x46e   :  { %v30020_v41 = vpack.c.bf16 %v36187_v15, %v36186_v2  ;;  %v135_v2 = vld [vmem:[#allocation5 + $0x2c8] sm:$0xff] }
 0x46f   :  { %8014 = vmatmul.mubr.f32.gmra.mrb[92].mxu1 %v27534_v40 }
 0x470   :  { %8019 = vmatprep.mubr.f32.mxu1 %v35926_v43  ;;  %36188 = vst [vmem:[#allocation268_spill] sm:$0xff] %v30020_v41 }
 0x473   :  { %8021 = vmatmul.mubr.f32.gmra.mrb[94].mxu1 %v27595_v9 }
 0x474   :  { %8107 = vmatprep.mubr.f32.mxu1 %v35926_v43 }
 0x477   :  { %8110 = vmatmul.mubr.f32.vlgmr.msra.gmra.mrb[88].mxu1 %v27517_v30 }
 0x478   :  { %24975 = vmatpush1.bf16.msra.mxu1 %v29842_v49  ;;  %8115 = vmatprep.mubr.f32.mxu1 %v35926_v43 }
 0x479   :  { %24977 = vmatprep.subr.bf16.mxu1 %v29844_v39 }
 0x47b   :  { %8118 = vmatmul.mubr.f32.gmra.mrb[90].mxu1 %v27548_v45 }
 0x47c   :  { %8123 = vmatprep.mubr.f32.mxu1 %v35926_v43  ;;  %24979 = vmatpush1.bf16.msra.mxu1 %v29855_v12 }
 0x47d   :  { %24981 = vmatprep.subr.bf16.mxu1 %v30000_v0  ;;  %v36189_v0 = vand.u32 4294901760, %v29861_v42  ;;  %v8471_v42 = vand.u32 4294901760, %v103_v13 }
 0x47f   :  { %8126 = vmatmul.mubr.f32.gmra.mrb[92].mxu1 %v27554_v48  ;;  %v30029_v62 = vpack.c.bf16 %v36190_v57, %v36189_v0  ;;  %v30044_v10 = vpack.c.bf16 %v8471_v42, %v8467_v35  ;;  %v30046_v0 = vsub.f32 %v71_v52, %v8467_v35  ;;  %v30048_v15 = vsub.f32 %v103_v13, %v8471_v42  ;;  %v167_v57 = vld [vmem:[#allocation5 + $0x3c8] sm:$0xff] }
 0x480   :  { %8131 = vmatprep.mubr.f32.mxu1 %v35926_v43  ;;  %v8469_v52 = vand.u32 4294901760, %v70_v18  ;;  %v8473_v13 = vand.u32 4294901760, %v102_v58  ;;  %v8475_v35 = vand.u32 4294901760, %v135_v2  ;;  %v8479_v42 = vand.u32 4294901760, %v167_v57 }
 0x481   :  { %36191 = vst [vmem:[#allocation269_spill] sm:$0xff] %v30029_v62  ;;  %36192 = vst [vmem:[#allocation270_spill] sm:$0xff] %v30044_v10 }
 0x482   :  { %v30066_v34 = vpack.c.bf16 %v8473_v13, %v8469_v52  ;;  %v30068_v7 = vpack.c.bf16 %v8479_v42, %v8475_v35  ;;  %v30070_v28 = vsub.f32 %v70_v18, %v8469_v52  ;;  %v30072_v27 = vsub.f32 %v102_v58, %v8473_v13 }
 0x483   :  { %8134 = vmatmul.mubr.f32.gmra.mrb[94].mxu1 %v27603_v14  ;;  %v30074_v5 = vsub.f32 %v135_v2, %v8475_v35  ;;  %v30076_v50 = vsub.f32 %v167_v57, %v8479_v42 }
 0x484   :  { %8212 = vmatprep.mubr.f32.mxu1 %v35926_v43  ;;  %36193 = vst [vmem:[#allocation271_spill] sm:$0xff] %v30066_v34  ;;  %36194 = vst [vmem:[#allocation272_spill] sm:$0xff] %v30068_v7  ;;  %v35625_v61 = vand.u32 4294901760, %v30070_v28  ;;  %v35622_v18 = vand.u32 4294901760, %v30072_v27 }
 0x485   :  { %v35623_v2 = vand.u32 4294901760, %v30074_v5  ;;  %v35624_v57 = vand.u32 4294901760, %v30076_v50 }
 0x487   :  { %8216 = vmatmul.mubr.f32.vlgmr.msra.gmra.mrb[88].mxu1 %v27529_v38 }
 0x488   :  { %24983 = vmatpush1.bf16.msra.mxu1 %v30014_v25  ;;  %8221 = vmatprep.mubr.f32.mxu1 %v35926_v43  ;;  %v134_v25 = vld [vmem:[#allocation5 + $0x2c0] sm:$0xff] }
 0x489   :  { %24985 = vmatprep.subr.bf16.mxu1 %v30020_v41  ;;  %v35619_v41 = vand.u32 4294901760, %v30048_v15 }
 0x48b   :  { %8225 = vmatmul.mubr.f32.gmra.mrb[90].mxu1 %v27558_v53 }
 0x48c   :  { %8230 = vmatprep.mubr.f32.mxu1 %v35926_v43  ;;  %24987 = vmatpush1.bf16.msra.mxu1 %v30029_v62  ;;  %v35614_v62 = vand.u32 4294901760, %v30046_v0 }
 0x48d   :  { %24989 = vmatprep.subr.bf16.mxu1 %v29820_v56  ;;  %v8481_v56 = vand.u32 4294901760, %v166_v31 }
 0x48f   :  { %8234 = vmatmul.mubr.f32.gmra.mrb[92].mxu1 %v27563_v55 }
 0x490   :  { %8239 = vmatprep.mubr.f32.mxu1 %v35926_v43 }
 0x493   :  { %8243 = vmatmul.mubr.f32.gmra.mrb[94].mxu1 %v27609_v19 }
 0x494   :  { %8337 = vmatprep.mubr.f32.mxu1 %v35926_v43 }
 0x497   :  { %8339 = vmatmul.mubr.f32.vlgmr.msra.gmra.mrb[88].mxu1 %v27502_v24 }
 0x498   :  { %24991 = vmatpush1.bf16.msra.mxu1 %v29842_v49  ;;  %8344 = vmatprep.mubr.f32.mxu1 %v35926_v43  ;;  %v8477_v49 = vand.u32 4294901760, %v134_v25 }
 0x499   :  { %24993 = vmatprep.subr.bf16.mxu1 %v29844_v39  ;;  %v8599_v39 = vsub.f32 %v30048_v15, %v35619_v41 }
 0x49a   :  { %v30079_v41 = vpack.c.bf16 %v8481_v56, %v8477_v49  ;;  %v30085_v58 = vsub.f32 %v134_v25, %v8477_v49  ;;  %v8593_v49 = vsub.f32 %v30070_v28, %v35625_v61  ;;  %v8623_v25 = vsub.f32 %v30076_v50, %v35624_v57 }
 0x49b   :  { %8346 = vmatmul.mubr.f32.gmra.mrb[90].mxu1 %v27526_v37 }
 0x49c   :  { %8351 = vmatprep.mubr.f32.mxu1 %v35926_v43  ;;  %24995 = vmatpush1.bf16.msra.mxu1 %v29855_v12  ;;  %v8587_v12 = vsub.f32 %v30046_v0, %v35614_v62  ;;  %v8600_v62 = vand.u32 4294901760, %v8599_v39  ;;  %36195 = vst [vmem:[#allocation273_spill] sm:$0xff] %v30079_v41  ;;  %v8594_v52 = vand.u32 4294901760, %v8593_v49 }
 0x49d   :  { %24997 = vmatprep.subr.bf16.mxu1 %v30044_v10 }
 0x49e   :  { %v8588_v1 = vand.u32 4294901760, %v8587_v12  ;;  %v30087_v12 = vsub.f32 %v166_v31, %v8481_v56  ;;  %v8605_v56 = vsub.f32 %v30072_v27, %v35622_v18  ;;  %v35628_v31 = vand.u32 4294901760, %v30085_v58 }
 0x49f   :  { %8353 = vmatmul.mubr.f32.gmra.mrb[92].mxu1 %v27534_v40 }
 0x4a0   :  { %8358 = vmatprep.mubr.f32.mxu1 %v35926_v43  ;;  %v30090_v39 = vpack.c.bf16 %v8600_v62, %v8588_v1  ;;  %v35627_v1 = vand.u32 4294901760, %v30087_v12  ;;  %v8611_v62 = vsub.f32 %v30074_v5, %v35623_v2  ;;  %v8606_v13 = vand.u32 4294901760, %v8605_v56 }
 0x4a1   :  { %v8617_v35 = vsub.f32 %v30085_v58, %v35628_v31  ;;  %v8624_v2 = vand.u32 4294901760, %v8623_v25  ;;  %v30186_v31 = vpack.c.bf16 %v30076_v50, %v30074_v5 }
 0x4a2   :  { %36196 = vst [vmem:[#allocation274_spill] sm:$0xff] %v30090_v39  ;;  %v8629_v42 = vsub.f32 %v30087_v12, %v35627_v1  ;;  %v8612_v18 = vand.u32 4294901760, %v8611_v62  ;;  %v30122_v57 = vpack.c.bf16 %v8606_v13, %v8594_v52  ;;  %v30134_v62 = vpack.c.bf16 %v30048_v15, %v30046_v0 }
 0x4a3   :  { %8360 = vmatmul.mubr.f32.gmra.mrb[94].mxu1 %v27595_v9  ;;  %v8618_v61 = vand.u32 4294901760, %v8617_v35  ;;  %36210 = vst [vmem:[#allocation285_spill] sm:$0xff] %v30186_v31 }
 0x4a4   :  { %8438 = vmatprep.mubr.f32.mxu1 %v35926_v43  ;;  %36197 = vst [vmem:[#allocation275_spill] sm:$0xff] %v30122_v57  ;;  %v30124_v49 = vpack.c.bf16 %v8624_v2, %v8612_v18  ;;  %36200 = vst [vmem:[#allocation278_spill] sm:$0xff] %v30134_v62  ;;  %v36202_v18 = vmax.f32 %v29918_v36, %v29920_v46  ;;  %v36204_v36 = vmax.f32 %v29934_v47, %v29936_v32 }
 0x4a6   :  { %36198 = vst [vmem:[#allocation276_spill] sm:$0xff] %v30124_v49 }
 0x4a7   :  { %8440 = vmatmul.mubr.f32.vlgmr.msra.gmra.mrb[88].mxu1 %v27502_v24 }
 0x4a8   :  { %24999 = vmatpush1.bf16.msra.mxu1 %v30066_v34  ;;  %8445 = vmatprep.mubr.f32.mxu1 %v35926_v43 }
 0x4a9   :  { %25001 = vmatprep.subr.bf16.mxu1 %v30068_v7 }
 0x4ab   :  { %8447 = vmatmul.mubr.f32.gmra.mrb[90].mxu1 %v27526_v37 }
 0x4ac   :  { %8452 = vmatprep.mubr.f32.mxu1 %v35926_v43  ;;  %25003 = vmatpush1.bf16.msra.mxu1 %v30079_v41 }
 0x4ad   :  { %25005 = vmatprep.subr.bf16.mxu1 %v30090_v39  ;;  %v8630_v39 = vand.u32 4294901760, %v8629_v42  ;;  %v30203_v42 = vpack.c.bf16 %v30087_v12, %v30085_v58 }
 0x4af   :  { %8454 = vmatmul.mubr.f32.gmra.mrb[92].mxu1 %v27534_v40  ;;  %v30129_v56 = vpack.c.bf16 %v8630_v39, %v8618_v61  ;;  %v36207_v61 = vmax.f32 %v29948_v8, %v29950_v63  ;;  %36214 = vst [vmem:[#allocation288_spill] sm:$0xff] %v30203_v42 }
 0x4b0   :  { %8459 = vmatprep.mubr.f32.mxu1 %v35926_v43 }
 0x4b1   :  { %36199 = vst [vmem:[#allocation277_spill] sm:$0xff] %v30129_v56 }
 0x4b3   :  { %8461 = vmatmul.mubr.f32.gmra.mrb[94].mxu1 %v27595_v9 }
 0x4b4   :  { %8539 = vmatprep.mubr.f32.mxu1 %v35926_v43 }
 0x4b7   :  { %8545 = vmatmul.mubr.f32.vlgmr.msra.gmra.mrb[96].mxu1 %v27560_v54 }
 0x4b8   :  { %25007 = vmatpush1.bf16.msra.mxu1 %v30122_v57  ;;  %8550 = vmatprep.mubr.f32.mxu1 %v35926_v43  ;;  %v74_v57 = vld [vmem:[#allocation5 + $0xe0] sm:$0xff] }
 0x4b9   :  { %25009 = vmatprep.subr.bf16.mxu1 %v30124_v49 }
 0x4ba   :  { %v30136_v25 = vpop.f32.mrb[72].mxu1 }
 0x4bb   :  { %36201 = vst [vmem:[#allocation279_spill] sm:$0xff] %v30136_v25  ;;  %v30142_v2 = vmax.f32 %v36202_v18, %v30136_v25  ;;  %v30144_v52 = vpop.f32.mrb[73].mxu1  ;;  %8556 = vmatmul.mubr.f32.gmra.mrb[98].mxu1 %v27586_v3 }
 0x4bc   :  { %8561 = vmatprep.mubr.f32.mxu1 %v35926_v43  ;;  %25011 = vmatpush1.bf16.msra.mxu1 %v30129_v56 }
 0x4bd   :  { %25013 = vmatprep.subr.bf16.mxu1 %v30134_v62 }
 0x4be   :  { %v30152_v39 = vpop.f32.mrb[74].mxu1 }
 0x4bf   :  { %36203 = vst [vmem:[#allocation280_spill] sm:$0xff] %v30152_v39  ;;  %v30158_v13 = vmax.f32 %v36204_v36, %v30152_v39  ;;  %v30160_v35 = vpop.f32.mrb[75].mxu1  ;;  %8567 = vmatmul.mubr.f32.gmra.mrb[100].mxu1 %v27599_v11  ;;  %v30180_v36 = vpack.c.bf16 %v30072_v27, %v30070_v28 }
 0x4c0   :  { %36205 = vst [vmem:[#allocation281_spill] sm:$0xff] %v30160_v35  ;;  %8572 = vmatprep.mubr.f32.mxu1 %v35926_v43 }
 0x4c1   :  { %36209 = vst [vmem:[#allocation284_spill] sm:$0xff] %v30180_v36 }
 0x4c2   :  { %v30166_v18 = vpop.f32.mrb[76].mxu1 }
 0x4c3   :  { %36206 = vst [vmem:[#allocation282_spill] sm:$0xff] %v30166_v18  ;;  %v30172_v1 = vmax.f32 %v36207_v61, %v30166_v18  ;;  %v30174_v47 = vpop.f32.mrb[77].mxu1  ;;  %8578 = vmatmul.mubr.f32.gmra.mrb[102].mxu1 %v27623_v33  ;;  %v36212_v61 = vmax.f32 %v29970_v4, %v29972_v44  ;;  %v36215_v4 = vand.u32 4294901760, %v30046_v0  ;;  %v36218_v0 = vand.u32 4294901760, %v30070_v28  ;;  %v138_v44 = vld [vmem:[#allocation5 + $0x2e0] sm:$0xff] }
 0x4c4   :  { %36208 = vst [vmem:[#allocation283_spill] sm:$0xff] %v30174_v47  ;;  %8688 = vmatprep.mubr.f32.mxu1 %v35926_v43  ;;  %v36224_v28 = vand.u32 4294901760, %v30085_v58  ;;  %v170_v18 = vld [vmem:[#allocation5 + $0x3e0] sm:$0xff]  ;;  %v9857_v63 = vand.u32 4294901760, %v138_v44 }
 0x4c5   :  { %v9861_v39 = vand.u32 4294901760, %v170_v18 }
 0x4c6   :  { %v30188_v8 = vpop.f32.mrb[78].mxu1 }
 0x4c7   :  { %36211 = vst [vmem:[#allocation286_spill] sm:$0xff] %v30188_v8  ;;  %v30194_v62 = vmax.f32 %v36212_v61, %v30188_v8  ;;  %v30196_v56 = vpop.f32.mrb[79].mxu1  ;;  %8690 = vmatmul.mubr.f32.vlgmr.msra.gmra.mrb[96].mxu1 %v27502_v24  ;;  %v36216_v61 = vand.u32 4294901760, %v30048_v15  ;;  %v36219_v15 = vand.u32 4294901760, %v30072_v27  ;;  %v36225_v27 = vand.u32 4294901760, %v30087_v12  ;;  %v139_v12 = vld [vmem:[#allocation5 + $0x2e8] sm:$0xff] }
 0x4c8   :  { %36213 = vst [vmem:[#allocation287_spill] sm:$0xff] %v30196_v56  ;;  %25015 = vmatpush1.bf16.msra.mxu1 %v30180_v36  ;;  %8695 = vmatprep.mubr.f32.mxu1 %v35926_v43  ;;  %v107_v36 = vld [vmem:[#allocation5 + $0x1e8] sm:$0xff]  ;;  %v30270_v25 = vpack.c.bf16 %v9861_v39, %v9857_v63 }
 0x4c9   :  { %25017 = vmatprep.subr.bf16.mxu1 %v30186_v31  ;;  %v30224_v49 = vpack.c.bf16 %v36216_v61, %v36215_v4  ;;  %v30238_v4 = vpack.c.bf16 %v36219_v15, %v36218_v0  ;;  %v36221_v61 = vand.u32 4294901760, %v30074_v5  ;;  %v30253_v0 = vpack.c.bf16 %v36225_v27, %v36224_v28  ;;  %v171_v28 = vld [vmem:[#allocation5 + $0x3e8] sm:$0xff]  ;;  %v73_v27 = vld [vmem:[#allocation5 + $0xd8] sm:$0xff] }
 0x4ca   :  { %v9851_v15 = vand.u32 4294901760, %v107_v36  ;;  %36230 = vst [vmem:[#allocation296_spill] sm:$0xff] %v30270_v25 }
 0x4cb   :  { %8697 = vmatmul.mubr.f32.gmra.mrb[98].mxu1 %v27526_v37  ;;  %36217 = vst [vmem:[#allocation289_spill] sm:$0xff] %v30224_v49  ;;  %36220 = vst [vmem:[#allocation290_spill] sm:$0xff] %v30238_v4 }
 0x4cc   :  { %8702 = vmatprep.mubr.f32.mxu1 %v35926_v43  ;;  %25019 = vmatpush1.bf16.msra.mxu1 %v30203_v42  ;;  %v36222_v42 = vand.u32 4294901760, %v30076_v50  ;;  %36226 = vst [vmem:[#allocation292_spill] sm:$0xff] %v30253_v0  ;;  %v106_v50 = vld [vmem:[#allocation5 + $0x1e0] sm:$0xff]  ;;  %v30280_v29 = vsub.f32 %v107_v36, %v9851_v15 }
 0x4cd   :  { %25021 = vmatprep.subr.bf16.mxu1 %v30044_v10 }
 0x4ce   :  { %v30244_v31 = vpack.c.bf16 %v36222_v42, %v36221_v61  ;;  %v9849_v42 = vand.u32 4294901760, %v74_v57  ;;  %v9853_v61 = vand.u32 4294901760, %v106_v50 }
 0x4cf   :  { %8704 = vmatmul.mubr.f32.gmra.mrb[100].mxu1 %v27534_v40 }
 0x4d0   :  { %8709 = vmatprep.mubr.f32.mxu1 %v35926_v43  ;;  %36223 = vst [vmem:[#allocation291_spill] sm:$0xff] %v30244_v31  ;;  %v30261_v58 = vpack.c.bf16 %v9853_v61, %v9849_v42  ;;  %v30283_v26 = vsub.f32 %v74_v57, %v9849_v42  ;;  %v30285_v23 = vsub.f32 %v106_v50, %v9853_v61 }
 0x4d1   :  { %v30317_v42 = vsub.f32 %v138_v44, %v9857_v63  ;;  %v30319_v61 = vsub.f32 %v170_v18, %v9861_v39  ;;  %v72_v44 = vld [vmem:[#allocation5 + $0xd0] sm:$0xff] }
 0x4d2   :  { %36228 = vst [vmem:[#allocation294_spill] sm:$0xff] %v30261_v58  ;;  %v35665_v36 = vand.u32 4294901760, %v30285_v23 }
 0x4d3   :  { %8711 = vmatmul.mubr.f32.gmra.mrb[102].mxu1 %v27595_v9  ;;  %v35675_v18 = vand.u32 4294901760, %v30317_v42 }
 0x4d4   :  { %8797 = vmatprep.mubr.f32.mxu1 %v35926_v43 }
 0x4d7   :  { %8800 = vmatmul.mubr.f32.vlgmr.msra.gmra.mrb[96].mxu1 %v27517_v30 }
 0x4d8   :  { %25023 = vmatpush1.bf16.msra.mxu1 %v30066_v34  ;;  %8805 = vmatprep.mubr.f32.mxu1 %v35926_v43 }
 0x4d9   :  { %25025 = vmatprep.subr.bf16.mxu1 %v30068_v7 }
 0x4db   :  { %8808 = vmatmul.mubr.f32.gmra.mrb[98].mxu1 %v27548_v45 }
 0x4dc   :  { %8813 = vmatprep.mubr.f32.mxu1 %v35926_v43  ;;  %25027 = vmatpush1.bf16.msra.mxu1 %v30079_v41 }
 0x4dd   :  { %25029 = vmatprep.subr.bf16.mxu1 %v30224_v49  ;;  %v75_v49 = vld [vmem:[#allocation5 + $0xe8] sm:$0xff] }
 0x4de   :  { %v9847_v5 = vand.u32 4294901760, %v75_v49 }
 0x4df   :  { %8816 = vmatmul.mubr.f32.gmra.mrb[100].mxu1 %v27554_v48 }
 0x4e0   :  { %8821 = vmatprep.mubr.f32.mxu1 %v35926_v43  ;;  %v30257_v8 = vpack.c.bf16 %v9851_v15, %v9847_v5  ;;  %v30278_v51 = vsub.f32 %v75_v49, %v9847_v5  ;;  %v35666_v49 = vand.u32 4294901760, %v30283_v26 }
 0x4e2   :  { %36227 = vst [vmem:[#allocation293_spill] sm:$0xff] %v30257_v8  ;;  %25133 = vmatprep.subr.bf16.mxu0 %v30257_v8  ;;  %v35668_v16 = vand.u32 4294901760, %v30278_v51 }
 0x4e3   :  { %8824 = vmatmul.mubr.f32.gmra.mrb[102].mxu1 %v27603_v14  ;;  %25135 = vmatpush1.bf16.msra.mxu0 %v30261_v58 }
 0x4e4   :  { %8902 = vmatprep.mubr.f32.mxu1 %v35926_v43 }
 0x4e7   :  { %8906 = vmatmul.mubr.f32.vlgmr.msra.gmra.mrb[96].mxu1 %v27529_v38 }
 0x4e8   :  { %25031 = vmatpush1.bf16.msra.mxu1 %v30238_v4  ;;  %8911 = vmatprep.mubr.f32.mxu1 %v35926_v43  ;;  %v9859_v4 = vand.u32 4294901760, %v171_v28 }
 0x4e9   :  { %25033 = vmatprep.subr.bf16.mxu1 %v30244_v31  ;;  %v9855_v31 = vand.u32 4294901760, %v139_v12 }
 0x4ea   :  { %v30309_v50 = vsub.f32 %v171_v28, %v9859_v4 }
 0x4eb   :  { %8915 = vmatmul.mubr.f32.gmra.mrb[98].mxu1 %v27558_v53  ;;  %v30268_v32 = vpack.c.bf16 %v9859_v4, %v9855_v31  ;;  %v30307_v15 = vsub.f32 %v139_v12, %v9855_v31 }
 0x4ec   :  { %8920 = vmatprep.mubr.f32.mxu1 %v35926_v43  ;;  %25035 = vmatpush1.bf16.msra.mxu1 %v30253_v0  ;;  %v105_v0 = vld [vmem:[#allocation5 + $0x1d8] sm:$0xff]  ;;  %v35670_v28 = vand.u32 4294901760, %v30309_v50 }
 0x4ed   :  { %25037 = vmatprep.subr.bf16.mxu1 %v30044_v10  ;;  %36229 = vst [vmem:[#allocation295_spill] sm:$0xff] %v30268_v32  ;;  %v9157_v10 = vand.u32 4294901760, %v73_v27  ;;  %v9161_v46 = vand.u32 4294901760, %v105_v0  ;;  %25137 = vmatprep.subr.bf16.mxu0 %v30268_v32  ;;  %v35669_v4 = vand.u32 4294901760, %v30307_v15 }
 0x4ee   :  { %25139 = vmatpush1.bf16.msra.mxu0 %v30270_v25 }
 0x4ef   :  { %8924 = vmatmul.mubr.f32.gmra.mrb[100].mxu1 %v27563_v55  ;;  %v30275_v6 = vsub.f32 %v73_v27, %v9157_v10  ;;  %25197 = vmatprep.subr.bf16.mxu0 %v27570_v59  ;;  %v30288_v22 = vpack.c.bf16 %v9161_v46, %v9157_v10  ;;  %v35667_v27 = vand.u32 4294901760, %v30280_v29  ;;  %v30296_v57 = vsub.f32 %v105_v0, %v9161_v46 }
 0x4f0   :  { %8929 = vmatprep.mubr.f32.mxu1 %v35926_v43  ;;  %v9967_v10 = vsub.f32 %v30278_v51, %v35668_v16  ;;  %v9973_v46 = vsub.f32 %v30283_v26, %v35666_v49  ;;  %v9985_v0 = vsub.f32 %v30285_v23, %v35665_v36  ;;  %v9991_v16 = vsub.f32 %v30307_v15, %v35669_v4 }
 0x4f1   :  { %36231 = vst [vmem:[#allocation297_spill] sm:$0xff] %v30288_v22  ;;  %10510 = vmatmul.mubr.f32.vlgmr.msra.gmra.mrb[0].mxu0 %v27502_v24  ;;  %v9979_v5 = vsub.f32 %v30280_v29, %v35667_v27  ;;  %v9997_v36 = vsub.f32 %v30317_v42, %v35675_v18  ;;  %v9159_v4 = vand.u32 4294901760, %v72_v44 }
 0x4f2   :  { %10515 = vmatprep.mubr.f32.mxu0 %v35926_v43  ;;  %v9968_v31 = vand.u32 4294901760, %v9967_v10  ;;  %v9974_v63 = vand.u32 4294901760, %v9973_v46  ;;  %v9986_v39 = vand.u32 4294901760, %v9985_v0  ;;  %v104_v10 = vld [vmem:[#allocation5 + $0x1d0] sm:$0xff]  ;;  %v10003_v46 = vsub.f32 %v30309_v50, %v35670_v28  ;;  %v169_v0 = vld [vmem:[#allocation5 + $0x3d8] sm:$0xff] }
 0x4f3   :  { %8933 = vmatmul.mubr.f32.gmra.mrb[102].mxu1 %v27609_v19  ;;  %v9980_v12 = vand.u32 4294901760, %v9979_v5  ;;  %v137_v5 = vld [vmem:[#allocation5 + $0x2d8] sm:$0xff]  ;;  %v9992_v49 = vand.u32 4294901760, %v9991_v16  ;;  %v9998_v18 = vand.u32 4294901760, %v9997_v36  ;;  %v36236_v16 = vand.u32 4294901760, %v30296_v57 }
 0x4f4   :  { %9027 = vmatprep.mubr.f32.mxu1 %v35926_v43  ;;  %v30341_v59 = vpack.c.bf16 %v9986_v39, %v9974_v63  ;;  %v10004_v28 = vand.u32 4294901760, %v10003_v46  ;;  %v9163_v63 = vand.u32 4294901760, %v104_v10  ;;  %v9165_v39 = vand.u32 4294901760, %v137_v5 }
 0x4f5   :  { %10517 = vmatmul.mubr.f32.gmra.mrb[2].mxu0 %v27526_v37  ;;  %v30332_v27 = vpack.c.bf16 %v9980_v12, %v9968_v31  ;;  %v36234_v31 = vand.u32 4294901760, %v30319_v61  ;;  %v9289_v46 = vsub.f32 %v30296_v57, %v36236_v16  ;;  %v30366_v32 = vsub.f32 %v72_v44, %v9159_v4 }
 0x4f6   :  { %10522 = vmatprep.mubr.f32.mxu0 %v35926_v43  ;;  %36233 = vst [vmem:[#allocation299_spill] sm:$0xff] %v30341_v59  ;;  %v30372_v58 = vsub.f32 %v104_v10, %v9163_v63 }
 0x4f7   :  { %9029 = vmatmul.mubr.f32.vlgmr.msra.gmra.mrb[96].mxu1 %v27502_v24  ;;  %36232 = vst [vmem:[#allocation298_spill] sm:$0xff] %v30332_v27  ;;  %v10009_v12 = vsub.f32 %v30319_v61, %v36234_v31  ;;  %25199 = vmatpush1.bf16.xpose.msra.mxu0 %v27572_v60  ;;  %v9169_v31 = vand.u32 4294901760, %v169_v0  ;;  %v36235_v60 = vand.u32 4294901760, %v30275_v6  ;;  %v30360_v27 = vpack.c.bf16 %v10004_v28, %v9992_v49 }
 0x4f8   :  { %25039 = vmatpush1.bf16.msra.mxu1 %v30066_v34  ;;  %9034 = vmatprep.mubr.f32.mxu1 %v35926_v43  ;;  %v30374_v49 = vsub.f32 %v137_v5, %v9165_v39  ;;  %v35689_v16 = vand.u32 4294901760, %v30366_v32 }
 0x4f9   :  { %25041 = vmatprep.subr.bf16.mxu1 %v30068_v7  ;;  %10524 = vmatmul.mubr.f32.gmra.mrb[4].mxu0 %v27534_v40  ;;  %v168_v7 = vld [vmem:[#allocation5 + $0x3d0] sm:$0xff]  ;;  %v10010_v34 = vand.u32 4294901760, %v10009_v12  ;;  %v9277_v59 = vsub.f32 %v30275_v6, %v36235_v60  ;;  %36237 = vst [vmem:[#allocation300_spill] sm:$0xff] %v30360_v27  ;;  %v30370_v60 = vpack.c.bf16 %v9163_v63, %v9159_v4  ;;  %v35686_v4 = vand.u32 4294901760, %v30372_v58 }
 0x4fa   :  { %10529 = vmatprep.mubr.f32.mxu0 %v35926_v43  ;;  %25201 = vmatprep.subr.bf16.mxu0 %v27606_v17  ;;  %v9171_v12 = vand.u32 4294901760, %v168_v7  ;;  %v30376_v28 = vpack.c.bf16 %v9169_v31, %v9165_v39  ;;  %v30404_v63 = vpack.c.bf16 %v30285_v23, %v30283_v26 }
 0x4fb   :  { %9036 = vmatmul.mubr.f32.gmra.mrb[98].mxu1 %v27526_v37  ;;  %v30363_v25 = vpack.c.bf16 %v10010_v34, %v9998_v18  ;;  %36239 = vst [vmem:[#allocation302_spill] sm:$0xff] %v30370_v60  ;;  %v9278_v17 = vand.u32 4294901760, %v9277_v59  ;;  %v9290_v34 = vand.u32 4294901760, %v9289_v46  ;;  %v30378_v18 = vsub.f32 %v169_v0, %v9169_v31 }
 0x4fc   :  { %9041 = vmatprep.mubr.f32.mxu1 %v35926_v43  ;;  %25043 = vmatpush1.bf16.msra.mxu1 %v30079_v41  ;;  %v136_v41 = vld [vmem:[#allocation5 + $0x2d0] sm:$0xff]  ;;  %36240 = vst [vmem:[#allocation303_spill] sm:$0xff] %v30376_v28  ;;  %v35687_v59 = vand.u32 4294901760, %v30374_v49  ;;  %v30392_v5 = vsub.f32 %v168_v7, %v9171_v12  ;;  %36244 = vst [vmem:[#allocation307_spill] sm:$0xff] %v30404_v63  ;;  %v9283_v7 = vsub.f32 %v30366_v32, %v35689_v16 }
 0x4fd   :  { %25045 = vmatprep.subr.bf16.mxu1 %v30288_v22  ;;  %36238 = vst [vmem:[#allocation301_spill] sm:$0xff] %v30363_v25  ;;  %v9167_v36 = vand.u32 4294901760, %v136_v41  ;;  %10531 = vmatmul.mubr.f32.gmra.mrb[6].mxu0 %v27595_v9  ;;  %v35688_v0 = vand.u32 4294901760, %v30378_v18 }
 0x4fe   :  { %v35694_v31 = vand.u32 4294901760, %v30392_v5  ;;  %v9301_v46 = vsub.f32 %v30374_v49, %v35687_v59 }
 0x4ff   :  { %9043 = vmatmul.mubr.f32.gmra.mrb[100].mxu1 %v27534_v40  ;;  %25203 = vmatpush1.bf16.xpose.msra.mxu0 %v27617_v21  ;;  %v30382_v44 = vpack.c.bf16 %v9171_v12, %v9167_v36  ;;  %v30390_v10 = vsub.f32 %v136_v41, %v9167_v36  ;;  %v30395_v21 = vpack.c.bf16 %v9290_v34, %v9278_v17  ;;  %v9284_v34 = vand.u32 4294901760, %v9283_v7 }
 0x500   :  { %9048 = vmatprep.mubr.f32.mxu1 %v35926_v43  ;;  %25205 = vmatprep.subr.bf16.mxu0 %v27613_v20  ;;  %v30400_v20 = vpack.c.bf16 %v30280_v29, %v30278_v51  ;;  %v9295_v41 = vsub.f32 %v30372_v58, %v35686_v4  ;;  %v9313_v36 = vsub.f32 %v30378_v18, %v35688_v0  ;;  %v9302_v16 = vand.u32 4294901760, %v9301_v46 }
 0x501   :  { %36241 = vst [vmem:[#allocation304_spill] sm:$0xff] %v30382_v44  ;;  %36242 = vst [vmem:[#allocation305_spill] sm:$0xff] %v30395_v21  ;;  %v35695_v39 = vand.u32 4294901760, %v30390_v10  ;;  %v30427_v12 = vpack.c.bf16 %v30309_v50, %v30307_v15  ;;  %v30431_v17 = vpack.c.bf16 %v30319_v61, %v30317_v42  ;;  %v9319_v0 = vsub.f32 %v30392_v5, %v35694_v31 }
 0x502   :  { %36243 = vst [vmem:[#allocation306_spill] sm:$0xff] %v30400_v20  ;;  %v9296_v4 = vand.u32 4294901760, %v9295_v41  ;;  %v30454_v46 = vpack.c.bf16 %v30296_v57, %v30275_v6 }
 0x503   :  { %9050 = vmatmul.mubr.f32.gmra.mrb[102].mxu1 %v27595_v9  ;;  %36245 = vst [vmem:[#allocation308_spill] sm:$0xff] %v30427_v12  ;;  %36246 = vst [vmem:[#allocation309_spill] sm:$0xff] %v30431_v17  ;;  %v9307_v59 = vsub.f32 %v30390_v10, %v35695_v39  ;;  %v9320_v63 = vand.u32 4294901760, %v9319_v0  ;;  %v36256_v0 = vmax.f32 %v30172_v1, %v30174_v47  ;;  %v36267_v47 = vand.u32 4294901760, %v30285_v23 }
 0x504   :  { %9128 = vmatprep.mubr.f32.mxu1 %v35926_v43  ;;  %v30442_v12 = vpack.c.bf16 %v9296_v4, %v9284_v34  ;;  %36250 = vst [vmem:[#allocation313_spill] sm:$0xff] %v30454_v46  ;;  %v30506_v39 = vpack.c.bf16 %v30378_v18, %v30374_v49  ;;  %v36264_v34 = vand.u32 4294901760, %v30280_v29  ;;  %v36270_v23 = vand.u32 4294901760, %v30307_v15 }
 0x505   :  { %v9308_v17 = vand.u32 4294901760, %v9307_v59  ;;  %v36276_v15 = vand.u32 4294901760, %v30275_v6  ;;  %v36279_v6 = vand.u32 4294901760, %v30366_v32 }
 0x506   :  { %36247 = vst [vmem:[#allocation310_spill] sm:$0xff] %v30442_v12  ;;  %36259 = vst [vmem:[#allocation319_spill] sm:$0xff] %v30506_v39 }
 0x507   :  { %9130 = vmatmul.mubr.f32.vlgmr.msra.gmra.mrb[96].mxu1 %v27502_v24  ;;  %v30449_v41 = vpack.c.bf16 %v9320_v63, %v9308_v17 }
 0x508   :  { %25047 = vmatpush1.bf16.msra.mxu1 %v30370_v60  ;;  %9135 = vmatprep.mubr.f32.mxu1 %v35926_v43 }
 0x509   :  { %25049 = vmatprep.subr.bf16.mxu1 %v30376_v28  ;;  %36249 = vst [vmem:[#allocation312_spill] sm:$0xff] %v30449_v41 }
 0x50b   :  { %9137 = vmatmul.mubr.f32.gmra.mrb[98].mxu1 %v27526_v37 }
 0x50c   :  { %9142 = vmatprep.mubr.f32.mxu1 %v35926_v43  ;;  %25051 = vmatpush1.bf16.msra.mxu1 %v30382_v44 }
 0x50d   :  { %25053 = vmatprep.subr.bf16.mxu1 %v30395_v21  ;;  %v9314_v21 = vand.u32 4294901760, %v9313_v36 }
 0x50f   :  { %9144 = vmatmul.mubr.f32.gmra.mrb[100].mxu1 %v27534_v40  ;;  %v30444_v7 = vpack.c.bf16 %v9314_v21, %v9302_v16  ;;  %v36251_v16 = vmax.f32 %v30142_v2, %v30144_v52  ;;  %v36253_v2 = vmax.f32 %v30158_v13, %v30160_v35 }
 0x510   :  { %9149 = vmatprep.mubr.f32.mxu1 %v35926_v43 }
 0x511   :  { %36248 = vst [vmem:[#allocation311_spill] sm:$0xff] %v30444_v7 }
 0x513   :  { %9151 = vmatmul.mubr.f32.gmra.mrb[102].mxu1 %v27595_v9 }
 0x514   :  { %9229 = vmatprep.mubr.f32.mxu1 %v35926_v43 }
 0x517   :  { %9235 = vmatmul.mubr.f32.vlgmr.msra.gmra.mrb[104].mxu1 %v27560_v54 }
 0x518   :  { %25055 = vmatpush1.bf16.msra.mxu1 %v30442_v12  ;;  %9240 = vmatprep.mubr.f32.mxu1 %v35926_v43 }
 0x519   :  { %25057 = vmatprep.subr.bf16.mxu1 %v30444_v7  ;;  %v36263_v7 = vand.u32 4294901760, %v30278_v51 }
 0x51a   :  { %v30456_v4 = vpop.f32.mrb[80].mxu1 }
 0x51b   :  { %v30462_v59 = vmax.f32 %v36251_v16, %v30456_v4  ;;  %v30464_v21 = vpop.f32.mrb[81].mxu1  ;;  %9246 = vmatmul.mubr.f32.gmra.mrb[106].mxu1 %v27586_v3  ;;  %v30523_v12 = vpack.c.bf16 %v36264_v34, %v36263_v7  ;;  %v36274_v7 = vand.u32 4294901760, %v30319_v61 }
 0x51c   :  { %9251 = vmatprep.mubr.f32.mxu1 %v35926_v43  ;;  %25059 = vmatpush1.bf16.msra.mxu1 %v30449_v41 }
 0x51d   :  { %25061 = vmatprep.subr.bf16.mxu1 %v30454_v46  ;;  %36265 = vst [vmem:[#allocation322_spill] sm:$0xff] %v30523_v12 }
 0x51e   :  { %v30472_v63 = vpop.f32.mrb[82].mxu1 }
 0x51f   :  { %36252 = vst [vmem:[#allocation314_spill] sm:$0xff] %v30472_v63  ;;  %v30478_v36 = vmax.f32 %v36253_v2, %v30472_v63  ;;  %v30480_v17 = vpop.f32.mrb[83].mxu1  ;;  %9257 = vmatmul.mubr.f32.gmra.mrb[108].mxu1 %v27599_v11  ;;  %v30500_v2 = vpack.c.bf16 %v30372_v58, %v30366_v32  ;;  %v36286_v32 = vand.u32 4294901760, %v30392_v5 }
 0x520   :  { %36254 = vst [vmem:[#allocation315_spill] sm:$0xff] %v30480_v17  ;;  %9262 = vmatprep.mubr.f32.mxu1 %v35926_v43 }
 0x521   :  { %36258 = vst [vmem:[#allocation318_spill] sm:$0xff] %v30500_v2 }
 0x522   :  { %v30486_v16 = vpop.f32.mrb[84].mxu1 }
 0x523   :  { %36255 = vst [vmem:[#allocation316_spill] sm:$0xff] %v30486_v16  ;;  %v30492_v31 = vmax.f32 %v36256_v0, %v30486_v16  ;;  %v30494_v13 = vpop.f32.mrb[85].mxu1  ;;  %9268 = vmatmul.mubr.f32.gmra.mrb[110].mxu1 %v27623_v33  ;;  %v36261_v0 = vmax.f32 %v30194_v62, %v30196_v56  ;;  %v36266_v16 = vand.u32 4294901760, %v30283_v26  ;;  %v30535_v62 = vpack.c.bf16 %v30392_v5, %v30390_v10  ;;  %v36292_v5 = vld [vmem:[#allocation299_spill] sm:$0xff] }
 0x524   :  { %36257 = vst [vmem:[#allocation317_spill] sm:$0xff] %v30494_v13  ;;  %9378 = vmatprep.mubr.f32.mxu1 %v35926_v43  ;;  %v36271_v26 = vand.u32 4294901760, %v30309_v50  ;;  %v36277_v50 = vand.u32 4294901760, %v30296_v57  ;;  %v36280_v57 = vand.u32 4294901760, %v30372_v58  ;;  %v36288_v58 = vld [vmem:[#allocation294_spill] sm:$0xff] }
 0x525   :  { %v30529_v63 = vpack.c.bf16 %v36267_v47, %v36266_v16  ;;  %36269 = vst [vmem:[#allocation324_spill] sm:$0xff] %v30535_v62  ;;  %v36273_v47 = vand.u32 4294901760, %v30317_v42  ;;  %v36282_v16 = vand.u32 4294901760, %v30374_v49  ;;  %v36289_v49 = vld [vmem:[#allocation295_spill] sm:$0xff] }
 0x526   :  { %v30508_v1 = vpop.f32.mrb[86].mxu1  ;;  %v30549_v29 = vpack.c.bf16 %v36271_v26, %v36270_v23  ;;  %v30568_v42 = vpack.c.bf16 %v36277_v50, %v36276_v15  ;;  %v30582_v61 = vpack.c.bf16 %v36280_v57, %v36279_v6  ;;  %v36285_v26 = vand.u32 4294901760, %v30390_v10  ;;  %v36291_v10 = vld [vmem:[#allocation298_spill] sm:$0xff] }
 0x527   :  { %36260 = vst [vmem:[#allocation320_spill] sm:$0xff] %v30508_v1  ;;  %v30514_v46 = vmax.f32 %v36261_v0, %v30508_v1  ;;  %v30516_v41 = vpop.f32.mrb[87].mxu1  ;;  %9380 = vmatmul.mubr.f32.vlgmr.msra.gmra.mrb[104].mxu1 %v27502_v24  ;;  %36268 = vst [vmem:[#allocation323_spill] sm:$0xff] %v30529_v63  ;;  %v30555_v34 = vpack.c.bf16 %v36274_v7, %v36273_v47  ;;  %v36283_v0 = vand.u32 4294901760, %v30378_v18  ;;  %v36290_v18 = vld [vmem:[#allocation296_spill] sm:$0xff] }
 0x528   :  { %36262 = vst [vmem:[#allocation321_spill] sm:$0xff] %v30516_v41  ;;  %25063 = vmatpush1.bf16.msra.mxu1 %v30500_v2  ;;  %9385 = vmatprep.mubr.f32.mxu1 %v35926_v43  ;;  %36272 = vst [vmem:[#allocation325_spill] sm:$0xff] %v30549_v29  ;;  %v30597_v47 = vpack.c.bf16 %v36286_v32, %v36285_v26  ;;  %v36293_v15 = vmax.f32 %v30462_v59, %v30464_v21 }
 0x529   :  { %25065 = vmatprep.subr.bf16.mxu1 %v30506_v39  ;;  %36275 = vst [vmem:[#allocation326_spill] sm:$0xff] %v30555_v34  ;;  %36278 = vst [vmem:[#allocation327_spill] sm:$0xff] %v30568_v42  ;;  %v30588_v23 = vpack.c.bf16 %v36283_v0, %v36282_v16  ;;  %v36295_v59 = vmax.f32 %v30478_v36, %v30480_v17  ;;  %v36298_v57 = vmax.f32 %v30492_v31, %v30494_v13 }
 0x52a   :  { %36281 = vst [vmem:[#allocation328_spill] sm:$0xff] %v30582_v61  ;;  %36287 = vst [vmem:[#allocation330_spill] sm:$0xff] %v30597_v47  ;;  %v36301_v32 = vmax.f32 %v30514_v46, %v30516_v41  ;;  %v36305_v46 = vld [vmem:[#allocation309_spill] sm:$0xff] }
 0x52b   :  { %9387 = vmatmul.mubr.f32.gmra.mrb[106].mxu1 %v27526_v37  ;;  %36284 = vst [vmem:[#allocation329_spill] sm:$0xff] %v30588_v23 }
 0x52c   :  { %9392 = vmatprep.mubr.f32.mxu1 %v35926_v43  ;;  %25067 = vmatpush1.bf16.msra.mxu1 %v30535_v62 }
 0x52d   :  { %25069 = vmatprep.subr.bf16.mxu1 %v30288_v22 }
 0x52f   :  { %9394 = vmatmul.mubr.f32.gmra.mrb[108].mxu1 %v27534_v40 }
 0x530   :  { %9399 = vmatprep.mubr.f32.mxu1 %v35926_v43 }
 0x533   :  { %9401 = vmatmul.mubr.f32.gmra.mrb[110].mxu1 %v27595_v9 }
 0x534   :  { %9487 = vmatprep.mubr.f32.mxu1 %v35926_v43 }
 0x537   :  { %9490 = vmatmul.mubr.f32.vlgmr.msra.gmra.mrb[104].mxu1 %v27517_v30 }
 0x538   :  { %25071 = vmatpush1.bf16.msra.mxu1 %v30370_v60  ;;  %9495 = vmatprep.mubr.f32.mxu1 %v35926_v43 }
 0x539   :  { %25073 = vmatprep.subr.bf16.mxu1 %v30376_v28 }
 0x53b   :  { %9498 = vmatmul.mubr.f32.gmra.mrb[106].mxu1 %v27548_v45 }
 0x53c   :  { %9503 = vmatprep.mubr.f32.mxu1 %v35926_v43  ;;  %25075 = vmatpush1.bf16.msra.mxu1 %v30382_v44 }
 0x53d   :  { %25077 = vmatprep.subr.bf16.mxu1 %v30568_v42 }
 0x53f   :  { %9506 = vmatmul.mubr.f32.gmra.mrb[108].mxu1 %v27554_v48 }
 0x540   :  { %9511 = vmatprep.mubr.f32.mxu1 %v35926_v43 }
 0x543   :  { %9514 = vmatmul.mubr.f32.gmra.mrb[110].mxu1 %v27603_v14 }
 0x544   :  { %9592 = vmatprep.mubr.f32.mxu1 %v35926_v43 }
 0x547   :  { %9596 = vmatmul.mubr.f32.vlgmr.msra.gmra.mrb[104].mxu1 %v27529_v38 }
 0x548   :  { %25079 = vmatpush1.bf16.msra.mxu1 %v30582_v61  ;;  %9601 = vmatprep.mubr.f32.mxu1 %v35926_v43 }
 0x549   :  { %25081 = vmatprep.subr.bf16.mxu1 %v30588_v23 }
 0x54b   :  { %9605 = vmatmul.mubr.f32.gmra.mrb[106].mxu1 %v27558_v53 }
 0x54c   :  { %9610 = vmatprep.mubr.f32.mxu1 %v35926_v43  ;;  %25083 = vmatpush1.bf16.msra.mxu1 %v30597_v47 }
 0x54d   :  { %25085 = vmatprep.subr.bf16.mxu1 %v30288_v22 }
 0x54f   :  { %9614 = vmatmul.mubr.f32.gmra.mrb[108].mxu1 %v27563_v55 }
 0x550   :  { %9619 = vmatprep.mubr.f32.mxu1 %v35926_v43 }
 0x553   :  { %9623 = vmatmul.mubr.f32.gmra.mrb[110].mxu1 %v27609_v19 }
 0x554   :  { %9717 = vmatprep.mubr.f32.mxu1 %v35926_v43 }
 0x557   :  { %9719 = vmatmul.mubr.f32.vlgmr.msra.gmra.mrb[104].mxu1 %v27502_v24 }
 0x558   :  { %25087 = vmatpush1.bf16.msra.mxu1 %v30370_v60  ;;  %9724 = vmatprep.mubr.f32.mxu1 %v35926_v43 }
 0x559   :  { %25089 = vmatprep.subr.bf16.mxu1 %v30376_v28 }
 0x55b   :  { %9726 = vmatmul.mubr.f32.gmra.mrb[106].mxu1 %v27526_v37 }
 0x55c   :  { %9731 = vmatprep.mubr.f32.mxu1 %v35926_v43  ;;  %25091 = vmatpush1.bf16.msra.mxu1 %v30382_v44 }
 0x55d   :  { %25093 = vmatprep.subr.bf16.mxu1 %v30257_v8 }
 0x55f   :  { %9733 = vmatmul.mubr.f32.gmra.mrb[108].mxu1 %v27534_v40 }
 0x560   :  { %9738 = vmatprep.mubr.f32.mxu1 %v35926_v43 }
 0x563   :  { %9740 = vmatmul.mubr.f32.gmra.mrb[110].mxu1 %v27595_v9 }
 0x564   :  { %9818 = vmatprep.mubr.f32.mxu1 %v35926_v43 }
 0x567   :  { %9820 = vmatmul.mubr.f32.vlgmr.msra.gmra.mrb[104].mxu1 %v27502_v24 }
 0x568   :  { %25095 = vmatpush1.bf16.msra.mxu1 %v36288_v58  ;;  %9825 = vmatprep.mubr.f32.mxu1 %v35926_v43 }
 0x569   :  { %25097 = vmatprep.subr.bf16.mxu1 %v36289_v49 }
 0x56b   :  { %9827 = vmatmul.mubr.f32.gmra.mrb[106].mxu1 %v27526_v37 }
 0x56c   :  { %9832 = vmatprep.mubr.f32.mxu1 %v35926_v43  ;;  %25099 = vmatpush1.bf16.msra.mxu1 %v36290_v18 }
 0x56d   :  { %25101 = vmatprep.subr.bf16.mxu1 %v36291_v10  ;;  %v76_v10 = vld [vmem:[#allocation5 + $0xf0] sm:$0xff] }
 0x56f   :  { %9834 = vmatmul.mubr.f32.gmra.mrb[108].mxu1 %v27534_v40 }
 0x570   :  { %9839 = vmatprep.mubr.f32.mxu1 %v35926_v43 }
 0x573   :  { %9841 = vmatmul.mubr.f32.gmra.mrb[110].mxu1 %v27595_v9 }
 0x574   :  { %9919 = vmatprep.mubr.f32.mxu1 %v35926_v43 }
 0x577   :  { %9925 = vmatmul.mubr.f32.vlgmr.msra.gmra.mrb[112].mxu1 %v27560_v54 }
 0x578   :  { %25103 = vmatpush1.bf16.msra.mxu1 %v36292_v5  ;;  %9930 = vmatprep.mubr.f32.mxu1 %v35926_v43 }
 0x579   :  { %25105 = vmatprep.subr.bf16.mxu1 %v30360_v27  ;;  %v109_v27 = vld [vmem:[#allocation5 + $0x1f8] sm:$0xff] }
 0x57a   :  { %v30636_v7 = vpop.f32.mrb[88].mxu1 }
 0x57b   :  { %v30642_v50 = vmax.f32 %v36293_v15, %v30636_v7  ;;  %v30644_v6 = vpop.f32.mrb[89].mxu1  ;;  %9936 = vmatmul.mubr.f32.gmra.mrb[114].mxu1 %v27586_v3 }
 0x57c   :  { %9941 = vmatprep.mubr.f32.mxu1 %v35926_v43  ;;  %25107 = vmatpush1.bf16.msra.mxu1 %v30363_v25 }
 0x57d   :  { %25109 = vmatprep.subr.bf16.mxu1 %v30400_v20 }
 0x57e   :  { %v30652_v16 = vpop.f32.mrb[90].mxu1 }
 0x57f   :  { %36294 = vst [vmem:[#allocation331_spill] sm:$0xff] %v30652_v16  ;;  %v30658_v0 = vmax.f32 %v36295_v59, %v30652_v16  ;;  %v30660_v26 = vpop.f32.mrb[91].mxu1  ;;  %9947 = vmatmul.mubr.f32.gmra.mrb[116].mxu1 %v27599_v11  ;;  %v36304_v59 = vld [vmem:[#allocation308_spill] sm:$0xff]  ;;  %v36384_v16 = vld [vmem:[#allocation66_spill] sm:$0xff] }
 0x580   :  { %36296 = vst [vmem:[#allocation332_spill] sm:$0xff] %v30660_v26  ;;  %9952 = vmatprep.mubr.f32.mxu1 %v35926_v43 }
 0x582   :  { %v30666_v15 = vpop.f32.mrb[92].mxu1 }
 0x583   :  { %36297 = vst [vmem:[#allocation333_spill] sm:$0xff] %v30666_v15  ;;  %v30672_v51 = vmax.f32 %v36298_v57, %v30666_v15  ;;  %v30674_v36 = vpop.f32.mrb[93].mxu1  ;;  %9958 = vmatmul.mubr.f32.gmra.mrb[118].mxu1 %v27623_v33  ;;  %v36303_v57 = vld [vmem:[#allocation307_spill] sm:$0xff] }
 0x584   :  { %36299 = vst [vmem:[#allocation334_spill] sm:$0xff] %v30674_v36  ;;  %10068 = vmatprep.mubr.f32.mxu1 %v35926_v43 }
 0x586   :  { %v30680_v20 = vpop.f32.mrb[94].mxu1 }
 0x587   :  { %36300 = vst [vmem:[#allocation335_spill] sm:$0xff] %v30680_v20  ;;  %v30686_v25 = vmax.f32 %v36301_v32, %v30680_v20  ;;  %v30688_v31 = vpop.f32.mrb[95].mxu1  ;;  %10070 = vmatmul.mubr.f32.vlgmr.msra.gmra.mrb[112].mxu1 %v27502_v24  ;;  %v77_v32 = vld [vmem:[#allocation5 + $0xf8] sm:$0xff] }
 0x588   :  { %36302 = vst [vmem:[#allocation336_spill] sm:$0xff] %v30688_v31  ;;  %25111 = vmatpush1.bf16.msra.mxu1 %v36303_v57  ;;  %10075 = vmatprep.mubr.f32.mxu1 %v35926_v43 }
 0x589   :  { %25113 = vmatprep.subr.bf16.mxu1 %v36304_v59  ;;  %v10541_v59 = vand.u32 4294901760, %v109_v27 }
 0x58b   :  { %10077 = vmatmul.mubr.f32.gmra.mrb[114].mxu1 %v27526_v37  ;;  %v30724_v5 = vsub.f32 %v109_v27, %v10541_v59  ;;  %v10539_v27 = vand.u32 4294901760, %v76_v10 }
 0x58c   :  { %10082 = vmatprep.mubr.f32.mxu1 %v35926_v43  ;;  %25115 = vmatpush1.bf16.msra.mxu1 %v36305_v46  ;;  %v10537_v46 = vand.u32 4294901760, %v77_v32 }
 0x58d   :  { %25117 = vmatprep.subr.bf16.mxu1 %v30257_v8  ;;  %v140_v8 = vld [vmem:[#allocation5 + $0x2f0] sm:$0xff]  ;;  %v30746_v2 = vsub.f32 %v76_v10, %v10539_v27 }
 0x58e   :  { %v30722_v57 = vsub.f32 %v77_v32, %v10537_v46  ;;  %v10547_v61 = vand.u32 4294901760, %v140_v8 }
 0x58f   :  { %10084 = vmatmul.mubr.f32.gmra.mrb[116].mxu1 %v27534_v40  ;;  %v35737_v20 = vand.u32 4294901760, %v30746_v2 }
 0x590   :  { %10089 = vmatprep.mubr.f32.mxu1 %v35926_v43 }
 0x593   :  { %10091 = vmatmul.mubr.f32.gmra.mrb[118].mxu1 %v27595_v9 }
 0x594   :  { %10177 = vmatprep.mubr.f32.mxu1 %v35926_v43 }
 0x597   :  { %10180 = vmatmul.mubr.f32.vlgmr.msra.gmra.mrb[112].mxu1 %v27517_v30 }
 0x598   :  { %25119 = vmatpush1.bf16.msra.mxu1 %v36288_v58  ;;  %10185 = vmatprep.mubr.f32.mxu1 %v35926_v43  ;;  %v35732_v58 = vand.u32 4294901760, %v30724_v5 }
 0x599   :  { %25121 = vmatprep.subr.bf16.mxu1 %v36289_v49  ;;  %v173_v49 = vld [vmem:[#allocation5 + $0x3f8] sm:$0xff] }
 0x59a   :  { %v10549_v32 = vand.u32 4294901760, %v173_v49  ;;  %v10669_v23 = vsub.f32 %v30724_v5, %v35732_v58 }
 0x59b   :  { %10188 = vmatmul.mubr.f32.gmra.mrb[114].mxu1 %v27548_v45 }
 0x59c   :  { %10193 = vmatprep.mubr.f32.mxu1 %v35926_v43  ;;  %25123 = vmatpush1.bf16.msra.mxu1 %v36290_v18  ;;  %v141_v18 = vld [vmem:[#allocation5 + $0x2f8] sm:$0xff]  ;;  %v30752_v22 = vsub.f32 %v173_v49, %v10549_v32 }
 0x59d   :  { %25125 = vmatprep.subr.bf16.mxu1 %v30523_v12  ;;  %v30720_v12 = vpack.c.bf16 %v10541_v59, %v10537_v46  ;;  %v10545_v46 = vand.u32 4294901760, %v141_v18 }
 0x59f   :  { %10196 = vmatmul.mubr.f32.gmra.mrb[116].mxu1 %v27554_v48  ;;  %36306 = vst [vmem:[#allocation337_spill] sm:$0xff] %v30720_v12  ;;  %v30744_v39 = vpack.c.bf16 %v10549_v32, %v10545_v46  ;;  %v30750_v60 = vsub.f32 %v141_v18, %v10545_v46  ;;  %v35736_v18 = vand.u32 4294901760, %v30752_v22 }
 0x5a0   :  { %10201 = vmatprep.mubr.f32.mxu1 %v35926_v43 }
 0x5a1   :  { %36308 = vst [vmem:[#allocation339_spill] sm:$0xff] %v30744_v39  ;;  %v35735_v49 = vand.u32 4294901760, %v30750_v60 }
 0x5a3   :  { %10204 = vmatmul.mubr.f32.gmra.mrb[118].mxu1 %v27603_v14 }
 0x5a4   :  { %10282 = vmatprep.mubr.f32.mxu1 %v35926_v43 }
 0x5a7   :  { %10286 = vmatmul.mubr.f32.vlgmr.msra.gmra.mrb[112].mxu1 %v27529_v38 }
 0x5a8   :  { %25127 = vmatpush1.bf16.msra.mxu1 %v30529_v63  ;;  %10291 = vmatprep.mubr.f32.mxu1 %v35926_v43  ;;  %v108_v63 = vld [vmem:[#allocation5 + $0x1f0] sm:$0xff] }
 0x5a9   :  { %25129 = vmatprep.subr.bf16.mxu1 %v30549_v29  ;;  %v35727_v29 = vand.u32 4294901760, %v30722_v57  ;;  %v10543_v59 = vand.u32 4294901760, %v108_v63 }
 0x5ab   :  { %10295 = vmatmul.mubr.f32.gmra.mrb[114].mxu1 %v27558_v53  ;;  %v10657_v47 = vsub.f32 %v30722_v57, %v35727_v29  ;;  %v30742_v62 = vpack.c.bf16 %v10543_v59, %v10539_v27  ;;  %v30748_v44 = vsub.f32 %v108_v63, %v10543_v59  ;;  %v10670_v29 = vand.u32 4294901760, %v10669_v23 }
 0x5ac   :  { %10300 = vmatprep.mubr.f32.mxu1 %v35926_v43  ;;  %25131 = vmatpush1.bf16.msra.mxu1 %v30555_v34  ;;  %v172_v34 = vld [vmem:[#allocation5 + $0x3f0] sm:$0xff]  ;;  %v30761_v63 = vsub.f32 %v140_v8, %v10547_v61  ;;  %v10663_v8 = vsub.f32 %v30746_v2, %v35737_v20 }
 0x5ad   :  { %25141 = vmatprep.subr.bf16.mxu1 %v30720_v12  ;;  %v10551_v42 = vand.u32 4294901760, %v172_v34  ;;  %36307 = vst [vmem:[#allocation338_spill] sm:$0xff] %v30742_v62  ;;  %v10658_v28 = vand.u32 4294901760, %v10657_v47  ;;  %v35734_v10 = vand.u32 4294901760, %v30748_v44 }
 0x5ae   :  { %v10664_v27 = vand.u32 4294901760, %v10663_v8 }
 0x5af   :  { %10304 = vmatmul.mubr.f32.gmra.mrb[116].mxu1 %v27563_v55  ;;  %v30755_v58 = vpack.c.bf16 %v10551_v42, %v10547_v61  ;;  %v30763_v47 = vsub.f32 %v172_v34, %v10551_v42  ;;  %v30766_v23 = vpack.c.bf16 %v10670_v29, %v10658_v28  ;;  %v10675_v34 = vsub.f32 %v30748_v44, %v35734_v10 }
 0x5b0   :  { %10309 = vmatprep.mubr.f32.mxu1 %v35926_v43  ;;  %v35740_v28 = vand.u32 4294901760, %v30761_v63  ;;  %v10681_v42 = vsub.f32 %v30750_v60, %v35735_v49  ;;  %v10693_v61 = vsub.f32 %v30752_v22, %v35736_v18 }
 0x5b1   :  { %36309 = vst [vmem:[#allocation340_spill] sm:$0xff] %v30755_v58  ;;  %36310 = vst [vmem:[#allocation341_spill] sm:$0xff] %v30766_v23  ;;  %v35739_v29 = vand.u32 4294901760, %v30763_v47  ;;  %v10676_v59 = vand.u32 4294901760, %v10675_v34 }
 0x5b2   :  { %v10687_v46 = vsub.f32 %v30761_v63, %v35740_v28  ;;  %v10682_v10 = vand.u32 4294901760, %v10681_v42  ;;  %v10694_v49 = vand.u32 4294901760, %v10693_v61  ;;  %v30810_v42 = vpack.c.bf16 %v30724_v5, %v30722_v57 }
 0x5b3   :  { %10313 = vmatmul.mubr.f32.gmra.mrb[118].mxu1 %v27609_v19  ;;  %v10699_v32 = vsub.f32 %v30763_v47, %v35739_v29  ;;  %v30798_v18 = vpack.c.bf16 %v10676_v59, %v10664_v27 }
 0x5b4   :  { %10407 = vmatprep.mubr.f32.mxu1 %v35926_v43  ;;  %v10688_v20 = vand.u32 4294901760, %v10687_v46  ;;  %v30800_v8 = vpack.c.bf16 %v10694_v49, %v10682_v10  ;;  %36314 = vst [vmem:[#allocation345_spill] sm:$0xff] %v30810_v42  ;;  %v36326_v46 = vmax.f32 %v30686_v25, %v30688_v31  ;;  %v36371_v31 = vld [vmem:[#allocation112_spill] sm:$0xff] }
 0x5b5   :  { %36311 = vst [vmem:[#allocation342_spill] sm:$0xff] %v30798_v18 }
 0x5b6   :  { %36312 = vst [vmem:[#allocation343_spill] sm:$0xff] %v30800_v8 }
 0x5b7   :  { %10409 = vmatmul.mubr.f32.vlgmr.msra.gmra.mrb[112].mxu1 %v27502_v24 }
 0x5b8   :  { %25143 = vmatpush1.bf16.msra.mxu1 %v30742_v62  ;;  %10414 = vmatprep.mubr.f32.mxu1 %v35926_v43 }
 0x5b9   :  { %25145 = vmatprep.subr.bf16.mxu1 %v30744_v39 }
 0x5bb   :  { %10416 = vmatmul.mubr.f32.gmra.mrb[114].mxu1 %v27526_v37 }
 0x5bc   :  { %10421 = vmatprep.mubr.f32.mxu1 %v35926_v43  ;;  %25147 = vmatpush1.bf16.msra.mxu1 %v30755_v58 }
 0x5bd   :  { %25149 = vmatprep.subr.bf16.mxu1 %v30766_v23  ;;  %v10700_v23 = vand.u32 4294901760, %v10699_v32 }
 0x5bf   :  { %10423 = vmatmul.mubr.f32.gmra.mrb[116].mxu1 %v27534_v40  ;;  %v30805_v34 = vpack.c.bf16 %v10700_v23, %v10688_v20  ;;  %v36318_v20 = vmax.f32 %v30642_v50, %v30644_v6  ;;  %v36320_v50 = vmax.f32 %v30658_v0, %v30660_v26  ;;  %v36383_v26 = vld [vmem:[#allocation65_spill] sm:$0xff] }
 0x5c0   :  { %10428 = vmatprep.mubr.f32.mxu1 %v35926_v43 }
 0x5c1   :  { %36313 = vst [vmem:[#allocation344_spill] sm:$0xff] %v30805_v34 }
 0x5c3   :  { %10430 = vmatmul.mubr.f32.gmra.mrb[118].mxu1 %v27595_v9 }
 0x5c4   :  { %10609 = vmatprep.mubr.f32.mxu1 %v35926_v43 }
 0x5c7   :  { %10615 = vmatmul.mubr.f32.vlgmr.msra.gmra.mrb[120].mxu1 %v27560_v54  ;;  %v30822_v54 = vpack.c.bf16 %v30748_v44, %v30746_v2 }
 0x5c8   :  { %25151 = vmatpush1.bf16.msra.mxu1 %v30798_v18  ;;  %10620 = vmatprep.mubr.f32.mxu1 %v35926_v43 }
 0x5c9   :  { %25153 = vmatprep.subr.bf16.mxu1 %v30800_v8  ;;  %36315 = vst [vmem:[#allocation346_spill] sm:$0xff] %v30822_v54 }
 0x5cb   :  { %10626 = vmatmul.mubr.f32.gmra.mrb[122].mxu1 %v27586_v3  ;;  %v30826_v3 = vpack.c.bf16 %v30752_v22, %v30750_v60 }
 0x5cc   :  { %10631 = vmatprep.mubr.f32.mxu1 %v35926_v43  ;;  %25155 = vmatpush1.bf16.msra.mxu1 %v30805_v34 }
 0x5cd   :  { %25157 = vmatprep.subr.bf16.mxu1 %v30810_v42  ;;  %36316 = vst [vmem:[#allocation347_spill] sm:$0xff] %v30826_v3 }
 0x5cf   :  { %10637 = vmatmul.mubr.f32.gmra.mrb[124].mxu1 %v27599_v11  ;;  %v30833_v11 = vpack.c.bf16 %v30763_v47, %v30761_v63 }
 0x5d0   :  { %10642 = vmatprep.mubr.f32.mxu1 %v35926_v43 }
 0x5d1   :  { %36317 = vst [vmem:[#allocation348_spill] sm:$0xff] %v30833_v11 }
 0x5d3   :  { %10648 = vmatmul.mubr.f32.gmra.mrb[126].mxu1 %v27623_v33 }
 0x5d4   :  { %10758 = vmatprep.mubr.f32.mxu1 %v35926_v43 }
 0x5d7   :  { %10760 = vmatmul.mubr.f32.vlgmr.msra.gmra.mrb[120].mxu1 %v27502_v24 }
 0x5d8   :  { %25159 = vmatpush1.bf16.msra.mxu1 %v30822_v54  ;;  %10765 = vmatprep.mubr.f32.mxu1 %v35926_v43 }
 0x5d9   :  { %25161 = vmatprep.subr.bf16.mxu1 %v30826_v3 }
 0x5da   :  { %v30836_v33 = vpop.f32.mrb[96].mxu1 }
 0x5db   :  { %v30842_v10 = vmax.f32 %v36318_v20, %v30836_v33  ;;  %v30844_v23 = vpop.f32.mrb[97].mxu1  ;;  %10767 = vmatmul.mubr.f32.gmra.mrb[122].mxu1 %v27526_v37  ;;  %v36323_v20 = vmax.f32 %v30672_v51, %v30674_v36  ;;  %v36374_v36 = vld [vmem:[#allocation159_spill] sm:$0xff] }
 0x5dc   :  { %10772 = vmatprep.mubr.f32.mxu1 %v35926_v43  ;;  %25163 = vmatpush1.bf16.msra.mxu1 %v30833_v11  ;;  %v36329_v11 = vand.u32 4294901760, %v30724_v5  ;;  %v36332_v5 = vand.u32 4294901760, %v30748_v44 }
 0x5dd   :  { %25165 = vmatprep.subr.bf16.mxu1 %v30720_v12 }
 0x5de   :  { %v30852_v61 = vpop.f32.mrb[98].mxu1 }
 0x5df   :  { %36319 = vst [vmem:[#allocation349_spill] sm:$0xff] %v30852_v61  ;;  %v30858_v27 = vmax.f32 %v36320_v50, %v30852_v61  ;;  %v30860_v59 = vpop.f32.mrb[99].mxu1  ;;  %10774 = vmatmul.mubr.f32.gmra.mrb[124].mxu1 %v27534_v40  ;;  %v36328_v50 = vand.u32 4294901760, %v30722_v57 }
 0x5e0   :  { %36321 = vst [vmem:[#allocation350_spill] sm:$0xff] %v30860_v59  ;;  %10779 = vmatprep.mubr.f32.mxu1 %v35926_v43 }
 0x5e1   :  { %v30900_v25 = vpack.c.bf16 %v36329_v11, %v36328_v50  ;;  %v36335_v11 = vand.u32 4294901760, %v30752_v22  ;;  %v10511_v22 = vpop.f32.mrb[0].mxu0  ;;  %v36341_v50 = vld [vmem:[#allocation12_spill] sm:$0xff] }
 0x5e2   :  { %v30866_v32 = vpop.f32.mrb[100].mxu1 }
 0x5e3   :  { %36322 = vst [vmem:[#allocation351_spill] sm:$0xff] %v30866_v32  ;;  %v30872_v49 = vmax.f32 %v36323_v20, %v30866_v32  ;;  %v30874_v0 = vpop.f32.mrb[101].mxu1  ;;  %10781 = vmatmul.mubr.f32.gmra.mrb[126].mxu1 %v27595_v9  ;;  %36330 = vst [vmem:[#allocation355_spill] sm:$0xff] %v30900_v25 }
 0x5e4   :  { %36324 = vst [vmem:[#allocation352_spill] sm:$0xff] %v30874_v0  ;;  %10867 = vmatprep.mubr.f32.mxu1 %v35926_v43 }
 0x5e6   :  { %v30880_v29 = vpop.f32.mrb[102].mxu1 }
 0x5e7   :  { %36325 = vst [vmem:[#allocation353_spill] sm:$0xff] %v30880_v29  ;;  %v30886_v28 = vmax.f32 %v36326_v46, %v30880_v29  ;;  %v30888_v51 = vpop.f32.mrb[103].mxu1  ;;  %10870 = vmatmul.mubr.f32.vlgmr.msra.gmra.mrb[120].mxu1 %v27517_v30  ;;  %v36331_v30 = vand.u32 4294901760, %v30746_v2 }
 0x5e8   :  { %36327 = vst [vmem:[#allocation354_spill] sm:$0xff] %v30888_v51  ;;  %25167 = vmatpush1.bf16.msra.mxu1 %v30742_v62  ;;  %10875 = vmatprep.mubr.f32.mxu1 %v35926_v43 }
 0x5e9   :  { %25169 = vmatprep.subr.bf16.mxu1 %v30744_v39  ;;  %v30914_v57 = vpack.c.bf16 %v36332_v5, %v36331_v30  ;;  %v36342_v30 = vld [vmem:[#allocation13_spill] sm:$0xff]  ;;  %v36343_v5 = vld [vmem:[#allocation14_spill] sm:$0xff] }
 0x5eb   :  { %10878 = vmatmul.mubr.f32.gmra.mrb[122].mxu1 %v27548_v45  ;;  %36333 = vst [vmem:[#allocation356_spill] sm:$0xff] %v30914_v57  ;;  %v36334_v45 = vand.u32 4294901760, %v30750_v60 }
 0x5ec   :  { %10883 = vmatprep.mubr.f32.mxu1 %v35926_v43  ;;  %25171 = vmatpush1.bf16.msra.mxu1 %v30755_v58 }
 0x5ed   :  { %25173 = vmatprep.subr.bf16.mxu1 %v30900_v25  ;;  %v30920_v46 = vpack.c.bf16 %v36335_v11, %v36334_v45  ;;  %v36344_v45 = vmax.f32 %v30842_v10, %v30844_v23  ;;  %v36349_v10 = vmax.f32 %v30872_v49, %v30874_v0 }
 0x5ef   :  { %10886 = vmatmul.mubr.f32.gmra.mrb[124].mxu1 %v27554_v48  ;;  %36336 = vst [vmem:[#allocation357_spill] sm:$0xff] %v30920_v46  ;;  %v36337_v48 = vand.u32 4294901760, %v30761_v63 }
 0x5f0   :  { %10891 = vmatprep.mubr.f32.mxu1 %v35926_v43 }
 0x5f3   :  { %10894 = vmatmul.mubr.f32.gmra.mrb[126].mxu1 %v27603_v14  ;;  %v36338_v14 = vand.u32 4294901760, %v30763_v47 }
 0x5f4   :  { %10972 = vmatprep.mubr.f32.mxu1 %v35926_v43 }
 0x5f5   :  { %v30929_v2 = vpack.c.bf16 %v36338_v14, %v36337_v48 }
 0x5f7   :  { %10976 = vmatmul.mubr.f32.vlgmr.msra.gmra.mrb[120].mxu1 %v27529_v38  ;;  %36339 = vst [vmem:[#allocation358_spill] sm:$0xff] %v30929_v2  ;;  %v10513_v38 = vpop.f32.mrb[1].mxu0 }
 0x5f8   :  { %25175 = vmatpush1.bf16.msra.mxu1 %v30914_v57  ;;  %10981 = vmatprep.mubr.f32.mxu1 %v35926_v43 }
 0x5f9   :  { %25177 = vmatprep.subr.bf16.mxu1 %v30920_v46 }
 0x5fb   :  { %10985 = vmatmul.mubr.f32.gmra.mrb[122].mxu1 %v27558_v53  ;;  %v36340_v53 = vld [vmem:[#allocation11_spill] sm:$0xff] }
 0x5fc   :  { %10990 = vmatprep.mubr.f32.mxu1 %v35926_v43  ;;  %25179 = vmatpush1.bf16.msra.mxu1 %v30929_v2 }
 0x5fd   :  { %25181 = vmatprep.subr.bf16.mxu1 %v30720_v12 }
 0x5ff   :  { %10994 = vmatmul.mubr.f32.gmra.mrb[124].mxu1 %v27563_v55  ;;  %v10518_v55 = vpop.f32.mrb[2].mxu0 }
 0x600   :  { %10999 = vmatprep.mubr.f32.mxu1 %v35926_v43 }
 0x603   :  { %11003 = vmatmul.mubr.f32.gmra.mrb[126].mxu1 %v27609_v19  ;;  %v10520_v19 = vpop.f32.mrb[3].mxu0 }
 0x604   :  { %11097 = vmatprep.mubr.f32.mxu1 %v35926_v43  ;;  %v10525_v60 = vpop.f32.mrb[4].mxu0 }
 0x605   :  { %v10527_v44 = vpop.f32.mrb[5].mxu0 }
 0x606   :  { %v10532_v63 = vpop.f32.mrb[6].mxu0 }
 0x607   :  { %11099 = vmatmul.mubr.f32.vlgmr.msra.gmra.mrb[120].mxu1 %v27502_v24  ;;  %v10534_v47 = vpop.f32.mrb[7].mxu0 }
 0x608   :  { %25183 = vmatpush1.bf16.msra.mxu1 %v30742_v62  ;;  %11104 = vmatprep.mubr.f32.mxu1 %v35926_v43 }
 0x609   :  { %25185 = vmatprep.subr.bf16.mxu1 %v30744_v39 }
 0x60b   :  { %11106 = vmatmul.mubr.f32.gmra.mrb[122].mxu1 %v27526_v37 }
 0x60c   :  { %11111 = vmatprep.mubr.f32.mxu1 %v35926_v43  ;;  %25187 = vmatpush1.bf16.msra.mxu1 %v30755_v58 }
 0x60d   :  { %25189 = vmatprep.subr.bf16.mxu1 %v36340_v53 }
 0x60f   :  { %11113 = vmatmul.mubr.f32.gmra.mrb[124].mxu1 %v27534_v40 }
 0x610   :  { %11118 = vmatprep.mubr.f32.mxu1 %v35926_v43 }
 0x613   :  { %11120 = vmatmul.mubr.f32.gmra.mrb[126].mxu1 %v27595_v9 }
 0x614   :  { %11198 = vmatprep.mubr.f32.mxu1 %v35926_v43 }
 0x617   :  { %11200 = vmatmul.mubr.f32.vlgmr.msra.gmra.mrb[120].mxu1 %v27502_v24 }
 0x618   :  { %11205 = vmatprep.mubr.f32.mxu1 %v35926_v43  ;;  %25191 = vmatpush1.bf16.xpose.msra.mxu1 %v36341_v50 }
 0x619   :  { %25193 = vmatprep.subr.bf16.mxu1 %v36342_v30 }
 0x61b   :  { %11207 = vmatmul.mubr.f32.gmra.mrb[122].mxu1 %v27526_v37 }
 0x61c   :  { %11212 = vmatprep.mubr.f32.mxu1 %v35926_v43 }
 0x61f   :  { %11214 = vmatmul.mubr.f32.gmra.mrb[124].mxu1 %v27534_v40  ;;  %v36346_v40 = vmax.f32 %v30858_v27, %v30860_v59  ;;  %v36352_v27 = vmax.f32 %v30886_v28, %v30888_v51 }
 0x620   :  { %11219 = vmatprep.mubr.f32.mxu1 %v35926_v43  ;;  %25195 = vmatpush1.bf16.xpose.msra.mxu1 %v36343_v5 }
 0x623   :  { %11221 = vmatmul.mubr.f32.gmra.mrb[126].mxu1 %v27595_v9 }
 0x63a   :  { %v30962_v24 = vpop.f32.mrb[104].mxu1 }
 0x63b   :  { %v11252_v11 = vmax.f32 %v36344_v45, %v30962_v24  ;;  %v30968_v48 = vpop.f32.mrb[105].mxu1 }
 0x63d   :  { %v11253_v37 = vmax.f32 %v11252_v11, %v30968_v48 }
 0x63e   :  { %v30971_v14 = vpop.f32.mrb[106].mxu1 }
 0x63f   :  { %36345 = vst [vmem:[#allocation359_spill] sm:$0xff] %v30971_v14  ;;  %v11285_v20 = vmax.f32 %v36346_v40, %v30971_v14  ;;  %v30977_v2 = vpop.f32.mrb[107].mxu1  ;;  %v36382_v14 = vld [vmem:[#allocation255_spill] sm:$0xff] }
 0x640   :  { %36347 = vst [vmem:[#allocation360_spill] sm:$0xff] %v30977_v2 }
 0x641   :  { %v11286_v9 = vmax.f32 %v11285_v20, %v30977_v2  ;;  %v36380_v2 = vld [vmem:[#allocation231_spill] sm:$0xff] }
 0x642   :  { %v30980_v46 = vpop.f32.mrb[108].mxu1 }
 0x643   :  { %36348 = vst [vmem:[#allocation361_spill] sm:$0xff] %v30980_v46  ;;  %v11318_v45 = vmax.f32 %v36349_v10, %v30980_v46  ;;  %v30986_v57 = vpop.f32.mrb[109].mxu1 }
 0x644   :  { %36350 = vst [vmem:[#allocation362_spill] sm:$0xff] %v30986_v57 }
 0x645   :  { %v11319_v11 = vmax.f32 %v11318_v45, %v30986_v57  ;;  %v36373_v57 = vld [vmem:[#allocation136_spill] sm:$0xff] }
 0x646   :  { %v30989_v25 = vpop.f32.mrb[110].mxu1 }
 0x647   :  { %36351 = vst [vmem:[#allocation363_spill] sm:$0xff] %v30989_v25  ;;  %v11351_v40 = vmax.f32 %v36352_v27, %v30989_v25  ;;  %v30995_v3 = vpop.f32.mrb[111].mxu1 }
 0x648   :  { %36353 = vst [vmem:[#allocation364_spill] sm:$0xff] %v30995_v3 }
 0x649   :  { %v11352_v20 = vmax.f32 %v11351_v40, %v30995_v3  ;;  %v36370_v3 = vld [vmem:[#allocation111_spill] sm:$0xff] }
 0x68a   :  { %v10410_v54 = vpop.f32.mrb[112].mxu1 }
 0x68b   :  { %v30998_v42 = vadd.f32 %v10511_v22, %v10410_v54  ;;  %v10412_v49 = vpop.f32.mrb[113].mxu1 }
 0x68c   :  { %v31000_v10 = vadd.f32 %v10513_v38, %v10412_v49 }
 0x68d   :  { %v11254_v38 = vmax.f32 %v11253_v37, %v30998_v42 }
 0x68e   :  { %v10417_v34 = vpop.f32.mrb[114].mxu1 }
 0x68f   :  { %v31002_v8 = vadd.f32 %v10518_v55, %v10417_v34  ;;  %v10419_v45 = vpop.f32.mrb[115].mxu1  ;;  %v11255_v34 = vmax.f32 %v11254_v38, %v31000_v10 }
 0x690   :  { %v31004_v18 = vadd.f32 %v10520_v19, %v10419_v45 }
 0x691   :  { %36354 = vst [vmem:[#allocation365_spill] sm:$0xff] %v31002_v8  ;;  %v11287_v55 = vmax.f32 %v11286_v9, %v31002_v8  ;;  %v36379_v8 = vld [vmem:[#allocation208_spill] sm:$0xff] }
 0x692   :  { %36355 = vst [vmem:[#allocation366_spill] sm:$0xff] %v31004_v18  ;;  %v10424_v58 = vpop.f32.mrb[116].mxu1 }
 0x693   :  { %v31006_v39 = vadd.f32 %v10525_v60, %v10424_v58  ;;  %v10426_v28 = vpop.f32.mrb[117].mxu1 }
 0x694   :  { %v31008_v27 = vadd.f32 %v10527_v44, %v10426_v28  ;;  %v11288_v44 = vmax.f32 %v11287_v55, %v31004_v18  ;;  %v36378_v18 = vld [vmem:[#allocation207_spill] sm:$0xff] }
 0x695   :  { %36356 = vst [vmem:[#allocation367_spill] sm:$0xff] %v31006_v39 }
 0x696   :  { %36357 = vst [vmem:[#allocation368_spill] sm:$0xff] %v31008_v27  ;;  %v10431_v62 = vpop.f32.mrb[118].mxu1 }
 0x697   :  { %v31010_v40 = vadd.f32 %v10532_v63, %v10431_v62  ;;  %v10433_v54 = vpop.f32.mrb[119].mxu1  ;;  %v11320_v62 = vmax.f32 %v11319_v11, %v31006_v39 }
 0x698   :  { %v31012_v22 = vadd.f32 %v10534_v47, %v10433_v54 }
 0x699   :  { %36358 = vst [vmem:[#allocation369_spill] sm:$0xff] %v31010_v40  ;;  %v11321_v9 = vmax.f32 %v11320_v62, %v31008_v27  ;;  %v11353_v45 = vmax.f32 %v11352_v20, %v31010_v40 }
 0x69a   :  { %36359 = vst [vmem:[#allocation370_spill] sm:$0xff] %v31012_v22 }
 0x6ea   :  { %v31017_v19 = vpop.f32.mrb[120].mxu1 }
 0x6eb   :  { %v11256_v58 = vmax.f32 %v11255_v34, %v31017_v19  ;;  %v31020_v60 = vpop.f32.mrb[121].mxu1  ;;  %v11354_v34 = vmax.f32 %v11353_v45, %v31012_v22  ;;  %v36366_v45 = vld [vmem:[#allocation63_spill] sm:$0xff] }
 0x6ed   :  { %v11257_v63 = vmax.f32 %v11256_v58, %v31020_v60 }
 0x6ee   :  { %v31025_v47 = vpop.f32.mrb[122].mxu1 }
 0x6ef   :  { %36360 = vst [vmem:[#allocation371_spill] sm:$0xff] %v31025_v47  ;;  %v11289_v37 = vmax.f32 %v11288_v44, %v31025_v47  ;;  %11258 = vmax.xlane.f32.xlu0 %v11257_v63  ;;  %v31028_v49 = vpop.f32.mrb[123].mxu1  ;;  %v11359_v63 = vlaneseq  ;;  %v36376_v47 = vld [vmem:[#allocation183_spill] sm:$0xff] }
 0x6f0   :  { %36361 = vst [vmem:[#allocation372_spill] sm:$0xff] %v31028_v49 }
 0x6f1   :  { %v11290_v28 = vmax.f32 %v11289_v37, %v31028_v49  ;;  %v31046_v37 = vand.u32 127, %v11359_v63  ;;  %v36368_v63 = vld [vmem:[#allocation87_spill] sm:$0xff] }
 0x6f2   :  { %v31033_v54 = vpop.f32.mrb[124].mxu1 }
 0x6f3   :  { %36362 = vst [vmem:[#allocation373_spill] sm:$0xff] %v31033_v54  ;;  %v11322_v38 = vmax.f32 %v11321_v9, %v31033_v54  ;;  %11291 = vmax.xlane.f32.xlu0 %v11290_v28  ;;  %v31036_v11 = vpop.f32.mrb[125].mxu1  ;;  %v31051_v28 = vadd.s32 128, %v31046_v37  ;;  %v31068_v12 = vadd.s32 512, %v31046_v37  ;;  %v31077_v5 = vadd.s32 896, %v31046_v37 }
 0x6f4   :  { %36363 = vst [vmem:[#allocation374_spill] sm:$0xff] %v31036_v11  ;;  %v31080_v30 = vadd.s32 1024, %v31046_v37  ;;  %v31083_v50 = vadd.s32 1152, %v31046_v37  ;;  %v31088_v53 = vadd.s32 1280, %v31046_v37  ;;  %v31091_v43 = vadd.s32 1408, %v31046_v37 }
 0x6f5   :  { %v11323_v55 = vmax.f32 %v11322_v38, %v31036_v11  ;;  %v36367_v38 = vld [vmem:[#allocation64_spill] sm:$0xff]  ;;  %v31095_v22 = vadd.s32 1536, %v31046_v37  ;;  %v31098_v40 = vadd.s32 1664, %v31046_v37  ;;  %v31106_v25 = vadd.s32 1920, %v31046_v37  ;;  %v36372_v11 = vld [vmem:[#allocation135_spill] sm:$0xff] }
 0x6f6   :  { %v31040_v58 = vpop.f32.mrb[126].mxu1  ;;  %v31121_v41 = vadd.s32 2432, %v31046_v37  ;;  %v31136_v54 = vadd.s32 2944, %v31046_v37  ;;  %v31151_v46 = vadd.s32 3456, %v31046_v37  ;;  %v31166_v15 = vadd.s32 3968, %v31046_v37 }
 0x6f7   :  { %36364 = vst [vmem:[#allocation375_spill] sm:$0xff] %v31040_v58  ;;  %v11355_v44 = vmax.f32 %v11354_v34, %v31040_v58  ;;  %11324 = vmax.xlane.f32.xlu1 %v11323_v55  ;;  %v31043_v62 = vpop.f32.mrb[127].mxu1  ;;  %v31058_v34 = vadd.s32 256, %v31046_v37 }
 0x6f8   :  { %36365 = vst [vmem:[#allocation376_spill] sm:$0xff] %v31043_v62 }
 0x6f9   :  { %v11356_v20 = vmax.f32 %v11355_v44, %v31043_v62 }
 0x6fb   :  { %11357 = vmax.xlane.f32.xlu1 %v11356_v20  ;;  %v31063_v20 = vadd.s32 384, %v31046_v37 }
 0x77c   :  { %v31048_v9 = vpop.xlane.xlu0 %11258 }
 0x77d   :  { %vm11392_vm1 = vcmp.ge.f32.partialorder %v36366_v45, %v31048_v9  ;;  %vm11393_vm2 = vcmp.ge.f32.partialorder %v36367_v38, %v31048_v9  ;;  %vm11394_vm3 = vcmp.ge.f32.partialorder %v36368_v63, %v31048_v9  ;;  %v31071_v45 = vadd.s32 640, %v31046_v37  ;;  %v36369_v63 = vld [vmem:[#allocation88_spill] sm:$0xff] }
 0x77e   :  { %v11520_v55 = vsel %vm11392_vm1, %v31046_v37, 4096  ;;  %v11521_v44 = vsel %vm11393_vm2, %v31051_v28, 4096  ;;  %v31074_v38 = vadd.s32 768, %v31046_v37  ;;  %vm11395_vm4 = vcmp.ge.f32.partialorder %v36369_v63, %v31048_v9 }
 0x77f   :  { %vm11648_vm5 = vcmp.lt.s32.totalorder %v11520_v55, %v11521_v44  ;;  %v11522_v62 = vsel %vm11394_vm3, %v31058_v34, 4096  ;;  %vm11396_vm6 = vcmp.ge.f32.partialorder %v36370_v3, %v31048_v9  ;;  %v31103_v63 = vadd.s32 1792, %v31046_v37 }
 0x780   :  { %v11649_v58 = vsel %vm11648_vm5, %v11520_v55, %v11521_v44  ;;  %v11523_v51 = vsel %vm11395_vm4, %v31063_v20, 4096  ;;  %v31110_v55 = vadd.s32 2048, %v31046_v37  ;;  %v31113_v44 = vadd.s32 2176, %v31046_v37 }
 0x781   :  { %vm11650_vm7 = vcmp.lt.s32.totalorder %v11649_v58, %v11522_v62  ;;  %vm11397_vm8 = vcmp.ge.f32.partialorder %v36371_v31, %v31048_v9  ;;  %v31118_v3 = vadd.s32 2304, %v31046_v37  ;;  %v11524_v1 = vsel %vm11396_vm6, %v31068_v12, 4096 }
 0x782   :  { %v11651_v29 = vsel %vm11650_vm7, %v11649_v58, %v11522_v62  ;;  %v31125_v58 = vadd.s32 2560, %v31046_v37  ;;  %v31128_v62 = vadd.s32 2688, %v31046_v37  ;;  %vm11398_vm10 = vcmp.ge.f32.partialorder %v36372_v11, %v31048_v9 }
 0x783   :  { %vm11652_vm9 = vcmp.lt.s32.totalorder %v11651_v29, %v11523_v51  ;;  %v31133_v31 = vadd.s32 2816, %v31046_v37  ;;  %v11525_v27 = vsel %vm11397_vm8, %v31071_v45, 4096  ;;  %vm11399_vm12 = vcmp.ge.f32.partialorder %v36373_v57, %v31048_v9 }
 0x784   :  { %v11653_v56 = vsel %vm11652_vm9, %v11651_v29, %v11523_v51  ;;  %v31140_v29 = vadd.s32 3072, %v31046_v37  ;;  %v31143_v51 = vadd.s32 3200, %v31046_v37  ;;  %v31148_v11 = vadd.s32 3328, %v31046_v37 }
 0x785   :  { %vm11654_vm11 = vcmp.lt.s32.totalorder %v11653_v56, %v11524_v1  ;;  %v11526_v0 = vsel %vm11398_vm10, %v31074_v38, 4096  ;;  %vm11400_vm14 = vcmp.ge.f32.partialorder %v36374_v36, %v31048_v9  ;;  %v31163_v57 = vadd.s32 3840, %v31046_v37  ;;  %v36377_v36 = vld [vmem:[#allocation184_spill] sm:$0xff] }
 0x786   :  { %v11655_v39 = vsel %vm11654_vm11, %v11653_v56, %v11524_v1  ;;  %v31155_v56 = vadd.s32 3584, %v31046_v37  ;;  %v31158_v1 = vadd.s32 3712, %v31046_v37  ;;  %v11527_v13 = vsel %vm11399_vm12, %v31077_v5, 4096 }
 0x787   :  { %vm11656_vm13 = vcmp.lt.s32.totalorder %v11655_v39, %v11525_v27  ;;  %vm11402_vm2 = vcmp.ge.f32.partialorder %v36376_v47, %v31048_v9  ;;  %vm11403_vm3 = vcmp.ge.f32.partialorder %v36377_v36, %v31048_v9  ;;  %vm11404_vm5 = vcmp.ge.f32.partialorder %v36378_v18, %v31048_v9  ;;  %v36387_v47 = vld [vmem:[#allocation89_spill] sm:$0xff] }
 0x788   :  { %v11657_v32 = vsel %vm11656_vm13, %v11655_v39, %v11525_v27  ;;  %v31169_v39 = vpop.xlane.xlu0 %11291  ;;  %v36375_v27 = vld [vmem:[#allocation160_spill] sm:$0xff]  ;;  %vm11405_vm6 = vcmp.ge.f32.partialorder %v36379_v8, %v31048_v9  ;;  %vm11406_vm7 = vcmp.ge.f32.partialorder %v36380_v2, %v31048_v9  ;;  %vm11408_vm9 = vcmp.ge.f32.partialorder %v36382_v14, %v31048_v9  ;;  %v36389_v2 = vld [vmem:[#allocation113_spill] sm:$0xff] }
 0x789   :  { %vm11658_vm15 = vcmp.lt.s32.totalorder %v11657_v32, %v11526_v0  ;;  %vm11401_vm1 = vcmp.ge.f32.partialorder %v36375_v27, %v31048_v9  ;;  %v36381_v27 = vld [vmem:[#allocation232_spill] sm:$0xff]  ;;  %vm11424_vm11 = vcmp.ge.f32.partialorder %v36383_v26, %v31169_v39  ;;  %vm11425_vm12 = vcmp.ge.f32.partialorder %v36384_v16, %v31169_v39 }
 0x78a   :  { %v11659_v49 = vsel %vm11658_vm15, %v11657_v32, %v11526_v0  ;;  %v11528_v32 = vsel %vm11400_vm14, %v31080_v30, 4096  ;;  %vm11407_vm8 = vcmp.ge.f32.partialorder %v36381_v27, %v31048_v9  ;;  %v11529_v59 = vsel %vm11401_vm1, %v31083_v50, 4096 }
 0x78b   :  { %vm11660_vm4 = vcmp.lt.s32.totalorder %v11659_v49, %v11527_v13  ;;  %vm11411_vm15 = vcmp.ge.f32.partialorder %v30144_v52, %v31048_v9  ;;  %v11530_v16 = vsel %vm11402_vm2, %v31088_v53, 4096  ;;  %vm11414_vm0 = vcmp.ge.f32.partialorder %v30636_v7, %v31048_v9 }
 0x78c   :  { %v11661_v0 = vsel %vm11660_vm4, %v11659_v49, %v11527_v13  ;;  %v36385_v13 = vld [vmem:[#allocation256_spill] sm:$0xff]  ;;  %v36386_v49 = vld [vmem:[#allocation279_spill] sm:$0xff]  ;;  %vm11415_vm1 = vcmp.ge.f32.partialorder %v30644_v6, %v31048_v9  ;;  %v11531_v17 = vsel %vm11403_vm3, %v31091_v43, 4096  ;;  %vm11426_vm2 = vcmp.ge.f32.partialorder %v36387_v47, %v31169_v39 }
 0x78d   :  { %vm11662_vm10 = vcmp.lt.s32.totalorder %v11661_v0, %v11528_v32  ;;  %vm11409_vm13 = vcmp.ge.f32.partialorder %v36385_v13, %v31048_v9  ;;  %vm11417_vm3 = vcmp.ge.f32.partialorder %v30844_v23, %v31048_v9  ;;  %v11534_v36 = vsel %vm11406_vm7, %v31103_v63, 4096 }
 0x78e   :  { %v11663_v61 = vsel %vm11662_vm10, %v11661_v0, %v11528_v32  ;;  %vm11413_vm10 = vcmp.ge.f32.partialorder %v30464_v21, %v31048_v9  ;;  %v11552_v32 = vsel %vm11424_vm11, %v31046_v37, 4096  ;;  %v11553_v0 = vsel %vm11425_vm12, %v31051_v28, 4096 }
 0x78f   :  { %vm11664_vm4 = vcmp.lt.s32.totalorder %v11663_v61, %v11529_v59  ;;  %v11535_v18 = vsel %vm11407_vm8, %v31106_v25, 4096  ;;  %v11554_v8 = vsel %vm11426_vm2, %v31058_v34, 4096  ;;  %vm11419_vm7 = vcmp.ge.f32.partialorder %v30968_v48, %v31048_v9 }
 0x790   :  { %v11665_v26 = vsel %vm11664_vm4, %v11663_v61, %v11529_v59  ;;  %vm11416_vm4 = vcmp.ge.f32.partialorder %v30836_v33, %v31048_v9  ;;  %v11532_v61 = vsel %vm11404_vm5, %v31095_v22, 4096  ;;  %v11533_v59 = vsel %vm11405_vm6, %v31098_v40, 4096 }
 0x791   :  { %vm11666_vm14 = vcmp.lt.s32.totalorder %v11665_v26, %v11530_v16  ;;  %v11537_v27 = vsel %vm11409_vm13, %v31113_v44, 4096  ;;  %v11539_v13 = vsel %vm11411_vm15, %v31121_v41, 4096  ;;  %v11541_v52 = vsel %vm11413_vm10, %v31128_v62, 4096 }
 0x792   :  { %v11667_v35 = vsel %vm11666_vm14, %v11665_v26, %v11530_v16  ;;  %v36388_v26 = vld [vmem:[#allocation90_spill] sm:$0xff]  ;;  %vm11724_vm14 = vcmp.lt.s32.totalorder %v11552_v32, %v11553_v0  ;;  %v11543_v21 = vsel %vm11415_vm1, %v31136_v54, 4096  ;;  %v31302_v7 = vsel %vm11416_vm4, %v31140_v29, 4096 }
 0x793   :  { %vm11668_vm11 = vcmp.lt.s32.totalorder %v11667_v35, %v11531_v17  ;;  %vm11427_vm12 = vcmp.ge.f32.partialorder %v36388_v26, %v31169_v39  ;;  %v11725_v47 = vsel %vm11724_vm14, %v11552_v32, %v11553_v0  ;;  %vm36390_vm14 = vcmp.ge.f32.partialorder %v36386_v49, %v31048_v9 }
 0x794   :  { %v11669_v16 = vsel %vm11668_vm11, %v11667_v35, %v11531_v17  ;;  %v11536_v35 = vsel %vm11408_vm9, %v31110_v55, 4096  ;;  %vm11428_vm11 = vcmp.ge.f32.partialorder %v36389_v2, %v31169_v39  ;;  %vm11726_vm5 = vcmp.lt.s32.totalorder %v11725_v47, %v11554_v8 }
 0x795   :  { %vm11670_vm6 = vcmp.lt.s32.totalorder %v11669_v16, %v11532_v61  ;;  %v11555_v32 = vsel %vm11427_vm12, %v31063_v20, 4096  ;;  %v11727_v0 = vsel %vm11726_vm5, %v11725_v47, %v11554_v8  ;;  %vm11421_vm9 = vcmp.ge.f32.partialorder %v31000_v10, %v31048_v9  ;;  %v36393_v47 = vld [vmem:[#allocation137_spill] sm:$0xff] }
 0x796   :  { %v11671_v17 = vsel %vm11670_vm6, %v11669_v16, %v11532_v61  ;;  %v11538_v14 = vsel %vm36390_vm14, %v31118_v3, 4096  ;;  %v36391_v16 = vld [vmem:[#allocation114_spill] sm:$0xff]  ;;  %vm11728_vm8 = vcmp.lt.s32.totalorder %v11727_v0, %v11555_v32  ;;  %v11556_v26 = vsel %vm11428_vm11, %v31068_v12, 4096 }
 0x797   :  { %vm11672_vm2 = vcmp.lt.s32.totalorder %v11671_v17, %v11533_v59  ;;  %vm11429_vm6 = vcmp.ge.f32.partialorder %v36391_v16, %v31169_v39  ;;  %v11729_v8 = vsel %vm11728_vm8, %v11727_v0, %v11555_v32  ;;  %vm11423_vm5 = vcmp.ge.f32.partialorder %v31020_v60, %v31048_v9  ;;  %v36395_v16 = vld [vmem:[#allocation161_spill] sm:$0xff] }
 0x798   :  { %v11673_v61 = vsel %vm11672_vm2, %v11671_v17, %v11533_v59  ;;  %vm36392_vm2 = vcmp.ge.f32.partialorder %v30456_v4, %v31048_v9  ;;  %vm11430_vm14 = vcmp.ge.f32.partialorder %v36393_v47, %v31169_v39  ;;  %vm11730_vm13 = vcmp.lt.s32.totalorder %v11729_v8, %v11556_v26 }
 0x799   :  { %vm11674_vm12 = vcmp.lt.s32.totalorder %v11673_v61, %v11534_v36  ;;  %v11540_v49 = vsel %vm36392_vm2, %v31125_v58, 4096  ;;  %v11557_v17 = vsel %vm11429_vm6, %v31071_v45, 4096  ;;  %v11731_v2 = vsel %vm11730_vm13, %v11729_v8, %v11556_v26 }
 0x79a   :  { %v11675_v59 = vsel %vm11674_vm12, %v11673_v61, %v11534_v36  ;;  %v11542_v4 = vsel %vm11414_vm0, %v31133_v31, 4096  ;;  %v36394_v36 = vld [vmem:[#allocation138_spill] sm:$0xff]  ;;  %vm11732_vm8 = vcmp.lt.s32.totalorder %v11731_v2, %v11557_v17  ;;  %v11558_v0 = vsel %vm11430_vm14, %v31074_v38, 4096 }
 0x79b   :  { %vm11676_vm15 = vcmp.lt.s32.totalorder %v11675_v59, %v11535_v18  ;;  %vm11431_vm11 = vcmp.ge.f32.partialorder %v36394_v36, %v31169_v39  ;;  %v11733_v61 = vsel %vm11732_vm8, %v11731_v2, %v11557_v17  ;;  %vm11432_vm0 = vcmp.ge.f32.partialorder %v36395_v16, %v31169_v39  ;;  %v36399_v2 = vld [vmem:[#allocation185_spill] sm:$0xff] }
 0x79c   :  { %v11677_v32 = vsel %vm11676_vm15, %v11675_v59, %v11535_v18  ;;  %vm11734_vm6 = vcmp.lt.s32.totalorder %v11733_v61, %v11558_v0  ;;  %v31310_v6 = vsel %vm11417_vm3, %v31143_v51, 4096  ;;  %v11559_v26 = vsel %vm11431_vm11, %v31077_v5, 4096  ;;  %v36397_v59 = vld [vmem:[#allocation162_spill] sm:$0xff] }
 0x79d   :  { %vm11678_vm10 = vcmp.lt.s32.totalorder %v11677_v32, %v11536_v35  ;;  %v11735_v8 = vsel %vm11734_vm6, %v11733_v61, %v11558_v0  ;;  %vm36396_vm4 = vcmp.ge.f32.partialorder %v30962_v24, %v31048_v9  ;;  %vm11433_vm13 = vcmp.ge.f32.partialorder %v36397_v59, %v31169_v39  ;;  %v36401_v0 = vld [vmem:[#allocation186_spill] sm:$0xff] }
 0x79e   :  { %v11679_v18 = vsel %vm11678_vm10, %v11677_v32, %v11536_v35  ;;  %v31317_v33 = vsel %vm36396_vm4, %v31148_v11, 4096  ;;  %vm11736_vm12 = vcmp.lt.s32.totalorder %v11735_v8, %v11559_v26  ;;  %v31325_v23 = vsel %vm11419_vm7, %v31151_v46, 4096  ;;  %v36407_v59 = vld [vmem:[#allocation258_spill] sm:$0xff] }
 0x79f   :  { %vm11680_vm1 = vcmp.lt.s32.totalorder %v11679_v18, %v11537_v27  ;;  %v11560_v47 = vsel %vm11432_vm0, %v31080_v30, 4096  ;;  %v11737_v17 = vsel %vm11736_vm12, %v11735_v8, %v11559_v26  ;;  %vm36398_vm2 = vcmp.ge.f32.partialorder %v30998_v42, %v31048_v9  ;;  %v36404_v26 = vld [vmem:[#allocation233_spill] sm:$0xff] }
 0x7a0   :  { %v11681_v35 = vsel %vm11680_vm1, %v11679_v18, %v11537_v27  ;;  %v31332_v24 = vsel %vm36398_vm2, %v31155_v56, 4096  ;;  %vm11434_vm14 = vcmp.ge.f32.partialorder %v36399_v2, %v31169_v39  ;;  %vm11738_vm15 = vcmp.lt.s32.totalorder %v11737_v17, %v11560_v47  ;;  %v36408_v2 = vld [vmem:[#allocation280_spill] sm:$0xff] }
 0x7a1   :  { %vm11682_vm3 = vcmp.lt.s32.totalorder %v11681_v35, %v11538_v14  ;;  %v31340_v48 = vsel %vm11421_vm9, %v31158_v1, 4096  ;;  %v11561_v32 = vsel %vm11433_vm13, %v31083_v50, 4096  ;;  %v11739_v36 = vsel %vm11738_vm15, %v11737_v17, %v11560_v47 }
 0x7a2   :  { %v11683_v27 = vsel %vm11682_vm3, %v11681_v35, %v11538_v14  ;;  %vm36400_vm11 = vcmp.ge.f32.partialorder %v31017_v19, %v31048_v9  ;;  %vm11435_vm8 = vcmp.ge.f32.partialorder %v36401_v0, %v31169_v39  ;;  %vm11740_vm10 = vcmp.lt.s32.totalorder %v11739_v36, %v11561_v32  ;;  %v36402_v19 = vld [vmem:[#allocation209_spill] sm:$0xff]  ;;  %v36405_v35 = vld [vmem:[#allocation234_spill] sm:$0xff] }
 0x7a3   :  { %vm11684_vm7 = vcmp.lt.s32.totalorder %v11683_v27, %v11539_v13  ;;  %v31347_v42 = vsel %vm36400_vm11, %v31163_v57, 4096  ;;  %v31355_v10 = vsel %vm11423_vm5, %v31166_v15, 4096  ;;  %v11562_v61 = vsel %vm11434_vm14, %v31088_v53, 4096 }
 0x7a4   :  { %v11685_v14 = vsel %vm11684_vm7, %v11683_v27, %v11539_v13  ;;  %v11741_v18 = vsel %vm11740_vm10, %v11739_v36, %v11561_v32  ;;  %vm11436_vm0 = vcmp.ge.f32.partialorder %v36402_v19, %v31169_v39  ;;  %v36403_v13 = vld [vmem:[#allocation210_spill] sm:$0xff]  ;;  %vm11438_vm13 = vcmp.ge.f32.partialorder %v36404_v26, %v31169_v39  ;;  %v31376_v32 = vpop.xlane.xlu1 %11324 }
 0x7a5   :  { %vm11686_vm9 = vcmp.lt.s32.totalorder %v11685_v14, %v11540_v49  ;;  %vm11437_vm6 = vcmp.ge.f32.partialorder %v36403_v13, %v31169_v39  ;;  %vm11742_vm1 = vcmp.lt.s32.totalorder %v11741_v18, %v11562_v61  ;;  %v11563_v60 = vsel %vm11435_vm8, %v31091_v43, 4096  ;;  %v36410_v36 = vld [vmem:[#allocation314_spill] sm:$0xff] }
 0x7a6   :  { %v11687_v16 = vsel %vm11686_vm9, %v11685_v14, %v11540_v49  ;;  %v11743_v9 = vsel %vm11742_vm1, %v11741_v18, %v11562_v61  ;;  %vm11439_vm5 = vcmp.ge.f32.partialorder %v36405_v35, %v31169_v39  ;;  %v36406_v49 = vld [vmem:[#allocation257_spill] sm:$0xff]  ;;  %vm11441_vm14 = vcmp.ge.f32.partialorder %v36407_v59, %v31169_v39  ;;  %v36411_v61 = vld [vmem:[#allocation315_spill] sm:$0xff] }
 0x7a7   :  { %vm11688_vm4 = vcmp.lt.s32.totalorder %v11687_v16, %v11541_v52  ;;  %vm11440_vm12 = vcmp.ge.f32.partialorder %v36406_v49, %v31169_v39  ;;  %vm11744_vm3 = vcmp.lt.s32.totalorder %v11743_v9, %v11563_v60  ;;  %v11564_v47 = vsel %vm11436_vm0, %v31095_v22, 4096  ;;  %v36412_v18 = vld [vmem:[#allocation331_spill] sm:$0xff] }
 0x7a8   :  { %v11689_v8 = vsel %vm11688_vm4, %v11687_v16, %v11541_v52  ;;  %v11745_v17 = vsel %vm11744_vm3, %v11743_v9, %v11563_v60  ;;  %vm11442_vm15 = vcmp.ge.f32.partialorder %v36408_v2, %v31169_v39  ;;  %v36409_v52 = vld [vmem:[#allocation281_spill] sm:$0xff]  ;;  %vm11444_vm10 = vcmp.ge.f32.partialorder %v36410_v36, %v31169_v39  ;;  %v36413_v60 = vld [vmem:[#allocation67_spill] sm:$0xff]  ;;  %v36414_v9 = vld [vmem:[#allocation68_spill] sm:$0xff] }
 0x7a9   :  { %vm11690_vm2 = vcmp.lt.s32.totalorder %v11689_v8, %v11542_v4  ;;  %vm11443_vm7 = vcmp.ge.f32.partialorder %v36409_v52, %v31169_v39  ;;  %vm11746_vm11 = vcmp.lt.s32.totalorder %v11745_v17, %v11564_v47  ;;  %v11565_v14 = vsel %vm11437_vm6, %v31098_v40, 4096  ;;  %v36416_v52 = vld [vmem:[#allocation332_spill] sm:$0xff] }
 0x7aa   :  { %v11691_v27 = vsel %vm11690_vm2, %v11689_v8, %v11542_v4  ;;  %v11747_v0 = vsel %vm11746_vm11, %v11745_v17, %v11564_v47  ;;  %vm11445_vm9 = vcmp.ge.f32.partialorder %v36411_v61, %v31169_v39  ;;  %vm11446_vm0 = vcmp.ge.f32.partialorder %v36412_v18, %v31169_v39  ;;  %v36419_v18 = vld [vmem:[#allocation115_spill] sm:$0xff] }
 0x7ab   :  { %vm11692_vm8 = vcmp.lt.s32.totalorder %v11691_v27, %v11543_v21  ;;  %vm11748_vm1 = vcmp.lt.s32.totalorder %v11747_v0, %v11565_v14  ;;  %v11566_v16 = vsel %vm11438_vm13, %v31103_v63, 4096  ;;  %v11567_v19 = vsel %vm11439_vm5, %v31106_v25, 4096 }
 0x7ac   :  { %v11693_v4 = vsel %vm11692_vm8, %v11691_v27, %v11543_v21  ;;  %v11749_v21 = vsel %vm11748_vm1, %v11747_v0, %v11565_v14  ;;  %vm11456_vm3 = vcmp.ge.f32.partialorder %v36413_v60, %v31376_v32  ;;  %vm11457_vm2 = vcmp.ge.f32.partialorder %v36414_v9, %v31376_v32  ;;  %v36415_v14 = vld [vmem:[#allocation91_spill] sm:$0xff]  ;;  %v36418_v60 = vld [vmem:[#allocation349_spill] sm:$0xff] }
 0x7ad   :  { %vm11694_vm4 = vcmp.lt.s32.totalorder %v11693_v4, %v31302_v7  ;;  %vm11750_vm6 = vcmp.lt.s32.totalorder %v11749_v21, %v11566_v16  ;;  %v11568_v26 = vsel %vm11440_vm12, %v31110_v55, 4096  ;;  %v11569_v8 = vsel %vm11441_vm14, %v31113_v44, 4096 }
 0x7ae   :  { %v11695_v13 = vsel %vm11694_vm4, %v11693_v4, %v31302_v7  ;;  %v11751_v7 = vsel %vm11750_vm6, %v11749_v21, %v11566_v16  ;;  %v11570_v47 = vsel %vm11442_vm15, %v31118_v3, 4096  ;;  %v11571_v17 = vsel %vm11443_vm7, %v31121_v41, 4096  ;;  %v36417_v16 = vld [vmem:[#allocation92_spill] sm:$0xff] }
 0x7af   :  { %vm11696_vm11 = vcmp.lt.s32.totalorder %v11695_v13, %v31310_v6  ;;  %vm11752_vm13 = vcmp.lt.s32.totalorder %v11751_v7, %v11567_v19  ;;  %v11584_v59 = vsel %vm11456_vm3, %v31046_v37, 4096  ;;  %v11585_v27 = vsel %vm11457_vm2, %v31051_v28, 4096 }
 0x7b0   :  { %v11697_v35 = vsel %vm11696_vm11, %v11695_v13, %v31310_v6  ;;  %v11753_v49 = vsel %vm11752_vm13, %v11751_v7, %v11567_v19  ;;  %v11572_v2 = vsel %vm11444_vm10, %v31125_v58, 4096  ;;  %vm11458_vm14 = vcmp.ge.f32.partialorder %v36415_v14, %v31376_v32  ;;  %v36420_v7 = vld [vmem:[#allocation116_spill] sm:$0xff] }
 0x7b1   :  { %vm11698_vm5 = vcmp.lt.s32.totalorder %v11697_v35, %v31317_v33  ;;  %vm11754_vm12 = vcmp.lt.s32.totalorder %v11753_v49, %v11568_v26  ;;  %vm11447_vm7 = vcmp.ge.f32.partialorder %v36416_v52, %v31169_v39  ;;  %v11573_v0 = vsel %vm11445_vm9, %v31128_v62, 4096 }
 0x7b2   :  { %v11699_v6 = vsel %vm11698_vm5, %v11697_v35, %v31317_v33  ;;  %v11574_v33 = vsel %vm11446_vm0, %v31133_v31, 4096  ;;  %v11755_v36 = vsel %vm11754_vm12, %v11753_v49, %v11568_v26  ;;  %vm11459_vm10 = vcmp.ge.f32.partialorder %v36417_v16, %v31376_v32 }
 0x7b3   :  { %vm11700_vm15 = vcmp.lt.s32.totalorder %v11699_v6, %v31325_v23  ;;  %vm11756_vm8 = vcmp.lt.s32.totalorder %v11755_v36, %v11569_v8  ;;  %vm11800_vm1 = vcmp.lt.s32.totalorder %v11584_v59, %v11585_v27  ;;  %v11586_v21 = vsel %vm11458_vm14, %v31058_v34, 4096 }
 0x7b4   :  { %v11701_v4 = vsel %vm11700_vm15, %v11699_v6, %v31325_v23  ;;  %v11757_v19 = vsel %vm11756_vm8, %v11755_v36, %v11569_v8  ;;  %v11801_v61 = vsel %vm11800_vm1, %v11584_v59, %v11585_v27  ;;  %vm11448_vm9 = vcmp.ge.f32.partialorder %v36418_v60, %v31169_v39  ;;  %v36428_v60 = vld [vmem:[#allocation360_spill] sm:$0xff] }
 0x7b5   :  { %vm11702_vm4 = vcmp.lt.s32.totalorder %v11701_v4, %v31332_v24  ;;  %vm11758_vm0 = vcmp.lt.s32.totalorder %v11757_v19, %v11570_v47  ;;  %vm11460_vm6 = vcmp.ge.f32.partialorder %v36419_v18, %v31376_v32  ;;  %vm11802_vm3 = vcmp.lt.s32.totalorder %v11801_v61, %v11586_v21  ;;  %v36425_v18 = vld [vmem:[#allocation164_spill] sm:$0xff] }
 0x7b6   :  { %v11703_v13 = vsel %vm11702_vm4, %v11701_v4, %v31332_v24  ;;  %v11759_v23 = vsel %vm11758_vm0, %v11757_v19, %v11570_v47  ;;  %v11587_v9 = vsel %vm11459_vm10, %v31063_v20, 4096  ;;  %v11803_v26 = vsel %vm11802_vm3, %v11801_v61, %v11586_v21  ;;  %v36421_v47 = vld [vmem:[#allocation139_spill] sm:$0xff] }
 0x7b7   :  { %vm11704_vm2 = vcmp.lt.s32.totalorder %v11703_v13, %v31340_v48  ;;  %vm11760_vm11 = vcmp.lt.s32.totalorder %v11759_v23, %v11571_v17  ;;  %vm11461_vm13 = vcmp.ge.f32.partialorder %v36420_v7, %v31376_v32  ;;  %vm11804_vm5 = vcmp.lt.s32.totalorder %v11803_v26, %v11587_v9 }
 0x7b8   :  { %v11705_v8 = vsel %vm11704_vm2, %v11703_v13, %v31340_v48  ;;  %v11761_v24 = vsel %vm11760_vm11, %v11759_v23, %v11571_v17  ;;  %v11588_v35 = vsel %vm11460_vm6, %v31068_v12, 4096  ;;  %v11805_v49 = vsel %vm11804_vm5, %v11803_v26, %v11587_v9  ;;  %v36422_v17 = vld [vmem:[#allocation140_spill] sm:$0xff]  ;;  %v36426_v26 = vld [vmem:[#allocation359_spill] sm:$0xff] }
 0x7b9   :  { %vm11706_vm12 = vcmp.lt.s32.totalorder %v11705_v8, %v31347_v42  ;;  %vm11762_vm14 = vcmp.lt.s32.totalorder %v11761_v24, %v11572_v2  ;;  %vm11462_vm15 = vcmp.ge.f32.partialorder %v36421_v47, %v31376_v32  ;;  %vm11806_vm8 = vcmp.lt.s32.totalorder %v11805_v49, %v11588_v35 }
 0x7ba   :  { %v11707_v59 = vsel %vm11706_vm12, %v11705_v8, %v31347_v42  ;;  %v11763_v48 = vsel %vm11762_vm14, %v11761_v24, %v11572_v2  ;;  %v11589_v27 = vsel %vm11461_vm13, %v31071_v45, 4096  ;;  %v11807_v6 = vsel %vm11806_vm8, %v11805_v49, %v11588_v35  ;;  %v36427_v8 = vld [vmem:[#allocation187_spill] sm:$0xff] }
 0x7bb   :  { %vm11708_vm10 = vcmp.lt.s32.totalorder %v11707_v59, %v31355_v10  ;;  %vm11764_vm1 = vcmp.lt.s32.totalorder %v11763_v48, %v11573_v0  ;;  %vm11463_vm4 = vcmp.ge.f32.partialorder %v36422_v17, %v31376_v32  ;;  %vm11808_vm0 = vcmp.lt.s32.totalorder %v11807_v6, %v11589_v27  ;;  %v36430_v17 = vld [vmem:[#allocation365_spill] sm:$0xff] }
 0x7bc   :  { %v31464_v14 = vsel %vm11708_vm10, %v11707_v59, %v31355_v10  ;;  %v11765_v36 = vsel %vm11764_vm1, %v11763_v48, %v11573_v0  ;;  %v11590_v4 = vsel %vm11462_vm15, %v31074_v38, 4096  ;;  %v11809_v16 = vsel %vm11808_vm0, %v11807_v6, %v11589_v27  ;;  %v36423_v10 = vld [vmem:[#allocation163_spill] sm:$0xff]  ;;  %v36424_v0 = vld [vmem:[#allocation350_spill] sm:$0xff]  ;;  %v36429_v59 = vld [vmem:[#allocation188_spill] sm:$0xff] }
 0x7bd   :  { %v11711_v42 = vshra.s32 %v31464_v14, 16  ;;  %v11575_v2 = vsel %vm11447_vm7, %v31136_v54, 4096  ;;  %vm11766_vm6 = vcmp.lt.s32.totalorder %v11765_v36, %v11574_v33  ;;  %vm11464_vm3 = vcmp.ge.f32.partialorder %v36423_v10, %v31376_v32  ;;  %v36432_v10 = vld [vmem:[#allocation366_spill] sm:$0xff] }
 0x7be   :  { %vm11810_vm2 = vcmp.lt.s32.totalorder %v11809_v16, %v11590_v4  ;;  %v11767_v21 = vsel %vm11766_vm6, %v11765_v36, %v11574_v33  ;;  %v11591_v61 = vsel %vm11463_vm4, %v31077_v5, 4096  ;;  %vm11449_vm11 = vcmp.ge.f32.partialorder %v36424_v0, %v31169_v39 }
 0x7bf   :  { %v31476_v19 = vcvt.s32.f32 %v11711_v42  ;;  %v11811_v13 = vsel %vm11810_vm2, %v11809_v16, %v11590_v4  ;;  %vm11768_vm13 = vcmp.lt.s32.totalorder %v11767_v21, %v11575_v2  ;;  %vm11465_vm5 = vcmp.ge.f32.partialorder %v36425_v18, %v31376_v32  ;;  %v36431_v42 = vld [vmem:[#allocation211_spill] sm:$0xff] }
 0x7c0   :  { %vm11812_vm12 = vcmp.lt.s32.totalorder %v11811_v13, %v11591_v61  ;;  %v11576_v52 = vsel %vm11448_vm9, %v31140_v29, 4096  ;;  %v11769_v23 = vsel %vm11768_vm13, %v11767_v21, %v11575_v2  ;;  %v11592_v33 = vsel %vm11464_vm3, %v31080_v30, 4096  ;;  %v36433_v21 = vld [vmem:[#allocation212_spill] sm:$0xff] }
 0x7c1   :  { %11714 = vmin.xlane.f32.xlu0 %v31476_v19  ;;  %v11813_v9 = vsel %vm11812_vm12, %v11811_v13, %v11591_v61  ;;  %vm11450_vm7 = vcmp.ge.f32.partialorder %v36426_v26, %v31169_v39  ;;  %vm11770_vm14 = vcmp.lt.s32.totalorder %v11769_v23, %v11576_v52  ;;  %vm11466_vm15 = vcmp.ge.f32.partialorder %v36427_v8, %v31376_v32 }
 0x7c2   :  { %vm11814_vm8 = vcmp.lt.s32.totalorder %v11813_v9, %v11592_v33  ;;  %v11577_v7 = vsel %vm11449_vm11, %v31143_v51, 4096  ;;  %v11771_v24 = vsel %vm11770_vm14, %v11769_v23, %v11576_v52  ;;  %v11593_v35 = vsel %vm11465_vm5, %v31083_v50, 4096  ;;  %v36434_v52 = vld [vmem:[#allocation371_spill] sm:$0xff] }
 0x7c3   :  { %v11815_v49 = vsel %vm11814_vm8, %v11813_v9, %v11592_v33  ;;  %vm11451_vm9 = vcmp.ge.f32.partialorder %v36428_v60, %v31169_v39  ;;  %vm11772_vm10 = vcmp.lt.s32.totalorder %v11771_v24, %v11577_v7  ;;  %vm11467_vm1 = vcmp.ge.f32.partialorder %v36429_v59, %v31376_v32  ;;  %v36435_v23 = vld [vmem:[#allocation235_spill] sm:$0xff] }
 0x7c4   :  { %vm11816_vm4 = vcmp.lt.s32.totalorder %v11815_v49, %v11593_v35  ;;  %v11578_v47 = vsel %vm11450_vm7, %v31148_v11, 4096  ;;  %v11773_v48 = vsel %vm11772_vm10, %v11771_v24, %v11577_v7  ;;  %v11594_v27 = vsel %vm11466_vm15, %v31088_v53, 4096  ;;  %v36436_v7 = vld [vmem:[#allocation372_spill] sm:$0xff] }
 0x7c5   :  { %v11817_v6 = vsel %vm11816_vm4, %v11815_v49, %v11593_v35  ;;  %vm11452_vm0 = vcmp.ge.f32.partialorder %v36430_v17, %v31169_v39  ;;  %vm11774_vm6 = vcmp.lt.s32.totalorder %v11773_v48, %v11578_v47  ;;  %vm11468_vm3 = vcmp.ge.f32.partialorder %v36431_v42, %v31376_v32  ;;  %v36437_v24 = vld [vmem:[#allocation236_spill] sm:$0xff] }
 0x7c6   :  { %vm11818_vm2 = vcmp.lt.s32.totalorder %v11817_v6, %v11594_v27  ;;  %v11579_v36 = vsel %vm11451_vm9, %v31151_v46, 4096  ;;  %v11775_v4 = vsel %vm11774_vm6, %v11773_v48, %v11578_v47  ;;  %v11595_v16 = vsel %vm11467_vm1, %v31091_v43, 4096  ;;  %v36438_v47 = vld [vmem:[#allocation259_spill] sm:$0xff]  ;;  %v31527_v48 = vpop.xlane.xlu1 %11357  ;;  %v36439_v42 = vld [vmem:[#allocation260_spill] sm:$0xff] }
 0x7c7   :  { %v11819_v2 = vsel %vm11818_vm2, %v11817_v6, %v11594_v27  ;;  %vm11453_vm11 = vcmp.ge.f32.partialorder %v36432_v10, %v31169_v39  ;;  %vm11776_vm13 = vcmp.lt.s32.totalorder %v11775_v4, %v11579_v36  ;;  %vm11469_vm5 = vcmp.ge.f32.partialorder %v36433_v21, %v31376_v32  ;;  %v36441_v21 = vld [vmem:[#allocation71_spill] sm:$0xff] }
 0x7c8   :  { %vm11820_vm12 = vcmp.lt.s32.totalorder %v11819_v2, %v11595_v16  ;;  %v11580_v61 = vsel %vm11452_vm0, %v31155_v56, 4096  ;;  %v11777_v13 = vsel %vm11776_vm13, %v11775_v4, %v11579_v36  ;;  %v11596_v0 = vsel %vm11468_vm3, %v31095_v22, 4096  ;;  %v36440_v4 = vld [vmem:[#allocation282_spill] sm:$0xff] }
 0x7c9   :  { %v11821_v18 = vsel %vm11820_vm12, %v11819_v2, %v11595_v16  ;;  %vm11454_vm7 = vcmp.ge.f32.partialorder %v36434_v52, %v31169_v39  ;;  %vm11778_vm14 = vcmp.lt.s32.totalorder %v11777_v13, %v11580_v61  ;;  %vm11470_vm15 = vcmp.ge.f32.partialorder %v36435_v23, %v31376_v32  ;;  %v36443_v52 = vld [vmem:[#allocation283_spill] sm:$0xff] }
 0x7ca   :  { %vm11822_vm8 = vcmp.lt.s32.totalorder %v11821_v18, %v11596_v0  ;;  %v11581_v33 = vsel %vm11453_vm11, %v31158_v1, 4096  ;;  %v11779_v9 = vsel %vm11778_vm14, %v11777_v13, %v11580_v61  ;;  %v11597_v26 = vsel %vm11469_vm5, %v31098_v40, 4096  ;;  %v36442_v61 = vld [vmem:[#allocation72_spill] sm:$0xff] }
 0x7cb   :  { %v11823_v8 = vsel %vm11822_vm8, %v11821_v18, %v11596_v0  ;;  %vm11455_vm9 = vcmp.ge.f32.partialorder %v36436_v7, %v31169_v39  ;;  %vm11780_vm10 = vcmp.lt.s32.totalorder %v11779_v9, %v11581_v33  ;;  %vm11471_vm1 = vcmp.ge.f32.partialorder %v36437_v24, %v31376_v32  ;;  %v36445_v7 = vld [vmem:[#allocation95_spill] sm:$0xff] }
 0x7cc   :  { %vm11824_vm4 = vcmp.lt.s32.totalorder %v11823_v8, %v11597_v26  ;;  %v11582_v35 = vsel %vm11454_vm7, %v31163_v57, 4096  ;;  %v11781_v49 = vsel %vm11780_vm10, %v11779_v9, %v11581_v33  ;;  %v11598_v60 = vsel %vm11470_vm15, %v31103_v63, 4096 }
 0x7cd   :  { %v11825_v59 = vsel %vm11824_vm4, %v11823_v8, %v11597_v26  ;;  %vm11782_vm0 = vcmp.lt.s32.totalorder %v11781_v49, %v11582_v35  ;;  %vm11472_vm6 = vcmp.ge.f32.partialorder %v36438_v47, %v31376_v32  ;;  %v11583_v39 = vsel %vm11455_vm9, %v31166_v15, 4096  ;;  %v36444_v8 = vld [vmem:[#allocation316_spill] sm:$0xff] }
 0x7ce   :  { %vm11826_vm3 = vcmp.lt.s32.totalorder %v11825_v59, %v11598_v60  ;;  %v11783_v27 = vsel %vm11782_vm0, %v11781_v49, %v11582_v35  ;;  %v11599_v6 = vsel %vm11471_vm1, %v31106_v25, 4096  ;;  %vm11473_vm11 = vcmp.ge.f32.partialorder %v36439_v42, %v31376_v32  ;;  %v36446_v49 = vld [vmem:[#allocation317_spill] sm:$0xff] }
 0x7cf   :  { %v11827_v17 = vsel %vm11826_vm3, %v11825_v59, %v11598_v60  ;;  %vm11784_vm2 = vcmp.lt.s32.totalorder %v11783_v27, %v11583_v39  ;;  %vm11474_vm5 = vcmp.ge.f32.partialorder %v36440_v4, %v31376_v32  ;;  %v11600_v16 = vsel %vm11472_vm6, %v31110_v55, 4096  ;;  %v36447_v60 = vld [vmem:[#allocation96_spill] sm:$0xff] }
 0x7d0   :  { %vm11828_vm13 = vcmp.lt.s32.totalorder %v11827_v17, %v11599_v6  ;;  %v31533_v36 = vsel %vm11784_vm2, %v11783_v27, %v11583_v39  ;;  %vm11488_vm7 = vcmp.ge.f32.partialorder %v36441_v21, %v31527_v48  ;;  %vm11489_vm14 = vcmp.ge.f32.partialorder %v36442_v61, %v31527_v48  ;;  %v36451_v21 = vld [vmem:[#allocation120_spill] sm:$0xff] }
 0x7d1   :  { %v11829_v2 = vsel %vm11828_vm13, %v11827_v17, %v11599_v6  ;;  %v11787_v10 = vshra.s32 %v31533_v36, 16  ;;  %v11601_v13 = vsel %vm11473_vm11, %v31113_v44, 4096  ;;  %vm11475_vm15 = vcmp.ge.f32.partialorder %v36443_v52, %v31376_v32  ;;  %v36448_v6 = vld [vmem:[#allocation333_spill] sm:$0xff]  ;;  %v36449_v17 = vld [vmem:[#allocation119_spill] sm:$0xff] }
 0x7d2   :  { %vm11830_vm12 = vcmp.lt.s32.totalorder %v11829_v2, %v11600_v16  ;;  %v11602_v23 = vsel %vm11474_vm5, %v31118_v3, 4096  ;;  %v11616_v9 = vsel %vm11488_vm7, %v31046_v37, 4096  ;;  %v11617_v26 = vsel %vm11489_vm14, %v31051_v28, 4096 }
 0x7d3   :  { %v11831_v0 = vsel %vm11830_vm12, %v11829_v2, %v11600_v16  ;;  %v31544_v18 = vcvt.s32.f32 %v11787_v10  ;;  %vm11476_vm9 = vcmp.ge.f32.partialorder %v36444_v8, %v31376_v32  ;;  %vm11490_vm1 = vcmp.ge.f32.partialorder %v36445_v7, %v31527_v48  ;;  %v36450_v10 = vld [vmem:[#allocation334_spill] sm:$0xff] }
 0x7d4   :  { %vm11832_vm8 = vcmp.lt.s32.totalorder %v11831_v0, %v11601_v13  ;;  %v11603_v24 = vsel %vm11475_vm15, %v31121_v41, 4096  ;;  %vm11477_vm4 = vcmp.ge.f32.partialorder %v36446_v49, %v31376_v32  ;;  %vm11491_vm6 = vcmp.ge.f32.partialorder %v36447_v60, %v31527_v48 }
 0x7d5   :  { %v11833_v33 = vsel %vm11832_vm8, %v11831_v0, %v11601_v13  ;;  %11790 = vmin.xlane.f32.xlu1 %v31544_v18  ;;  %vm11876_vm3 = vcmp.lt.s32.totalorder %v11616_v9, %v11617_v26  ;;  %v11604_v59 = vsel %vm11476_vm9, %v31125_v58, 4096  ;;  %v11618_v39 = vsel %vm11490_vm1, %v31058_v34, 4096 }
 0x7d6   :  { %vm11834_vm10 = vcmp.lt.s32.totalorder %v11833_v33, %v11602_v23  ;;  %v11877_v27 = vsel %vm11876_vm3, %v11616_v9, %v11617_v26  ;;  %vm11478_vm2 = vcmp.ge.f32.partialorder %v36448_v6, %v31376_v32  ;;  %vm11492_vm13 = vcmp.ge.f32.partialorder %v36449_v17, %v31527_v48 }
 0x7d7   :  { %v11835_v35 = vsel %vm11834_vm10, %v11833_v33, %v11602_v23  ;;  %vm11878_vm5 = vcmp.lt.s32.totalorder %v11877_v27, %v11618_v39  ;;  %v11605_v42 = vsel %vm11477_vm4, %v31128_v62, 4096  ;;  %v11619_v16 = vsel %vm11491_vm6, %v31063_v20, 4096  ;;  %v36452_v23 = vld [vmem:[#allocation351_spill] sm:$0xff] }
 0x7d8   :  { %vm11836_vm0 = vcmp.lt.s32.totalorder %v11835_v35, %v11603_v24  ;;  %v11879_v2 = vsel %vm11878_vm5, %v11877_v27, %v11618_v39  ;;  %vm11479_vm12 = vcmp.ge.f32.partialorder %v36450_v10, %v31376_v32  ;;  %vm11493_vm14 = vcmp.ge.f32.partialorder %v36451_v21, %v31527_v48  ;;  %v36453_v33 = vld [vmem:[#allocation143_spill] sm:$0xff]  ;;  %v36456_v39 = vld [vmem:[#allocation361_spill] sm:$0xff] }
 0x7d9   :  { %v11837_v47 = vsel %vm11836_vm0, %v11835_v35, %v11603_v24  ;;  %vm11880_vm15 = vcmp.lt.s32.totalorder %v11879_v2, %v11619_v16  ;;  %v11606_v61 = vsel %vm11478_vm2, %v31133_v31, 4096  ;;  %v11620_v0 = vsel %vm11492_vm13, %v31068_v12, 4096  ;;  %v36454_v24 = vld [vmem:[#allocation352_spill] sm:$0xff]  ;;  %v36457_v27 = vld [vmem:[#allocation167_spill] sm:$0xff] }
 0x7da   :  { %vm11838_vm11 = vcmp.lt.s32.totalorder %v11837_v47, %v11604_v59  ;;  %v11881_v52 = vsel %vm11880_vm15, %v11879_v2, %v11619_v16  ;;  %vm11480_vm8 = vcmp.ge.f32.partialorder %v36452_v23, %v31376_v32  ;;  %vm11494_vm10 = vcmp.ge.f32.partialorder %v36453_v33, %v31527_v48  ;;  %v36455_v35 = vld [vmem:[#allocation144_spill] sm:$0xff]  ;;  %v36458_v16 = vld [vmem:[#allocation362_spill] sm:$0xff] }
 0x7db   :  { %v11839_v4 = vsel %vm11838_vm11, %v11837_v47, %v11604_v59  ;;  %vm11882_vm1 = vcmp.lt.s32.totalorder %v11881_v52, %v11620_v0  ;;  %v11607_v9 = vsel %vm11479_vm12, %v31136_v54, 4096  ;;  %v11621_v8 = vsel %vm11493_vm14, %v31071_v45, 4096  ;;  %v36459_v2 = vld [vmem:[#allocation168_spill] sm:$0xff] }
 0x7dc   :  { %vm11840_vm7 = vcmp.lt.s32.totalorder %v11839_v4, %v11605_v42  ;;  %v11883_v7 = vsel %vm11882_vm1, %v11881_v52, %v11620_v0  ;;  %vm11481_vm4 = vcmp.ge.f32.partialorder %v36454_v24, %v31376_v32  ;;  %vm11495_vm6 = vcmp.ge.f32.partialorder %v36455_v35, %v31527_v48  ;;  %v36460_v0 = vld [vmem:[#allocation367_spill] sm:$0xff] }
 0x7dd   :  { %v11841_v13 = vsel %vm11840_vm7, %v11839_v4, %v11605_v42  ;;  %vm11884_vm3 = vcmp.lt.s32.totalorder %v11883_v7, %v11621_v8  ;;  %v11608_v49 = vsel %vm11480_vm8, %v31140_v29, 4096  ;;  %v11622_v59 = vsel %vm11494_vm10, %v31074_v38, 4096  ;;  %v36461_v52 = vld [vmem:[#allocation191_spill] sm:$0xff] }
 0x7de   :  { %vm11842_vm9 = vcmp.lt.s32.totalorder %v11841_v13, %v11606_v61  ;;  %v11885_v47 = vsel %vm11884_vm3, %v11883_v7, %v11621_v8  ;;  %vm11482_vm2 = vcmp.ge.f32.partialorder %v36456_v39, %v31376_v32  ;;  %vm11496_vm13 = vcmp.ge.f32.partialorder %v36457_v27, %v31527_v48  ;;  %v36462_v8 = vld [vmem:[#allocation368_spill] sm:$0xff] }
 0x7df   :  { %v11843_v26 = vsel %vm11842_vm9, %v11841_v13, %v11606_v61  ;;  %vm11886_vm5 = vcmp.lt.s32.totalorder %v11885_v47, %v11622_v59  ;;  %v11609_v6 = vsel %vm11481_vm4, %v31143_v51, 4096  ;;  %v11623_v42 = vsel %vm11495_vm6, %v31077_v5, 4096  ;;  %v36463_v7 = vld [vmem:[#allocation192_spill] sm:$0xff] }
 0x7e0   :  { %vm11844_vm0 = vcmp.lt.s32.totalorder %v11843_v26, %v11607_v9  ;;  %v11887_v4 = vsel %vm11886_vm5, %v11885_v47, %v11622_v59  ;;  %vm11483_vm12 = vcmp.ge.f32.partialorder %v36458_v16, %v31376_v32  ;;  %vm11497_vm14 = vcmp.ge.f32.partialorder %v36459_v2, %v31527_v48  ;;  %v36464_v59 = vld [vmem:[#allocation373_spill] sm:$0xff]  ;;  %v36465_v47 = vld [vmem:[#allocation215_spill] sm:$0xff] }
 0x7e1   :  { %v11845_v60 = vsel %vm11844_vm0, %v11843_v26, %v11607_v9  ;;  %vm11888_vm15 = vcmp.lt.s32.totalorder %v11887_v4, %v11623_v42  ;;  %v11610_v10 = vsel %vm11482_vm2, %v31148_v11, 4096  ;;  %v11624_v61 = vsel %vm11496_vm13, %v31080_v30, 4096 }
 0x7e2   :  { %vm11846_vm11 = vcmp.lt.s32.totalorder %v11845_v60, %v11608_v49  ;;  %v11889_v13 = vsel %vm11888_vm15, %v11887_v4, %v11623_v42  ;;  %vm11484_vm8 = vcmp.ge.f32.partialorder %v36460_v0, %v31376_v32  ;;  %vm11498_vm10 = vcmp.ge.f32.partialorder %v36461_v52, %v31527_v48  ;;  %v36466_v42 = vld [vmem:[#allocation374_spill] sm:$0xff]  ;;  %v36467_v4 = vld [vmem:[#allocation216_spill] sm:$0xff] }
 0x7e3   :  { %v11847_v17 = vsel %vm11846_vm11, %v11845_v60, %v11608_v49  ;;  %vm11890_vm1 = vcmp.lt.s32.totalorder %v11889_v13, %v11624_v61  ;;  %v11611_v23 = vsel %vm11483_vm12, %v31151_v46, 4096  ;;  %v11625_v9 = vsel %vm11497_vm14, %v31083_v50, 4096 }
 0x7e4   :  { %vm11848_vm7 = vcmp.lt.s32.totalorder %v11847_v17, %v11609_v6  ;;  %v11891_v26 = vsel %vm11890_vm1, %v11889_v13, %v11624_v61  ;;  %vm11485_vm4 = vcmp.ge.f32.partialorder %v36462_v8, %v31376_v32  ;;  %vm11499_vm6 = vcmp.ge.f32.partialorder %v36463_v7, %v31527_v48  ;;  %v36468_v61 = vld [vmem:[#allocation239_spill] sm:$0xff] }
 0x7e5   :  { %v11849_v21 = vsel %vm11848_vm7, %v11847_v17, %v11609_v6  ;;  %vm11892_vm3 = vcmp.lt.s32.totalorder %v11891_v26, %v11625_v9  ;;  %v11612_v24 = vsel %vm11484_vm8, %v31155_v56, 4096  ;;  %v11626_v49 = vsel %vm11498_vm10, %v31088_v53, 4096  ;;  %v36470_v7 = vld [vmem:[#allocation263_spill] sm:$0xff] }
 0x7e6   :  { %vm11850_vm9 = vcmp.lt.s32.totalorder %v11849_v21, %v11610_v10  ;;  %v11893_v60 = vsel %vm11892_vm3, %v11891_v26, %v11625_v9  ;;  %vm11486_vm2 = vcmp.ge.f32.partialorder %v36464_v59, %v31376_v32  ;;  %vm11500_vm13 = vcmp.ge.f32.partialorder %v36465_v47, %v31527_v48 }
 0x7e7   :  { %v11851_v33 = vsel %vm11850_vm9, %v11849_v21, %v11610_v10  ;;  %vm11894_vm5 = vcmp.lt.s32.totalorder %v11893_v60, %v11626_v49  ;;  %v11613_v39 = vsel %vm11485_vm4, %v31158_v1, 4096  ;;  %v11627_v6 = vsel %vm11499_vm6, %v31091_v43, 4096 }
 0x7e8   :  { %vm11852_vm0 = vcmp.lt.s32.totalorder %v11851_v33, %v11611_v23  ;;  %v11895_v17 = vsel %vm11894_vm5, %v11893_v60, %v11626_v49  ;;  %vm11487_vm12 = vcmp.ge.f32.partialorder %v36466_v42, %v31376_v32  ;;  %vm11501_vm14 = vcmp.ge.f32.partialorder %v36467_v4, %v31527_v48  ;;  %v36471_v60 = vld [vmem:[#allocation264_spill] sm:$0xff] }
 0x7e9   :  { %v11853_v35 = vsel %vm11852_vm0, %v11851_v33, %v11611_v23  ;;  %vm11896_vm15 = vcmp.lt.s32.totalorder %v11895_v17, %v11627_v6  ;;  %v11614_v16 = vsel %vm11486_vm2, %v31163_v57, 4096  ;;  %v11628_v10 = vsel %vm11500_vm13, %v31095_v22, 4096  ;;  %v36469_v23 = vld [vmem:[#allocation240_spill] sm:$0xff] }
 0x7ea   :  { %vm11854_vm11 = vcmp.lt.s32.totalorder %v11853_v35, %v11612_v24  ;;  %v11897_v21 = vsel %vm11896_vm15, %v11895_v17, %v11627_v6  ;;  %vm11502_vm9 = vcmp.ge.f32.partialorder %v36468_v61, %v31527_v48  ;;  %v11615_v13 = vsel %vm11487_vm12, %v31166_v15, 4096  ;;  %v36473_v17 = vld [vmem:[#allocation287_spill] sm:$0xff] }
 0x7eb   :  { %v11855_v27 = vsel %vm11854_vm11, %v11853_v35, %v11612_v24  ;;  %vm11898_vm10 = vcmp.lt.s32.totalorder %v11897_v21, %v11628_v10  ;;  %v11629_v32 = vsel %vm11501_vm14, %v31098_v40, 4096  ;;  %vm11503_vm4 = vcmp.ge.f32.partialorder %v36469_v23, %v31527_v48  ;;  %v36477_v23 = vld [vmem:[#allocation336_spill] sm:$0xff] }
 0x7ec   :  { %vm11856_vm7 = vcmp.lt.s32.totalorder %v11855_v27, %v11613_v39  ;;  %v11899_v52 = vsel %vm11898_vm10, %v11897_v21, %v11628_v10  ;;  %v11630_v9 = vsel %vm11502_vm9, %v31103_v63, 4096  ;;  %vm11504_vm6 = vcmp.ge.f32.partialorder %v36470_v7, %v31527_v48  ;;  %v36475_v21 = vld [vmem:[#allocation321_spill] sm:$0xff] }
 0x7ed   :  { %v11857_v2 = vsel %vm11856_vm7, %v11855_v27, %v11613_v39  ;;  %vm11900_vm0 = vcmp.lt.s32.totalorder %v11899_v52, %v11629_v32  ;;  %v11631_v24 = vsel %vm11503_vm4, %v31106_v25, 4096  ;;  %vm11505_vm2 = vcmp.ge.f32.partialorder %v36471_v60, %v31527_v48  ;;  %v36472_v39 = vld [vmem:[#allocation286_spill] sm:$0xff] }
 0x7ee   :  { %vm11858_vm8 = vcmp.lt.s32.totalorder %v11857_v2, %v11614_v16  ;;  %v11901_v26 = vsel %vm11900_vm0, %v11899_v52, %v11629_v32  ;;  %v11632_v59 = vsel %vm11504_vm6, %v31110_v55, 4096  ;;  %vm11506_vm13 = vcmp.ge.f32.partialorder %v36472_v39, %v31527_v48 }
 0x7ef   :  { %v11859_v0 = vsel %vm11858_vm8, %v11857_v2, %v11614_v16  ;;  %vm11902_vm3 = vcmp.lt.s32.totalorder %v11901_v26, %v11630_v9  ;;  %v11633_v27 = vsel %vm11505_vm2, %v31113_v44, 4096  ;;  %vm11507_vm12 = vcmp.ge.f32.partialorder %v36473_v17, %v31527_v48  ;;  %v36474_v16 = vld [vmem:[#allocation320_spill] sm:$0xff] }
 0x7f0   :  { %vm11860_vm1 = vcmp.lt.s32.totalorder %v11859_v0, %v11615_v13  ;;  %v11903_v35 = vsel %vm11902_vm3, %v11901_v26, %v11630_v9  ;;  %v11634_v42 = vsel %vm11506_vm13, %v31118_v3, 4096  ;;  %vm11508_vm14 = vcmp.ge.f32.partialorder %v36474_v16, %v31527_v48 }
 0x7f1   :  { %v31629_v33 = vsel %vm11860_vm1, %v11859_v0, %v11615_v13  ;;  %vm11904_vm11 = vcmp.lt.s32.totalorder %v11903_v35, %v11631_v24  ;;  %v11635_v2 = vsel %vm11507_vm12, %v31121_v41, 4096  ;;  %vm11509_vm8 = vcmp.ge.f32.partialorder %v36475_v21, %v31527_v48  ;;  %v36476_v0 = vld [vmem:[#allocation335_spill] sm:$0xff] }
 0x7f2   :  { %v11863_v8 = vshra.s32 %v31629_v33, 16  ;;  %v11905_v47 = vsel %vm11904_vm11, %v11903_v35, %v11631_v24  ;;  %v11636_v61 = vsel %vm11508_vm14, %v31125_v58, 4096  ;;  %vm11510_vm10 = vcmp.ge.f32.partialorder %v36476_v0, %v31527_v48  ;;  %v36479_v35 = vld [vmem:[#allocation354_spill] sm:$0xff] }
 0x7f3   :  { %vm11906_vm5 = vcmp.lt.s32.totalorder %v11905_v47, %v11632_v59  ;;  %v11637_v32 = vsel %vm11509_vm8, %v31128_v62, 4096  ;;  %vm11511_vm4 = vcmp.ge.f32.partialorder %v36477_v23, %v31527_v48  ;;  %v11638_v9 = vsel %vm11510_vm10, %v31133_v31, 4096 }
 0x7f4   :  { %v31636_v49 = vcvt.s32.f32 %v11863_v8  ;;  %v11907_v6 = vsel %vm11906_vm5, %v11905_v47, %v11632_v59  ;;  %v36478_v8 = vld [vmem:[#allocation353_spill] sm:$0xff]  ;;  %v11639_v7 = vsel %vm11511_vm4, %v31136_v54, 4096  ;;  %vm11513_vm2 = vcmp.ge.f32.partialorder %v36479_v35, %v31527_v48  ;;  %v36480_v47 = vld [vmem:[#allocation363_spill] sm:$0xff] }
 0x7f5   :  { %vm11908_vm7 = vcmp.lt.s32.totalorder %v11907_v6, %v11633_v27  ;;  %vm11512_vm6 = vcmp.ge.f32.partialorder %v36478_v8, %v31527_v48  ;;  %vm11514_vm13 = vcmp.ge.f32.partialorder %v36480_v47, %v31527_v48  ;;  %v11641_v39 = vsel %vm11513_vm2, %v31143_v51, 4096 }
 0x7f6   :  { %11866 = vmin.xlane.f32.xlu0 %v31636_v49  ;;  %v11909_v4 = vsel %vm11908_vm7, %v11907_v6, %v11633_v27  ;;  %v11640_v60 = vsel %vm11512_vm6, %v31140_v29, 4096  ;;  %v36481_v6 = vld [vmem:[#allocation364_spill] sm:$0xff]  ;;  %v11642_v17 = vsel %vm11514_vm13, %v31148_v11, 4096 }
 0x7f7   :  { %vm11910_vm15 = vcmp.lt.s32.totalorder %v11909_v4, %v11634_v42  ;;  %vm11515_vm12 = vcmp.ge.f32.partialorder %v36481_v6, %v31527_v48 }
 0x7f8   :  { %v11911_v10 = vsel %vm11910_vm15, %v11909_v4, %v11634_v42  ;;  %v36482_v4 = vld [vmem:[#allocation369_spill] sm:$0xff]  ;;  %v11643_v16 = vsel %vm11515_vm12, %v31151_v46, 4096 }
 0x7f9   :  { %vm11912_vm9 = vcmp.lt.s32.totalorder %v11911_v10, %v11635_v2  ;;  %vm11516_vm14 = vcmp.ge.f32.partialorder %v36482_v4, %v31527_v48 }
 0x7fa   :  { %v11913_v13 = vsel %vm11912_vm9, %v11911_v10, %v11635_v2  ;;  %v36483_v10 = vld [vmem:[#allocation370_spill] sm:$0xff]  ;;  %v11644_v21 = vsel %vm11516_vm14, %v31155_v56, 4096 }
 0x7fb   :  { %vm11914_vm1 = vcmp.lt.s32.totalorder %v11913_v13, %v11636_v61  ;;  %vm11517_vm8 = vcmp.ge.f32.partialorder %v36483_v10, %v31527_v48 }
 0x7fc   :  { %v11915_v52 = vsel %vm11914_vm1, %v11913_v13, %v11636_v61  ;;  %v36484_v13 = vld [vmem:[#allocation375_spill] sm:$0xff]  ;;  %v11645_v0 = vsel %vm11517_vm8, %v31158_v1, 4096 }
 0x7fd   :  { %vm11916_vm0 = vcmp.lt.s32.totalorder %v11915_v52, %v11637_v32  ;;  %vm11518_vm10 = vcmp.ge.f32.partialorder %v36484_v13, %v31527_v48 }
 0x7fe   :  { %v11917_v26 = vsel %vm11916_vm0, %v11915_v52, %v11637_v32  ;;  %v36485_v52 = vld [vmem:[#allocation376_spill] sm:$0xff]  ;;  %v11646_v23 = vsel %vm11518_vm10, %v31163_v57, 4096 }
 0x7ff   :  { %vm11918_vm3 = vcmp.lt.s32.totalorder %v11917_v26, %v11638_v9  ;;  %vm11519_vm4 = vcmp.ge.f32.partialorder %v36485_v52, %v31527_v48 }
 0x800   :  { %v11919_v24 = vsel %vm11918_vm3, %v11917_v26, %v11638_v9  ;;  %v11647_v26 = vsel %vm11519_vm4, %v31166_v15, 4096 }
 0x801   :  { %vm11920_vm11 = vcmp.lt.s32.totalorder %v11919_v24, %v11639_v7 }
 0x802   :  { %v11921_v59 = vsel %vm11920_vm11, %v11919_v24, %v11639_v7 }
 0x803   :  { %vm11922_vm5 = vcmp.lt.s32.totalorder %v11921_v59, %v11640_v60 }
 0x804   :  { %v11923_v27 = vsel %vm11922_vm5, %v11921_v59, %v11640_v60  ;;  %v11710_v60 = vand.u32 65535, %v31464_v14 }
 0x805   :  { %vm11924_vm7 = vcmp.lt.s32.totalorder %v11923_v27, %v11641_v39 }
 0x806   :  { %v11925_v42 = vsel %vm11924_vm7, %v11923_v27, %v11641_v39  ;;  %v11712_v47 = vcvt.s32.f32 %v11710_v60  ;;  %v11786_v39 = vand.u32 65535, %v31533_v36 }
 0x807   :  { %vm11926_vm15 = vcmp.lt.s32.totalorder %v11925_v42, %v11642_v17 }
 0x808   :  { %v11927_v2 = vsel %vm11926_vm15, %v11925_v42, %v11642_v17  ;;  %v11788_v6 = vcvt.s32.f32 %v11786_v39  ;;  %v11862_v42 = vand.u32 65535, %v31629_v33  ;;  %v36486_v33 = vmov 0.0   ;;  %v36490_v39 = vld [vmem:[#allocation11_spill] sm:$0xff] }
 0x809   :  { %vm11928_vm9 = vcmp.lt.s32.totalorder %v11927_v2, %v11643_v16 }
 0x80a   :  { %v11929_v61 = vsel %vm11928_vm9, %v11927_v2, %v11643_v16  ;;  %v11864_v16 = vcvt.s32.f32 %v11862_v42 }
 0x80b   :  { %vm11930_vm1 = vcmp.lt.s32.totalorder %v11929_v61, %v11644_v21 }
 0x80c   :  { %v11931_v32 = vsel %vm11930_vm1, %v11929_v61, %v11644_v21 }
 0x80d   :  { %vm11932_vm0 = vcmp.lt.s32.totalorder %v11931_v32, %v11645_v0 }
 0x80e   :  { %v11933_v9 = vsel %vm11932_vm0, %v11931_v32, %v11645_v0  ;;  %v35806_v32 = vmov 1.0  }
 0x80f   :  { %vm11934_vm6 = vcmp.lt.s32.totalorder %v11933_v9, %v11646_v23 }
 0x810   :  { %v11935_v8 = vsel %vm11934_vm6, %v11933_v9, %v11646_v23 }
 0x811   :  { %vm11936_vm3 = vcmp.lt.s32.totalorder %v11935_v8, %v11647_v26 }
 0x812   :  { %v11937_v7 = vsel %vm11936_vm3, %v11935_v8, %v11647_v26  ;;  %v36487_v26 = vld [vmem:[#allocation15_spill] sm:$0xff] }
 0x813   :  { %v11939_v24 = vshra.s32 %v11937_v7, 16  ;;  %v11938_v2 = vand.u32 65535, %v11937_v7  ;;  %v36488_v7 = vld [vmem:[#allocation16_spill] sm:$0xff] }
 0x815   :  { %v11941_v35 = vcvt.s32.f32 %v11939_v24  ;;  %v11940_v10 = vcvt.s32.f32 %v11938_v2 }
 0x817   :  { %11942 = vmin.xlane.f32.xlu1 %v11941_v35 }
 0x84e   :  { %v11715_v59 = vpop.xlane.xlu0 %11714 }
 0x84f   :  { %vm11716_vm2 = vcmp.eq.f32.partialorder %v31476_v19, %v11715_v59  ;;  %v11721_v21 = vcvt.f32.s32 %v11715_v59 }
 0x850   :  { %v11717_v48 = vsel %vm11716_vm2, %v11712_v47, inf }
 0x851   :  { %11718 = vmin.xlane.f32.xlu0 %v11717_v48  ;;  %v11722_v61 = vshll.u32 %v11721_v21, 16  ;;  %v36489_v48 = vld [vmem:[#allocation17_spill] sm:$0xff] }
 0x862   :  { %v11791_v27 = vpop.xlane.xlu1 %11790 }
 0x863   :  { %vm11792_vm11 = vcmp.eq.f32.partialorder %v31544_v18, %v11791_v27 }
 0x864   :  { %v11793_v17 = vsel %vm11792_vm11, %v11788_v6, inf  ;;  %v11797_v6 = vcvt.f32.s32 %v11791_v27 }
 0x865   :  { %11794 = vmin.xlane.f32.xlu1 %v11793_v17 }
 0x866   :  { %v11798_v42 = vshll.u32 %v11797_v6, 16 }
 0x883   :  { %v11867_v4 = vpop.xlane.xlu0 %11866 }
 0x884   :  { %vm11868_vm13 = vcmp.eq.f32.partialorder %v31636_v49, %v11867_v4 }
 0x885   :  { %v11869_v14 = vsel %vm11868_vm13, %v11864_v16, inf }
 0x886   :  { %11870 = vmin.xlane.f32.xlu0 %v11869_v14 }
 0x8a4   :  { %v31691_v19 = vpop.xlane.xlu1 %11942 }
 0x8a5   :  { %vm11944_vm5 = vcmp.eq.f32.partialorder %v11941_v35, %v31691_v19 }
 0x8a6   :  { %v11945_v36 = vsel %vm11944_vm5, %v11940_v10, inf }
 0x8a7   :  { %11946 = vmin.xlane.f32.xlu1 %v11945_v36 }
 0x8de   :  { %v11719_v18 = vpop.xlane.xlu0 %11718 }
 0x8df   :  { %v11720_v13 = vcvt.f32.s32 %v11719_v18 }
 0x8e1   :  { %v31694_v0 = vadd.s32 %v11722_v61, %v11720_v13 }
 0x8e3   :  { %vm11953_vm12 = vcmp.eq.s32.totalorder %v31051_v28, %v31694_v0  ;;  %vm11952_vm7 = vcmp.eq.s32.totalorder %v31046_v37, %v31694_v0  ;;  %vm11955_vm4 = vcmp.eq.s32.totalorder %v31063_v20, %v31694_v0  ;;  %vm11954_vm0 = vcmp.eq.s32.totalorder %v31058_v34, %v31694_v0 }
 0x8e4   :  { %v23909_v49 = vsel %vm11953_vm12, 1.0, %v36486_v33  ;;  %24036 = vmatprep.mubr.msk.f32.mxu0 %vm11953_vm12, %v35806_v32  ;;  %v23908_v52 = vsel %vm11952_vm7, 1.0, %v36486_v33 }
 0x8e5   :  { %v31712_v23 = vsub.f32 %v23909_v49, %v23909_v49  ;;  %v31714_v9 = vsub.f32 %v23908_v52, %v23908_v52  ;;  %24037 = vmatmul.mubr.msk.f32.vlgmr.msra.gmra.mrb[8].mxu0 %vm11952_vm7, %v35806_v32 }
 0x8e6   :  { %25207 = vmatpush1.bf16.xpose.msra.mxu0 %v36487_v26  ;;  %v11873_v26 = vcvt.f32.s32 %v11867_v4 }
 0x8e7   :  { %v12410_v8 = vand.u32 4294901760, %v31712_v23  ;;  %25209 = vmatprep.subr.bf16.mxu0 %v36488_v7  ;;  %v12416_v24 = vand.u32 4294901760, %v31714_v9 }
 0x8e9   :  { %v12411_v35 = vsub.f32 %v31712_v23, %v12410_v8  ;;  %v12417_v60 = vsub.f32 %v31714_v9, %v12416_v24 }
 0x8eb   :  { %v12412_v59 = vand.u32 4294901760, %v12411_v35  ;;  %v12418_v47 = vand.u32 4294901760, %v12417_v60  ;;  %v11874_v35 = vshll.u32 %v11873_v26, 16 }
 0x8ed   :  { %12413 = vmatprep.mubr.f32.mxu1 %v12412_v59 }
 0x8ee   :  { %12419 = vmatmul.mubr.f32.vlgmr.msra.gmra.mrb[128].mxu1 %v12418_v47  ;;  %25211 = vmatpush1.bf16.xpose.msra.mxu0 %v36489_v48 }
 0x8ef   :  { %25213 = vmatprep.subr.bf16.mxu0 %v36490_v39 }
 0x8f2   :  { %v11795_v17 = vpop.xlane.xlu1 %11794 }
 0x8f3   :  { %v11796_v16 = vcvt.f32.s32 %v11795_v17 }
 0x8f5   :  { %v31732_v14 = vadd.s32 %v11798_v42, %v11796_v16 }
 0x8f7   :  { %vm11985_vm14 = vcmp.eq.s32.totalorder %v31051_v28, %v31732_v14  ;;  %vm11984_vm15 = vcmp.eq.s32.totalorder %v31046_v37, %v31732_v14  ;;  %vm11987_vm6 = vcmp.eq.s32.totalorder %v31063_v20, %v31732_v14  ;;  %vm11986_vm3 = vcmp.eq.s32.totalorder %v31058_v34, %v31732_v14 }
 0x8f8   :  { %v23941_v2 = vsel %vm11985_vm14, 1.0, %v36486_v33  ;;  %24038 = vmatprep.mubr.msk.f32.mxu0 %vm11985_vm14, %v35806_v32  ;;  %v23940_v27 = vsel %vm11984_vm15, 1.0, %v36486_v33 }
 0x8f9   :  { %v31750_v10 = vsub.f32 %v23941_v2, %v23941_v2  ;;  %v31752_v36 = vsub.f32 %v23940_v27, %v23940_v27  ;;  %24039 = vmatmul.mubr.msk.f32.gmra.mrb[10].mxu0 %vm11984_vm15, %v35806_v32 }
 0x8fb   :  { %v12425_v21 = vand.u32 4294901760, %v31750_v10  ;;  %v12431_v18 = vand.u32 4294901760, %v31752_v36 }
 0x8fd   :  { %v12426_v61 = vsub.f32 %v31750_v10, %v12425_v21  ;;  %v12432_v13 = vsub.f32 %v31752_v36, %v12431_v18 }
 0x8ff   :  { %v12427_v49 = vand.u32 4294901760, %v12426_v61  ;;  %v12433_v52 = vand.u32 4294901760, %v12432_v13  ;;  %v11949_v13 = vcvt.f32.s32 %v31691_v19 }
 0x901   :  { %12428 = vmatprep.mubr.f32.mxu1 %v12427_v49 }
 0x902   :  { %12434 = vmatmul.mubr.f32.gmra.mrb[130].mxu1 %v12433_v52  ;;  %v11950_v52 = vshll.u32 %v11949_v13, 16 }
 0x913   :  { %v11871_v7 = vpop.xlane.xlu0 %11870 }
 0x914   :  { %v11872_v60 = vcvt.f32.s32 %v11871_v7 }
 0x916   :  { %v31766_v59 = vadd.s32 %v11874_v35, %v11872_v60 }
 0x918   :  { %vm12017_vm8 = vcmp.eq.s32.totalorder %v31051_v28, %v31766_v59  ;;  %vm12016_vm9 = vcmp.eq.s32.totalorder %v31046_v37, %v31766_v59  ;;  %vm12019_vm2 = vcmp.eq.s32.totalorder %v31063_v20, %v31766_v59  ;;  %vm12018_vm11 = vcmp.eq.s32.totalorder %v31058_v34, %v31766_v59 }
 0x919   :  { %v23973_v47 = vsel %vm12017_vm8, 1.0, %v36486_v33  ;;  %24040 = vmatprep.mubr.msk.f32.mxu0 %vm12017_vm8, %v35806_v32  ;;  %v23972_v4 = vsel %vm12016_vm9, 1.0, %v36486_v33 }
 0x91a   :  { %v12439_v48 = vsub.f32 %v23973_v47, %v23973_v47  ;;  %v12445_v6 = vsub.f32 %v23972_v4, %v23972_v4  ;;  %24041 = vmatmul.mubr.msk.f32.gmra.mrb[12].mxu0 %vm12016_vm9, %v35806_v32 }
 0x91c   :  { %v12440_v17 = vand.u32 4294901760, %v12439_v48  ;;  %v12446_v42 = vand.u32 4294901760, %v12445_v6 }
 0x91e   :  { %v12441_v16 = vsub.f32 %v12439_v48, %v12440_v17  ;;  %v12447_v2 = vsub.f32 %v12445_v6, %v12446_v42 }
 0x920   :  { %v12442_v27 = vand.u32 4294901760, %v12441_v16  ;;  %v12448_v61 = vand.u32 4294901760, %v12447_v2 }
 0x922   :  { %12443 = vmatprep.mubr.f32.mxu1 %v12442_v27 }
 0x923   :  { %12449 = vmatmul.mubr.f32.gmra.mrb[132].mxu1 %v12448_v61  ;;  %v36491_v61 = vld [vmem:[#allocation12_spill] sm:$0xff] }
 0x934   :  { %v11947_v49 = vpop.xlane.xlu1 %11946 }
 0x935   :  { %v11948_v26 = vcvt.f32.s32 %v11947_v49 }
 0x937   :  { %v31789_v7 = vadd.s32 %v11950_v52, %v11948_v26  ;;  %v36492_v52 = vld [vmem:[#allocation13_spill] sm:$0xff]  ;;  %v36493_v26 = vld [vmem:[#allocation14_spill] sm:$0xff] }
 0x939   :  { %vm12049_vm10 = vcmp.eq.s32.totalorder %v31051_v28, %v31789_v7  ;;  %vm12048_vm1 = vcmp.eq.s32.totalorder %v31046_v37, %v31789_v7  ;;  %vm12051_vm13 = vcmp.eq.s32.totalorder %v31063_v20, %v31789_v7  ;;  %vm12050_vm5 = vcmp.eq.s32.totalorder %v31058_v34, %v31789_v7  ;;  %v36524_v34 = vld [vmem:[#allocation43_spill] sm:$0xff] }
 0x93a   :  { %v24005_v35 = vsel %vm12049_vm10, 1.0, %v36486_v33  ;;  %24042 = vmatprep.mubr.msk.f32.mxu0 %vm12049_vm10, %v35806_v32  ;;  %v24004_v19 = vsel %vm12048_vm1, 1.0, %v36486_v33 }
 0x93b   :  { %v12454_v60 = vsub.f32 %v24005_v35, %v24005_v35  ;;  %v12460_v47 = vsub.f32 %v24004_v19, %v24004_v19  ;;  %24043 = vmatmul.mubr.msk.f32.gmra.mrb[14].mxu0 %vm12048_vm1, %v35806_v32  ;;  %v36494_v35 = vld [vmem:[#allocation18_spill] sm:$0xff]  ;;  %v36495_v19 = vld [vmem:[#allocation19_spill] sm:$0xff] }
 0x93c   :  { %12684 = vmatprep.mubr.f32.mxu0 %v31712_v23  ;;  %v36498_v23 = vld [vmem:[#allocation22_spill] sm:$0xff] }
 0x93d   :  { %v12455_v4 = vand.u32 4294901760, %v12454_v60  ;;  %v12461_v16 = vand.u32 4294901760, %v12460_v47 }
 0x93f   :  { %12687 = vmatmul.mubr.f32.vlgmr.msra.gmra.mrb[8].mxu0 %v31714_v9  ;;  %v12456_v2 = vsub.f32 %v12454_v60, %v12455_v4  ;;  %v12462_v27 = vsub.f32 %v12460_v47, %v12461_v16  ;;  %v23911_v9 = vsel %vm11955_vm4, 1.0, %v36486_v33 }
 0x940   :  { %12693 = vmatprep.mubr.f32.mxu0 %v31750_v10  ;;  %25215 = vmatpush1.bf16.xpose.msra.mxu0 %v36491_v61  ;;  %v36499_v10 = vld [vmem:[#allocation23_spill] sm:$0xff] }
 0x941   :  { %v12457_v13 = vand.u32 4294901760, %v12456_v2  ;;  %v12463_v49 = vand.u32 4294901760, %v12462_v27  ;;  %25217 = vmatprep.subr.bf16.mxu0 %v36492_v52  ;;  %v36496_v2 = vld [vmem:[#allocation20_spill] sm:$0xff] }
 0x943   :  { %12458 = vmatprep.mubr.f32.mxu1 %v12457_v13  ;;  %12696 = vmatmul.mubr.f32.gmra.mrb[10].mxu0 %v31752_v36  ;;  %v36500_v36 = vld [vmem:[#allocation24_spill] sm:$0xff]  ;;  %v24007_v13 = vsel %vm12051_vm13, 1.0, %v36486_v33 }
 0x944   :  { %12464 = vmatmul.mubr.f32.gmra.mrb[134].mxu1 %v12463_v49  ;;  %12702 = vmatprep.mubr.f32.mxu0 %v12439_v48  ;;  %v36497_v48 = vld [vmem:[#allocation21_spill] sm:$0xff] }
 0x945   :  { %v36501_v49 = vld [vmem:[#allocation25_spill] sm:$0xff] }
 0x947   :  { %12705 = vmatmul.mubr.f32.gmra.mrb[12].mxu0 %v12445_v6 }
 0x948   :  { %12711 = vmatprep.mubr.f32.mxu0 %v12454_v60  ;;  %25219 = vmatpush1.bf16.xpose.msra.mxu0 %v36493_v26 }
 0x949   :  { %25221 = vmatprep.subr.bf16.mxu0 %v36494_v35  ;;  %v36502_v35 = vld [vmem:[#allocation26_spill] sm:$0xff] }
 0x94b   :  { %12714 = vmatmul.mubr.f32.gmra.mrb[14].mxu0 %v12460_v47 }
 0x94c   :  { %12794 = vmatprep.mubr.f32.mxu0 %v12410_v8  ;;  %v31881_v8 = vsub.f32 %v23911_v9, %v23911_v9  ;;  %v31969_v9 = vsub.f32 %v24007_v13, %v24007_v13 }
 0x94f   :  { %12798 = vmatmul.mubr.f32.vlgmr.msra.gmra.mrb[8].mxu0 %v12416_v24  ;;  %v23910_v24 = vsel %vm11954_vm0, 1.0, %v36486_v33 }
 0x950   :  { %12805 = vmatprep.mubr.f32.mxu0 %v12425_v21  ;;  %25223 = vmatpush1.bf16.xpose.msra.mxu0 %v36495_v19  ;;  %v35804_v21 = vand.u32 4294901760, %v31881_v8 }
 0x951   :  { %25225 = vmatprep.subr.bf16.mxu0 %v36496_v2 }
 0x952   :  { %v13129_v60 = vsub.f32 %v31881_v8, %v35804_v21 }
 0x953   :  { %12809 = vmatmul.mubr.f32.gmra.mrb[10].mxu0 %v12431_v18  ;;  %v31906_v18 = vsub.f32 %v23910_v24, %v23910_v24  ;;  %v24006_v24 = vsel %vm12050_vm5, 1.0, %v36486_v33 }
 0x954   :  { %12816 = vmatprep.mubr.f32.mxu0 %v12440_v17  ;;  %v23942_v17 = vsel %vm11986_vm3, 1.0, %v36486_v33 }
 0x955   :  { %v35803_v47 = vand.u32 4294901760, %v31906_v18 }
 0x957   :  { %12820 = vmatmul.mubr.f32.gmra.mrb[12].mxu0 %v12446_v42  ;;  %v23975_v42 = vsel %vm12019_vm2, 1.0, %v36486_v33 }
 0x958   :  { %12827 = vmatprep.mubr.f32.mxu0 %v12455_v4  ;;  %25227 = vmatpush1.bf16.xpose.msra.mxu0 %v36497_v48  ;;  %v31934_v4 = vsub.f32 %v23942_v17, %v23942_v17  ;;  %v31937_v27 = vsub.f32 %v23975_v42, %v23975_v42 }
 0x959   :  { %25229 = vmatprep.subr.bf16.mxu0 %v36490_v39  ;;  %v23943_v39 = vsel %vm11987_vm6, 1.0, %v36486_v33 }
 0x95a   :  { %v31908_v6 = vsub.f32 %v23943_v39, %v23943_v39  ;;  %v35805_v19 = vand.u32 4294901760, %v31934_v4  ;;  %v13158_v28 = vand.u32 4294901760, %v31937_v27 }
 0x95b   :  { %12831 = vmatmul.mubr.f32.gmra.mrb[14].mxu0 %v12461_v16 }
 0x95c   :  { %24044 = vmatprep.mubr.msk.f32.mxu0 %vm11953_vm12, %v35806_v32  ;;  %v35802_v16 = vand.u32 4294901760, %v31908_v6  ;;  %v13150_v17 = vsub.f32 %v31934_v4, %v35805_v19  ;;  %v13159_v13 = vsub.f32 %v31937_v27, %v13158_v28 }
 0x95e   :  { %v13144_v48 = vsub.f32 %v31908_v6, %v35802_v16  ;;  %v36503_v16 = vld [vmem:[#allocation27_spill] sm:$0xff]  ;;  %v13151_v37 = vand.u32 4294901760, %v13150_v17  ;;  %v13160_v21 = vand.u32 4294901760, %v13159_v13  ;;  %v36507_v17 = vmov 1.0   ;;  %v36511_v13 = vld [vmem:[#allocation34_spill] sm:$0xff] }
 0x95f   :  { %24045 = vmatmul.mubr.msk.f32.vlgmr.msra.gmra.mrb[8].mxu0 %vm11952_vm7, %v35806_v32 }
 0x960   :  { %24046 = vmatprep.mubr.msk.f32.mxu0 %vm11985_vm14, %v35806_v32  ;;  %25231 = vmatpush1.bf16.xpose.msra.mxu0 %v36491_v61  ;;  %v23974_v61 = vsel %vm12018_vm11, 1.0, %v36486_v33 }
 0x961   :  { %25233 = vmatprep.subr.bf16.mxu0 %v36492_v52  ;;  %v13130_v52 = vand.u32 4294901760, %v13129_v60  ;;  %v31963_v2 = vsub.f32 %v23974_v61, %v23974_v61  ;;  %v13178_v60 = vsub.f32 %v24006_v24, %v24006_v24  ;;  %v13145_v61 = vand.u32 4294901760, %v13144_v48 }
 0x963   :  { %24047 = vmatmul.mubr.msk.f32.gmra.mrb[10].mxu0 %vm11984_vm15, %v35806_v32  ;;  %v13164_v42 = vand.u32 4294901760, %v31963_v2 }
 0x964   :  { %24048 = vmatprep.mubr.msk.f32.mxu0 %vm12017_vm8, %v35806_v32 }
 0x967   :  { %24049 = vmatmul.mubr.msk.f32.gmra.mrb[12].mxu0 %vm12016_vm9, %v35806_v32 }
 0x968   :  { %24050 = vmatprep.mubr.msk.f32.mxu0 %vm12049_vm10, %v35806_v32  ;;  %25235 = vmatpush1.bf16.xpose.msra.mxu0 %v36493_v26  ;;  %v13135_v26 = vsub.f32 %v31906_v18, %v35803_v47  ;;  %v13179_v47 = vand.u32 4294901760, %v13178_v60 }
 0x969   :  { %25237 = vmatprep.subr.bf16.mxu0 %v36498_v23 }
 0x96a   :  { %v13136_v39 = vand.u32 4294901760, %v13135_v26  ;;  %v36504_v26 = vld [vmem:[#allocation28_spill] sm:$0xff]  ;;  %v13180_v24 = vsub.f32 %v13178_v60, %v13179_v47 }
 0x96b   :  { %24051 = vmatmul.mubr.msk.f32.gmra.mrb[14].mxu0 %vm12048_vm1, %v35806_v32 }
 0x96c   :  { %24052 = vmatprep.mubr.msk.f32.mxu0 %vm11953_vm12, %v35806_v32  ;;  %vm11957_vm12 = vcmp.eq.s32.totalorder %v31071_v45, %v31694_v0 }
 0x96f   :  { %24053 = vmatmul.mubr.msk.f32.vlgmr.msra.gmra.mrb[8].mxu0 %vm11952_vm7, %v35806_v32  ;;  %vm11956_vm7 = vcmp.eq.s32.totalorder %v31068_v12, %v31694_v0 }
 0x970   :  { %24054 = vmatprep.mubr.msk.f32.mxu0 %vm11985_vm14, %v35806_v32  ;;  %25239 = vmatpush1.bf16.xpose.msra.mxu0 %v36499_v10  ;;  %vm11989_vm14 = vcmp.eq.s32.totalorder %v31071_v45, %v31732_v14 }
 0x971   :  { %25241 = vmatprep.subr.bf16.mxu0 %v36500_v36 }
 0x973   :  { %24055 = vmatmul.mubr.msk.f32.gmra.mrb[10].mxu0 %vm11984_vm15, %v35806_v32  ;;  %vm11988_vm15 = vcmp.eq.s32.totalorder %v31068_v12, %v31732_v14 }
 0x974   :  { %24056 = vmatprep.mubr.msk.f32.mxu0 %vm12017_vm8, %v35806_v32  ;;  %vm12021_vm8 = vcmp.eq.s32.totalorder %v31071_v45, %v31766_v59 }
 0x977   :  { %24057 = vmatmul.mubr.msk.f32.gmra.mrb[12].mxu0 %vm12016_vm9, %v35806_v32  ;;  %vm12020_vm9 = vcmp.eq.s32.totalorder %v31068_v12, %v31766_v59 }
 0x978   :  { %24058 = vmatprep.mubr.msk.f32.mxu0 %vm12049_vm10, %v35806_v32  ;;  %25243 = vmatpush1.bf16.xpose.msra.mxu0 %v36501_v49  ;;  %vm12053_vm10 = vcmp.eq.s32.totalorder %v31071_v45, %v31789_v7 }
 0x979   :  { %25245 = vmatprep.subr.bf16.mxu0 %v36502_v35  ;;  %v13173_v35 = vand.u32 4294901760, %v31969_v9 }
 0x97b   :  { %24059 = vmatmul.mubr.msk.f32.gmra.mrb[14].mxu0 %vm12048_vm1, %v35806_v32  ;;  %v13174_v19 = vsub.f32 %v31969_v9, %v13173_v35  ;;  %vm12052_vm1 = vcmp.eq.s32.totalorder %v31068_v12, %v31789_v7 }
 0x97c   :  { %13131 = vmatprep.mubr.f32.mxu0 %v13130_v52  ;;  %v13165_v52 = vsub.f32 %v31963_v2, %v13164_v42 }
 0x97d   :  { %v13175_v32 = vand.u32 4294901760, %v13174_v19  ;;  %v36510_v19 = vld [vmem:[#allocation33_spill] sm:$0xff] }
 0x97e   :  { %v13166_v48 = vand.u32 4294901760, %v13165_v52  ;;  %v36513_v52 = vand.u32 4294901760, %v31906_v18 }
 0x97f   :  { %13137 = vmatmul.mubr.f32.vlgmr.msra.gmra.mrb[8].mxu0 %v13136_v39  ;;  %v36505_v39 = vld [vmem:[#allocation29_spill] sm:$0xff] }
 0x980   :  { %13146 = vmatprep.mubr.f32.mxu0 %v13145_v61  ;;  %25247 = vmatpush1.bf16.xpose.msra.mxu0 %v36503_v16  ;;  %v13181_v61 = vand.u32 4294901760, %v13180_v24  ;;  %v36506_v16 = vld [vmem:[#allocation30_spill] sm:$0xff]  ;;  %v23977_v24 = vsel %vm12021_vm8, 1.0, %v36486_v33 }
 0x981   :  { %25249 = vmatprep.subr.bf16.mxu0 %v36504_v26  ;;  %v36514_v26 = vand.u32 4294901760, %v31908_v6 }
 0x983   :  { %13152 = vmatmul.mubr.f32.gmra.mrb[10].mxu0 %v13151_v37  ;;  %v36512_v37 = vand.u32 4294901760, %v31881_v8 }
 0x984   :  { %13161 = vmatprep.mubr.f32.mxu0 %v13160_v21  ;;  %v36509_v21 = vld [vmem:[#allocation32_spill] sm:$0xff] }
 0x987   :  { %13167 = vmatmul.mubr.f32.gmra.mrb[12].mxu0 %v13166_v48  ;;  %v36515_v48 = vld [vmem:[#allocation35_spill] sm:$0xff] }
 0x988   :  { %13176 = vmatprep.mubr.f32.mxu0 %v13175_v32  ;;  %25251 = vmatpush1.bf16.xpose.msra.mxu0 %v36505_v39  ;;  %v36508_v32 = vld [vmem:[#allocation31_spill] sm:$0xff] }
 0x989   :  { %25253 = vmatprep.subr.bf16.mxu0 %v36506_v16 }
 0x98b   :  { %13182 = vmatmul.mubr.f32.gmra.mrb[14].mxu0 %v13181_v61 }
 0x98c   :  { %24060 = vmatprep.mubr.msk.f32.mxu0 %vm11955_vm4, %v36507_v17 }
 0x98f   :  { %24061 = vmatmul.mubr.msk.f32.vlgmr.msra.gmra.mrb[8].mxu0 %vm11954_vm0, %v36507_v17 }
 0x990   :  { %24062 = vmatprep.mubr.msk.f32.mxu0 %vm11987_vm6, %v36507_v17  ;;  %25255 = vmatpush1.bf16.xpose.msra.mxu0 %v36508_v32 }
 0x991   :  { %25257 = vmatprep.subr.bf16.mxu0 %v36509_v21 }
 0x993   :  { %24063 = vmatmul.mubr.msk.f32.gmra.mrb[10].mxu0 %vm11986_vm3, %v36507_v17 }
 0x994   :  { %24064 = vmatprep.mubr.msk.f32.mxu0 %vm12019_vm2, %v36507_v17 }
 0x997   :  { %24065 = vmatmul.mubr.msk.f32.gmra.mrb[12].mxu0 %vm12018_vm11, %v36507_v17 }
 0x998   :  { %24066 = vmatprep.mubr.msk.f32.mxu0 %vm12051_vm13, %v36507_v17  ;;  %25259 = vmatpush1.bf16.xpose.msra.mxu0 %v36510_v19 }
 0x999   :  { %25261 = vmatprep.subr.bf16.mxu0 %v36498_v23 }
 0x99b   :  { %24067 = vmatmul.mubr.msk.f32.gmra.mrb[14].mxu0 %vm12050_vm5, %v36507_v17 }
 0x99c   :  { %13402 = vmatprep.mubr.f32.mxu0 %v31881_v8 }
 0x99f   :  { %13405 = vmatmul.mubr.f32.vlgmr.msra.gmra.mrb[8].mxu0 %v31906_v18 }
 0x9a0   :  { %13411 = vmatprep.mubr.f32.mxu0 %v31908_v6  ;;  %25263 = vmatpush1.bf16.xpose.msra.mxu0 %v36499_v10  ;;  %v23912_v6 = vsel %vm11956_vm7, 1.0, %v36486_v33 }
 0x9a1   :  { %25265 = vmatprep.subr.bf16.mxu0 %v36500_v36 }
 0x9a3   :  { %13414 = vmatmul.mubr.f32.gmra.mrb[10].mxu0 %v31934_v4 }
 0x9a4   :  { %13420 = vmatprep.mubr.f32.mxu0 %v31937_v27  ;;  %v36516_v27 = vld [vmem:[#allocation36_spill] sm:$0xff] }
 0x9a7   :  { %13423 = vmatmul.mubr.f32.gmra.mrb[12].mxu0 %v31963_v2  ;;  %v36517_v2 = vand.u32 4294901760, %v31934_v4  ;;  %v36520_v4 = vld [vmem:[#allocation39_spill] sm:$0xff] }
 0x9a8   :  { %13429 = vmatprep.mubr.f32.mxu0 %v31969_v9  ;;  %25267 = vmatpush1.bf16.xpose.msra.mxu0 %v36501_v49  ;;  %v36518_v9 = vld [vmem:[#allocation37_spill] sm:$0xff] }
 0x9a9   :  { %25269 = vmatprep.subr.bf16.mxu0 %v36511_v13  ;;  %v32160_v13 = vsub.f32 %v23977_v24, %v23977_v24 }
 0x9ab   :  { %13432 = vmatmul.mubr.f32.gmra.mrb[14].mxu0 %v13178_v60  ;;  %v35811_v20 = vand.u32 4294901760, %v32160_v13 }
 0x9ac   :  { %13512 = vmatprep.mubr.f32.mxu0 %v36512_v37  ;;  %v23976_v37 = vsel %vm12020_vm9, 1.0, %v36486_v33 }
 0x9af   :  { %13516 = vmatmul.mubr.f32.vlgmr.msra.gmra.mrb[8].mxu0 %v36513_v52  ;;  %v24009_v52 = vsel %vm12053_vm10, 1.0, %v36486_v33 }
 0x9b0   :  { %13523 = vmatprep.mubr.f32.mxu0 %v36514_v26  ;;  %25271 = vmatpush1.bf16.xpose.msra.mxu0 %v36515_v48  ;;  %v36522_v26 = vld [vmem:[#allocation41_spill] sm:$0xff] }
 0x9b1   :  { %25273 = vmatprep.subr.bf16.mxu0 %v36516_v27 }
 0x9b3   :  { %13527 = vmatmul.mubr.f32.gmra.mrb[10].mxu0 %v36517_v2  ;;  %v36523_v2 = vld [vmem:[#allocation42_spill] sm:$0xff] }
 0x9b4   :  { %13534 = vmatprep.mubr.f32.mxu0 %v13158_v28 }
 0x9b7   :  { %13538 = vmatmul.mubr.f32.gmra.mrb[12].mxu0 %v13164_v42  ;;  %v32127_v42 = vsub.f32 %v23912_v6, %v23912_v6  ;;  %v32192_v6 = vsub.f32 %v24009_v52, %v24009_v52  ;;  %v13877_v52 = vsub.f32 %v32160_v13, %v35811_v20 }
 0x9b8   :  { %13545 = vmatprep.mubr.f32.mxu0 %v13173_v35  ;;  %25275 = vmatpush1.bf16.xpose.msra.mxu0 %v36518_v9  ;;  %v23944_v35 = vsel %vm11988_vm15, 1.0, %v36486_v33 }
 0x9b9   :  { %25277 = vmatprep.subr.bf16.mxu0 %v36498_v23  ;;  %v36519_v23 = vld [vmem:[#allocation38_spill] sm:$0xff]  ;;  %v35810_v32 = vand.u32 4294901760, %v32127_v42  ;;  %v32157_v21 = vsub.f32 %v23944_v35, %v23944_v35 }
 0x9bb   :  { %13549 = vmatmul.mubr.f32.gmra.mrb[14].mxu0 %v13179_v47  ;;  %v23945_v47 = vsel %vm11989_vm14, 1.0, %v36486_v33  ;;  %v13853_v27 = vsub.f32 %v32127_v42, %v35810_v32  ;;  %v35809_v9 = vand.u32 4294901760, %v32157_v21 }
 0x9bc   :  { %24068 = vmatprep.mubr.msk.f32.mxu0 %vm11955_vm4, %v36507_v17  ;;  %v32129_v60 = vsub.f32 %v23945_v47, %v23945_v47  ;;  %v24008_v47 = vsel %vm12052_vm1, 1.0, %v36486_v33 }
 0x9bd   :  { %v13854_v35 = vand.u32 4294901760, %v13853_v27  ;;  %v13868_v24 = vsub.f32 %v32157_v21, %v35809_v9 }
 0x9be   :  { %v35808_v19 = vand.u32 4294901760, %v32129_v60 }
 0x9bf   :  { %24069 = vmatmul.mubr.msk.f32.vlgmr.msra.gmra.mrb[8].mxu0 %vm11954_vm0, %v36507_v17 }
 0x9c0   :  { %24070 = vmatprep.mubr.msk.f32.mxu0 %vm11987_vm6, %v36507_v17  ;;  %25279 = vmatpush1.bf16.xpose.msra.mxu0 %v36499_v10  ;;  %v23913_v10 = vsel %vm11957_vm12, 1.0, %v36486_v33 }
 0x9c1   :  { %v32054_v8 = vpop.f32.mrb[128].mxu1  ;;  %25281 = vmatprep.subr.bf16.mxu0 %v36500_v36  ;;  %v32102_v36 = vsub.f32 %v23913_v10, %v23913_v10  ;;  %v13862_v10 = vsub.f32 %v32129_v60, %v35808_v19  ;;  %v36525_v19 = vld [vmem:[#allocation44_spill] sm:$0xff] }
 0x9c2   :  { %v12422_v18 = vpop.f32.mrb[129].mxu1 }
 0x9c3   :  { %24071 = vmatmul.mubr.msk.f32.gmra.mrb[10].mxu0 %vm11986_vm3, %v36507_v17  ;;  %v35812_v28 = vand.u32 4294901760, %v32102_v36  ;;  %v32186_v18 = vsub.f32 %v23976_v37, %v23976_v37  ;;  %v13863_v37 = vand.u32 4294901760, %v13862_v10 }
 0x9c4   :  { %24072 = vmatprep.mubr.msk.f32.mxu0 %vm12019_vm2, %v36507_v17 }
 0x9c5   :  { %v13847_v16 = vsub.f32 %v32102_v36, %v35812_v28 }
 0x9c7   :  { %24073 = vmatmul.mubr.msk.f32.gmra.mrb[12].mxu0 %vm12018_vm11, %v36507_v17  ;;  %v13848_v48 = vand.u32 4294901760, %v13847_v16  ;;  %v32206_v16 = vsub.f32 %v24008_v47, %v24008_v47  ;;  %v13878_v47 = vand.u32 4294901760, %v13877_v52  ;;  %v36530_v52 = vld [vmem:[#allocation49_spill] sm:$0xff] }
 0x9c8   :  { %24074 = vmatprep.mubr.msk.f32.mxu0 %vm12051_vm13, %v36507_v17  ;;  %25283 = vmatpush1.bf16.xpose.msra.mxu0 %v36501_v49  ;;  %v36521_v49 = vld [vmem:[#allocation40_spill] sm:$0xff] }
 0x9c9   :  { %25285 = vmatprep.subr.bf16.mxu0 %v36519_v23  ;;  %v13897_v9 = vand.u32 4294901760, %v32206_v16 }
 0x9cb   :  { %24075 = vmatmul.mubr.msk.f32.gmra.mrb[14].mxu0 %vm12050_vm5, %v36507_v17  ;;  %v13898_v20 = vsub.f32 %v32206_v16, %v13897_v9 }
 0x9cc   :  { %24076 = vmatprep.mubr.msk.f32.mxu0 %vm11955_vm4, %v36507_v17  ;;  %vm11959_vm4 = vcmp.eq.s32.totalorder %v31077_v5, %v31694_v0 }
 0x9cf   :  { %24077 = vmatmul.mubr.msk.f32.vlgmr.msra.gmra.mrb[8].mxu0 %vm11954_vm0, %v36507_v17  ;;  %vm11958_vm0 = vcmp.eq.s32.totalorder %v31074_v38, %v31694_v0 }
 0x9d0   :  { %24078 = vmatprep.mubr.msk.f32.mxu0 %vm11987_vm6, %v36507_v17  ;;  %25287 = vmatpush1.bf16.xpose.msra.mxu0 %v36520_v4  ;;  %vm11991_vm6 = vcmp.eq.s32.totalorder %v31077_v5, %v31732_v14 }
 0x9d1   :  { %25289 = vmatprep.subr.bf16.mxu0 %v36521_v49 }
 0x9d3   :  { %24079 = vmatmul.mubr.msk.f32.gmra.mrb[10].mxu0 %vm11986_vm3, %v36507_v17  ;;  %vm11990_vm3 = vcmp.eq.s32.totalorder %v31074_v38, %v31732_v14 }
 0x9d4   :  { %24080 = vmatprep.mubr.msk.f32.mxu0 %vm12019_vm2, %v36507_v17  ;;  %vm12023_vm2 = vcmp.eq.s32.totalorder %v31077_v5, %v31766_v59 }
 0x9d5   :  { %v32145_v39 = vpop.f32.mrb[130].mxu1 }
 0x9d6   :  { %v12437_v61 = vpop.f32.mrb[131].mxu1 }
 0x9d7   :  { %24081 = vmatmul.mubr.msk.f32.gmra.mrb[12].mxu0 %vm12018_vm11, %v36507_v17  ;;  %v13882_v61 = vand.u32 4294901760, %v32186_v18  ;;  %vm12022_vm11 = vcmp.eq.s32.totalorder %v31074_v38, %v31766_v59 }
 0x9d8   :  { %24082 = vmatprep.mubr.msk.f32.mxu0 %vm12051_vm13, %v36507_v17  ;;  %25291 = vmatpush1.bf16.xpose.msra.mxu0 %v36522_v26  ;;  %vm12055_vm13 = vcmp.eq.s32.totalorder %v31077_v5, %v31789_v7 }
 0x9d9   :  { %25293 = vmatprep.subr.bf16.mxu0 %v36523_v2  ;;  %v13891_v2 = vand.u32 4294901760, %v32192_v6  ;;  %v13883_v27 = vsub.f32 %v32186_v18, %v13882_v61 }
 0x9db   :  { %24083 = vmatmul.mubr.msk.f32.gmra.mrb[14].mxu0 %vm12050_vm5, %v36507_v17  ;;  %v13892_v10 = vsub.f32 %v32192_v6, %v13891_v2  ;;  %v13884_v32 = vand.u32 4294901760, %v13883_v27  ;;  %v36533_v27 = vand.u32 4294901760, %v32127_v42  ;;  %vm12054_vm5 = vcmp.eq.s32.totalorder %v31074_v38, %v31789_v7 }
 0x9dc   :  { %13849 = vmatprep.mubr.f32.mxu0 %v13848_v48  ;;  %v13869_v48 = vand.u32 4294901760, %v13868_v24  ;;  %v13899_v24 = vand.u32 4294901760, %v13898_v20 }
 0x9dd   :  { %v13893_v28 = vand.u32 4294901760, %v13892_v10  ;;  %v36535_v10 = vld [vmem:[#allocation51_spill] sm:$0xff] }
 0x9df   :  { %13855 = vmatmul.mubr.f32.vlgmr.msra.gmra.mrb[8].mxu0 %v13854_v35  ;;  %v36526_v35 = vld [vmem:[#allocation45_spill] sm:$0xff] }
 0x9e0   :  { %13864 = vmatprep.mubr.f32.mxu0 %v13863_v37  ;;  %25295 = vmatpush1.bf16.xpose.msra.mxu0 %v36524_v34  ;;  %v36527_v37 = vld [vmem:[#allocation46_spill] sm:$0xff] }
 0x9e1   :  { %25297 = vmatprep.subr.bf16.mxu0 %v36525_v19  ;;  %v36531_v34 = vld [vmem:[#allocation50_spill] sm:$0xff] }
 0x9e3   :  { %13870 = vmatmul.mubr.f32.gmra.mrb[10].mxu0 %v13869_v48  ;;  %v36532_v48 = vand.u32 4294901760, %v32102_v36 }
 0x9e4   :  { %13879 = vmatprep.mubr.f32.mxu0 %v13878_v47  ;;  %v36534_v47 = vand.u32 4294901760, %v32129_v60 }
 0x9e7   :  { %13885 = vmatmul.mubr.f32.gmra.mrb[12].mxu0 %v13884_v32  ;;  %v36529_v32 = vld [vmem:[#allocation48_spill] sm:$0xff] }
 0x9e8   :  { %13894 = vmatprep.mubr.f32.mxu0 %v13893_v28  ;;  %25299 = vmatpush1.bf16.xpose.msra.mxu0 %v36526_v35  ;;  %v36528_v28 = vld [vmem:[#allocation47_spill] sm:$0xff]  ;;  %v36538_v35 = vand.u32 4294901760, %v32160_v13 }
 0x9e9   :  { %25301 = vmatprep.subr.bf16.mxu0 %v36527_v37  ;;  %v23979_v37 = vsel %vm12023_vm2, 1.0, %v36486_v33 }
 0x9eb   :  { %13900 = vmatmul.mubr.f32.gmra.mrb[14].mxu0 %v13899_v24  ;;  %v23946_v24 = vsel %vm11990_vm3, 1.0, %v36486_v33 }
 0x9ec   :  { %24084 = vmatprep.mubr.msk.f32.mxu0 %vm11957_vm12, %v36507_v17 }
 0x9ef   :  { %24085 = vmatmul.mubr.msk.f32.vlgmr.msra.gmra.mrb[8].mxu0 %vm11956_vm7, %v36507_v17 }
 0x9f0   :  { %24086 = vmatprep.mubr.msk.f32.mxu0 %vm11989_vm14, %v36507_v17  ;;  %25303 = vmatpush1.bf16.xpose.msra.mxu0 %v36528_v28 }
 0x9f1   :  { %25305 = vmatprep.subr.bf16.mxu0 %v36529_v32 }
 0x9f3   :  { %24087 = vmatmul.mubr.msk.f32.gmra.mrb[10].mxu0 %vm11988_vm15, %v36507_v17 }
 0x9f4   :  { %24088 = vmatprep.mubr.msk.f32.mxu0 %vm12021_vm8, %v36507_v17 }
 0x9f6   :  { %v32238_v19 = vpop.f32.mrb[132].mxu1 }
 0x9f7   :  { %v12452_v20 = vpop.f32.mrb[133].mxu1  ;;  %24089 = vmatmul.mubr.msk.f32.gmra.mrb[12].mxu0 %vm12020_vm9, %v36507_v17 }
 0x9f8   :  { %24090 = vmatprep.mubr.msk.f32.mxu0 %vm12053_vm10, %v36507_v17  ;;  %25307 = vmatpush1.bf16.xpose.msra.mxu0 %v36530_v52  ;;  %v32389_v20 = vsub.f32 %v23946_v24, %v23946_v24 }
 0x9f9   :  { %25309 = vmatprep.subr.bf16.mxu0 %v36519_v23 }
 0x9fb   :  { %24091 = vmatmul.mubr.msk.f32.gmra.mrb[14].mxu0 %vm12052_vm1, %v36507_v17 }
 0x9fc   :  { %14120 = vmatprep.mubr.f32.mxu0 %v32102_v36 }
 0x9ff   :  { %14123 = vmatmul.mubr.f32.vlgmr.msra.gmra.mrb[8].mxu0 %v32127_v42  ;;  %v36540_v42 = vld [vmem:[#allocation53_spill] sm:$0xff] }
 0xa00   :  { %14129 = vmatprep.mubr.f32.mxu0 %v32129_v60  ;;  %25311 = vmatpush1.bf16.xpose.msra.mxu0 %v36520_v4  ;;  %v23914_v60 = vsel %vm11958_vm0, 1.0, %v36486_v33 }
 0xa01   :  { %25313 = vmatprep.subr.bf16.mxu0 %v36521_v49 }
 0xa03   :  { %14132 = vmatmul.mubr.f32.gmra.mrb[10].mxu0 %v32157_v21 }
 0xa04   :  { %14138 = vmatprep.mubr.f32.mxu0 %v32160_v13  ;;  %v36542_v13 = vld [vmem:[#allocation55_spill] sm:$0xff] }
 0xa07   :  { %14141 = vmatmul.mubr.f32.gmra.mrb[12].mxu0 %v32186_v18  ;;  %v36536_v18 = vld [vmem:[#allocation52_spill] sm:$0xff] }
 0xa08   :  { %14147 = vmatprep.mubr.f32.mxu0 %v32192_v6  ;;  %25315 = vmatpush1.bf16.xpose.msra.mxu0 %v36522_v26  ;;  %v36537_v6 = vand.u32 4294901760, %v32157_v21  ;;  %v23947_v21 = vsel %vm11991_vm6, 1.0, %v36486_v33 }
 0xa09   :  { %25317 = vmatprep.subr.bf16.mxu0 %v36531_v34  ;;  %v32392_v34 = vsub.f32 %v23979_v37, %v23979_v37 }
 0xa0b   :  { %14150 = vmatmul.mubr.f32.gmra.mrb[14].mxu0 %v32206_v16  ;;  %v14594_v45 = vand.u32 4294901760, %v32392_v34 }
 0xa0c   :  { %14230 = vmatprep.mubr.f32.mxu0 %v36532_v48  ;;  %v23978_v48 = vsel %vm12022_vm11, 1.0, %v36486_v33 }
 0xa0f   :  { %14234 = vmatmul.mubr.f32.vlgmr.msra.gmra.mrb[8].mxu0 %v36533_v27  ;;  %v24011_v27 = vsel %vm12055_vm13, 1.0, %v36486_v33 }
 0xa10   :  { %14241 = vmatprep.mubr.f32.mxu0 %v36534_v47  ;;  %25319 = vmatpush1.bf16.xpose.msra.mxu0 %v36535_v10  ;;  %v36544_v47 = vld [vmem:[#allocation57_spill] sm:$0xff] }
 0xa11   :  { %25321 = vmatprep.subr.bf16.mxu0 %v36536_v18 }
 0xa13   :  { %14245 = vmatmul.mubr.f32.gmra.mrb[10].mxu0 %v36537_v6  ;;  %v36545_v6 = vld [vmem:[#allocation58_spill] sm:$0xff] }
 0xa14   :  { %14252 = vmatprep.mubr.f32.mxu0 %v36538_v35  ;;  %v35816_v35 = vand.u32 4294901760, %v32389_v20 }
 0xa16   :  { %v14586_v24 = vsub.f32 %v32389_v20, %v35816_v35 }
 0xa17   :  { %v32282_v16 = vpop.f32.mrb[134].mxu1  ;;  %14256 = vmatmul.mubr.f32.gmra.mrb[12].mxu0 %v13882_v61  ;;  %v32361_v61 = vsub.f32 %v23914_v60, %v23914_v60  ;;  %v24010_v60 = vsel %vm12054_vm5, 1.0, %v36486_v33 }
 0xa18   :  { %36539 = vst [vmem:[#allocation63_spill] sm:$0xff] %v32282_v16  ;;  %v12467_v36 = vpop.f32.mrb[135].mxu1  ;;  %14263 = vmatprep.mubr.f32.mxu0 %v13891_v2  ;;  %25323 = vmatpush1.bf16.xpose.msra.mxu0 %v36540_v42  ;;  %v32363_v2 = vsub.f32 %v23947_v21, %v23947_v21  ;;  %v14587_v12 = vand.u32 4294901760, %v14586_v24  ;;  %v36553_v24 = vld [vmem:[#allocation74_spill] sm:$0xff] }
 0xa19   :  { %25325 = vmatprep.subr.bf16.mxu0 %v36519_v23  ;;  %v36541_v23 = vld [vmem:[#allocation54_spill] sm:$0xff]  ;;  %v35814_v32 = vand.u32 4294901760, %v32361_v61  ;;  %v32418_v36 = vsub.f32 %v23978_v48, %v23978_v48 }
 0xa1a   :  { %v35813_v52 = vand.u32 4294901760, %v32363_v2 }
 0xa1b   :  { %14267 = vmatmul.mubr.f32.gmra.mrb[14].mxu0 %v13897_v9  ;;  %v14571_v18 = vsub.f32 %v32361_v61, %v35814_v32  ;;  %v14600_v37 = vand.u32 4294901760, %v32418_v36 }
 0xa1c   :  { %24092 = vmatprep.mubr.msk.f32.mxu0 %vm11957_vm12, %v36507_v17  ;;  %v14580_v42 = vsub.f32 %v32363_v2, %v35813_v52  ;;  %v36546_v52 = vld [vmem:[#allocation59_spill] sm:$0xff] }
 0xa1d   :  { %v14572_v21 = vand.u32 4294901760, %v14571_v18  ;;  %v36547_v18 = vld [vmem:[#allocation60_spill] sm:$0xff] }
 0xa1e   :  { %v14581_v48 = vand.u32 4294901760, %v14580_v42 }
 0xa1f   :  { %24093 = vmatmul.mubr.msk.f32.vlgmr.msra.gmra.mrb[8].mxu0 %vm11956_vm7, %v36507_v17 }
 0xa20   :  { %24094 = vmatprep.mubr.msk.f32.mxu0 %vm11989_vm14, %v36507_v17  ;;  %25327 = vmatpush1.bf16.xpose.msra.mxu0 %v36520_v4  ;;  %v23915_v4 = vsel %vm11959_vm4, 1.0, %v36486_v33 }
 0xa21   :  { %25329 = vmatprep.subr.bf16.mxu0 %v36521_v49  ;;  %v32336_v49 = vsub.f32 %v23915_v4, %v23915_v4  ;;  %v32424_v4 = vsub.f32 %v24011_v27, %v24011_v27  ;;  %v14595_v27 = vsub.f32 %v32392_v34, %v14594_v45 }
 0xa23   :  { %24095 = vmatmul.mubr.msk.f32.gmra.mrb[10].mxu0 %vm11988_vm15, %v36507_v17  ;;  %v35815_v9 = vand.u32 4294901760, %v32336_v49 }
 0xa24   :  { %24096 = vmatprep.mubr.msk.f32.mxu0 %vm12021_vm8, %v36507_v17 }
 0xa25   :  { %v14565_v28 = vsub.f32 %v32336_v49, %v35815_v9  ;;  %v14596_v9 = vand.u32 4294901760, %v14595_v27  ;;  %v36554_v27 = vand.u32 4294901760, %v32336_v49 }
 0xa27   :  { %24097 = vmatmul.mubr.msk.f32.gmra.mrb[12].mxu0 %vm12020_vm9, %v36507_v17  ;;  %v14566_v10 = vand.u32 4294901760, %v14565_v28  ;;  %v14614_v28 = vsub.f32 %v24010_v60, %v24010_v60 }
 0xa28   :  { %24098 = vmatprep.mubr.msk.f32.mxu0 %vm12053_vm10, %v36507_v17  ;;  %25331 = vmatpush1.bf16.xpose.msra.mxu0 %v36522_v26  ;;  %v36543_v26 = vld [vmem:[#allocation56_spill] sm:$0xff] }
 0xa29   :  { %25333 = vmatprep.subr.bf16.mxu0 %v36541_v23  ;;  %v14615_v32 = vand.u32 4294901760, %v14614_v28 }
 0xa2b   :  { %24099 = vmatmul.mubr.msk.f32.gmra.mrb[14].mxu0 %vm12052_vm1, %v36507_v17  ;;  %v14616_v60 = vsub.f32 %v14614_v28, %v14615_v32 }
 0xa2c   :  { %24100 = vmatprep.mubr.msk.f32.mxu0 %vm11957_vm12, %v36507_v17  ;;  %vm11961_vm12 = vcmp.eq.s32.totalorder %v31083_v50, %v31694_v0 }
 0xa2f   :  { %24101 = vmatmul.mubr.msk.f32.vlgmr.msra.gmra.mrb[8].mxu0 %vm11956_vm7, %v36507_v17  ;;  %vm11960_vm7 = vcmp.eq.s32.totalorder %v31080_v30, %v31694_v0 }
 0xa30   :  { %24102 = vmatprep.mubr.msk.f32.mxu0 %vm11989_vm14, %v36507_v17  ;;  %25335 = vmatpush1.bf16.xpose.msra.mxu0 %v36542_v13  ;;  %vm11993_vm14 = vcmp.eq.s32.totalorder %v31083_v50, %v31732_v14 }
 0xa31   :  { %25337 = vmatprep.subr.bf16.mxu0 %v36543_v26 }
 0xa33   :  { %24103 = vmatmul.mubr.msk.f32.gmra.mrb[10].mxu0 %vm11988_vm15, %v36507_v17  ;;  %vm11992_vm15 = vcmp.eq.s32.totalorder %v31080_v30, %v31732_v14 }
 0xa34   :  { %24104 = vmatprep.mubr.msk.f32.mxu0 %vm12021_vm8, %v36507_v17  ;;  %vm12025_vm8 = vcmp.eq.s32.totalorder %v31083_v50, %v31766_v59 }
 0xa37   :  { %24105 = vmatmul.mubr.msk.f32.gmra.mrb[12].mxu0 %vm12020_vm9, %v36507_v17  ;;  %vm12024_vm9 = vcmp.eq.s32.totalorder %v31080_v30, %v31766_v59 }
 0xa38   :  { %24106 = vmatprep.mubr.msk.f32.mxu0 %vm12053_vm10, %v36507_v17  ;;  %25339 = vmatpush1.bf16.xpose.msra.mxu0 %v36544_v47  ;;  %vm12057_vm10 = vcmp.eq.s32.totalorder %v31083_v50, %v31789_v7 }
 0xa39   :  { %25341 = vmatprep.subr.bf16.mxu0 %v36545_v6  ;;  %v14609_v6 = vand.u32 4294901760, %v32424_v4 }
 0xa3b   :  { %24107 = vmatmul.mubr.msk.f32.gmra.mrb[14].mxu0 %vm12052_vm1, %v36507_v17  ;;  %v14610_v35 = vsub.f32 %v32424_v4, %v14609_v6  ;;  %vm12056_vm1 = vcmp.eq.s32.totalorder %v31080_v30, %v31789_v7 }
 0xa3c   :  { %14567 = vmatprep.mubr.f32.mxu0 %v14566_v10  ;;  %v14601_v10 = vsub.f32 %v32418_v36, %v14600_v37 }
 0xa3d   :  { %v14611_v16 = vand.u32 4294901760, %v14610_v35  ;;  %v36552_v35 = vld [vmem:[#allocation73_spill] sm:$0xff] }
 0xa3e   :  { %v14602_v42 = vand.u32 4294901760, %v14601_v10  ;;  %v36556_v10 = vand.u32 4294901760, %v32363_v2 }
 0xa3f   :  { %14573 = vmatmul.mubr.f32.vlgmr.msra.gmra.mrb[8].mxu0 %v14572_v21  ;;  %v36548_v21 = vld [vmem:[#allocation61_spill] sm:$0xff] }
 0xa40   :  { %14582 = vmatprep.mubr.f32.mxu0 %v14581_v48  ;;  %25343 = vmatpush1.bf16.xpose.msra.mxu0 %v36546_v52  ;;  %v14617_v48 = vand.u32 4294901760, %v14616_v60  ;;  %v36549_v52 = vld [vmem:[#allocation62_spill] sm:$0xff] }
 0xa41   :  { %25345 = vmatprep.subr.bf16.mxu0 %v36547_v18  ;;  %v36557_v18 = vld [vmem:[#allocation75_spill] sm:$0xff] }
 0xa43   :  { %14588 = vmatmul.mubr.f32.gmra.mrb[10].mxu0 %v14587_v12  ;;  %v36555_v12 = vand.u32 4294901760, %v32361_v61 }
 0xa44   :  { %14597 = vmatprep.mubr.f32.mxu0 %v14596_v9  ;;  %v36551_v9 = vld [vmem:[#allocation70_spill] sm:$0xff] }
 0xa47   :  { %14603 = vmatmul.mubr.f32.gmra.mrb[12].mxu0 %v14602_v42 }
 0xa48   :  { %14612 = vmatprep.mubr.f32.mxu0 %v14611_v16  ;;  %25347 = vmatpush1.bf16.xpose.msra.mxu0 %v36548_v21  ;;  %v36550_v16 = vld [vmem:[#allocation69_spill] sm:$0xff] }
 0xa49   :  { %25349 = vmatprep.subr.bf16.mxu0 %v36549_v52  ;;  %v23980_v52 = vsel %vm12024_vm9, 1.0, %v36486_v33 }
 0xa4b   :  { %14618 = vmatmul.mubr.f32.gmra.mrb[14].mxu0 %v14617_v48 }
 0xa4c   :  { %24108 = vmatprep.mubr.msk.f32.mxu0 %vm11959_vm4, %v36507_v17 }
 0xa4f   :  { %24109 = vmatmul.mubr.msk.f32.vlgmr.msra.gmra.mrb[8].mxu0 %vm11958_vm0, %v36507_v17 }
 0xa50   :  { %24110 = vmatprep.mubr.msk.f32.mxu0 %vm11991_vm6, %v36507_v17  ;;  %25351 = vmatpush1.bf16.xpose.msra.mxu0 %v36550_v16  ;;  %v24013_v16 = vsel %vm12057_vm10, 1.0, %v36486_v33 }
 0xa51   :  { %25353 = vmatprep.subr.bf16.mxu0 %v36551_v9  ;;  %v36564_v9 = vld [vmem:[#allocation81_spill] sm:$0xff] }
 0xa53   :  { %24111 = vmatmul.mubr.msk.f32.gmra.mrb[10].mxu0 %vm11990_vm3, %v36507_v17 }
 0xa54   :  { %24112 = vmatprep.mubr.msk.f32.mxu0 %vm12023_vm2, %v36507_v17 }
 0xa57   :  { %24113 = vmatmul.mubr.msk.f32.gmra.mrb[12].mxu0 %vm12022_vm11, %v36507_v17 }
 0xa58   :  { %24114 = vmatprep.mubr.msk.f32.mxu0 %vm12055_vm13, %v36507_v17  ;;  %25355 = vmatpush1.bf16.xpose.msra.mxu0 %v36552_v35 }
 0xa59   :  { %25357 = vmatprep.subr.bf16.mxu0 %v36541_v23 }
 0xa5b   :  { %24115 = vmatmul.mubr.msk.f32.gmra.mrb[14].mxu0 %vm12054_vm5, %v36507_v17 }
 0xa5c   :  { %14838 = vmatprep.mubr.f32.mxu0 %v32336_v49  ;;  %v23917_v49 = vsel %vm11961_vm12, 1.0, %v36486_v33 }
 0xa5f   :  { %14841 = vmatmul.mubr.f32.vlgmr.msra.gmra.mrb[8].mxu0 %v32361_v61  ;;  %v23949_v61 = vsel %vm11993_vm14, 1.0, %v36486_v33 }
 0xa60   :  { %14847 = vmatprep.mubr.f32.mxu0 %v32363_v2  ;;  %25359 = vmatpush1.bf16.xpose.msra.mxu0 %v36542_v13  ;;  %v36562_v2 = vld [vmem:[#allocation79_spill] sm:$0xff] }
 0xa61   :  { %25361 = vmatprep.subr.bf16.mxu0 %v36543_v26 }
 0xa63   :  { %14850 = vmatmul.mubr.f32.gmra.mrb[10].mxu0 %v32389_v20 }
 0xa64   :  { %14856 = vmatprep.mubr.f32.mxu0 %v32392_v34  ;;  %v36558_v34 = vld [vmem:[#allocation76_spill] sm:$0xff] }
 0xa67   :  { %14859 = vmatmul.mubr.f32.gmra.mrb[12].mxu0 %v32418_v36  ;;  %v36559_v36 = vand.u32 4294901760, %v32389_v20 }
 0xa68   :  { %14865 = vmatprep.mubr.f32.mxu0 %v32424_v4  ;;  %25363 = vmatpush1.bf16.xpose.msra.mxu0 %v36544_v47  ;;  %v36560_v4 = vld [vmem:[#allocation77_spill] sm:$0xff] }
 0xa69   :  { %25365 = vmatprep.subr.bf16.mxu0 %v36553_v24 }
 0xa6b   :  { %14868 = vmatmul.mubr.f32.gmra.mrb[14].mxu0 %v14614_v28  ;;  %v23981_v28 = vsel %vm12025_vm8, 1.0, %v36486_v33 }
 0xa6c   :  { %14948 = vmatprep.mubr.f32.mxu0 %v36554_v27  ;;  %v32611_v48 = vsub.f32 %v23981_v28, %v23981_v28  ;;  %v36565_v27 = vld [vmem:[#allocation82_spill] sm:$0xff] }
 0xa6e   :  { %v15312_v5 = vand.u32 4294901760, %v32611_v48 }
 0xa6f   :  { %14952 = vmatmul.mubr.f32.vlgmr.msra.gmra.mrb[8].mxu0 %v36555_v12 }
 0xa70   :  { %14959 = vmatprep.mubr.f32.mxu0 %v36556_v10  ;;  %25367 = vmatpush1.bf16.xpose.msra.mxu0 %v36557_v18  ;;  %v32637_v10 = vsub.f32 %v23980_v52, %v23980_v52  ;;  %v15313_v28 = vsub.f32 %v32611_v48, %v15312_v5  ;;  %v36566_v52 = vld [vmem:[#allocation83_spill] sm:$0xff] }
 0xa71   :  { %25369 = vmatprep.subr.bf16.mxu0 %v36558_v34  ;;  %v32643_v34 = vsub.f32 %v24013_v16, %v24013_v16 }
 0xa73   :  { %14963 = vmatmul.mubr.f32.gmra.mrb[10].mxu0 %v36559_v36  ;;  %v24012_v36 = vsel %vm12056_vm1, 1.0, %v36486_v33 }
 0xa74   :  { %14970 = vmatprep.mubr.f32.mxu0 %v14594_v45  ;;  %v32582_v45 = vsub.f32 %v23949_v61, %v23949_v61  ;;  %v15332_v61 = vsub.f32 %v24012_v36, %v24012_v36 }
 0xa76   :  { %v35818_v21 = vand.u32 4294901760, %v32582_v45 }
 0xa77   :  { %14974 = vmatmul.mubr.f32.gmra.mrb[12].mxu0 %v14600_v37  ;;  %v23948_v37 = vsel %vm11992_vm15, 1.0, %v36486_v33 }
 0xa78   :  { %14981 = vmatprep.mubr.f32.mxu0 %v14609_v6  ;;  %25371 = vmatpush1.bf16.xpose.msra.mxu0 %v36560_v4  ;;  %v32608_v60 = vsub.f32 %v23948_v37, %v23948_v37  ;;  %v15298_v18 = vsub.f32 %v32582_v45, %v35818_v21 }
 0xa79   :  { %25373 = vmatprep.subr.bf16.mxu0 %v36541_v23  ;;  %v36561_v23 = vld [vmem:[#allocation78_spill] sm:$0xff] }
 0xa7a   :  { %v35817_v12 = vand.u32 4294901760, %v32608_v60  ;;  %v15299_v37 = vand.u32 4294901760, %v15298_v18 }
 0xa7b   :  { %14985 = vmatmul.mubr.f32.gmra.mrb[14].mxu0 %v14615_v32  ;;  %v36563_v32 = vld [vmem:[#allocation80_spill] sm:$0xff] }
 0xa7c   :  { %24116 = vmatprep.mubr.msk.f32.mxu0 %vm11959_vm4, %v36507_v17 }
 0xa7f   :  { %24117 = vmatmul.mubr.msk.f32.vlgmr.msra.gmra.mrb[8].mxu0 %vm11958_vm0, %v36507_v17 }
 0xa80   :  { %24118 = vmatprep.mubr.msk.f32.mxu0 %vm11991_vm6, %v36507_v17  ;;  %25375 = vmatpush1.bf16.xpose.msra.mxu0 %v36542_v13  ;;  %v32555_v13 = vsub.f32 %v23917_v49, %v23917_v49  ;;  %v15304_v49 = vsub.f32 %v32608_v60, %v35817_v12 }
 0xa81   :  { %25377 = vmatprep.subr.bf16.mxu0 %v36543_v26  ;;  %v23916_v26 = vsel %vm11960_vm7, 1.0, %v36486_v33 }
 0xa82   :  { %v15282_v20 = vand.u32 4294901760, %v32555_v13  ;;  %v15305_v38 = vand.u32 4294901760, %v15304_v49  ;;  %v36572_v49 = vld [vmem:[#allocation97_spill] sm:$0xff] }
 0xa83   :  { %24119 = vmatmul.mubr.msk.f32.gmra.mrb[10].mxu0 %vm11990_vm3, %v36507_v17 }
 0xa84   :  { %24120 = vmatprep.mubr.msk.f32.mxu0 %vm12023_vm2, %v36507_v17  ;;  %v15283_v6 = vsub.f32 %v32555_v13, %v15282_v20 }
 0xa86   :  { %v15284_v35 = vand.u32 4294901760, %v15283_v6  ;;  %v15327_v6 = vand.u32 4294901760, %v32643_v34 }
 0xa87   :  { %24121 = vmatmul.mubr.msk.f32.gmra.mrb[12].mxu0 %vm12022_vm11, %v36507_v17 }
 0xa88   :  { %24122 = vmatprep.mubr.msk.f32.mxu0 %vm12055_vm13, %v36507_v17  ;;  %25379 = vmatpush1.bf16.xpose.msra.mxu0 %v36544_v47  ;;  %v32580_v47 = vsub.f32 %v23916_v26, %v23916_v26  ;;  %v15318_v26 = vand.u32 4294901760, %v32637_v10  ;;  %v15328_v12 = vsub.f32 %v32643_v34, %v15327_v6 }
 0xa89   :  { %25381 = vmatprep.subr.bf16.mxu0 %v36561_v23 }
 0xa8a   :  { %v15288_v42 = vand.u32 4294901760, %v32580_v47  ;;  %v15319_v16 = vsub.f32 %v32637_v10, %v15318_v26  ;;  %v15329_v21 = vand.u32 4294901760, %v15328_v12  ;;  %v36571_v12 = vld [vmem:[#allocation94_spill] sm:$0xff] }
 0xa8b   :  { %24123 = vmatmul.mubr.msk.f32.gmra.mrb[14].mxu0 %vm12054_vm5, %v36507_v17 }
 0xa8c   :  { %24124 = vmatprep.mubr.msk.f32.mxu0 %vm11959_vm4, %v36507_v17  ;;  %v15289_v24 = vsub.f32 %v32580_v47, %v15288_v42  ;;  %v15320_v18 = vand.u32 4294901760, %v15319_v16  ;;  %v36575_v16 = vld [vmem:[#allocation99_spill] sm:$0xff]  ;;  %vm11963_vm4 = vcmp.eq.s32.totalorder %v31091_v43, %v31694_v0 }
 0xa8e   :  { %v15290_v4 = vand.u32 4294901760, %v15289_v24  ;;  %v15333_v24 = vand.u32 4294901760, %v15332_v61 }
 0xa8f   :  { %24125 = vmatmul.mubr.msk.f32.vlgmr.msra.gmra.mrb[8].mxu0 %vm11958_vm0, %v36507_v17  ;;  %vm11962_vm0 = vcmp.eq.s32.totalorder %v31088_v53, %v31694_v0 }
 0xa90   :  { %24126 = vmatprep.mubr.msk.f32.mxu0 %vm11991_vm6, %v36507_v17  ;;  %25383 = vmatpush1.bf16.xpose.msra.mxu0 %v36562_v2  ;;  %v15334_v36 = vsub.f32 %v15332_v61, %v15333_v24  ;;  %vm11995_vm6 = vcmp.eq.s32.totalorder %v31091_v43, %v31732_v14 }
 0xa91   :  { %25385 = vmatprep.subr.bf16.mxu0 %v36563_v32 }
 0xa93   :  { %24127 = vmatmul.mubr.msk.f32.gmra.mrb[10].mxu0 %vm11990_vm3, %v36507_v17  ;;  %vm11994_vm3 = vcmp.eq.s32.totalorder %v31088_v53, %v31732_v14 }
 0xa94   :  { %24128 = vmatprep.mubr.msk.f32.mxu0 %vm12023_vm2, %v36507_v17  ;;  %vm12027_vm2 = vcmp.eq.s32.totalorder %v31091_v43, %v31766_v59 }
 0xa97   :  { %24129 = vmatmul.mubr.msk.f32.gmra.mrb[12].mxu0 %vm12022_vm11, %v36507_v17  ;;  %vm12026_vm11 = vcmp.eq.s32.totalorder %v31088_v53, %v31766_v59 }
 0xa98   :  { %24130 = vmatprep.mubr.msk.f32.mxu0 %vm12055_vm13, %v36507_v17  ;;  %25387 = vmatpush1.bf16.xpose.msra.mxu0 %v36564_v9  ;;  %vm12059_vm13 = vcmp.eq.s32.totalorder %v31091_v43, %v31789_v7 }
 0xa99   :  { %25389 = vmatprep.subr.bf16.mxu0 %v36565_v27  ;;  %v15314_v27 = vand.u32 4294901760, %v15313_v28  ;;  %v36573_v28 = vld [vmem:[#allocation98_spill] sm:$0xff] }
 0xa9b   :  { %24131 = vmatmul.mubr.msk.f32.gmra.mrb[14].mxu0 %vm12054_vm5, %v36507_v17  ;;  %vm12058_vm5 = vcmp.eq.s32.totalorder %v31088_v53, %v31789_v7 }
 0xa9c   :  { %15285 = vmatprep.mubr.f32.mxu0 %v15284_v35  ;;  %v36567_v35 = vld [vmem:[#allocation84_spill] sm:$0xff] }
 0xa9f   :  { %15291 = vmatmul.mubr.f32.vlgmr.msra.gmra.mrb[8].mxu0 %v15290_v4  ;;  %v36568_v4 = vld [vmem:[#allocation85_spill] sm:$0xff] }
 0xaa0   :  { %15300 = vmatprep.mubr.f32.mxu0 %v15299_v37  ;;  %25391 = vmatpush1.bf16.xpose.msra.mxu0 %v36566_v52  ;;  %v15335_v37 = vand.u32 4294901760, %v15334_v36  ;;  %v36569_v52 = vld [vmem:[#allocation86_spill] sm:$0xff]  ;;  %v24015_v36 = vsel %vm12059_vm13, 1.0, %v36486_v33 }
 0xaa1   :  { %25393 = vmatprep.subr.bf16.mxu0 %v36567_v35 }
 0xaa3   :  { %15306 = vmatmul.mubr.f32.gmra.mrb[10].mxu0 %v15305_v38  ;;  %v36574_v38 = vand.u32 4294901760, %v32582_v45 }
 0xaa4   :  { %15315 = vmatprep.mubr.f32.mxu0 %v15314_v27 }
 0xaa7   :  { %15321 = vmatmul.mubr.f32.gmra.mrb[12].mxu0 %v15320_v18  ;;  %v23982_v18 = vsel %vm12026_vm11, 1.0, %v36486_v33 }
 0xaa8   :  { %15330 = vmatprep.mubr.f32.mxu0 %v15329_v21  ;;  %25395 = vmatpush1.bf16.xpose.msra.mxu0 %v36568_v4  ;;  %v36570_v21 = vld [vmem:[#allocation93_spill] sm:$0xff] }
 0xaa9   :  { %25397 = vmatprep.subr.bf16.mxu0 %v36569_v52  ;;  %v36582_v4 = vld [vmem:[#allocation105_spill] sm:$0xff] }
 0xaab   :  { %15336 = vmatmul.mubr.f32.gmra.mrb[14].mxu0 %v15335_v37 }
 0xaac   :  { %24132 = vmatprep.mubr.msk.f32.mxu0 %vm11961_vm12, %v36507_v17 }
 0xaaf   :  { %24133 = vmatmul.mubr.msk.f32.vlgmr.msra.gmra.mrb[8].mxu0 %vm11960_vm7, %v36507_v17 }
 0xab0   :  { %24134 = vmatprep.mubr.msk.f32.mxu0 %vm11993_vm14, %v36507_v17  ;;  %25399 = vmatpush1.bf16.xpose.msra.mxu0 %v36570_v21  ;;  %v36583_v21 = vld [vmem:[#allocation106_spill] sm:$0xff] }
 0xab1   :  { %25401 = vmatprep.subr.bf16.mxu0 %v36571_v12 }
 0xab3   :  { %24135 = vmatmul.mubr.msk.f32.gmra.mrb[10].mxu0 %vm11992_vm15, %v36507_v17 }
 0xab4   :  { %24136 = vmatprep.mubr.msk.f32.mxu0 %vm12025_vm8, %v36507_v17 }
 0xab7   :  { %24137 = vmatmul.mubr.msk.f32.gmra.mrb[12].mxu0 %vm12024_vm9, %v36507_v17 }
 0xab8   :  { %24138 = vmatprep.mubr.msk.f32.mxu0 %vm12057_vm10, %v36507_v17  ;;  %25403 = vmatpush1.bf16.xpose.msra.mxu0 %v36572_v49  ;;  %v32856_v49 = vsub.f32 %v23982_v18, %v23982_v18  ;;  %v36585_v18 = vld [vmem:[#allocation108_spill] sm:$0xff] }
 0xab9   :  { %25405 = vmatprep.subr.bf16.mxu0 %v36561_v23 }
 0xabb   :  { %24139 = vmatmul.mubr.msk.f32.gmra.mrb[14].mxu0 %vm12056_vm1, %v36507_v17 }
 0xabc   :  { %15556 = vmatprep.mubr.f32.mxu0 %v32555_v13  ;;  %v23919_v13 = vsel %vm11963_vm4, 1.0, %v36486_v33 }
 0xabf   :  { %15559 = vmatmul.mubr.f32.vlgmr.msra.gmra.mrb[8].mxu0 %v32580_v47  ;;  %v36580_v47 = vld [vmem:[#allocation103_spill] sm:$0xff] }
 0xac0   :  { %15565 = vmatprep.mubr.f32.mxu0 %v32582_v45  ;;  %25407 = vmatpush1.bf16.xpose.msra.mxu0 %v36562_v2  ;;  %v36581_v45 = vld [vmem:[#allocation104_spill] sm:$0xff] }
 0xac1   :  { %25409 = vmatprep.subr.bf16.mxu0 %v36563_v32 }
 0xac3   :  { %15568 = vmatmul.mubr.f32.gmra.mrb[10].mxu0 %v32608_v60 }
 0xac4   :  { %15574 = vmatprep.mubr.f32.mxu0 %v32611_v48  ;;  %v36576_v48 = vld [vmem:[#allocation100_spill] sm:$0xff] }
 0xac7   :  { %15577 = vmatmul.mubr.f32.gmra.mrb[12].mxu0 %v32637_v10  ;;  %v36577_v10 = vand.u32 4294901760, %v32608_v60 }
 0xac8   :  { %15583 = vmatprep.mubr.f32.mxu0 %v32643_v34  ;;  %25411 = vmatpush1.bf16.xpose.msra.mxu0 %v36564_v9  ;;  %v36578_v34 = vld [vmem:[#allocation101_spill] sm:$0xff] }
 0xac9   :  { %25413 = vmatprep.subr.bf16.mxu0 %v36573_v28 }
 0xacb   :  { %15586 = vmatmul.mubr.f32.gmra.mrb[14].mxu0 %v15332_v61 }
 0xacc   :  { %15666 = vmatprep.mubr.f32.mxu0 %v15282_v20  ;;  %v23951_v20 = vsel %vm11995_vm6, 1.0, %v36486_v33 }
 0xacf   :  { %15670 = vmatmul.mubr.f32.vlgmr.msra.gmra.mrb[8].mxu0 %v15288_v42 }
 0xad0   :  { %15677 = vmatprep.mubr.f32.mxu0 %v36574_v38  ;;  %25415 = vmatpush1.bf16.xpose.msra.mxu0 %v36575_v16  ;;  %v32862_v38 = vsub.f32 %v24015_v36, %v24015_v36  ;;  %v24014_v16 = vsel %vm12058_vm5, 1.0, %v36486_v33 }
 0xad1   :  { %25417 = vmatprep.subr.bf16.mxu0 %v36576_v48 }
 0xad3   :  { %15681 = vmatmul.mubr.f32.gmra.mrb[10].mxu0 %v36577_v10 }
 0xad4   :  { %15688 = vmatprep.mubr.f32.mxu0 %v15312_v5  ;;  %v23950_v5 = vsel %vm11994_vm3, 1.0, %v36486_v33 }
 0xad5   :  { %v32827_v35 = vsub.f32 %v23950_v5, %v23950_v5  ;;  %v16045_v5 = vand.u32 4294901760, %v32862_v38 }
 0xad7   :  { %15692 = vmatmul.mubr.f32.gmra.mrb[12].mxu0 %v15318_v26  ;;  %v23983_v26 = vsel %vm12027_vm2, 1.0, %v36486_v33  ;;  %v16021_v12 = vand.u32 4294901760, %v32827_v35 }
 0xad8   :  { %15699 = vmatprep.mubr.f32.mxu0 %v15327_v6  ;;  %25419 = vmatpush1.bf16.xpose.msra.mxu0 %v36578_v34  ;;  %v32830_v27 = vsub.f32 %v23983_v26, %v23983_v26  ;;  %v16036_v34 = vand.u32 4294901760, %v32856_v49  ;;  %v36584_v26 = vld [vmem:[#allocation107_spill] sm:$0xff] }
 0xad9   :  { %25421 = vmatprep.subr.bf16.mxu0 %v36561_v23  ;;  %v36579_v23 = vld [vmem:[#allocation102_spill] sm:$0xff]  ;;  %v16022_v10 = vsub.f32 %v32827_v35, %v16021_v12 }
 0xada   :  { %v16030_v50 = vand.u32 4294901760, %v32830_v27 }
 0xadb   :  { %15703 = vmatmul.mubr.f32.gmra.mrb[14].mxu0 %v15333_v24  ;;  %v16023_v30 = vand.u32 4294901760, %v16022_v10  ;;  %v36588_v10 = vld [vmem:[#allocation117_spill] sm:$0xff] }
 0xadc   :  { %24140 = vmatprep.mubr.msk.f32.mxu0 %vm11961_vm12, %v36507_v17 }
 0xadf   :  { %24141 = vmatmul.mubr.msk.f32.vlgmr.msra.gmra.mrb[8].mxu0 %vm11960_vm7, %v36507_v17 }
 0xae0   :  { %24142 = vmatprep.mubr.msk.f32.mxu0 %vm11993_vm14, %v36507_v17  ;;  %25423 = vmatpush1.bf16.xpose.msra.mxu0 %v36562_v2  ;;  %v32774_v2 = vsub.f32 %v23919_v13, %v23919_v13  ;;  %v16050_v13 = vsub.f32 %v24014_v16, %v24014_v16 }
 0xae1   :  { %25425 = vmatprep.subr.bf16.mxu0 %v36563_v32  ;;  %v23918_v32 = vsel %vm11962_vm0, 1.0, %v36486_v33 }
 0xae2   :  { %v16000_v42 = vand.u32 4294901760, %v32774_v2  ;;  %v32799_v60 = vsub.f32 %v23918_v32, %v23918_v32  ;;  %v16051_v36 = vand.u32 4294901760, %v16050_v13 }
 0xae3   :  { %24143 = vmatmul.mubr.msk.f32.gmra.mrb[10].mxu0 %vm11992_vm15, %v36507_v17 }
 0xae4   :  { %24144 = vmatprep.mubr.msk.f32.mxu0 %vm12025_vm8, %v36507_v17  ;;  %v16001_v61 = vsub.f32 %v32774_v2, %v16000_v42  ;;  %v16006_v6 = vand.u32 4294901760, %v32799_v60 }
 0xae6   :  { %v16002_v37 = vand.u32 4294901760, %v16001_v61  ;;  %v16007_v52 = vsub.f32 %v32799_v60, %v16006_v6  ;;  %v16037_v61 = vsub.f32 %v32856_v49, %v16036_v34 }
 0xae7   :  { %24145 = vmatmul.mubr.msk.f32.gmra.mrb[12].mxu0 %vm12024_vm9, %v36507_v17 }
 0xae8   :  { %24146 = vmatprep.mubr.msk.f32.mxu0 %vm12057_vm10, %v36507_v17  ;;  %25427 = vmatpush1.bf16.xpose.msra.mxu0 %v36564_v9  ;;  %v32801_v9 = vsub.f32 %v23951_v20, %v23951_v20  ;;  %v16008_v48 = vand.u32 4294901760, %v16007_v52  ;;  %v16031_v20 = vsub.f32 %v32830_v27, %v16030_v50  ;;  %v16046_v52 = vsub.f32 %v32862_v38, %v16045_v5 }
 0xae9   :  { %25429 = vmatprep.subr.bf16.mxu0 %v36579_v23 }
 0xaea   :  { %v16015_v24 = vand.u32 4294901760, %v32801_v9  ;;  %v16047_v16 = vand.u32 4294901760, %v16046_v52  ;;  %v36598_v52 = vld [vmem:[#allocation129_spill] sm:$0xff] }
 0xaeb   :  { %24147 = vmatmul.mubr.msk.f32.gmra.mrb[14].mxu0 %vm12056_vm1, %v36507_v17 }
 0xaec   :  { %24148 = vmatprep.mubr.msk.f32.mxu0 %vm11961_vm12, %v36507_v17  ;;  %v16016_v28 = vsub.f32 %v32801_v9, %v16015_v24  ;;  %vm11965_vm12 = vcmp.eq.s32.totalorder %v31098_v40, %v31694_v0 }
 0xaee   :  { %v16017_v32 = vand.u32 4294901760, %v16016_v28  ;;  %v16052_v28 = vsub.f32 %v16050_v13, %v16051_v36 }
 0xaef   :  { %24149 = vmatmul.mubr.msk.f32.vlgmr.msra.gmra.mrb[8].mxu0 %vm11960_vm7, %v36507_v17  ;;  %vm11964_vm7 = vcmp.eq.s32.totalorder %v31095_v22, %v31694_v0 }
 0xaf0   :  { %24150 = vmatprep.mubr.msk.f32.mxu0 %vm11993_vm14, %v36507_v17  ;;  %25431 = vmatpush1.bf16.xpose.msra.mxu0 %v36580_v47  ;;  %vm11997_vm14 = vcmp.eq.s32.totalorder %v31098_v40, %v31732_v14 }
 0xaf1   :  { %25433 = vmatprep.subr.bf16.mxu0 %v36581_v45 }
 0xaf3   :  { %24151 = vmatmul.mubr.msk.f32.gmra.mrb[10].mxu0 %vm11992_vm15, %v36507_v17  ;;  %vm11996_vm15 = vcmp.eq.s32.totalorder %v31095_v22, %v31732_v14 }
 0xaf4   :  { %24152 = vmatprep.mubr.msk.f32.mxu0 %vm12025_vm8, %v36507_v17  ;;  %vm12029_vm8 = vcmp.eq.s32.totalorder %v31098_v40, %v31766_v59 }
 0xaf7   :  { %24153 = vmatmul.mubr.msk.f32.gmra.mrb[12].mxu0 %vm12024_vm9, %v36507_v17  ;;  %vm12028_vm9 = vcmp.eq.s32.totalorder %v31095_v22, %v31766_v59 }
 0xaf8   :  { %24154 = vmatprep.mubr.msk.f32.mxu0 %vm12057_vm10, %v36507_v17  ;;  %25435 = vmatpush1.bf16.xpose.msra.mxu0 %v36582_v4  ;;  %vm12061_vm10 = vcmp.eq.s32.totalorder %v31098_v40, %v31789_v7 }
 0xaf9   :  { %25437 = vmatprep.subr.bf16.mxu0 %v36583_v21  ;;  %v16038_v21 = vand.u32 4294901760, %v16037_v61  ;;  %v36591_v61 = vld [vmem:[#allocation122_spill] sm:$0xff] }
 0xafb   :  { %24155 = vmatmul.mubr.msk.f32.gmra.mrb[14].mxu0 %vm12056_vm1, %v36507_v17  ;;  %vm12060_vm1 = vcmp.eq.s32.totalorder %v31095_v22, %v31789_v7 }
 0xafc   :  { %16003 = vmatprep.mubr.f32.mxu0 %v16002_v37  ;;  %v16032_v37 = vand.u32 4294901760, %v16031_v20  ;;  %v36589_v20 = vld [vmem:[#allocation118_spill] sm:$0xff] }
 0xaff   :  { %16009 = vmatmul.mubr.f32.vlgmr.msra.gmra.mrb[8].mxu0 %v16008_v48  ;;  %v36586_v48 = vld [vmem:[#allocation109_spill] sm:$0xff] }
 0xb00   :  { %16018 = vmatprep.mubr.f32.mxu0 %v16017_v32  ;;  %25439 = vmatpush1.bf16.xpose.msra.mxu0 %v36584_v26  ;;  %v16053_v32 = vand.u32 4294901760, %v16052_v28  ;;  %v36587_v26 = vld [vmem:[#allocation110_spill] sm:$0xff] }
 0xb01   :  { %25441 = vmatprep.subr.bf16.mxu0 %v36585_v18  ;;  %v36592_v18 = vld [vmem:[#allocation123_spill] sm:$0xff] }
 0xb03   :  { %16024 = vmatmul.mubr.f32.gmra.mrb[10].mxu0 %v16023_v30  ;;  %v36590_v30 = vld [vmem:[#allocation121_spill] sm:$0xff] }
 0xb04   :  { %16033 = vmatprep.mubr.f32.mxu0 %v16032_v37  ;;  %v24017_v37 = vsel %vm12061_vm10, 1.0, %v36486_v33 }
 0xb07   :  { %16039 = vmatmul.mubr.f32.gmra.mrb[12].mxu0 %v16038_v21 }
 0xb08   :  { %16048 = vmatprep.mubr.f32.mxu0 %v16047_v16  ;;  %25443 = vmatpush1.bf16.xpose.msra.mxu0 %v36586_v48  ;;  %v36599_v16 = vld [vmem:[#allocation130_spill] sm:$0xff] }
 0xb09   :  { %25445 = vmatprep.subr.bf16.mxu0 %v36587_v26 }
 0xb0b   :  { %16054 = vmatmul.mubr.f32.gmra.mrb[14].mxu0 %v16053_v32 }
 0xb0c   :  { %24156 = vmatprep.mubr.msk.f32.mxu0 %vm11963_vm4, %v36507_v17 }
 0xb0f   :  { %24157 = vmatmul.mubr.msk.f32.vlgmr.msra.gmra.mrb[8].mxu0 %vm11962_vm0, %v36507_v17 }
 0xb10   :  { %24158 = vmatprep.mubr.msk.f32.mxu0 %vm11995_vm6, %v36507_v17  ;;  %25447 = vmatpush1.bf16.xpose.msra.mxu0 %v36588_v10  ;;  %v33081_v10 = vsub.f32 %v24017_v37, %v24017_v37 }
 0xb11   :  { %25449 = vmatprep.subr.bf16.mxu0 %v36589_v20  ;;  %v24016_v20 = vsel %vm12060_vm1, 1.0, %v36486_v33 }
 0xb13   :  { %24159 = vmatmul.mubr.msk.f32.gmra.mrb[10].mxu0 %vm11994_vm3, %v36507_v17 }
 0xb14   :  { %24160 = vmatprep.mubr.msk.f32.mxu0 %vm12027_vm2, %v36507_v17 }
 0xb17   :  { %24161 = vmatmul.mubr.msk.f32.gmra.mrb[12].mxu0 %vm12026_vm11, %v36507_v17 }
 0xb18   :  { %24162 = vmatprep.mubr.msk.f32.mxu0 %vm12059_vm13, %v36507_v17  ;;  %25451 = vmatpush1.bf16.xpose.msra.mxu0 %v36590_v30 }
 0xb19   :  { %25453 = vmatprep.subr.bf16.mxu0 %v36579_v23 }
 0xb1b   :  { %24163 = vmatmul.mubr.msk.f32.gmra.mrb[14].mxu0 %vm12058_vm5, %v36507_v17 }
 0xb1c   :  { %16274 = vmatprep.mubr.f32.mxu0 %v32774_v2  ;;  %v23921_v2 = vsel %vm11965_vm12, 1.0, %v36486_v33 }
 0xb1f   :  { %16277 = vmatmul.mubr.f32.vlgmr.msra.gmra.mrb[8].mxu0 %v32799_v60  ;;  %v36596_v60 = vld [vmem:[#allocation127_spill] sm:$0xff] }
 0xb20   :  { %16283 = vmatprep.mubr.f32.mxu0 %v32801_v9  ;;  %25455 = vmatpush1.bf16.xpose.msra.mxu0 %v36580_v47  ;;  %v36597_v9 = vld [vmem:[#allocation128_spill] sm:$0xff] }
 0xb21   :  { %25457 = vmatprep.subr.bf16.mxu0 %v36581_v45 }
 0xb23   :  { %16286 = vmatmul.mubr.f32.gmra.mrb[10].mxu0 %v32827_v35 }
 0xb24   :  { %16292 = vmatprep.mubr.f32.mxu0 %v32830_v27  ;;  %v36593_v27 = vld [vmem:[#allocation124_spill] sm:$0xff] }
 0xb27   :  { %16295 = vmatmul.mubr.f32.gmra.mrb[12].mxu0 %v32856_v49  ;;  %v36594_v49 = vld [vmem:[#allocation125_spill] sm:$0xff] }
 0xb28   :  { %16301 = vmatprep.mubr.f32.mxu0 %v32862_v38  ;;  %25459 = vmatpush1.bf16.xpose.msra.mxu0 %v36582_v4 }
 0xb29   :  { %25461 = vmatprep.subr.bf16.mxu0 %v36591_v61 }
 0xb2b   :  { %16304 = vmatmul.mubr.f32.gmra.mrb[14].mxu0 %v16050_v13 }
 0xb2c   :  { %16384 = vmatprep.mubr.f32.mxu0 %v16000_v42  ;;  %v23953_v42 = vsel %vm11997_vm14, 1.0, %v36486_v33 }
 0xb2f   :  { %16388 = vmatmul.mubr.f32.vlgmr.msra.gmra.mrb[8].mxu0 %v16006_v6 }
 0xb30   :  { %16395 = vmatprep.mubr.f32.mxu0 %v16015_v24  ;;  %25463 = vmatpush1.bf16.xpose.msra.mxu0 %v36592_v18  ;;  %v33020_v24 = vsub.f32 %v23953_v42, %v23953_v42  ;;  %v36600_v42 = vld [vmem:[#allocation131_spill] sm:$0xff] }
 0xb31   :  { %25465 = vmatprep.subr.bf16.mxu0 %v36593_v27  ;;  %v16768_v27 = vsub.f32 %v24016_v20, %v24016_v20 }
 0xb32   :  { %v16733_v13 = vand.u32 4294901760, %v33020_v24 }
 0xb33   :  { %16399 = vmatmul.mubr.f32.gmra.mrb[10].mxu0 %v16021_v12  ;;  %v23985_v12 = vsel %vm12029_vm8, 1.0, %v36486_v33 }
 0xb34   :  { %16406 = vmatprep.mubr.f32.mxu0 %v16030_v50  ;;  %v16734_v26 = vsub.f32 %v33020_v24, %v16733_v13 }
 0xb37   :  { %16410 = vmatmul.mubr.f32.gmra.mrb[12].mxu0 %v16036_v34 }
 0xb38   :  { %16417 = vmatprep.mubr.f32.mxu0 %v16045_v5  ;;  %25467 = vmatpush1.bf16.xpose.msra.mxu0 %v36594_v49  ;;  %v33049_v5 = vsub.f32 %v23985_v12, %v23985_v12  ;;  %v16735_v49 = vand.u32 4294901760, %v16734_v26  ;;  %v36601_v12 = vld [vmem:[#allocation132_spill] sm:$0xff]  ;;  %v36602_v26 = vld [vmem:[#allocation133_spill] sm:$0xff] }
 0xb39   :  { %25469 = vmatprep.subr.bf16.mxu0 %v36579_v23  ;;  %v36595_v23 = vld [vmem:[#allocation126_spill] sm:$0xff] }
 0xb3a   :  { %v16748_v43 = vand.u32 4294901760, %v33049_v5 }
 0xb3b   :  { %16421 = vmatmul.mubr.f32.gmra.mrb[14].mxu0 %v16051_v36  ;;  %v23984_v36 = vsel %vm12028_vm9, 1.0, %v36486_v33 }
 0xb3c   :  { %24164 = vmatprep.mubr.msk.f32.mxu0 %vm11963_vm4, %v36507_v17  ;;  %v33075_v32 = vsub.f32 %v23984_v36, %v23984_v36 }
 0xb3e   :  { %v16754_v18 = vand.u32 4294901760, %v33075_v32 }
 0xb3f   :  { %24165 = vmatmul.mubr.msk.f32.vlgmr.msra.gmra.mrb[8].mxu0 %vm11962_vm0, %v36507_v17 }
 0xb40   :  { %24166 = vmatprep.mubr.msk.f32.mxu0 %vm11995_vm6, %v36507_v17  ;;  %25471 = vmatpush1.bf16.xpose.msra.mxu0 %v36580_v47  ;;  %v32993_v47 = vsub.f32 %v23921_v2, %v23921_v2  ;;  %v16749_v2 = vsub.f32 %v33049_v5, %v16748_v43 }
 0xb41   :  { %25473 = vmatprep.subr.bf16.mxu0 %v36581_v45  ;;  %v23920_v45 = vsel %vm11964_vm7, 1.0, %v36486_v33 }
 0xb42   :  { %v16718_v6 = vand.u32 4294901760, %v32993_v47  ;;  %v33018_v35 = vsub.f32 %v23920_v45, %v23920_v45  ;;  %v16763_v45 = vand.u32 4294901760, %v33081_v10  ;;  %v16750_v36 = vand.u32 4294901760, %v16749_v2  ;;  %v36606_v2 = vld [vmem:[#allocation145_spill] sm:$0xff] }
 0xb43   :  { %24167 = vmatmul.mubr.msk.f32.gmra.mrb[10].mxu0 %vm11994_vm3, %v36507_v17 }
 0xb44   :  { %24168 = vmatprep.mubr.msk.f32.mxu0 %vm12027_vm2, %v36507_v17  ;;  %v16719_v50 = vsub.f32 %v32993_v47, %v16718_v6  ;;  %v16724_v38 = vand.u32 4294901760, %v33018_v35  ;;  %v16764_v37 = vsub.f32 %v33081_v10, %v16763_v45 }
 0xb46   :  { %v16720_v21 = vand.u32 4294901760, %v16719_v50  ;;  %v16725_v28 = vsub.f32 %v33018_v35, %v16724_v38  ;;  %v16769_v50 = vand.u32 4294901760, %v16768_v27 }
 0xb47   :  { %24169 = vmatmul.mubr.msk.f32.gmra.mrb[12].mxu0 %vm12026_vm11, %v36507_v17 }
 0xb48   :  { %24170 = vmatprep.mubr.msk.f32.mxu0 %vm12059_vm13, %v36507_v17  ;;  %25475 = vmatpush1.bf16.xpose.msra.mxu0 %v36582_v4  ;;  %v23952_v4 = vsel %vm11996_vm15, 1.0, %v36486_v33  ;;  %v16726_v30 = vand.u32 4294901760, %v16725_v28  ;;  %v16770_v28 = vsub.f32 %v16768_v27, %v16769_v50 }
 0xb49   :  { %25477 = vmatprep.subr.bf16.mxu0 %v36595_v23  ;;  %v33046_v34 = vsub.f32 %v23952_v4, %v23952_v4  ;;  %v16755_v4 = vsub.f32 %v33075_v32, %v16754_v18 }
 0xb4a   :  { %v16771_v20 = vand.u32 4294901760, %v16770_v28 }
 0xb4b   :  { %24171 = vmatmul.mubr.msk.f32.gmra.mrb[14].mxu0 %vm12058_vm5, %v36507_v17  ;;  %v16739_v48 = vand.u32 4294901760, %v33046_v34 }
 0xb4c   :  { %24172 = vmatprep.mubr.msk.f32.mxu0 %vm11963_vm4, %v36507_v17  ;;  %vm11967_vm4 = vcmp.eq.s32.totalorder %v31106_v25, %v31694_v0 }
 0xb4d   :  { %v16740_v61 = vsub.f32 %v33046_v34, %v16739_v48 }
 0xb4f   :  { %24173 = vmatmul.mubr.msk.f32.vlgmr.msra.gmra.mrb[8].mxu0 %vm11962_vm0, %v36507_v17  ;;  %v16741_v53 = vand.u32 4294901760, %v16740_v61  ;;  %v36604_v61 = vld [vmem:[#allocation141_spill] sm:$0xff]  ;;  %vm11966_vm0 = vcmp.eq.s32.totalorder %v31103_v63, %v31694_v0 }
 0xb50   :  { %24174 = vmatprep.mubr.msk.f32.mxu0 %vm11995_vm6, %v36507_v17  ;;  %25479 = vmatpush1.bf16.xpose.msra.mxu0 %v36596_v60  ;;  %vm11999_vm6 = vcmp.eq.s32.totalorder %v31106_v25, %v31732_v14 }
 0xb51   :  { %25481 = vmatprep.subr.bf16.mxu0 %v36597_v9 }
 0xb53   :  { %24175 = vmatmul.mubr.msk.f32.gmra.mrb[10].mxu0 %vm11994_vm3, %v36507_v17  ;;  %vm11998_vm3 = vcmp.eq.s32.totalorder %v31103_v63, %v31732_v14 }
 0xb54   :  { %24176 = vmatprep.mubr.msk.f32.mxu0 %vm12027_vm2, %v36507_v17  ;;  %vm12031_vm2 = vcmp.eq.s32.totalorder %v31106_v25, %v31766_v59 }
 0xb57   :  { %24177 = vmatmul.mubr.msk.f32.gmra.mrb[12].mxu0 %vm12026_vm11, %v36507_v17  ;;  %vm12030_vm11 = vcmp.eq.s32.totalorder %v31103_v63, %v31766_v59 }
 0xb58   :  { %24178 = vmatprep.mubr.msk.f32.mxu0 %vm12059_vm13, %v36507_v17  ;;  %25483 = vmatpush1.bf16.xpose.msra.mxu0 %v36598_v52  ;;  %vm12063_vm13 = vcmp.eq.s32.totalorder %v31106_v25, %v31789_v7 }
 0xb59   :  { %25485 = vmatprep.subr.bf16.mxu0 %v36599_v16  ;;  %v16765_v16 = vand.u32 4294901760, %v16764_v37 }
 0xb5b   :  { %24179 = vmatmul.mubr.msk.f32.gmra.mrb[14].mxu0 %vm12058_vm5, %v36507_v17  ;;  %vm12062_vm5 = vcmp.eq.s32.totalorder %v31103_v63, %v31789_v7 }
 0xb5c   :  { %16721 = vmatprep.mubr.f32.mxu0 %v16720_v21  ;;  %v16756_v21 = vand.u32 4294901760, %v16755_v4  ;;  %v23986_v4 = vsel %vm12030_vm11, 1.0, %v36486_v33 }
 0xb5f   :  { %16727 = vmatmul.mubr.f32.vlgmr.msra.gmra.mrb[8].mxu0 %v16726_v30  ;;  %v36603_v30 = vld [vmem:[#allocation134_spill] sm:$0xff] }
 0xb60   :  { %16736 = vmatprep.mubr.f32.mxu0 %v16735_v49  ;;  %25487 = vmatpush1.bf16.xpose.msra.mxu0 %v36600_v42  ;;  %v36605_v49 = vld [vmem:[#allocation142_spill] sm:$0xff] }
 0xb61   :  { %25489 = vmatprep.subr.bf16.mxu0 %v36601_v12  ;;  %v36607_v42 = vld [vmem:[#allocation146_spill] sm:$0xff]  ;;  %v24019_v12 = vsel %vm12063_vm13, 1.0, %v36486_v33 }
 0xb63   :  { %16742 = vmatmul.mubr.f32.gmra.mrb[10].mxu0 %v16741_v53  ;;  %v36608_v53 = vld [vmem:[#allocation147_spill] sm:$0xff] }
 0xb64   :  { %16751 = vmatprep.mubr.f32.mxu0 %v16750_v36 }
 0xb67   :  { %16757 = vmatmul.mubr.f32.gmra.mrb[12].mxu0 %v16756_v21  ;;  %v36615_v21 = vld [vmem:[#allocation154_spill] sm:$0xff] }
 0xb68   :  { %16766 = vmatprep.mubr.f32.mxu0 %v16765_v16  ;;  %25491 = vmatpush1.bf16.xpose.msra.mxu0 %v36602_v26  ;;  %v33294_v16 = vsub.f32 %v23986_v4, %v23986_v4 }
 0xb69   :  { %25493 = vmatprep.subr.bf16.mxu0 %v36603_v30  ;;  %v24018_v30 = vsel %vm12062_vm5, 1.0, %v36486_v33 }
 0xb6b   :  { %16772 = vmatmul.mubr.f32.gmra.mrb[14].mxu0 %v16771_v20  ;;  %v33300_v20 = vsub.f32 %v24019_v12, %v24019_v12 }
 0xb6c   :  { %24180 = vmatprep.mubr.msk.f32.mxu0 %vm11965_vm12, %v36507_v17 }
 0xb6f   :  { %24181 = vmatmul.mubr.msk.f32.vlgmr.msra.gmra.mrb[8].mxu0 %vm11964_vm7, %v36507_v17 }
 0xb70   :  { %24182 = vmatprep.mubr.msk.f32.mxu0 %vm11997_vm14, %v36507_v17  ;;  %25495 = vmatpush1.bf16.xpose.msra.mxu0 %v36604_v61 }
 0xb71   :  { %25497 = vmatprep.subr.bf16.mxu0 %v36605_v49 }
 0xb73   :  { %24183 = vmatmul.mubr.msk.f32.gmra.mrb[10].mxu0 %vm11996_vm15, %v36507_v17 }
 0xb74   :  { %24184 = vmatprep.mubr.msk.f32.mxu0 %vm12029_vm8, %v36507_v17 }
 0xb77   :  { %24185 = vmatmul.mubr.msk.f32.gmra.mrb[12].mxu0 %vm12028_vm9, %v36507_v17 }
 0xb78   :  { %24186 = vmatprep.mubr.msk.f32.mxu0 %vm12061_vm10, %v36507_v17  ;;  %25499 = vmatpush1.bf16.xpose.msra.mxu0 %v36606_v2  ;;  %v17472_v2 = vand.u32 4294901760, %v33294_v16 }
 0xb79   :  { %25501 = vmatprep.subr.bf16.mxu0 %v36595_v23 }
 0xb7b   :  { %24187 = vmatmul.mubr.msk.f32.gmra.mrb[14].mxu0 %vm12060_vm1, %v36507_v17 }
 0xb7c   :  { %16992 = vmatprep.mubr.f32.mxu0 %v32993_v47  ;;  %v23923_v47 = vsel %vm11967_vm4, 1.0, %v36486_v33 }
 0xb7f   :  { %16995 = vmatmul.mubr.f32.vlgmr.msra.gmra.mrb[8].mxu0 %v33018_v35  ;;  %v36612_v35 = vld [vmem:[#allocation151_spill] sm:$0xff] }
 0xb80   :  { %17001 = vmatprep.mubr.f32.mxu0 %v33020_v24  ;;  %25503 = vmatpush1.bf16.xpose.msra.mxu0 %v36596_v60  ;;  %v36613_v24 = vld [vmem:[#allocation152_spill] sm:$0xff] }
 0xb81   :  { %25505 = vmatprep.subr.bf16.mxu0 %v36597_v9 }
 0xb83   :  { %17004 = vmatmul.mubr.f32.gmra.mrb[10].mxu0 %v33046_v34 }
 0xb84   :  { %17010 = vmatprep.mubr.f32.mxu0 %v33049_v5  ;;  %v36609_v5 = vld [vmem:[#allocation148_spill] sm:$0xff] }
 0xb87   :  { %17013 = vmatmul.mubr.f32.gmra.mrb[12].mxu0 %v33075_v32  ;;  %v36610_v32 = vld [vmem:[#allocation149_spill] sm:$0xff] }
 0xb88   :  { %17019 = vmatprep.mubr.f32.mxu0 %v33081_v10  ;;  %25507 = vmatpush1.bf16.xpose.msra.mxu0 %v36598_v52 }
 0xb89   :  { %25509 = vmatprep.subr.bf16.mxu0 %v36607_v42  ;;  %v17486_v42 = vsub.f32 %v24018_v30, %v24018_v30  ;;  %v36620_v30 = vld [vmem:[#allocation165_spill] sm:$0xff] }
 0xb8b   :  { %17022 = vmatmul.mubr.f32.gmra.mrb[14].mxu0 %v16768_v27 }
 0xb8c   :  { %17102 = vmatprep.mubr.f32.mxu0 %v16718_v6  ;;  %v23955_v6 = vsel %vm11999_vm6, 1.0, %v36486_v33 }
 0xb8f   :  { %17106 = vmatmul.mubr.f32.vlgmr.msra.gmra.mrb[8].mxu0 %v16724_v38 }
 0xb90   :  { %17113 = vmatprep.mubr.f32.mxu0 %v16733_v13  ;;  %25511 = vmatpush1.bf16.xpose.msra.mxu0 %v36608_v53  ;;  %v33239_v13 = vsub.f32 %v23955_v6, %v23955_v6  ;;  %v36617_v6 = vld [vmem:[#allocation156_spill] sm:$0xff] }
 0xb91   :  { %25513 = vmatprep.subr.bf16.mxu0 %v36609_v5 }
 0xb92   :  { %v17451_v27 = vand.u32 4294901760, %v33239_v13 }
 0xb93   :  { %17117 = vmatmul.mubr.f32.gmra.mrb[10].mxu0 %v16739_v48  ;;  %v23987_v48 = vsel %vm12031_vm2, 1.0, %v36486_v33 }
 0xb94   :  { %17124 = vmatprep.mubr.f32.mxu0 %v16748_v43  ;;  %v17452_v26 = vsub.f32 %v33239_v13, %v17451_v27 }
 0xb96   :  { %v17453_v53 = vand.u32 4294901760, %v17452_v26  ;;  %v36619_v26 = vld [vmem:[#allocation158_spill] sm:$0xff] }
 0xb97   :  { %17128 = vmatmul.mubr.f32.gmra.mrb[12].mxu0 %v16754_v18 }
 0xb98   :  { %17135 = vmatprep.mubr.f32.mxu0 %v16763_v45  ;;  %25515 = vmatpush1.bf16.xpose.msra.mxu0 %v36610_v32  ;;  %v33268_v45 = vsub.f32 %v23987_v48, %v23987_v48  ;;  %v17481_v32 = vand.u32 4294901760, %v33300_v20 }
 0xb99   :  { %25517 = vmatprep.subr.bf16.mxu0 %v36595_v23  ;;  %v36611_v23 = vld [vmem:[#allocation150_spill] sm:$0xff] }
 0xb9a   :  { %v17466_v40 = vand.u32 4294901760, %v33268_v45 }
 0xb9b   :  { %17139 = vmatmul.mubr.f32.gmra.mrb[14].mxu0 %v16769_v50  ;;  %v36614_v50 = vld [vmem:[#allocation153_spill] sm:$0xff] }
 0xb9c   :  { %24188 = vmatprep.mubr.msk.f32.mxu0 %vm11965_vm12, %v36507_v17  ;;  %v17467_v5 = vsub.f32 %v33268_v45, %v17466_v40 }
 0xb9e   :  { %v17468_v48 = vand.u32 4294901760, %v17467_v5  ;;  %v36624_v5 = vld [vmem:[#allocation171_spill] sm:$0xff] }
 0xb9f   :  { %24189 = vmatmul.mubr.msk.f32.vlgmr.msra.gmra.mrb[8].mxu0 %vm11964_vm7, %v36507_v17 }
 0xba0   :  { %24190 = vmatprep.mubr.msk.f32.mxu0 %vm11997_vm14, %v36507_v17  ;;  %25519 = vmatpush1.bf16.xpose.msra.mxu0 %v36596_v60  ;;  %v33212_v60 = vsub.f32 %v23923_v47, %v23923_v47  ;;  %v36616_v47 = vld [vmem:[#allocation155_spill] sm:$0xff] }
 0xba1   :  { %25521 = vmatprep.subr.bf16.mxu0 %v36597_v9  ;;  %v23922_v9 = vsel %vm11966_vm0, 1.0, %v36486_v33 }
 0xba2   :  { %v17436_v38 = vand.u32 4294901760, %v33212_v60  ;;  %v33237_v34 = vsub.f32 %v23922_v9, %v23922_v9  ;;  %v17473_v9 = vsub.f32 %v33294_v16, %v17472_v2 }
 0xba3   :  { %24191 = vmatmul.mubr.msk.f32.gmra.mrb[10].mxu0 %vm11996_vm15, %v36507_v17 }
 0xba4   :  { %24192 = vmatprep.mubr.msk.f32.mxu0 %vm12029_vm8, %v36507_v17  ;;  %v17437_v43 = vsub.f32 %v33212_v60, %v17436_v38  ;;  %v17442_v10 = vand.u32 4294901760, %v33237_v34  ;;  %v17474_v4 = vand.u32 4294901760, %v17473_v9  ;;  %v36630_v9 = vld [vmem:[#allocation177_spill] sm:$0xff] }
 0xba6   :  { %v17438_v36 = vand.u32 4294901760, %v17437_v43  ;;  %v17443_v37 = vsub.f32 %v33237_v34, %v17442_v10  ;;  %v17482_v43 = vsub.f32 %v33300_v20, %v17481_v32 }
 0xba7   :  { %24193 = vmatmul.mubr.msk.f32.gmra.mrb[12].mxu0 %vm12028_vm9, %v36507_v17 }
 0xba8   :  { %24194 = vmatprep.mubr.msk.f32.mxu0 %vm12061_vm10, %v36507_v17  ;;  %25523 = vmatpush1.bf16.xpose.msra.mxu0 %v36598_v52  ;;  %v23954_v52 = vsel %vm11998_vm3, 1.0, %v36486_v33  ;;  %v17444_v61 = vand.u32 4294901760, %v17443_v37  ;;  %v36618_v37 = vld [vmem:[#allocation157_spill] sm:$0xff] }
 0xba9   :  { %25525 = vmatprep.subr.bf16.mxu0 %v36611_v23  ;;  %v33265_v18 = vsub.f32 %v23954_v52, %v23954_v52  ;;  %v17487_v52 = vand.u32 4294901760, %v17486_v42 }
 0xbab   :  { %24195 = vmatmul.mubr.msk.f32.gmra.mrb[14].mxu0 %vm12060_vm1, %v36507_v17  ;;  %v17457_v28 = vand.u32 4294901760, %v33265_v18  ;;  %v17488_v12 = vsub.f32 %v17486_v42, %v17487_v52 }
 0xbac   :  { %24196 = vmatprep.mubr.msk.f32.mxu0 %vm11965_vm12, %v36507_v17  ;;  %vm11969_vm12 = vcmp.eq.s32.totalorder %v31113_v44, %v31694_v0 }
 0xbad   :  { %v17458_v49 = vsub.f32 %v33265_v18, %v17457_v28 }
 0xbaf   :  { %24197 = vmatmul.mubr.msk.f32.vlgmr.msra.gmra.mrb[8].mxu0 %vm11964_vm7, %v36507_v17  ;;  %v17459_v22 = vand.u32 4294901760, %v17458_v49  ;;  %v36622_v49 = vld [vmem:[#allocation169_spill] sm:$0xff]  ;;  %vm11968_vm7 = vcmp.eq.s32.totalorder %v31110_v55, %v31694_v0 }
 0xbb0   :  { %24198 = vmatprep.mubr.msk.f32.mxu0 %vm11997_vm14, %v36507_v17  ;;  %25527 = vmatpush1.bf16.xpose.msra.mxu0 %v36612_v35  ;;  %vm12001_vm14 = vcmp.eq.s32.totalorder %v31113_v44, %v31732_v14 }
 0xbb1   :  { %25529 = vmatprep.subr.bf16.mxu0 %v36613_v24 }
 0xbb3   :  { %24199 = vmatmul.mubr.msk.f32.gmra.mrb[10].mxu0 %vm11996_vm15, %v36507_v17  ;;  %vm12000_vm15 = vcmp.eq.s32.totalorder %v31110_v55, %v31732_v14 }
 0xbb4   :  { %24200 = vmatprep.mubr.msk.f32.mxu0 %vm12029_vm8, %v36507_v17  ;;  %vm12033_vm8 = vcmp.eq.s32.totalorder %v31113_v44, %v31766_v59 }
 0xbb7   :  { %24201 = vmatmul.mubr.msk.f32.gmra.mrb[12].mxu0 %vm12028_vm9, %v36507_v17  ;;  %vm12032_vm9 = vcmp.eq.s32.totalorder %v31110_v55, %v31766_v59 }
 0xbb8   :  { %24202 = vmatprep.mubr.msk.f32.mxu0 %vm12061_vm10, %v36507_v17  ;;  %25531 = vmatpush1.bf16.xpose.msra.mxu0 %v36614_v50  ;;  %vm12065_vm10 = vcmp.eq.s32.totalorder %v31113_v44, %v31789_v7 }
 0xbb9   :  { %25533 = vmatprep.subr.bf16.mxu0 %v36615_v21  ;;  %v17489_v21 = vand.u32 4294901760, %v17488_v12 }
 0xbbb   :  { %24203 = vmatmul.mubr.msk.f32.gmra.mrb[14].mxu0 %vm12060_vm1, %v36507_v17  ;;  %vm12064_vm1 = vcmp.eq.s32.totalorder %v31110_v55, %v31789_v7 }
 0xbbc   :  { %17439 = vmatprep.mubr.f32.mxu0 %v17438_v36  ;;  %v17483_v36 = vand.u32 4294901760, %v17482_v43 }
 0xbbf   :  { %17445 = vmatmul.mubr.f32.vlgmr.msra.gmra.mrb[8].mxu0 %v17444_v61  ;;  %v36621_v61 = vld [vmem:[#allocation166_spill] sm:$0xff] }
 0xbc0   :  { %17454 = vmatprep.mubr.f32.mxu0 %v17453_v53  ;;  %25535 = vmatpush1.bf16.xpose.msra.mxu0 %v36616_v47  ;;  %v36623_v53 = vld [vmem:[#allocation170_spill] sm:$0xff]  ;;  %v23988_v47 = vsel %vm12032_vm9, 1.0, %v36486_v33 }
 0xbc1   :  { %25537 = vmatprep.subr.bf16.mxu0 %v36617_v6 }
 0xbc3   :  { %17460 = vmatmul.mubr.f32.gmra.mrb[10].mxu0 %v17459_v22  ;;  %v24021_v22 = vsel %vm12065_vm10, 1.0, %v36486_v33 }
 0xbc4   :  { %17469 = vmatprep.mubr.f32.mxu0 %v17468_v48 }
 0xbc7   :  { %17475 = vmatmul.mubr.f32.gmra.mrb[12].mxu0 %v17474_v4  ;;  %v33516_v4 = vsub.f32 %v23988_v47, %v23988_v47 }
 0xbc8   :  { %17484 = vmatprep.mubr.f32.mxu0 %v17483_v36  ;;  %25539 = vmatpush1.bf16.xpose.msra.mxu0 %v36618_v37  ;;  %v33519_v36 = vsub.f32 %v24021_v22, %v24021_v22  ;;  %v24020_v37 = vsel %vm12064_vm1, 1.0, %v36486_v33  ;;  %v36634_v22 = vld [vmem:[#allocation181_spill] sm:$0xff] }
 0xbc9   :  { %25541 = vmatprep.subr.bf16.mxu0 %v36619_v26 }
 0xbcb   :  { %17490 = vmatmul.mubr.f32.gmra.mrb[14].mxu0 %v17489_v21 }
 0xbcc   :  { %24204 = vmatprep.mubr.msk.f32.mxu0 %vm11967_vm4, %v36507_v17 }
 0xbcf   :  { %24205 = vmatmul.mubr.msk.f32.vlgmr.msra.gmra.mrb[8].mxu0 %vm11966_vm0, %v36507_v17 }
 0xbd0   :  { %24206 = vmatprep.mubr.msk.f32.mxu0 %vm11999_vm6, %v36507_v17  ;;  %25543 = vmatpush1.bf16.xpose.msra.mxu0 %v36620_v30  ;;  %v18190_v30 = vand.u32 4294901760, %v33516_v4 }
 0xbd1   :  { %25545 = vmatprep.subr.bf16.mxu0 %v36621_v61  ;;  %v18204_v61 = vsub.f32 %v24020_v37, %v24020_v37  ;;  %v36638_v37 = vld [vmem:[#allocation193_spill] sm:$0xff] }
 0xbd3   :  { %24207 = vmatmul.mubr.msk.f32.gmra.mrb[10].mxu0 %vm11998_vm3, %v36507_v17 }
 0xbd4   :  { %24208 = vmatprep.mubr.msk.f32.mxu0 %vm12031_vm2, %v36507_v17 }
 0xbd7   :  { %24209 = vmatmul.mubr.msk.f32.gmra.mrb[12].mxu0 %vm12030_vm11, %v36507_v17 }
 0xbd8   :  { %24210 = vmatprep.mubr.msk.f32.mxu0 %vm12063_vm13, %v36507_v17  ;;  %25547 = vmatpush1.bf16.xpose.msra.mxu0 %v36622_v49 }
 0xbd9   :  { %25549 = vmatprep.subr.bf16.mxu0 %v36611_v23 }
 0xbdb   :  { %24211 = vmatmul.mubr.msk.f32.gmra.mrb[14].mxu0 %vm12062_vm5, %v36507_v17 }
 0xbdc   :  { %17710 = vmatprep.mubr.f32.mxu0 %v33212_v60  ;;  %v23925_v60 = vsel %vm11969_vm12, 1.0, %v36486_v33 }
 0xbdf   :  { %17713 = vmatmul.mubr.f32.vlgmr.msra.gmra.mrb[8].mxu0 %v33237_v34  ;;  %v36628_v34 = vld [vmem:[#allocation175_spill] sm:$0xff] }
 0xbe0   :  { %17719 = vmatprep.mubr.f32.mxu0 %v33239_v13  ;;  %25551 = vmatpush1.bf16.xpose.msra.mxu0 %v36612_v35  ;;  %v36629_v13 = vld [vmem:[#allocation176_spill] sm:$0xff] }
 0xbe1   :  { %25553 = vmatprep.subr.bf16.mxu0 %v36613_v24 }
 0xbe3   :  { %17722 = vmatmul.mubr.f32.gmra.mrb[10].mxu0 %v33265_v18 }
 0xbe4   :  { %17728 = vmatprep.mubr.f32.mxu0 %v33268_v45  ;;  %v36625_v45 = vld [vmem:[#allocation172_spill] sm:$0xff] }
 0xbe7   :  { %17731 = vmatmul.mubr.f32.gmra.mrb[12].mxu0 %v33294_v16  ;;  %v36626_v16 = vld [vmem:[#allocation173_spill] sm:$0xff] }
 0xbe8   :  { %17737 = vmatprep.mubr.f32.mxu0 %v33300_v20  ;;  %25555 = vmatpush1.bf16.xpose.msra.mxu0 %v36614_v50 }
 0xbe9   :  { %25557 = vmatprep.subr.bf16.mxu0 %v36623_v53 }
 0xbeb   :  { %17740 = vmatmul.mubr.f32.gmra.mrb[14].mxu0 %v17486_v42 }
 0xbec   :  { %17820 = vmatprep.mubr.f32.mxu0 %v17436_v38  ;;  %v23957_v38 = vsel %vm12001_vm14, 1.0, %v36486_v33 }
 0xbed   :  { %v33457_v18 = vsub.f32 %v23957_v38, %v23957_v38 }
 0xbef   :  { %17824 = vmatmul.mubr.f32.vlgmr.msra.gmra.mrb[8].mxu0 %v17442_v10  ;;  %v18169_v20 = vand.u32 4294901760, %v33457_v18 }
 0xbf0   :  { %17831 = vmatprep.mubr.f32.mxu0 %v17451_v27  ;;  %25559 = vmatpush1.bf16.xpose.msra.mxu0 %v36624_v5  ;;  %v18199_v5 = vand.u32 4294901760, %v33519_v36 }
 0xbf1   :  { %25561 = vmatprep.subr.bf16.mxu0 %v36625_v45  ;;  %v18170_v48 = vsub.f32 %v33457_v18, %v18169_v20  ;;  %v36632_v45 = vld [vmem:[#allocation179_spill] sm:$0xff] }
 0xbf3   :  { %17835 = vmatmul.mubr.f32.gmra.mrb[10].mxu0 %v17457_v28  ;;  %v23989_v28 = vsel %vm12033_vm8, 1.0, %v36486_v33  ;;  %v18171_v49 = vand.u32 4294901760, %v18170_v48  ;;  %v36636_v48 = vld [vmem:[#allocation189_spill] sm:$0xff] }
 0xbf4   :  { %17842 = vmatprep.mubr.f32.mxu0 %v17466_v40 }
 0xbf7   :  { %17846 = vmatmul.mubr.f32.gmra.mrb[12].mxu0 %v17472_v2 }
 0xbf8   :  { %17853 = vmatprep.mubr.f32.mxu0 %v17481_v32  ;;  %25563 = vmatpush1.bf16.xpose.msra.mxu0 %v36626_v16  ;;  %v33487_v32 = vsub.f32 %v23989_v28, %v23989_v28  ;;  %v18191_v16 = vsub.f32 %v33516_v4, %v18190_v30 }
 0xbf9   :  { %25565 = vmatprep.subr.bf16.mxu0 %v36611_v23  ;;  %v36627_v23 = vld [vmem:[#allocation174_spill] sm:$0xff] }
 0xbfa   :  { %v18184_v25 = vand.u32 4294901760, %v33487_v32  ;;  %v18192_v28 = vand.u32 4294901760, %v18191_v16 }
 0xbfb   :  { %17857 = vmatmul.mubr.f32.gmra.mrb[14].mxu0 %v17487_v52  ;;  %v36631_v52 = vld [vmem:[#allocation178_spill] sm:$0xff] }
 0xbfc   :  { %24212 = vmatprep.mubr.msk.f32.mxu0 %vm11967_vm4, %v36507_v17  ;;  %v18185_v53 = vsub.f32 %v33487_v32, %v18184_v25 }
 0xbfe   :  { %v18186_v38 = vand.u32 4294901760, %v18185_v53 }
 0xbff   :  { %24213 = vmatmul.mubr.msk.f32.vlgmr.msra.gmra.mrb[8].mxu0 %vm11966_vm0, %v36507_v17 }
 0xc00   :  { %24214 = vmatprep.mubr.msk.f32.mxu0 %vm11999_vm6, %v36507_v17  ;;  %25567 = vmatpush1.bf16.xpose.msra.mxu0 %v36612_v35  ;;  %v33431_v35 = vsub.f32 %v23925_v60, %v23925_v60  ;;  %v36633_v60 = vld [vmem:[#allocation180_spill] sm:$0xff] }
 0xc01   :  { %25569 = vmatprep.subr.bf16.mxu0 %v36613_v24  ;;  %v23924_v24 = vsel %vm11968_vm7, 1.0, %v36486_v33 }
 0xc02   :  { %v33455_v10 = vsub.f32 %v23924_v24, %v23924_v24  ;;  %v18154_v27 = vand.u32 4294901760, %v33431_v35  ;;  %v18205_v24 = vand.u32 4294901760, %v18204_v61 }
 0xc03   :  { %24215 = vmatmul.mubr.msk.f32.gmra.mrb[10].mxu0 %vm11998_vm3, %v36507_v17 }
 0xc04   :  { %24216 = vmatprep.mubr.msk.f32.mxu0 %vm12031_vm2, %v36507_v17  ;;  %v18160_v40 = vand.u32 4294901760, %v33455_v10  ;;  %v18155_v42 = vsub.f32 %v33431_v35, %v18154_v27 }
 0xc06   :  { %v18161_v6 = vsub.f32 %v33455_v10, %v18160_v40  ;;  %v18156_v12 = vand.u32 4294901760, %v18155_v42  ;;  %v18206_v42 = vsub.f32 %v18204_v61, %v18205_v24 }
 0xc07   :  { %24217 = vmatmul.mubr.msk.f32.gmra.mrb[12].mxu0 %vm12030_vm11, %v36507_v17 }
 0xc08   :  { %24218 = vmatprep.mubr.msk.f32.mxu0 %vm12063_vm13, %v36507_v17  ;;  %25571 = vmatpush1.bf16.xpose.msra.mxu0 %v36614_v50  ;;  %v23956_v50 = vsel %vm12000_vm15, 1.0, %v36486_v33  ;;  %v18162_v21 = vand.u32 4294901760, %v18161_v6  ;;  %v18207_v6 = vand.u32 4294901760, %v18206_v42 }
 0xc09   :  { %25573 = vmatprep.subr.bf16.mxu0 %v36627_v23  ;;  %v33482_v2 = vsub.f32 %v23956_v50, %v23956_v50  ;;  %v18200_v50 = vsub.f32 %v33519_v36, %v18199_v5 }
 0xc0b   :  { %24219 = vmatmul.mubr.msk.f32.gmra.mrb[14].mxu0 %vm12062_vm5, %v36507_v17  ;;  %v18175_v43 = vand.u32 4294901760, %v33482_v2  ;;  %v18201_v47 = vand.u32 4294901760, %v18200_v50 }
 0xc0c   :  { %24220 = vmatprep.mubr.msk.f32.mxu0 %vm11967_vm4, %v36507_v17  ;;  %vm11971_vm4 = vcmp.eq.s32.totalorder %v31121_v41, %v31694_v0 }
 0xc0d   :  { %v18176_v26 = vsub.f32 %v33482_v2, %v18175_v43 }
 0xc0f   :  { %24221 = vmatmul.mubr.msk.f32.vlgmr.msra.gmra.mrb[8].mxu0 %vm11966_vm0, %v36507_v17  ;;  %v18177_v63 = vand.u32 4294901760, %v18176_v26  ;;  %v36640_v26 = vld [vmem:[#allocation195_spill] sm:$0xff]  ;;  %vm11970_vm0 = vcmp.eq.s32.totalorder %v31118_v3, %v31694_v0 }
 0xc10   :  { %24222 = vmatprep.mubr.msk.f32.mxu0 %vm11999_vm6, %v36507_v17  ;;  %25575 = vmatpush1.bf16.xpose.msra.mxu0 %v36628_v34  ;;  %vm12003_vm6 = vcmp.eq.s32.totalorder %v31121_v41, %v31732_v14 }
 0xc11   :  { %25577 = vmatprep.subr.bf16.mxu0 %v36629_v13 }
 0xc13   :  { %24223 = vmatmul.mubr.msk.f32.gmra.mrb[10].mxu0 %vm11998_vm3, %v36507_v17  ;;  %vm12002_vm3 = vcmp.eq.s32.totalorder %v31118_v3, %v31732_v14 }
 0xc14   :  { %24224 = vmatprep.mubr.msk.f32.mxu0 %vm12031_vm2, %v36507_v17  ;;  %vm12035_vm2 = vcmp.eq.s32.totalorder %v31121_v41, %v31766_v59 }
 0xc17   :  { %24225 = vmatmul.mubr.msk.f32.gmra.mrb[12].mxu0 %vm12030_vm11, %v36507_v17  ;;  %vm12034_vm11 = vcmp.eq.s32.totalorder %v31118_v3, %v31766_v59 }
 0xc18   :  { %24226 = vmatprep.mubr.msk.f32.mxu0 %vm12063_vm13, %v36507_v17  ;;  %25579 = vmatpush1.bf16.xpose.msra.mxu0 %v36630_v9  ;;  %vm12067_vm13 = vcmp.eq.s32.totalorder %v31121_v41, %v31789_v7  ;;  %v23990_v53 = vsel %vm12034_vm11, 1.0, %v36486_v33 }
 0xc19   :  { %25581 = vmatprep.subr.bf16.mxu0 %v36631_v52  ;;  %v36635_v52 = vld [vmem:[#allocation182_spill] sm:$0xff] }
 0xc1b   :  { %24227 = vmatmul.mubr.msk.f32.gmra.mrb[14].mxu0 %vm12062_vm5, %v36507_v17  ;;  %vm12066_vm5 = vcmp.eq.s32.totalorder %v31118_v3, %v31789_v7 }
 0xc1c   :  { %18157 = vmatprep.mubr.f32.mxu0 %v18156_v12  ;;  %v36637_v12 = vld [vmem:[#allocation190_spill] sm:$0xff]  ;;  %v24022_v42 = vsel %vm12066_vm5, 1.0, %v36486_v33 }
 0xc1f   :  { %18163 = vmatmul.mubr.f32.vlgmr.msra.gmra.mrb[8].mxu0 %v18162_v21  ;;  %v36639_v21 = vld [vmem:[#allocation194_spill] sm:$0xff] }
 0xc20   :  { %18172 = vmatprep.mubr.f32.mxu0 %v18171_v49  ;;  %25583 = vmatpush1.bf16.xpose.msra.mxu0 %v36632_v45  ;;  %v36646_v45 = vld [vmem:[#allocation201_spill] sm:$0xff] }
 0xc21   :  { %25585 = vmatprep.subr.bf16.mxu0 %v36633_v60  ;;  %v36647_v60 = vld [vmem:[#allocation202_spill] sm:$0xff] }
 0xc23   :  { %18178 = vmatmul.mubr.f32.gmra.mrb[10].mxu0 %v18177_v63 }
 0xc24   :  { %18187 = vmatprep.mubr.f32.mxu0 %v18186_v38  ;;  %v33732_v38 = vsub.f32 %v23990_v53, %v23990_v53 }
 0xc27   :  { %18193 = vmatmul.mubr.f32.gmra.mrb[12].mxu0 %v18192_v28 }
 0xc28   :  { %18202 = vmatprep.mubr.f32.mxu0 %v18201_v47  ;;  %25587 = vmatpush1.bf16.xpose.msra.mxu0 %v36634_v22 }
 0xc29   :  { %25589 = vmatprep.subr.bf16.mxu0 %v36635_v52  ;;  %v18922_v52 = vsub.f32 %v24022_v42, %v24022_v42  ;;  %v36656_v42 = vld [vmem:[#allocation219_spill] sm:$0xff] }
 0xc2b   :  { %18208 = vmatmul.mubr.f32.gmra.mrb[14].mxu0 %v18207_v6  ;;  %v18908_v6 = vand.u32 4294901760, %v33732_v38 }
 0xc2c   :  { %24228 = vmatprep.mubr.msk.f32.mxu0 %vm11969_vm12, %v36507_v17 }
 0xc2f   :  { %24229 = vmatmul.mubr.msk.f32.vlgmr.msra.gmra.mrb[8].mxu0 %vm11968_vm7, %v36507_v17 }
 0xc30   :  { %24230 = vmatprep.mubr.msk.f32.mxu0 %vm12001_vm14, %v36507_v17  ;;  %25591 = vmatpush1.bf16.xpose.msra.mxu0 %v36636_v48 }
 0xc31   :  { %25593 = vmatprep.subr.bf16.mxu0 %v36637_v12 }
 0xc33   :  { %24231 = vmatmul.mubr.msk.f32.gmra.mrb[10].mxu0 %vm12000_vm15, %v36507_v17 }
 0xc34   :  { %24232 = vmatprep.mubr.msk.f32.mxu0 %vm12033_vm8, %v36507_v17 }
 0xc37   :  { %24233 = vmatmul.mubr.msk.f32.gmra.mrb[12].mxu0 %vm12032_vm9, %v36507_v17 }
 0xc38   :  { %24234 = vmatprep.mubr.msk.f32.mxu0 %vm12065_vm10, %v36507_v17  ;;  %25595 = vmatpush1.bf16.xpose.msra.mxu0 %v36638_v37 }
 0xc39   :  { %25597 = vmatprep.subr.bf16.mxu0 %v36627_v23 }
 0xc3b   :  { %24235 = vmatmul.mubr.msk.f32.gmra.mrb[14].mxu0 %vm12064_vm1, %v36507_v17 }
 0xc3c   :  { %18428 = vmatprep.mubr.f32.mxu0 %v33431_v35  ;;  %v23927_v35 = vsel %vm11971_vm4, 1.0, %v36486_v33 }
 0xc3f   :  { %18431 = vmatmul.mubr.f32.vlgmr.msra.gmra.mrb[8].mxu0 %v33455_v10  ;;  %v23959_v10 = vsel %vm12003_vm6, 1.0, %v36486_v33 }
 0xc40   :  { %18437 = vmatprep.mubr.f32.mxu0 %v33457_v18  ;;  %25599 = vmatpush1.bf16.xpose.msra.mxu0 %v36628_v34  ;;  %v36644_v18 = vld [vmem:[#allocation199_spill] sm:$0xff] }
 0xc41   :  { %25601 = vmatprep.subr.bf16.mxu0 %v36629_v13 }
 0xc43   :  { %18440 = vmatmul.mubr.f32.gmra.mrb[10].mxu0 %v33482_v2  ;;  %v33677_v2 = vsub.f32 %v23959_v10, %v23959_v10 }
 0xc44   :  { %18446 = vmatprep.mubr.f32.mxu0 %v33487_v32  ;;  %v36641_v32 = vld [vmem:[#allocation196_spill] sm:$0xff] }
 0xc47   :  { %18449 = vmatmul.mubr.f32.gmra.mrb[12].mxu0 %v33516_v4  ;;  %v36642_v4 = vld [vmem:[#allocation197_spill] sm:$0xff] }
 0xc48   :  { %18455 = vmatprep.mubr.f32.mxu0 %v33519_v36  ;;  %25603 = vmatpush1.bf16.xpose.msra.mxu0 %v36630_v9 }
 0xc49   :  { %25605 = vmatprep.subr.bf16.mxu0 %v36639_v21  ;;  %v36648_v21 = vld [vmem:[#allocation203_spill] sm:$0xff] }
 0xc4b   :  { %18458 = vmatmul.mubr.f32.gmra.mrb[14].mxu0 %v18204_v61  ;;  %v18887_v61 = vand.u32 4294901760, %v33677_v2 }
 0xc4c   :  { %18538 = vmatprep.mubr.f32.mxu0 %v18154_v27  ;;  %v36645_v27 = vld [vmem:[#allocation200_spill] sm:$0xff] }
 0xc4d   :  { %v18888_v50 = vsub.f32 %v33677_v2, %v18887_v61 }
 0xc4f   :  { %18542 = vmatmul.mubr.f32.vlgmr.msra.gmra.mrb[8].mxu0 %v18160_v40  ;;  %v18889_v48 = vand.u32 4294901760, %v18888_v50  ;;  %v36655_v50 = vld [vmem:[#allocation218_spill] sm:$0xff] }
 0xc50   :  { %18549 = vmatprep.mubr.f32.mxu0 %v18169_v20  ;;  %25607 = vmatpush1.bf16.xpose.msra.mxu0 %v36640_v26  ;;  %v18909_v26 = vsub.f32 %v33732_v38, %v18908_v6 }
 0xc51   :  { %25609 = vmatprep.subr.bf16.mxu0 %v36641_v32  ;;  %v36649_v32 = vld [vmem:[#allocation204_spill] sm:$0xff] }
 0xc52   :  { %v18910_v10 = vand.u32 4294901760, %v18909_v26 }
 0xc53   :  { %18553 = vmatmul.mubr.f32.gmra.mrb[10].mxu0 %v18175_v43  ;;  %v23991_v43 = vsel %vm12035_vm2, 1.0, %v36486_v33 }
 0xc54   :  { %18560 = vmatprep.mubr.f32.mxu0 %v18184_v25  ;;  %v33706_v49 = vsub.f32 %v23991_v43, %v23991_v43 }
 0xc56   :  { %v18902_v44 = vand.u32 4294901760, %v33706_v49 }
 0xc57   :  { %18564 = vmatmul.mubr.f32.gmra.mrb[12].mxu0 %v18190_v30 }
 0xc58   :  { %18571 = vmatprep.mubr.f32.mxu0 %v18199_v5  ;;  %25611 = vmatpush1.bf16.xpose.msra.mxu0 %v36642_v4  ;;  %v24023_v5 = vsel %vm12067_vm13, 1.0, %v36486_v33  ;;  %v18903_v12 = vsub.f32 %v33706_v49, %v18902_v44  ;;  %v18923_v4 = vand.u32 4294901760, %v18922_v52 }
 0xc59   :  { %25613 = vmatprep.subr.bf16.mxu0 %v36627_v23  ;;  %v36643_v23 = vld [vmem:[#allocation198_spill] sm:$0xff]  ;;  %v33738_v28 = vsub.f32 %v24023_v5, %v24023_v5 }
 0xc5a   :  { %v36651_v5 = vld [vmem:[#allocation206_spill] sm:$0xff] }
 0xc5b   :  { %18575 = vmatmul.mubr.f32.gmra.mrb[14].mxu0 %v18205_v24  ;;  %v18917_v37 = vand.u32 4294901760, %v33738_v28 }
 0xc5c   :  { %24236 = vmatprep.mubr.msk.f32.mxu0 %vm11969_vm12, %v36507_v17 }
 0xc5f   :  { %24237 = vmatmul.mubr.msk.f32.vlgmr.msra.gmra.mrb[8].mxu0 %vm11968_vm7, %v36507_v17 }
 0xc60   :  { %24238 = vmatprep.mubr.msk.f32.mxu0 %vm12001_vm14, %v36507_v17  ;;  %25615 = vmatpush1.bf16.xpose.msra.mxu0 %v36628_v34  ;;  %v33650_v34 = vsub.f32 %v23927_v35, %v23927_v35  ;;  %v18904_v35 = vand.u32 4294901760, %v18903_v12  ;;  %v36662_v12 = vld [vmem:[#allocation225_spill] sm:$0xff] }
 0xc61   :  { %25617 = vmatprep.subr.bf16.mxu0 %v36629_v13  ;;  %v23926_v13 = vsel %vm11970_vm0, 1.0, %v36486_v33 }
 0xc62   :  { %v18872_v40 = vand.u32 4294901760, %v33650_v34  ;;  %v33675_v20 = vsub.f32 %v23926_v13, %v23926_v13  ;;  %v18918_v13 = vsub.f32 %v33738_v28, %v18917_v37 }
 0xc63   :  { %24239 = vmatmul.mubr.msk.f32.gmra.mrb[10].mxu0 %vm12000_vm15, %v36507_v17 }
 0xc64   :  { %24240 = vmatprep.mubr.msk.f32.mxu0 %vm12033_vm8, %v36507_v17  ;;  %v18873_v25 = vsub.f32 %v33650_v34, %v18872_v40  ;;  %v18878_v36 = vand.u32 4294901760, %v33675_v20  ;;  %v18919_v43 = vand.u32 4294901760, %v18918_v13 }
 0xc66   :  { %v18874_v63 = vand.u32 4294901760, %v18873_v25  ;;  %v18879_v16 = vsub.f32 %v33675_v20, %v18878_v36  ;;  %v36650_v25 = vld [vmem:[#allocation205_spill] sm:$0xff] }
 0xc67   :  { %24241 = vmatmul.mubr.msk.f32.gmra.mrb[12].mxu0 %vm12032_vm9, %v36507_v17 }
 0xc68   :  { %24242 = vmatprep.mubr.msk.f32.mxu0 %vm12065_vm10, %v36507_v17  ;;  %25619 = vmatpush1.bf16.xpose.msra.mxu0 %v36630_v9  ;;  %v23958_v9 = vsel %vm12002_vm3, 1.0, %v36486_v33  ;;  %v18880_v47 = vand.u32 4294901760, %v18879_v16  ;;  %v36653_v16 = vld [vmem:[#allocation214_spill] sm:$0xff] }
 0xc69   :  { %25621 = vmatprep.subr.bf16.mxu0 %v36643_v23  ;;  %v33703_v30 = vsub.f32 %v23958_v9, %v23958_v9  ;;  %v18924_v9 = vsub.f32 %v18922_v52, %v18923_v4 }
 0xc6b   :  { %24243 = vmatmul.mubr.msk.f32.gmra.mrb[14].mxu0 %vm12064_vm1, %v36507_v17  ;;  %v18893_v24 = vand.u32 4294901760, %v33703_v30  ;;  %v18925_v53 = vand.u32 4294901760, %v18924_v9 }
 0xc6c   :  { %24244 = vmatprep.mubr.msk.f32.mxu0 %vm11969_vm12, %v36507_v17  ;;  %vm11973_vm12 = vcmp.eq.s32.totalorder %v31128_v62, %v31694_v0 }
 0xc6d   :  { %v18894_v22 = vsub.f32 %v33703_v30, %v18893_v24 }
 0xc6f   :  { %24245 = vmatmul.mubr.msk.f32.vlgmr.msra.gmra.mrb[8].mxu0 %vm11968_vm7, %v36507_v17  ;;  %v18895_v55 = vand.u32 4294901760, %v18894_v22  ;;  %vm11972_vm7 = vcmp.eq.s32.totalorder %v31125_v58, %v31694_v0 }
 0xc70   :  { %24246 = vmatprep.mubr.msk.f32.mxu0 %vm12001_vm14, %v36507_v17  ;;  %25623 = vmatpush1.bf16.xpose.msra.mxu0 %v36644_v18  ;;  %vm12005_vm14 = vcmp.eq.s32.totalorder %v31128_v62, %v31732_v14 }
 0xc71   :  { %25625 = vmatprep.subr.bf16.mxu0 %v36645_v27 }
 0xc73   :  { %24247 = vmatmul.mubr.msk.f32.gmra.mrb[10].mxu0 %vm12000_vm15, %v36507_v17  ;;  %vm12004_vm15 = vcmp.eq.s32.totalorder %v31125_v58, %v31732_v14 }
 0xc74   :  { %24248 = vmatprep.mubr.msk.f32.mxu0 %vm12033_vm8, %v36507_v17  ;;  %vm12037_vm8 = vcmp.eq.s32.totalorder %v31128_v62, %v31766_v59 }
 0xc77   :  { %24249 = vmatmul.mubr.msk.f32.gmra.mrb[12].mxu0 %vm12032_vm9, %v36507_v17  ;;  %vm12036_vm9 = vcmp.eq.s32.totalorder %v31125_v58, %v31766_v59 }
 0xc78   :  { %24250 = vmatprep.mubr.msk.f32.mxu0 %vm12065_vm10, %v36507_v17  ;;  %25627 = vmatpush1.bf16.xpose.msra.mxu0 %v36646_v45  ;;  %vm12069_vm10 = vcmp.eq.s32.totalorder %v31128_v62, %v31789_v7 }
 0xc79   :  { %25629 = vmatprep.subr.bf16.mxu0 %v36647_v60  ;;  %v36654_v60 = vld [vmem:[#allocation217_spill] sm:$0xff] }
 0xc7b   :  { %24251 = vmatmul.mubr.msk.f32.gmra.mrb[14].mxu0 %vm12064_vm1, %v36507_v17  ;;  %vm12068_vm1 = vcmp.eq.s32.totalorder %v31125_v58, %v31789_v7 }
 0xc7c   :  { %18875 = vmatprep.mubr.f32.mxu0 %v18874_v63  ;;  %v36652_v63 = vld [vmem:[#allocation213_spill] sm:$0xff]  ;;  %v24024_v13 = vsel %vm12068_vm1, 1.0, %v36486_v33 }
 0xc7f   :  { %18881 = vmatmul.mubr.f32.vlgmr.msra.gmra.mrb[8].mxu0 %v18880_v47 }
 0xc80   :  { %18890 = vmatprep.mubr.f32.mxu0 %v18889_v48  ;;  %25631 = vmatpush1.bf16.xpose.msra.mxu0 %v36648_v21  ;;  %v24025_v48 = vsel %vm12069_vm10, 1.0, %v36486_v33 }
 0xc81   :  { %25633 = vmatprep.subr.bf16.mxu0 %v36649_v32 }
 0xc83   :  { %18896 = vmatmul.mubr.f32.gmra.mrb[10].mxu0 %v18895_v55  ;;  %v36663_v55 = vld [vmem:[#allocation226_spill] sm:$0xff] }
 0xc84   :  { %18905 = vmatprep.mubr.f32.mxu0 %v18904_v35  ;;  %v33957_v35 = vsub.f32 %v24025_v48, %v24025_v48  ;;  %v36669_v48 = vld [vmem:[#allocation238_spill] sm:$0xff] }
 0xc87   :  { %18911 = vmatmul.mubr.f32.gmra.mrb[12].mxu0 %v18910_v10 }
 0xc88   :  { %18920 = vmatprep.mubr.f32.mxu0 %v18919_v43  ;;  %25635 = vmatpush1.bf16.xpose.msra.mxu0 %v36650_v25  ;;  %v19640_v25 = vsub.f32 %v24024_v13, %v24024_v13 }
 0xc89   :  { %25637 = vmatprep.subr.bf16.mxu0 %v36651_v5 }
 0xc8b   :  { %18926 = vmatmul.mubr.f32.gmra.mrb[14].mxu0 %v18925_v53 }
 0xc8c   :  { %24252 = vmatprep.mubr.msk.f32.mxu0 %vm11971_vm4, %v36507_v17 }
 0xc8f   :  { %24253 = vmatmul.mubr.msk.f32.vlgmr.msra.gmra.mrb[8].mxu0 %vm11970_vm0, %v36507_v17 }
 0xc90   :  { %24254 = vmatprep.mubr.msk.f32.mxu0 %vm12003_vm6, %v36507_v17  ;;  %25639 = vmatpush1.bf16.xpose.msra.mxu0 %v36652_v63  ;;  %v19635_v63 = vand.u32 4294901760, %v33957_v35 }
 0xc91   :  { %25641 = vmatprep.subr.bf16.mxu0 %v36653_v16  ;;  %v36664_v16 = vld [vmem:[#allocation227_spill] sm:$0xff] }
 0xc93   :  { %24255 = vmatmul.mubr.msk.f32.gmra.mrb[10].mxu0 %vm12002_vm3, %v36507_v17 }
 0xc94   :  { %24256 = vmatprep.mubr.msk.f32.mxu0 %vm12035_vm2, %v36507_v17 }
 0xc97   :  { %24257 = vmatmul.mubr.msk.f32.gmra.mrb[12].mxu0 %vm12034_vm11, %v36507_v17 }
 0xc98   :  { %24258 = vmatprep.mubr.msk.f32.mxu0 %vm12067_vm13, %v36507_v17  ;;  %25643 = vmatpush1.bf16.xpose.msra.mxu0 %v36654_v60 }
 0xc99   :  { %25645 = vmatprep.subr.bf16.mxu0 %v36643_v23 }
 0xc9b   :  { %24259 = vmatmul.mubr.msk.f32.gmra.mrb[14].mxu0 %vm12066_vm5, %v36507_v17 }
 0xc9c   :  { %19146 = vmatprep.mubr.f32.mxu0 %v33650_v34  ;;  %v23929_v34 = vsel %vm11973_vm12, 1.0, %v36486_v33 }
 0xc9f   :  { %19149 = vmatmul.mubr.f32.vlgmr.msra.gmra.mrb[8].mxu0 %v33675_v20  ;;  %v36660_v20 = vld [vmem:[#allocation223_spill] sm:$0xff] }
 0xca0   :  { %19155 = vmatprep.mubr.f32.mxu0 %v33677_v2  ;;  %25647 = vmatpush1.bf16.xpose.msra.mxu0 %v36644_v18  ;;  %v36661_v2 = vld [vmem:[#allocation224_spill] sm:$0xff] }
 0xca1   :  { %25649 = vmatprep.subr.bf16.mxu0 %v36645_v27 }
 0xca3   :  { %19158 = vmatmul.mubr.f32.gmra.mrb[10].mxu0 %v33703_v30 }
 0xca4   :  { %19164 = vmatprep.mubr.f32.mxu0 %v33706_v49  ;;  %v36657_v49 = vld [vmem:[#allocation220_spill] sm:$0xff] }
 0xca7   :  { %19167 = vmatmul.mubr.f32.gmra.mrb[12].mxu0 %v33732_v38  ;;  %v36658_v38 = vld [vmem:[#allocation221_spill] sm:$0xff] }
 0xca8   :  { %19173 = vmatprep.mubr.f32.mxu0 %v33738_v28  ;;  %25651 = vmatpush1.bf16.xpose.msra.mxu0 %v36646_v45 }
 0xca9   :  { %25653 = vmatprep.subr.bf16.mxu0 %v36655_v50  ;;  %v36665_v50 = vld [vmem:[#allocation228_spill] sm:$0xff] }
 0xcab   :  { %19176 = vmatmul.mubr.f32.gmra.mrb[14].mxu0 %v18922_v52  ;;  %v23992_v52 = vsel %vm12036_vm9, 1.0, %v36486_v33 }
 0xcac   :  { %19256 = vmatprep.mubr.f32.mxu0 %v18872_v40  ;;  %v23961_v40 = vsel %vm12005_vm14, 1.0, %v36486_v33  ;;  %v33951_v32 = vsub.f32 %v23992_v52, %v23992_v52  ;;  %v36668_v52 = vld [vmem:[#allocation237_spill] sm:$0xff] }
 0xcae   :  { %v19626_v43 = vand.u32 4294901760, %v33951_v32 }
 0xcaf   :  { %19260 = vmatmul.mubr.f32.vlgmr.msra.gmra.mrb[8].mxu0 %v18878_v36 }
 0xcb0   :  { %19267 = vmatprep.mubr.f32.mxu0 %v18887_v61  ;;  %25655 = vmatpush1.bf16.xpose.msra.mxu0 %v36656_v42  ;;  %v33896_v61 = vsub.f32 %v23961_v40, %v23961_v40  ;;  %v19627_v60 = vsub.f32 %v33951_v32, %v19626_v43  ;;  %v19641_v42 = vand.u32 4294901760, %v19640_v25 }
 0xcb1   :  { %25657 = vmatprep.subr.bf16.mxu0 %v36657_v49 }
 0xcb2   :  { %v19605_v22 = vand.u32 4294901760, %v33896_v61 }
 0xcb3   :  { %19271 = vmatmul.mubr.f32.gmra.mrb[10].mxu0 %v18893_v24  ;;  %v23993_v24 = vsel %vm12037_vm8, 1.0, %v36486_v33 }
 0xcb4   :  { %19278 = vmatprep.mubr.f32.mxu0 %v18902_v44 }
 0xcb7   :  { %19282 = vmatmul.mubr.f32.gmra.mrb[12].mxu0 %v18908_v6  ;;  %v33925_v6 = vsub.f32 %v23993_v24, %v23993_v24 }
 0xcb8   :  { %19289 = vmatprep.mubr.f32.mxu0 %v18917_v37  ;;  %25659 = vmatpush1.bf16.xpose.msra.mxu0 %v36658_v38  ;;  %v19636_v38 = vsub.f32 %v33957_v35, %v19635_v63 }
 0xcb9   :  { %25661 = vmatprep.subr.bf16.mxu0 %v36643_v23  ;;  %v36659_v23 = vld [vmem:[#allocation222_spill] sm:$0xff]  ;;  %v19620_v41 = vand.u32 4294901760, %v33925_v6 }
 0xcba   :  { %v19637_v40 = vand.u32 4294901760, %v19636_v38 }
 0xcbb   :  { %19293 = vmatmul.mubr.f32.gmra.mrb[14].mxu0 %v18923_v4  ;;  %v19606_v4 = vsub.f32 %v33896_v61, %v19605_v22  ;;  %v19621_v5 = vsub.f32 %v33925_v6, %v19620_v41 }
 0xcbc   :  { %24260 = vmatprep.mubr.msk.f32.mxu0 %vm11971_vm4, %v36507_v17 }
 0xcbd   :  { %v19607_v53 = vand.u32 4294901760, %v19606_v4  ;;  %v19622_v49 = vand.u32 4294901760, %v19621_v5 }
 0xcbf   :  { %24261 = vmatmul.mubr.msk.f32.vlgmr.msra.gmra.mrb[8].mxu0 %vm11970_vm0, %v36507_v17 }
 0xcc0   :  { %24262 = vmatprep.mubr.msk.f32.mxu0 %vm12003_vm6, %v36507_v17  ;;  %25663 = vmatpush1.bf16.xpose.msra.mxu0 %v36644_v18  ;;  %v33869_v18 = vsub.f32 %v23929_v34, %v23929_v34  ;;  %v19628_v34 = vand.u32 4294901760, %v19627_v60 }
 0xcc1   :  { %25665 = vmatprep.subr.bf16.mxu0 %v36645_v27  ;;  %v23928_v27 = vsel %vm11972_vm7, 1.0, %v36486_v33 }
 0xcc2   :  { %v19590_v36 = vand.u32 4294901760, %v33869_v18  ;;  %v33894_v30 = vsub.f32 %v23928_v27, %v23928_v27  ;;  %v19642_v27 = vsub.f32 %v19640_v25, %v19641_v42 }
 0xcc3   :  { %24263 = vmatmul.mubr.msk.f32.gmra.mrb[10].mxu0 %vm12002_vm3, %v36507_v17 }
 0xcc4   :  { %24264 = vmatprep.mubr.msk.f32.mxu0 %vm12035_vm2, %v36507_v17  ;;  %v19591_v44 = vsub.f32 %v33869_v18, %v19590_v36  ;;  %v19596_v28 = vand.u32 4294901760, %v33894_v30  ;;  %v19643_v24 = vand.u32 4294901760, %v19642_v27 }
 0xcc6   :  { %v19592_v37 = vand.u32 4294901760, %v19591_v44  ;;  %v19597_v21 = vsub.f32 %v33894_v30, %v19596_v28  ;;  %v36667_v44 = vld [vmem:[#allocation230_spill] sm:$0xff] }
 0xcc7   :  { %24265 = vmatmul.mubr.msk.f32.gmra.mrb[12].mxu0 %vm12034_vm11, %v36507_v17 }
 0xcc8   :  { %24266 = vmatprep.mubr.msk.f32.mxu0 %vm12067_vm13, %v36507_v17  ;;  %25667 = vmatpush1.bf16.xpose.msra.mxu0 %v36646_v45  ;;  %v23960_v45 = vsel %vm12004_vm15, 1.0, %v36486_v33  ;;  %v19598_v10 = vand.u32 4294901760, %v19597_v21  ;;  %v36671_v21 = vld [vmem:[#allocation242_spill] sm:$0xff] }
 0xcc9   :  { %25669 = vmatprep.subr.bf16.mxu0 %v36659_v23  ;;  %v33922_v47 = vsub.f32 %v23960_v45, %v23960_v45  ;;  %v36666_v45 = vld [vmem:[#allocation229_spill] sm:$0xff] }
 0xccb   :  { %24267 = vmatmul.mubr.msk.f32.gmra.mrb[14].mxu0 %vm12066_vm5, %v36507_v17  ;;  %v19611_v26 = vand.u32 4294901760, %v33922_v47 }
 0xccc   :  { %24268 = vmatprep.mubr.msk.f32.mxu0 %vm11971_vm4, %v36507_v17  ;;  %vm11975_vm4 = vcmp.eq.s32.totalorder %v31136_v54, %v31694_v0 }
 0xccd   :  { %v19612_v9 = vsub.f32 %v33922_v47, %v19611_v26 }
 0xccf   :  { %24269 = vmatmul.mubr.msk.f32.vlgmr.msra.gmra.mrb[8].mxu0 %vm11970_vm0, %v36507_v17  ;;  %v19613_v3 = vand.u32 4294901760, %v19612_v9  ;;  %vm11974_vm0 = vcmp.eq.s32.totalorder %v31133_v31, %v31694_v0 }
 0xcd0   :  { %24270 = vmatprep.mubr.msk.f32.mxu0 %vm12003_vm6, %v36507_v17  ;;  %25671 = vmatpush1.bf16.xpose.msra.mxu0 %v36660_v20  ;;  %vm12007_vm6 = vcmp.eq.s32.totalorder %v31136_v54, %v31732_v14 }
 0xcd1   :  { %25673 = vmatprep.subr.bf16.mxu0 %v36661_v2 }
 0xcd3   :  { %24271 = vmatmul.mubr.msk.f32.gmra.mrb[10].mxu0 %vm12002_vm3, %v36507_v17  ;;  %vm12006_vm3 = vcmp.eq.s32.totalorder %v31133_v31, %v31732_v14 }
 0xcd4   :  { %24272 = vmatprep.mubr.msk.f32.mxu0 %vm12035_vm2, %v36507_v17  ;;  %vm12039_vm2 = vcmp.eq.s32.totalorder %v31136_v54, %v31766_v59 }
 0xcd7   :  { %24273 = vmatmul.mubr.msk.f32.gmra.mrb[12].mxu0 %vm12034_vm11, %v36507_v17  ;;  %vm12038_vm11 = vcmp.eq.s32.totalorder %v31133_v31, %v31766_v59 }
 0xcd8   :  { %24274 = vmatprep.mubr.msk.f32.mxu0 %vm12067_vm13, %v36507_v17  ;;  %25675 = vmatpush1.bf16.xpose.msra.mxu0 %v36662_v12  ;;  %vm12071_vm13 = vcmp.eq.s32.totalorder %v31136_v54, %v31789_v7  ;;  %v23994_v9 = vsel %vm12038_vm11, 1.0, %v36486_v33 }
 0xcd9   :  { %25677 = vmatprep.subr.bf16.mxu0 %v36663_v55  ;;  %v36672_v55 = vld [vmem:[#allocation243_spill] sm:$0xff] }
 0xcdb   :  { %24275 = vmatmul.mubr.msk.f32.gmra.mrb[14].mxu0 %vm12066_vm5, %v36507_v17  ;;  %vm12070_vm5 = vcmp.eq.s32.totalorder %v31133_v31, %v31789_v7 }
 0xcdc   :  { %19593 = vmatprep.mubr.f32.mxu0 %v19592_v37  ;;  %v36670_v37 = vld [vmem:[#allocation241_spill] sm:$0xff] }
 0xcdf   :  { %19599 = vmatmul.mubr.f32.vlgmr.msra.gmra.mrb[8].mxu0 %v19598_v10 }
 0xce0   :  { %19608 = vmatprep.mubr.f32.mxu0 %v19607_v53  ;;  %25679 = vmatpush1.bf16.xpose.msra.mxu0 %v36664_v16 }
 0xce1   :  { %25681 = vmatprep.subr.bf16.mxu0 %v36665_v50 }
 0xce3   :  { %19614 = vmatmul.mubr.f32.gmra.mrb[10].mxu0 %v19613_v3  ;;  %v34170_v3 = vsub.f32 %v23994_v9, %v23994_v9  ;;  %v36686_v9 = vld [vmem:[#allocation265_spill] sm:$0xff] }
 0xce4   :  { %19623 = vmatprep.mubr.f32.mxu0 %v19622_v49 }
 0xce7   :  { %19629 = vmatmul.mubr.f32.gmra.mrb[12].mxu0 %v19628_v34  ;;  %v20344_v34 = vand.u32 4294901760, %v34170_v3 }
 0xce8   :  { %19638 = vmatprep.mubr.f32.mxu0 %v19637_v40  ;;  %25683 = vmatpush1.bf16.xpose.msra.mxu0 %v36666_v45 }
 0xce9   :  { %25685 = vmatprep.subr.bf16.mxu0 %v36667_v44  ;;  %v36680_v44 = vld [vmem:[#allocation251_spill] sm:$0xff] }
 0xceb   :  { %19644 = vmatmul.mubr.f32.gmra.mrb[14].mxu0 %v19643_v24 }
 0xcec   :  { %24276 = vmatprep.mubr.msk.f32.mxu0 %vm11973_vm12, %v36507_v17 }
 0xcef   :  { %24277 = vmatmul.mubr.msk.f32.vlgmr.msra.gmra.mrb[8].mxu0 %vm11972_vm7, %v36507_v17 }
 0xcf0   :  { %24278 = vmatprep.mubr.msk.f32.mxu0 %vm12005_vm14, %v36507_v17  ;;  %25687 = vmatpush1.bf16.xpose.msra.mxu0 %v36668_v52  ;;  %v20345_v52 = vsub.f32 %v34170_v3, %v20344_v34 }
 0xcf1   :  { %25689 = vmatprep.subr.bf16.mxu0 %v36669_v48  ;;  %v36681_v48 = vld [vmem:[#allocation252_spill] sm:$0xff] }
 0xcf3   :  { %24279 = vmatmul.mubr.msk.f32.gmra.mrb[10].mxu0 %vm12004_vm15, %v36507_v17 }
 0xcf4   :  { %24280 = vmatprep.mubr.msk.f32.mxu0 %vm12037_vm8, %v36507_v17 }
 0xcf7   :  { %24281 = vmatmul.mubr.msk.f32.gmra.mrb[12].mxu0 %vm12036_vm9, %v36507_v17 }
 0xcf8   :  { %24282 = vmatprep.mubr.msk.f32.mxu0 %vm12069_vm10, %v36507_v17  ;;  %25691 = vmatpush1.bf16.xpose.msra.mxu0 %v36670_v37 }
 0xcf9   :  { %25693 = vmatprep.subr.bf16.mxu0 %v36659_v23 }
 0xcfb   :  { %24283 = vmatmul.mubr.msk.f32.gmra.mrb[14].mxu0 %vm12068_vm1, %v36507_v17 }
 0xcfc   :  { %19864 = vmatprep.mubr.f32.mxu0 %v33869_v18  ;;  %v23931_v18 = vsel %vm11975_vm4, 1.0, %v36486_v33 }
 0xcff   :  { %19867 = vmatmul.mubr.f32.vlgmr.msra.gmra.mrb[8].mxu0 %v33894_v30  ;;  %v36676_v30 = vld [vmem:[#allocation247_spill] sm:$0xff] }
 0xd00   :  { %19873 = vmatprep.mubr.f32.mxu0 %v33896_v61  ;;  %25695 = vmatpush1.bf16.xpose.msra.mxu0 %v36660_v20  ;;  %v36677_v61 = vld [vmem:[#allocation248_spill] sm:$0xff] }
 0xd01   :  { %25697 = vmatprep.subr.bf16.mxu0 %v36661_v2 }
 0xd03   :  { %19876 = vmatmul.mubr.f32.gmra.mrb[10].mxu0 %v33922_v47 }
 0xd04   :  { %19882 = vmatprep.mubr.f32.mxu0 %v33925_v6  ;;  %v36673_v6 = vld [vmem:[#allocation244_spill] sm:$0xff] }
 0xd07   :  { %19885 = vmatmul.mubr.f32.gmra.mrb[12].mxu0 %v33951_v32  ;;  %v36674_v32 = vld [vmem:[#allocation245_spill] sm:$0xff] }
 0xd08   :  { %19891 = vmatprep.mubr.f32.mxu0 %v33957_v35  ;;  %25699 = vmatpush1.bf16.xpose.msra.mxu0 %v36662_v12 }
 0xd09   :  { %25701 = vmatprep.subr.bf16.mxu0 %v36671_v21 }
 0xd0b   :  { %19894 = vmatmul.mubr.f32.gmra.mrb[14].mxu0 %v19640_v25  ;;  %v36678_v25 = vld [vmem:[#allocation249_spill] sm:$0xff] }
 0xd0c   :  { %19974 = vmatprep.mubr.f32.mxu0 %v19590_v36  ;;  %v23963_v36 = vsel %vm12007_vm6, 1.0, %v36486_v33 }
 0xd0f   :  { %19978 = vmatmul.mubr.f32.vlgmr.msra.gmra.mrb[8].mxu0 %v19596_v28 }
 0xd10   :  { %19985 = vmatprep.mubr.f32.mxu0 %v19605_v22  ;;  %25703 = vmatpush1.bf16.xpose.msra.mxu0 %v36672_v55  ;;  %v34115_v22 = vsub.f32 %v23963_v36, %v23963_v36 }
 0xd11   :  { %25705 = vmatprep.subr.bf16.mxu0 %v36673_v6  ;;  %v20346_v6 = vand.u32 4294901760, %v20345_v52 }
 0xd12   :  { %v20323_v13 = vand.u32 4294901760, %v34115_v22 }
 0xd13   :  { %19989 = vmatmul.mubr.f32.gmra.mrb[10].mxu0 %v19611_v26  ;;  %v23995_v26 = vsel %vm12039_vm2, 1.0, %v36486_v33 }
 0xd14   :  { %19996 = vmatprep.mubr.f32.mxu0 %v19620_v41  ;;  %v34144_v10 = vsub.f32 %v23995_v26, %v23995_v26  ;;  %v20324_v60 = vsub.f32 %v34115_v22, %v20323_v13  ;;  %v36684_v26 = vld [vmem:[#allocation261_spill] sm:$0xff] }
 0xd16   :  { %v20338_v62 = vand.u32 4294901760, %v34144_v10  ;;  %v20325_v40 = vand.u32 4294901760, %v20324_v60 }
 0xd17   :  { %20000 = vmatmul.mubr.f32.gmra.mrb[12].mxu0 %v19626_v43  ;;  %v24027_v43 = vsel %vm12071_vm13, 1.0, %v36486_v33 }
 0xd18   :  { %20007 = vmatprep.mubr.f32.mxu0 %v19635_v63  ;;  %25707 = vmatpush1.bf16.xpose.msra.mxu0 %v36674_v32  ;;  %v36679_v63 = vld [vmem:[#allocation250_spill] sm:$0xff]  ;;  %v34176_v50 = vsub.f32 %v24027_v43, %v24027_v43  ;;  %v20339_v45 = vsub.f32 %v34144_v10, %v20338_v62 }
 0xd19   :  { %25709 = vmatprep.subr.bf16.mxu0 %v36659_v23  ;;  %v36675_v23 = vld [vmem:[#allocation246_spill] sm:$0xff] }
 0xd1a   :  { %v20353_v24 = vand.u32 4294901760, %v34176_v50  ;;  %v20340_v21 = vand.u32 4294901760, %v20339_v45  ;;  %v36687_v43 = vld [vmem:[#allocation266_spill] sm:$0xff] }
 0xd1b   :  { %20011 = vmatmul.mubr.f32.gmra.mrb[14].mxu0 %v19641_v42  ;;  %v24026_v42 = vsel %vm12070_vm5, 1.0, %v36486_v33 }
 0xd1c   :  { %24284 = vmatprep.mubr.msk.f32.mxu0 %vm11973_vm12, %v36507_v17  ;;  %v20358_v27 = vsub.f32 %v24026_v42, %v24026_v42  ;;  %v20354_v55 = vsub.f32 %v34176_v50, %v20353_v24 }
 0xd1e   :  { %v20359_v37 = vand.u32 4294901760, %v20358_v27 }
 0xd1f   :  { %24285 = vmatmul.mubr.msk.f32.vlgmr.msra.gmra.mrb[8].mxu0 %vm11972_vm7, %v36507_v17 }
 0xd20   :  { %24286 = vmatprep.mubr.msk.f32.mxu0 %vm12005_vm14, %v36507_v17  ;;  %25711 = vmatpush1.bf16.xpose.msra.mxu0 %v36660_v20  ;;  %v34088_v20 = vsub.f32 %v23931_v18, %v23931_v18  ;;  %v20360_v32 = vsub.f32 %v20358_v27, %v20359_v37  ;;  %v20355_v18 = vand.u32 4294901760, %v20354_v55 }
 0xd21   :  { %25713 = vmatprep.subr.bf16.mxu0 %v36661_v2  ;;  %v23930_v2 = vsel %vm11974_vm0, 1.0, %v36486_v33 }
 0xd22   :  { %v20308_v28 = vand.u32 4294901760, %v34088_v20  ;;  %v34113_v47 = vsub.f32 %v23930_v2, %v23930_v2  ;;  %v36682_v2 = vld [vmem:[#allocation253_spill] sm:$0xff]  ;;  %v20361_v36 = vand.u32 4294901760, %v20360_v32 }
 0xd23   :  { %24287 = vmatmul.mubr.msk.f32.gmra.mrb[10].mxu0 %vm12004_vm15, %v36507_v17 }
 0xd24   :  { %24288 = vmatprep.mubr.msk.f32.mxu0 %vm12037_vm8, %v36507_v17  ;;  %v20309_v4 = vsub.f32 %v34088_v20, %v20308_v28  ;;  %v20314_v41 = vand.u32 4294901760, %v34113_v47 }
 0xd26   :  { %v20310_v53 = vand.u32 4294901760, %v20309_v4  ;;  %v20315_v5 = vsub.f32 %v34113_v47, %v20314_v41  ;;  %v36685_v4 = vld [vmem:[#allocation262_spill] sm:$0xff] }
 0xd27   :  { %24289 = vmatmul.mubr.msk.f32.gmra.mrb[12].mxu0 %vm12036_vm9, %v36507_v17 }
 0xd28   :  { %24290 = vmatprep.mubr.msk.f32.mxu0 %vm12069_vm10, %v36507_v17  ;;  %25715 = vmatpush1.bf16.xpose.msra.mxu0 %v36662_v12  ;;  %v23962_v12 = vsel %vm12006_vm3, 1.0, %v36486_v33  ;;  %v20316_v49 = vand.u32 4294901760, %v20315_v5  ;;  %v36690_v5 = vld [vmem:[#allocation269_spill] sm:$0xff] }
 0xd29   :  { %25717 = vmatprep.subr.bf16.mxu0 %v36675_v23  ;;  %v34141_v35 = vsub.f32 %v23962_v12, %v23962_v12  ;;  %v36683_v12 = vld [vmem:[#allocation254_spill] sm:$0xff] }
 0xd2b   :  { %24291 = vmatmul.mubr.msk.f32.gmra.mrb[14].mxu0 %vm12068_vm1, %v36507_v17  ;;  %v20329_v16 = vand.u32 4294901760, %v34141_v35 }
 0xd2c   :  { %24292 = vmatprep.mubr.msk.f32.mxu0 %vm11973_vm12, %v36507_v17  ;;  %vm11977_vm12 = vcmp.eq.s32.totalorder %v31143_v51, %v31694_v0 }
 0xd2d   :  { %v20330_v38 = vsub.f32 %v34141_v35, %v20329_v16 }
 0xd2f   :  { %24293 = vmatmul.mubr.msk.f32.vlgmr.msra.gmra.mrb[8].mxu0 %vm11972_vm7, %v36507_v17  ;;  %v20331_v58 = vand.u32 4294901760, %v20330_v38  ;;  %vm11976_vm7 = vcmp.eq.s32.totalorder %v31140_v29, %v31694_v0  ;;  %v36694_v38 = vld [vmem:[#allocation273_spill] sm:$0xff] }
 0xd30   :  { %24294 = vmatprep.mubr.msk.f32.mxu0 %vm12005_vm14, %v36507_v17  ;;  %25719 = vmatpush1.bf16.xpose.msra.mxu0 %v36676_v30  ;;  %vm12009_vm14 = vcmp.eq.s32.totalorder %v31143_v51, %v31732_v14 }
 0xd31   :  { %25721 = vmatprep.subr.bf16.mxu0 %v36677_v61 }
 0xd33   :  { %24295 = vmatmul.mubr.msk.f32.gmra.mrb[10].mxu0 %vm12004_vm15, %v36507_v17  ;;  %vm12008_vm15 = vcmp.eq.s32.totalorder %v31140_v29, %v31732_v14 }
 0xd34   :  { %24296 = vmatprep.mubr.msk.f32.mxu0 %vm12037_vm8, %v36507_v17  ;;  %vm12041_vm8 = vcmp.eq.s32.totalorder %v31143_v51, %v31766_v59 }
 0xd37   :  { %24297 = vmatmul.mubr.msk.f32.gmra.mrb[12].mxu0 %vm12036_vm9, %v36507_v17  ;;  %vm12040_vm9 = vcmp.eq.s32.totalorder %v31140_v29, %v31766_v59 }
 0xd38   :  { %24298 = vmatprep.mubr.msk.f32.mxu0 %vm12069_vm10, %v36507_v17  ;;  %25723 = vmatpush1.bf16.xpose.msra.mxu0 %v36678_v25  ;;  %vm12073_vm10 = vcmp.eq.s32.totalorder %v31143_v51, %v31789_v7  ;;  %v23996_v42 = vsel %vm12040_vm9, 1.0, %v36486_v33 }
 0xd39   :  { %25725 = vmatprep.subr.bf16.mxu0 %v36679_v63  ;;  %v23997_v63 = vsel %vm12041_vm8, 1.0, %v36486_v33 }
 0xd3b   :  { %24299 = vmatmul.mubr.msk.f32.gmra.mrb[14].mxu0 %vm12068_vm1, %v36507_v17  ;;  %vm12072_vm1 = vcmp.eq.s32.totalorder %v31140_v29, %v31789_v7 }
 0xd3c   :  { %20311 = vmatprep.mubr.f32.mxu0 %v20310_v53  ;;  %v36688_v53 = vld [vmem:[#allocation267_spill] sm:$0xff]  ;;  %v24028_v52 = vsel %vm12072_vm1, 1.0, %v36486_v33 }
 0xd3d   :  { %v21076_v55 = vsub.f32 %v24028_v52, %v24028_v52  ;;  %v36710_v52 = vld [vmem:[#allocation304_spill] sm:$0xff] }
 0xd3f   :  { %20317 = vmatmul.mubr.f32.vlgmr.msra.gmra.mrb[8].mxu0 %v20316_v49  ;;  %v24029_v49 = vsel %vm12073_vm10, 1.0, %v36486_v33 }
 0xd40   :  { %20326 = vmatprep.mubr.f32.mxu0 %v20325_v40  ;;  %25727 = vmatpush1.bf16.xpose.msra.mxu0 %v36680_v44  ;;  %v36695_v40 = vld [vmem:[#allocation274_spill] sm:$0xff] }
 0xd41   :  { %25729 = vmatprep.subr.bf16.mxu0 %v36681_v48 }
 0xd43   :  { %20332 = vmatmul.mubr.f32.gmra.mrb[10].mxu0 %v20331_v58  ;;  %v34395_v58 = vsub.f32 %v24029_v49, %v24029_v49  ;;  %v36706_v49 = vld [vmem:[#allocation292_spill] sm:$0xff] }
 0xd44   :  { %20341 = vmatprep.mubr.f32.mxu0 %v20340_v21 }
 0xd47   :  { %20347 = vmatmul.mubr.f32.gmra.mrb[12].mxu0 %v20346_v6 }
 0xd48   :  { %20356 = vmatprep.mubr.f32.mxu0 %v20355_v18  ;;  %25731 = vmatpush1.bf16.xpose.msra.mxu0 %v36682_v2  ;;  %v21071_v18 = vand.u32 4294901760, %v34395_v58  ;;  %v36696_v2 = vld [vmem:[#allocation275_spill] sm:$0xff] }
 0xd49   :  { %25733 = vmatprep.subr.bf16.mxu0 %v36683_v12  ;;  %v36697_v12 = vld [vmem:[#allocation276_spill] sm:$0xff] }
 0xd4b   :  { %20362 = vmatmul.mubr.f32.gmra.mrb[14].mxu0 %v20361_v36 }
 0xd4c   :  { %24300 = vmatprep.mubr.msk.f32.mxu0 %vm11975_vm4, %v36507_v17 }
 0xd4f   :  { %24301 = vmatmul.mubr.msk.f32.vlgmr.msra.gmra.mrb[8].mxu0 %vm11974_vm0, %v36507_v17 }
 0xd50   :  { %24302 = vmatprep.mubr.msk.f32.mxu0 %vm12007_vm6, %v36507_v17  ;;  %25735 = vmatpush1.bf16.xpose.msra.mxu0 %v36684_v26  ;;  %v21077_v26 = vand.u32 4294901760, %v21076_v55 }
 0xd51   :  { %25737 = vmatprep.subr.bf16.mxu0 %v36685_v4 }
 0xd53   :  { %24303 = vmatmul.mubr.msk.f32.gmra.mrb[10].mxu0 %vm12006_vm3, %v36507_v17 }
 0xd54   :  { %24304 = vmatprep.mubr.msk.f32.mxu0 %vm12039_vm2, %v36507_v17 }
 0xd57   :  { %24305 = vmatmul.mubr.msk.f32.gmra.mrb[12].mxu0 %vm12038_vm11, %v36507_v17 }
 0xd58   :  { %24306 = vmatprep.mubr.msk.f32.mxu0 %vm12071_vm13, %v36507_v17  ;;  %25739 = vmatpush1.bf16.xpose.msra.mxu0 %v36686_v9  ;;  %v21072_v9 = vsub.f32 %v34395_v58, %v21071_v18 }
 0xd59   :  { %25741 = vmatprep.subr.bf16.mxu0 %v36675_v23 }
 0xd5b   :  { %24307 = vmatmul.mubr.msk.f32.gmra.mrb[14].mxu0 %vm12070_vm5, %v36507_v17 }
 0xd5c   :  { %20582 = vmatprep.mubr.f32.mxu0 %v34088_v20  ;;  %v23933_v20 = vsel %vm11977_vm12, 1.0, %v36486_v33 }
 0xd5f   :  { %20585 = vmatmul.mubr.f32.vlgmr.msra.gmra.mrb[8].mxu0 %v34113_v47  ;;  %v36692_v47 = vld [vmem:[#allocation271_spill] sm:$0xff] }
 0xd60   :  { %20591 = vmatprep.mubr.f32.mxu0 %v34115_v22  ;;  %25743 = vmatpush1.bf16.xpose.msra.mxu0 %v36676_v30  ;;  %v36693_v22 = vld [vmem:[#allocation272_spill] sm:$0xff] }
 0xd61   :  { %25745 = vmatprep.subr.bf16.mxu0 %v36677_v61 }
 0xd63   :  { %20594 = vmatmul.mubr.f32.gmra.mrb[10].mxu0 %v34141_v35 }
 0xd64   :  { %20600 = vmatprep.mubr.f32.mxu0 %v34144_v10  ;;  %v36689_v10 = vld [vmem:[#allocation268_spill] sm:$0xff] }
 0xd67   :  { %20603 = vmatmul.mubr.f32.gmra.mrb[12].mxu0 %v34170_v3 }
 0xd68   :  { %20609 = vmatprep.mubr.f32.mxu0 %v34176_v50  ;;  %25747 = vmatpush1.bf16.xpose.msra.mxu0 %v36678_v25  ;;  %v34363_v50 = vsub.f32 %v23997_v63, %v23997_v63  ;;  %v36702_v63 = vld [vmem:[#allocation288_spill] sm:$0xff] }
 0xd69   :  { %25749 = vmatprep.subr.bf16.mxu0 %v36687_v43 }
 0xd6a   :  { %v21056_v54 = vand.u32 4294901760, %v34363_v50 }
 0xd6b   :  { %20612 = vmatmul.mubr.f32.gmra.mrb[14].mxu0 %v20358_v27 }
 0xd6c   :  { %20692 = vmatprep.mubr.f32.mxu0 %v20308_v28  ;;  %v23965_v28 = vsel %vm12009_vm14, 1.0, %v36486_v33  ;;  %v21057_v32 = vsub.f32 %v34363_v50, %v21056_v54 }
 0xd6e   :  { %v21058_v4 = vand.u32 4294901760, %v21057_v32 }
 0xd6f   :  { %20696 = vmatmul.mubr.f32.vlgmr.msra.gmra.mrb[8].mxu0 %v20314_v41 }
 0xd70   :  { %20703 = vmatprep.mubr.f32.mxu0 %v20323_v13  ;;  %25751 = vmatpush1.bf16.xpose.msra.mxu0 %v36688_v53  ;;  %v34334_v13 = vsub.f32 %v23965_v28, %v23965_v28  ;;  %v21078_v53 = vsub.f32 %v21076_v55, %v21077_v26  ;;  %v36700_v28 = vld [vmem:[#allocation284_spill] sm:$0xff] }
 0xd71   :  { %25753 = vmatprep.subr.bf16.mxu0 %v36689_v10  ;;  %v21073_v10 = vand.u32 4294901760, %v21072_v9 }
 0xd73   :  { %20707 = vmatmul.mubr.f32.gmra.mrb[10].mxu0 %v20329_v16 }
 0xd74   :  { %20714 = vmatprep.mubr.f32.mxu0 %v20338_v62  ;;  %v21041_v62 = vand.u32 4294901760, %v34334_v13 }
 0xd76   :  { %v21042_v44 = vsub.f32 %v34334_v13, %v21041_v62 }
 0xd77   :  { %20718 = vmatmul.mubr.f32.gmra.mrb[12].mxu0 %v20344_v34 }
 0xd78   :  { %20725 = vmatprep.mubr.f32.mxu0 %v20353_v24  ;;  %25755 = vmatpush1.bf16.xpose.msra.mxu0 %v36690_v5  ;;  %v34389_v24 = vsub.f32 %v23996_v42, %v23996_v42  ;;  %v21043_v6 = vand.u32 4294901760, %v21042_v44  ;;  %v36698_v5 = vld [vmem:[#allocation277_spill] sm:$0xff]  ;;  %v36704_v42 = vld [vmem:[#allocation290_spill] sm:$0xff] }
 0xd79   :  { %25757 = vmatprep.subr.bf16.mxu0 %v36675_v23  ;;  %v36691_v23 = vld [vmem:[#allocation270_spill] sm:$0xff] }
 0xd7a   :  { %v21062_v21 = vand.u32 4294901760, %v34389_v24 }
 0xd7b   :  { %20729 = vmatmul.mubr.f32.gmra.mrb[14].mxu0 %v20359_v37 }
 0xd7c   :  { %24308 = vmatprep.mubr.msk.f32.mxu0 %vm11975_vm4, %v36507_v17  ;;  %v21063_v36 = vsub.f32 %v34389_v24, %v21062_v21 }
 0xd7e   :  { %v21064_v43 = vand.u32 4294901760, %v21063_v36 }
 0xd7f   :  { %24309 = vmatmul.mubr.msk.f32.vlgmr.msra.gmra.mrb[8].mxu0 %vm11974_vm0, %v36507_v17 }
 0xd80   :  { %24310 = vmatprep.mubr.msk.f32.mxu0 %vm12007_vm6, %v36507_v17  ;;  %25759 = vmatpush1.bf16.xpose.msra.mxu0 %v36676_v30  ;;  %v34307_v30 = vsub.f32 %v23933_v20, %v23933_v20  ;;  %v21079_v20 = vand.u32 4294901760, %v21078_v53  ;;  %v36712_v53 = vld [vmem:[#allocation310_spill] sm:$0xff] }
 0xd81   :  { %25761 = vmatprep.subr.bf16.mxu0 %v36677_v61  ;;  %v23932_v61 = vsel %vm11976_vm7, 1.0, %v36486_v33 }
 0xd82   :  { %v21026_v41 = vand.u32 4294901760, %v34307_v30  ;;  %v34332_v35 = vsub.f32 %v23932_v61, %v23932_v61  ;;  %v36699_v61 = vld [vmem:[#allocation278_spill] sm:$0xff] }
 0xd83   :  { %24311 = vmatmul.mubr.msk.f32.gmra.mrb[10].mxu0 %vm12006_vm3, %v36507_v17 }
 0xd84   :  { %24312 = vmatprep.mubr.msk.f32.mxu0 %vm12039_vm2, %v36507_v17  ;;  %v21027_v16 = vsub.f32 %v34307_v30, %v21026_v41  ;;  %v21032_v3 = vand.u32 4294901760, %v34332_v35 }
 0xd86   :  { %v21028_v34 = vand.u32 4294901760, %v21027_v16  ;;  %v21033_v27 = vsub.f32 %v34332_v35, %v21032_v3  ;;  %v36703_v16 = vld [vmem:[#allocation289_spill] sm:$0xff] }
 0xd87   :  { %24313 = vmatmul.mubr.msk.f32.gmra.mrb[12].mxu0 %vm12038_vm11, %v36507_v17 }
 0xd88   :  { %24314 = vmatprep.mubr.msk.f32.mxu0 %vm12071_vm13, %v36507_v17  ;;  %25763 = vmatpush1.bf16.xpose.msra.mxu0 %v36678_v25  ;;  %v23964_v25 = vsel %vm12008_vm15, 1.0, %v36486_v33  ;;  %v21034_v48 = vand.u32 4294901760, %v21033_v27 }
 0xd89   :  { %25765 = vmatprep.subr.bf16.mxu0 %v36691_v23  ;;  %v34360_v60 = vsub.f32 %v23964_v25, %v23964_v25  ;;  %v36701_v25 = vld [vmem:[#allocation285_spill] sm:$0xff] }
 0xd8b   :  { %24315 = vmatmul.mubr.msk.f32.gmra.mrb[14].mxu0 %vm12070_vm5, %v36507_v17  ;;  %v21047_v45 = vand.u32 4294901760, %v34360_v60 }
 0xd8c   :  { %24316 = vmatprep.mubr.msk.f32.mxu0 %vm11975_vm4, %v36507_v17  ;;  %vm11979_vm4 = vcmp.eq.s32.totalorder %v31151_v46, %v31694_v0 }
 0xd8d   :  { %v21048_v37 = vsub.f32 %v34360_v60, %v21047_v45 }
 0xd8f   :  { %24317 = vmatmul.mubr.msk.f32.vlgmr.msra.gmra.mrb[8].mxu0 %vm11974_vm0, %v36507_v17  ;;  %v21049_v31 = vand.u32 4294901760, %v21048_v37  ;;  %vm11978_vm0 = vcmp.eq.s32.totalorder %v31148_v11, %v31694_v0 }
 0xd90   :  { %24318 = vmatprep.mubr.msk.f32.mxu0 %vm12007_vm6, %v36507_v17  ;;  %25767 = vmatpush1.bf16.xpose.msra.mxu0 %v36692_v47  ;;  %vm12011_vm6 = vcmp.eq.s32.totalorder %v31151_v46, %v31732_v14 }
 0xd91   :  { %25769 = vmatprep.subr.bf16.mxu0 %v36693_v22 }
 0xd93   :  { %24319 = vmatmul.mubr.msk.f32.gmra.mrb[10].mxu0 %vm12006_vm3, %v36507_v17  ;;  %vm12010_vm3 = vcmp.eq.s32.totalorder %v31148_v11, %v31732_v14 }
 0xd94   :  { %24320 = vmatprep.mubr.msk.f32.mxu0 %vm12039_vm2, %v36507_v17  ;;  %vm12043_vm2 = vcmp.eq.s32.totalorder %v31151_v46, %v31766_v59 }
 0xd97   :  { %24321 = vmatmul.mubr.msk.f32.gmra.mrb[12].mxu0 %vm12038_vm11, %v36507_v17  ;;  %vm12042_vm11 = vcmp.eq.s32.totalorder %v31148_v11, %v31766_v59 }
 0xd98   :  { %24322 = vmatprep.mubr.msk.f32.mxu0 %vm12071_vm13, %v36507_v17  ;;  %25771 = vmatpush1.bf16.xpose.msra.mxu0 %v36694_v38  ;;  %vm12075_vm13 = vcmp.eq.s32.totalorder %v31151_v46, %v31789_v7 }
 0xd99   :  { %25773 = vmatprep.subr.bf16.mxu0 %v36695_v40 }
 0xd9b   :  { %24323 = vmatmul.mubr.msk.f32.gmra.mrb[14].mxu0 %vm12070_vm5, %v36507_v17  ;;  %vm12074_vm5 = vcmp.eq.s32.totalorder %v31148_v11, %v31789_v7 }
 0xd9c   :  { %21029 = vmatprep.mubr.f32.mxu0 %v21028_v34  ;;  %v23999_v34 = vsel %vm12043_vm2, 1.0, %v36486_v33 }
 0xd9d   :  { %v34582_v44 = vsub.f32 %v23999_v34, %v23999_v34  ;;  %v36720_v34 = vld [vmem:[#allocation328_spill] sm:$0xff] }
 0xd9f   :  { %21035 = vmatmul.mubr.f32.vlgmr.msra.gmra.mrb[8].mxu0 %v21034_v48  ;;  %v21774_v51 = vand.u32 4294901760, %v34582_v44 }
 0xda0   :  { %21044 = vmatprep.mubr.f32.mxu0 %v21043_v6  ;;  %25775 = vmatpush1.bf16.xpose.msra.mxu0 %v36696_v2  ;;  %v24030_v2 = vsel %vm12074_vm5, 1.0, %v36486_v33 }
 0xda1   :  { %25777 = vmatprep.subr.bf16.mxu0 %v36697_v12  ;;  %v21775_v9 = vsub.f32 %v34582_v44, %v21774_v51 }
 0xda3   :  { %21050 = vmatmul.mubr.f32.gmra.mrb[10].mxu0 %v21049_v31 }
 0xda4   :  { %21059 = vmatprep.mubr.f32.mxu0 %v21058_v4 }
 0xda7   :  { %21065 = vmatmul.mubr.f32.gmra.mrb[12].mxu0 %v21064_v43 }
 0xda8   :  { %21074 = vmatprep.mubr.f32.mxu0 %v21073_v10  ;;  %25779 = vmatpush1.bf16.xpose.msra.mxu0 %v36698_v5  ;;  %v36713_v5 = vld [vmem:[#allocation311_spill] sm:$0xff] }
 0xda9   :  { %25781 = vmatprep.subr.bf16.mxu0 %v36699_v61  ;;  %v21776_v61 = vand.u32 4294901760, %v21775_v9 }
 0xdab   :  { %21080 = vmatmul.mubr.f32.gmra.mrb[14].mxu0 %v21079_v20 }
 0xdac   :  { %24324 = vmatprep.mubr.msk.f32.mxu0 %vm11977_vm12, %v36507_v17 }
 0xdaf   :  { %24325 = vmatmul.mubr.msk.f32.vlgmr.msra.gmra.mrb[8].mxu0 %vm11976_vm7, %v36507_v17 }
 0xdb0   :  { %24326 = vmatprep.mubr.msk.f32.mxu0 %vm12009_vm14, %v36507_v17  ;;  %25783 = vmatpush1.bf16.xpose.msra.mxu0 %v36700_v28 }
 0xdb1   :  { %25785 = vmatprep.subr.bf16.mxu0 %v36701_v25 }
 0xdb3   :  { %24327 = vmatmul.mubr.msk.f32.gmra.mrb[10].mxu0 %vm12008_vm15, %v36507_v17 }
 0xdb4   :  { %24328 = vmatprep.mubr.msk.f32.mxu0 %vm12041_vm8, %v36507_v17 }
 0xdb7   :  { %24329 = vmatmul.mubr.msk.f32.gmra.mrb[12].mxu0 %vm12040_vm9, %v36507_v17 }
 0xdb8   :  { %24330 = vmatprep.mubr.msk.f32.mxu0 %vm12073_vm10, %v36507_v17  ;;  %25787 = vmatpush1.bf16.xpose.msra.mxu0 %v36702_v63 }
 0xdb9   :  { %25789 = vmatprep.subr.bf16.mxu0 %v36691_v23 }
 0xdbb   :  { %24331 = vmatmul.mubr.msk.f32.gmra.mrb[14].mxu0 %vm12072_vm1, %v36507_v17 }
 0xdbc   :  { %21300 = vmatprep.mubr.f32.mxu0 %v34307_v30  ;;  %v23935_v30 = vsel %vm11979_vm4, 1.0, %v36486_v33 }
 0xdbf   :  { %21303 = vmatmul.mubr.f32.vlgmr.msra.gmra.mrb[8].mxu0 %v34332_v35  ;;  %v36708_v35 = vld [vmem:[#allocation302_spill] sm:$0xff] }
 0xdc0   :  { %21309 = vmatprep.mubr.f32.mxu0 %v34334_v13  ;;  %25791 = vmatpush1.bf16.xpose.msra.mxu0 %v36692_v47  ;;  %v36709_v13 = vld [vmem:[#allocation303_spill] sm:$0xff] }
 0xdc1   :  { %25793 = vmatprep.subr.bf16.mxu0 %v36693_v22 }
 0xdc3   :  { %21312 = vmatmul.mubr.f32.gmra.mrb[10].mxu0 %v34360_v60 }
 0xdc4   :  { %21318 = vmatprep.mubr.f32.mxu0 %v34363_v50  ;;  %v36705_v50 = vld [vmem:[#allocation291_spill] sm:$0xff] }
 0xdc7   :  { %21321 = vmatmul.mubr.f32.gmra.mrb[12].mxu0 %v34389_v24 }
 0xdc8   :  { %21327 = vmatprep.mubr.f32.mxu0 %v34395_v58  ;;  %25795 = vmatpush1.bf16.xpose.msra.mxu0 %v36694_v38  ;;  %v24031_v58 = vsel %vm12075_vm13, 1.0, %v36486_v33 }
 0xdc9   :  { %25797 = vmatprep.subr.bf16.mxu0 %v36703_v16 }
 0xdcb   :  { %21330 = vmatmul.mubr.f32.gmra.mrb[14].mxu0 %v21076_v55 }
 0xdcc   :  { %21410 = vmatprep.mubr.f32.mxu0 %v21026_v41  ;;  %v23967_v41 = vsel %vm12011_vm6, 1.0, %v36486_v33 }
 0xdcf   :  { %21414 = vmatmul.mubr.f32.vlgmr.msra.gmra.mrb[8].mxu0 %v21032_v3 }
 0xdd0   :  { %21421 = vmatprep.mubr.f32.mxu0 %v21041_v62  ;;  %25799 = vmatpush1.bf16.xpose.msra.mxu0 %v36704_v42  ;;  %v34553_v62 = vsub.f32 %v23967_v41, %v23967_v41  ;;  %v36714_v42 = vld [vmem:[#allocation312_spill] sm:$0xff] }
 0xdd1   :  { %25801 = vmatprep.subr.bf16.mxu0 %v36705_v50  ;;  %v36718_v41 = vld [vmem:[#allocation324_spill] sm:$0xff] }
 0xdd2   :  { %v21759_v24 = vand.u32 4294901760, %v34553_v62 }
 0xdd3   :  { %21425 = vmatmul.mubr.f32.gmra.mrb[10].mxu0 %v21047_v45 }
 0xdd4   :  { %21432 = vmatprep.mubr.f32.mxu0 %v21056_v54  ;;  %v23998_v54 = vsel %vm12042_vm11, 1.0, %v36486_v33  ;;  %v21760_v32 = vsub.f32 %v34553_v62, %v21759_v24 }
 0xdd5   :  { %v34608_v6 = vsub.f32 %v23998_v54, %v23998_v54 }
 0xdd6   :  { %v21761_v4 = vand.u32 4294901760, %v21760_v32 }
 0xdd7   :  { %21436 = vmatmul.mubr.f32.gmra.mrb[12].mxu0 %v21062_v21  ;;  %v36711_v21 = vld [vmem:[#allocation305_spill] sm:$0xff]  ;;  %v21780_v12 = vand.u32 4294901760, %v34608_v6 }
 0xdd8   :  { %21443 = vmatprep.mubr.f32.mxu0 %v21071_v18  ;;  %25803 = vmatpush1.bf16.xpose.msra.mxu0 %v36706_v49  ;;  %v34614_v18 = vsub.f32 %v24031_v58, %v24031_v58  ;;  %v36715_v49 = vld [vmem:[#allocation313_spill] sm:$0xff] }
 0xdd9   :  { %25805 = vmatprep.subr.bf16.mxu0 %v36691_v23  ;;  %v36707_v23 = vld [vmem:[#allocation297_spill] sm:$0xff]  ;;  %v21781_v10 = vsub.f32 %v34608_v6, %v21780_v12 }
 0xdda   :  { %v21789_v43 = vand.u32 4294901760, %v34614_v18 }
 0xddb   :  { %21447 = vmatmul.mubr.f32.gmra.mrb[14].mxu0 %v21077_v26  ;;  %v21794_v26 = vsub.f32 %v24030_v2, %v24030_v2  ;;  %v21782_v25 = vand.u32 4294901760, %v21781_v10 }
 0xddc   :  { %24332 = vmatprep.mubr.msk.f32.mxu0 %vm11977_vm12, %v36507_v17  ;;  %v21790_v28 = vsub.f32 %v34614_v18, %v21789_v43 }
 0xddd   :  { %v21795_v20 = vand.u32 4294901760, %v21794_v26 }
 0xdde   :  { %v21791_v16 = vand.u32 4294901760, %v21790_v28  ;;  %v36728_v28 = vld [vmem:[#allocation299_spill] sm:$0xff] }
 0xddf   :  { %24333 = vmatmul.mubr.msk.f32.vlgmr.msra.gmra.mrb[8].mxu0 %vm11976_vm7, %v36507_v17  ;;  %v21796_v63 = vsub.f32 %v21794_v26, %v21795_v20 }
 0xde0   :  { %24334 = vmatprep.mubr.msk.f32.mxu0 %vm12009_vm14, %v36507_v17  ;;  %25807 = vmatpush1.bf16.xpose.msra.mxu0 %v36692_v47  ;;  %v34526_v47 = vsub.f32 %v23935_v30, %v23935_v30  ;;  %v36716_v30 = vld [vmem:[#allocation318_spill] sm:$0xff] }
 0xde1   :  { %25809 = vmatprep.subr.bf16.mxu0 %v36693_v22  ;;  %v23934_v22 = vsel %vm11978_vm0, 1.0, %v36486_v33  ;;  %v21797_v50 = vand.u32 4294901760, %v21796_v63  ;;  %v36729_v63 = vld [vmem:[#allocation300_spill] sm:$0xff] }
 0xde2   :  { %v21744_v3 = vand.u32 4294901760, %v34526_v47  ;;  %v34551_v60 = vsub.f32 %v23934_v22, %v23934_v22  ;;  %v36717_v22 = vld [vmem:[#allocation319_spill] sm:$0xff] }
 0xde3   :  { %24335 = vmatmul.mubr.msk.f32.gmra.mrb[10].mxu0 %vm12008_vm15, %v36507_v17 }
 0xde4   :  { %24336 = vmatprep.mubr.msk.f32.mxu0 %vm12041_vm8, %v36507_v17  ;;  %v21745_v27 = vsub.f32 %v34526_v47, %v21744_v3  ;;  %v21750_v40 = vand.u32 4294901760, %v34551_v60 }
 0xde6   :  { %v21746_v48 = vand.u32 4294901760, %v21745_v27  ;;  %v21751_v37 = vsub.f32 %v34551_v60, %v21750_v40  ;;  %v36721_v27 = vld [vmem:[#allocation329_spill] sm:$0xff] }
 0xde7   :  { %24337 = vmatmul.mubr.msk.f32.gmra.mrb[12].mxu0 %vm12040_vm9, %v36507_v17 }
 0xde8   :  { %24338 = vmatprep.mubr.msk.f32.mxu0 %vm12073_vm10, %v36507_v17  ;;  %25811 = vmatpush1.bf16.xpose.msra.mxu0 %v36694_v38  ;;  %v23966_v38 = vsel %vm12010_vm3, 1.0, %v36486_v33  ;;  %v21752_v31 = vand.u32 4294901760, %v21751_v37 }
 0xde9   :  { %25813 = vmatprep.subr.bf16.mxu0 %v36707_v23  ;;  %v34579_v45 = vsub.f32 %v23966_v38, %v23966_v38  ;;  %v36719_v38 = vld [vmem:[#allocation327_spill] sm:$0xff] }
 0xdeb   :  { %24339 = vmatmul.mubr.msk.f32.gmra.mrb[14].mxu0 %vm12072_vm1, %v36507_v17  ;;  %v21765_v55 = vand.u32 4294901760, %v34579_v45 }
 0xdec   :  { %24340 = vmatprep.mubr.msk.f32.mxu0 %vm11977_vm12, %v36507_v17  ;;  %vm11981_vm12 = vcmp.eq.s32.totalorder %v31158_v1, %v31694_v0 }
 0xded   :  { %v21766_v36 = vsub.f32 %v34579_v45, %v21765_v55 }
 0xdef   :  { %24341 = vmatmul.mubr.msk.f32.vlgmr.msra.gmra.mrb[8].mxu0 %vm11976_vm7, %v36507_v17  ;;  %v21767_v29 = vand.u32 4294901760, %v21766_v36  ;;  %vm11980_vm7 = vcmp.eq.s32.totalorder %v31155_v56, %v31694_v0 }
 0xdf0   :  { %24342 = vmatprep.mubr.msk.f32.mxu0 %vm12009_vm14, %v36507_v17  ;;  %25815 = vmatpush1.bf16.xpose.msra.mxu0 %v36708_v35  ;;  %vm12013_vm14 = vcmp.eq.s32.totalorder %v31158_v1, %v31732_v14 }
 0xdf1   :  { %25817 = vmatprep.subr.bf16.mxu0 %v36709_v13 }
 0xdf3   :  { %24343 = vmatmul.mubr.msk.f32.gmra.mrb[10].mxu0 %vm12008_vm15, %v36507_v17  ;;  %vm12012_vm15 = vcmp.eq.s32.totalorder %v31155_v56, %v31732_v14 }
 0xdf4   :  { %24344 = vmatprep.mubr.msk.f32.mxu0 %vm12041_vm8, %v36507_v17  ;;  %vm12045_vm8 = vcmp.eq.s32.totalorder %v31158_v1, %v31766_v59  ;;  %v23968_v54 = vsel %vm12012_vm15, 1.0, %v36486_v33 }
 0xdf5   :  { %v24001_v58 = vsel %vm12045_vm8, 1.0, %v36486_v33  ;;  %v34798_v37 = vsub.f32 %v23968_v54, %v23968_v54  ;;  %v36737_v54 = vld [vmem:[#allocation325_spill] sm:$0xff] }
 0xdf7   :  { %24345 = vmatmul.mubr.msk.f32.gmra.mrb[12].mxu0 %vm12040_vm9, %v36507_v17  ;;  %vm12044_vm9 = vcmp.eq.s32.totalorder %v31155_v56, %v31766_v59  ;;  %v22483_v36 = vand.u32 4294901760, %v34798_v37 }
 0xdf8   :  { %24346 = vmatprep.mubr.msk.f32.mxu0 %vm12073_vm10, %v36507_v17  ;;  %25819 = vmatpush1.bf16.xpose.msra.mxu0 %v36710_v52  ;;  %vm12077_vm10 = vcmp.eq.s32.totalorder %v31158_v1, %v31789_v7 }
 0xdf9   :  { %25821 = vmatprep.subr.bf16.mxu0 %v36711_v21  ;;  %v24033_v32 = vsel %vm12077_vm10, 1.0, %v36486_v33 }
 0xdfb   :  { %24347 = vmatmul.mubr.msk.f32.gmra.mrb[14].mxu0 %vm12072_vm1, %v36507_v17  ;;  %vm12076_vm1 = vcmp.eq.s32.totalorder %v31155_v56, %v31789_v7 }
 0xdfc   :  { %21747 = vmatprep.mubr.f32.mxu0 %v21746_v48  ;;  %v24032_v9 = vsel %vm12076_vm1, 1.0, %v36486_v33 }
 0xdfd   :  { %v22512_v10 = vsub.f32 %v24032_v9, %v24032_v9 }
 0xdff   :  { %21753 = vmatmul.mubr.f32.vlgmr.msra.gmra.mrb[8].mxu0 %v21752_v31  ;;  %v36727_v31 = vld [vmem:[#allocation298_spill] sm:$0xff] }
 0xe00   :  { %21762 = vmatprep.mubr.f32.mxu0 %v21761_v4  ;;  %25823 = vmatpush1.bf16.xpose.msra.mxu0 %v36712_v53  ;;  %v34833_v4 = vsub.f32 %v24033_v32, %v24033_v32  ;;  %v22484_v53 = vsub.f32 %v34798_v37, %v22483_v36 }
 0xe01   :  { %25825 = vmatprep.subr.bf16.mxu0 %v36713_v5 }
 0xe02   :  { %v22485_v11 = vand.u32 4294901760, %v22484_v53 }
 0xe03   :  { %21768 = vmatmul.mubr.f32.gmra.mrb[10].mxu0 %v21767_v29 }
 0xe04   :  { %21777 = vmatprep.mubr.f32.mxu0 %v21776_v61  ;;  %v22507_v61 = vand.u32 4294901760, %v34833_v4 }
 0xe07   :  { %21783 = vmatmul.mubr.f32.gmra.mrb[12].mxu0 %v21782_v25 }
 0xe08   :  { %21792 = vmatprep.mubr.f32.mxu0 %v21791_v16  ;;  %25827 = vmatpush1.bf16.xpose.msra.mxu0 %v36714_v42  ;;  %v22513_v16 = vand.u32 4294901760, %v22512_v10 }
 0xe09   :  { %25829 = vmatprep.subr.bf16.mxu0 %v36715_v49 }
 0xe0b   :  { %21798 = vmatmul.mubr.f32.gmra.mrb[14].mxu0 %v21797_v50  ;;  %v22508_v50 = vsub.f32 %v34833_v4, %v22507_v61 }
 0xe0c   :  { %24348 = vmatprep.mubr.msk.f32.mxu0 %vm11979_vm4, %v36507_v17 }
 0xe0f   :  { %24349 = vmatmul.mubr.msk.f32.vlgmr.msra.gmra.mrb[8].mxu0 %vm11978_vm0, %v36507_v17 }
 0xe10   :  { %24350 = vmatprep.mubr.msk.f32.mxu0 %vm12011_vm6, %v36507_v17  ;;  %25831 = vmatpush1.bf16.xpose.msra.mxu0 %v36716_v30  ;;  %v22514_v30 = vsub.f32 %v22512_v10, %v22513_v16 }
 0xe11   :  { %25833 = vmatprep.subr.bf16.mxu0 %v36717_v22  ;;  %v22509_v22 = vand.u32 4294901760, %v22508_v50 }
 0xe13   :  { %24351 = vmatmul.mubr.msk.f32.gmra.mrb[10].mxu0 %vm12010_vm3, %v36507_v17 }
 0xe14   :  { %24352 = vmatprep.mubr.msk.f32.mxu0 %vm12043_vm2, %v36507_v17 }
 0xe17   :  { %24353 = vmatmul.mubr.msk.f32.gmra.mrb[12].mxu0 %vm12042_vm11, %v36507_v17 }
 0xe18   :  { %24354 = vmatprep.mubr.msk.f32.mxu0 %vm12075_vm13, %v36507_v17  ;;  %25835 = vmatpush1.bf16.xpose.msra.mxu0 %v36718_v41  ;;  %v36730_v41 = vld [vmem:[#allocation301_spill] sm:$0xff] }
 0xe19   :  { %25837 = vmatprep.subr.bf16.mxu0 %v36707_v23 }
 0xe1b   :  { %24355 = vmatmul.mubr.msk.f32.gmra.mrb[14].mxu0 %vm12074_vm5, %v36507_v17 }
 0xe1c   :  { %22018 = vmatprep.mubr.f32.mxu0 %v34526_v47  ;;  %v23937_v47 = vsel %vm11981_vm12, 1.0, %v36486_v33 }
 0xe1f   :  { %22021 = vmatmul.mubr.f32.vlgmr.msra.gmra.mrb[8].mxu0 %v34551_v60  ;;  %v36724_v60 = vld [vmem:[#allocation294_spill] sm:$0xff] }
 0xe20   :  { %22027 = vmatprep.mubr.f32.mxu0 %v34553_v62  ;;  %25839 = vmatpush1.bf16.xpose.msra.mxu0 %v36708_v35  ;;  %v36725_v62 = vld [vmem:[#allocation295_spill] sm:$0xff] }
 0xe21   :  { %25841 = vmatprep.subr.bf16.mxu0 %v36709_v13 }
 0xe23   :  { %22030 = vmatmul.mubr.f32.gmra.mrb[10].mxu0 %v34579_v45 }
 0xe24   :  { %22036 = vmatprep.mubr.f32.mxu0 %v34582_v44  ;;  %v36722_v44 = vld [vmem:[#allocation330_spill] sm:$0xff] }
 0xe27   :  { %22039 = vmatmul.mubr.f32.gmra.mrb[12].mxu0 %v34608_v6  ;;  %v24000_v6 = vsel %vm12044_vm9, 1.0, %v36486_v33 }
 0xe28   :  { %22045 = vmatprep.mubr.f32.mxu0 %v34614_v18  ;;  %25843 = vmatpush1.bf16.xpose.msra.mxu0 %v36710_v52 }
 0xe29   :  { %25845 = vmatprep.subr.bf16.mxu0 %v36719_v38  ;;  %v22515_v38 = vand.u32 4294901760, %v22514_v30 }
 0xe2b   :  { %22048 = vmatmul.mubr.f32.gmra.mrb[14].mxu0 %v21794_v26 }
 0xe2c   :  { %22128 = vmatprep.mubr.f32.mxu0 %v21744_v3  ;;  %v23969_v3 = vsel %vm12013_vm14, 1.0, %v36486_v33 }
 0xe2f   :  { %22132 = vmatmul.mubr.f32.vlgmr.msra.gmra.mrb[8].mxu0 %v21750_v40 }
 0xe30   :  { %22139 = vmatprep.mubr.f32.mxu0 %v21759_v24  ;;  %25847 = vmatpush1.bf16.xpose.msra.mxu0 %v36720_v34  ;;  %v34772_v24 = vsub.f32 %v23969_v3, %v23969_v3  ;;  %v36731_v34 = vld [vmem:[#allocation306_spill] sm:$0xff]  ;;  %v36736_v3 = vld [vmem:[#allocation323_spill] sm:$0xff] }
 0xe31   :  { %25849 = vmatprep.subr.bf16.mxu0 %v36721_v27  ;;  %v36732_v27 = vld [vmem:[#allocation307_spill] sm:$0xff] }
 0xe32   :  { %v22477_v21 = vand.u32 4294901760, %v34772_v24 }
 0xe33   :  { %22143 = vmatmul.mubr.f32.gmra.mrb[10].mxu0 %v21765_v55  ;;  %v34801_v55 = vsub.f32 %v24001_v58, %v24001_v58  ;;  %v36738_v58 = vld [vmem:[#allocation326_spill] sm:$0xff] }
 0xe34   :  { %22150 = vmatprep.mubr.f32.mxu0 %v21774_v51  ;;  %v36726_v51 = vld [vmem:[#allocation296_spill] sm:$0xff]  ;;  %v22478_v26 = vsub.f32 %v34772_v24, %v22477_v21 }
 0xe35   :  { %v22492_v46 = vand.u32 4294901760, %v34801_v55 }
 0xe36   :  { %v22479_v5 = vand.u32 4294901760, %v22478_v26 }
 0xe37   :  { %22154 = vmatmul.mubr.f32.gmra.mrb[12].mxu0 %v21780_v12  ;;  %v34827_v12 = vsub.f32 %v24000_v6, %v24000_v6 }
 0xe38   :  { %22161 = vmatprep.mubr.f32.mxu0 %v21789_v43  ;;  %25851 = vmatpush1.bf16.xpose.msra.mxu0 %v36722_v44  ;;  %v36733_v44 = vld [vmem:[#allocation308_spill] sm:$0xff] }
 0xe39   :  { %25853 = vmatprep.subr.bf16.mxu0 %v36707_v23  ;;  %v36723_v23 = vld [vmem:[#allocation293_spill] sm:$0xff]  ;;  %v22498_v29 = vand.u32 4294901760, %v34827_v12 }
 0xe3b   :  { %22165 = vmatmul.mubr.f32.gmra.mrb[14].mxu0 %v21795_v20  ;;  %v22493_v20 = vsub.f32 %v34801_v55, %v22492_v46  ;;  %v22499_v25 = vsub.f32 %v34827_v12, %v22498_v29 }
 0xe3c   :  { %24356 = vmatprep.mubr.msk.f32.mxu0 %vm11979_vm4, %v36507_v17 }
 0xe3d   :  { %v22494_v42 = vand.u32 4294901760, %v22493_v20  ;;  %v22500_v49 = vand.u32 4294901760, %v22499_v25 }
 0xe3f   :  { %24357 = vmatmul.mubr.msk.f32.vlgmr.msra.gmra.mrb[8].mxu0 %vm11978_vm0, %v36507_v17 }
 0xe40   :  { %24358 = vmatprep.mubr.msk.f32.mxu0 %vm12011_vm6, %v36507_v17  ;;  %25855 = vmatpush1.bf16.xpose.msra.mxu0 %v36708_v35  ;;  %v34745_v35 = vsub.f32 %v23937_v47, %v23937_v47  ;;  %v36734_v47 = vld [vmem:[#allocation309_spill] sm:$0xff] }
 0xe41   :  { %25857 = vmatprep.subr.bf16.mxu0 %v36709_v13  ;;  %v23936_v13 = vsel %vm11980_vm7, 1.0, %v36486_v33 }
 0xe42   :  { %v22462_v40 = vand.u32 4294901760, %v34745_v35  ;;  %v34770_v45 = vsub.f32 %v23936_v13, %v23936_v13  ;;  %v36735_v13 = vld [vmem:[#allocation322_spill] sm:$0xff] }
 0xe43   :  { %24359 = vmatmul.mubr.msk.f32.gmra.mrb[10].mxu0 %vm12010_vm3, %v36507_v17 }
 0xe44   :  { %24360 = vmatprep.mubr.msk.f32.mxu0 %vm12043_vm2, %v36507_v17  ;;  %v22468_v48 = vand.u32 4294901760, %v34770_v45 }
 0xe46   :  { %v22469_v2 = vsub.f32 %v34770_v45, %v22468_v48 }
 0xe47   :  { %24361 = vmatmul.mubr.msk.f32.gmra.mrb[12].mxu0 %vm12042_vm11, %v36507_v17 }
 0xe48   :  { %24362 = vmatprep.mubr.msk.f32.mxu0 %vm12075_vm13, %v36507_v17  ;;  %25859 = vmatpush1.bf16.xpose.msra.mxu0 %v36710_v52  ;;  %v22463_v52 = vsub.f32 %v34745_v35, %v22462_v40  ;;  %v22470_v43 = vand.u32 4294901760, %v22469_v2 }
 0xe49   :  { %25861 = vmatprep.subr.bf16.mxu0 %v36723_v23 }
 0xe4a   :  { %v22464_v18 = vand.u32 4294901760, %v22463_v52 }
 0xe4b   :  { %24363 = vmatmul.mubr.msk.f32.gmra.mrb[14].mxu0 %vm12074_vm5, %v36507_v17 }
 0xe4c   :  { %24364 = vmatprep.mubr.msk.f32.mxu0 %vm11979_vm4, %v36507_v17  ;;  %vm11983_vm4 = vcmp.eq.s32.totalorder %v31166_v15, %v31694_v0 }
 0xe4f   :  { %24365 = vmatmul.mubr.msk.f32.vlgmr.msra.gmra.mrb[8].mxu0 %vm11978_vm0, %v36507_v17  ;;  %vm11982_vm0 = vcmp.eq.s32.totalorder %v31163_v57, %v31694_v0 }
 0xe50   :  { %24366 = vmatprep.mubr.msk.f32.mxu0 %vm12011_vm6, %v36507_v17  ;;  %25863 = vmatpush1.bf16.xpose.msra.mxu0 %v36724_v60  ;;  %vm12015_vm6 = vcmp.eq.s32.totalorder %v31166_v15, %v31732_v14 }
 0xe51   :  { %25865 = vmatprep.subr.bf16.mxu0 %v36725_v62 }
 0xe53   :  { %24367 = vmatmul.mubr.msk.f32.gmra.mrb[10].mxu0 %vm12010_vm3, %v36507_v17  ;;  %vm12014_vm3 = vcmp.eq.s32.totalorder %v31163_v57, %v31732_v14 }
 0xe54   :  { %24368 = vmatprep.mubr.msk.f32.mxu0 %vm12043_vm2, %v36507_v17  ;;  %vm12047_vm2 = vcmp.eq.s32.totalorder %v31166_v15, %v31766_v59 }
 0xe57   :  { %24369 = vmatmul.mubr.msk.f32.gmra.mrb[12].mxu0 %vm12042_vm11, %v36507_v17  ;;  %vm12046_vm11 = vcmp.eq.s32.totalorder %v31163_v57, %v31766_v59 }
 0xe58   :  { %24370 = vmatprep.mubr.msk.f32.mxu0 %vm12075_vm13, %v36507_v17  ;;  %25867 = vmatpush1.bf16.xpose.msra.mxu0 %v36726_v51  ;;  %vm12079_vm13 = vcmp.eq.s32.totalorder %v31166_v15, %v31789_v7  ;;  %v27362_v15 = vld [vmem:[#allocation2 + $0x8] sm:$0xff] }
 0xe59   :  { %25869 = vmatprep.subr.bf16.mxu0 %v36727_v31  ;;  %v24002_v31 = vsel %vm12046_vm11, 1.0, %v36486_v33 }
 0xe5b   :  { %24371 = vmatmul.mubr.msk.f32.gmra.mrb[14].mxu0 %vm12074_vm5, %v36507_v17  ;;  %vm12078_vm5 = vcmp.eq.s32.totalorder %v31163_v57, %v31789_v7 }
 0xe5c   :  { %22465 = vmatprep.mubr.f32.mxu0 %v22464_v18 }
 0xe5f   :  { %22471 = vmatmul.mubr.f32.vlgmr.msra.gmra.mrb[8].mxu0 %v22470_v43  ;;  %v35046_v43 = vsub.f32 %v24002_v31, %v24002_v31 }
 0xe60   :  { %22480 = vmatprep.mubr.f32.mxu0 %v22479_v5  ;;  %25871 = vmatpush1.bf16.xpose.msra.mxu0 %v36728_v28 }
 0xe61   :  { %25873 = vmatprep.subr.bf16.mxu0 %v36729_v63 }
 0xe63   :  { %22486 = vmatmul.mubr.f32.gmra.mrb[10].mxu0 %v22485_v11 }
 0xe64   :  { %22495 = vmatprep.mubr.f32.mxu0 %v22494_v42  ;;  %v36745_v42 = vld [vmem:[#allocation343_spill] sm:$0xff] }
 0xe67   :  { %22501 = vmatmul.mubr.f32.gmra.mrb[12].mxu0 %v22500_v49 }
 0xe68   :  { %22510 = vmatprep.mubr.f32.mxu0 %v22509_v22  ;;  %25875 = vmatpush1.bf16.xpose.msra.mxu0 %v36730_v41 }
 0xe69   :  { %25877 = vmatprep.subr.bf16.mxu0 %v36731_v34  ;;  %v36746_v34 = vld [vmem:[#allocation344_spill] sm:$0xff] }
 0xe6b   :  { %22516 = vmatmul.mubr.f32.gmra.mrb[14].mxu0 %v22515_v38 }
 0xe6c   :  { %24372 = vmatprep.mubr.msk.f32.mxu0 %vm11981_vm12, %v36507_v17 }
 0xe6f   :  { %24373 = vmatmul.mubr.msk.f32.vlgmr.msra.gmra.mrb[8].mxu0 %vm11980_vm7, %v36507_v17 }
 0xe70   :  { %24374 = vmatprep.mubr.msk.f32.mxu0 %vm12013_vm14, %v36507_v17  ;;  %25879 = vmatpush1.bf16.xpose.msra.mxu0 %v36732_v27 }
 0xe71   :  { %25881 = vmatprep.subr.bf16.mxu0 %v36733_v44  ;;  %v36747_v44 = vld [vmem:[#allocation345_spill] sm:$0xff] }
 0xe73   :  { %24375 = vmatmul.mubr.msk.f32.gmra.mrb[10].mxu0 %vm12012_vm15, %v36507_v17 }
 0xe74   :  { %24376 = vmatprep.mubr.msk.f32.mxu0 %vm12045_vm8, %v36507_v17 }
 0xe77   :  { %24377 = vmatmul.mubr.msk.f32.gmra.mrb[12].mxu0 %vm12044_vm9, %v36507_v17 }
 0xe78   :  { %24378 = vmatprep.mubr.msk.f32.mxu0 %vm12077_vm10, %v36507_v17  ;;  %25883 = vmatpush1.bf16.xpose.msra.mxu0 %v36734_v47  ;;  %v36748_v47 = vld [vmem:[#allocation346_spill] sm:$0xff] }
 0xe79   :  { %25885 = vmatprep.subr.bf16.mxu0 %v36723_v23 }
 0xe7b   :  { %24379 = vmatmul.mubr.msk.f32.gmra.mrb[14].mxu0 %vm12076_vm1, %v36507_v17 }
 0xe7c   :  { %22736 = vmatprep.mubr.f32.mxu0 %v34745_v35  ;;  %v23939_v35 = vsel %vm11983_vm4, 1.0, %v36486_v33 }
 0xe7f   :  { %22739 = vmatmul.mubr.f32.vlgmr.msra.gmra.mrb[8].mxu0 %v34770_v45  ;;  %v36740_v45 = vld [vmem:[#allocation338_spill] sm:$0xff] }
 0xe80   :  { %22745 = vmatprep.mubr.f32.mxu0 %v34772_v24  ;;  %25887 = vmatpush1.bf16.xpose.msra.mxu0 %v36724_v60  ;;  %v36741_v24 = vld [vmem:[#allocation339_spill] sm:$0xff] }
 0xe81   :  { %25889 = vmatprep.subr.bf16.mxu0 %v36725_v62 }
 0xe83   :  { %22748 = vmatmul.mubr.f32.gmra.mrb[10].mxu0 %v34798_v37 }
 0xe84   :  { %22754 = vmatprep.mubr.f32.mxu0 %v34801_v55  ;;  %v24003_v55 = vsel %vm12047_vm2, 1.0, %v36486_v33 }
 0xe85   :  { %v35020_v2 = vsub.f32 %v24003_v55, %v24003_v55 }
 0xe87   :  { %22757 = vmatmul.mubr.f32.gmra.mrb[12].mxu0 %v34827_v12  ;;  %v36742_v12 = vld [vmem:[#allocation340_spill] sm:$0xff]  ;;  %v23210_v1 = vand.u32 4294901760, %v35020_v2 }
 0xe88   :  { %22763 = vmatprep.mubr.f32.mxu0 %v34833_v4  ;;  %25891 = vmatpush1.bf16.xpose.msra.mxu0 %v36726_v51  ;;  %v36743_v4 = vld [vmem:[#allocation341_spill] sm:$0xff] }
 0xe89   :  { %25893 = vmatprep.subr.bf16.mxu0 %v36735_v13  ;;  %v23211_v25 = vsub.f32 %v35020_v2, %v23210_v1  ;;  %v36749_v13 = vld [vmem:[#allocation347_spill] sm:$0xff] }
 0xe8b   :  { %22766 = vmatmul.mubr.f32.gmra.mrb[14].mxu0 %v22512_v10  ;;  %v24034_v10 = vsel %vm12078_vm5, 1.0, %v36486_v33  ;;  %v23212_v49 = vand.u32 4294901760, %v23211_v25 }
 0xe8c   :  { %22846 = vmatprep.mubr.f32.mxu0 %v22462_v40  ;;  %v23971_v40 = vsel %vm12015_vm6, 1.0, %v36486_v33  ;;  %v23230_v28 = vsub.f32 %v24034_v10, %v24034_v10 }
 0xe8d   :  { %v34991_v37 = vsub.f32 %v23971_v40, %v23971_v40 }
 0xe8e   :  { %v23231_v50 = vand.u32 4294901760, %v23230_v28 }
 0xe8f   :  { %22850 = vmatmul.mubr.f32.vlgmr.msra.gmra.mrb[8].mxu0 %v22468_v48  ;;  %v23195_v18 = vand.u32 4294901760, %v34991_v37 }
 0xe90   :  { %22857 = vmatprep.mubr.f32.mxu0 %v22477_v21  ;;  %25895 = vmatpush1.bf16.xpose.msra.mxu0 %v36736_v3  ;;  %v23970_v21 = vsel %vm12014_vm3, 1.0, %v36486_v33  ;;  %v23232_v41 = vsub.f32 %v23230_v28, %v23231_v50  ;;  %v36750_v3 = vld [vmem:[#allocation348_spill] sm:$0xff] }
 0xe91   :  { %25897 = vmatprep.subr.bf16.mxu0 %v36737_v54  ;;  %v23196_v53 = vsub.f32 %v34991_v37, %v23195_v18  ;;  %v36751_v54 = vld [vmem:[#allocation355_spill] sm:$0xff] }
 0xe92   :  { %v23233_v27 = vand.u32 4294901760, %v23232_v41 }
 0xe93   :  { %22861 = vmatmul.mubr.f32.gmra.mrb[10].mxu0 %v22483_v36  ;;  %v24035_v36 = vsel %vm12079_vm13, 1.0, %v36486_v33  ;;  %v23197_v11 = vand.u32 4294901760, %v23196_v53 }
 0xe94   :  { %22868 = vmatprep.mubr.f32.mxu0 %v22492_v46 }
 0xe97   :  { %22872 = vmatmul.mubr.f32.gmra.mrb[12].mxu0 %v22498_v29  ;;  %v35052_v29 = vsub.f32 %v24035_v36, %v24035_v36 }
 0xe98   :  { %22879 = vmatprep.mubr.f32.mxu0 %v22507_v61  ;;  %25899 = vmatpush1.bf16.xpose.msra.mxu0 %v36738_v58  ;;  %v23216_v61 = vand.u32 4294901760, %v35046_v43  ;;  %v36752_v58 = vld [vmem:[#allocation356_spill] sm:$0xff] }
 0xe99   :  { %25901 = vmatprep.subr.bf16.mxu0 %v36723_v23  ;;  %v36739_v23 = vld [vmem:[#allocation337_spill] sm:$0xff]  ;;  %v23225_v63 = vand.u32 4294901760, %v35052_v29 }
 0xe9b   :  { %22883 = vmatmul.mubr.f32.gmra.mrb[14].mxu0 %v22513_v16  ;;  %v23217_v16 = vsub.f32 %v35046_v43, %v23216_v61  ;;  %v23226_v30 = vsub.f32 %v35052_v29, %v23225_v63 }
 0xe9c   :  { %24380 = vmatprep.mubr.msk.f32.mxu0 %vm11981_vm12, %v36507_v17 }
 0xe9d   :  { %v23218_v22 = vand.u32 4294901760, %v23217_v16  ;;  %v23227_v38 = vand.u32 4294901760, %v23226_v30 }
 0xe9f   :  { %24381 = vmatmul.mubr.msk.f32.vlgmr.msra.gmra.mrb[8].mxu0 %vm11980_vm7, %v36507_v17 }
 0xea0   :  { %24382 = vmatprep.mubr.msk.f32.mxu0 %vm12013_vm14, %v36507_v17  ;;  %25903 = vmatpush1.bf16.xpose.msra.mxu0 %v36724_v60  ;;  %v34964_v60 = vsub.f32 %v23939_v35, %v23939_v35  ;;  %v36753_v35 = vld [vmem:[#allocation357_spill] sm:$0xff] }
 0xea1   :  { %25905 = vmatprep.subr.bf16.mxu0 %v36725_v62  ;;  %v23938_v62 = vsel %vm11982_vm0, 1.0, %v36486_v33  ;;  %v36744_v33 = vld [vmem:[#allocation342_spill] sm:$0xff] }
 0xea2   :  { %v23180_v52 = vand.u32 4294901760, %v34964_v60  ;;  %v34989_v48 = vsub.f32 %v23938_v62, %v23938_v62  ;;  %v36754_v62 = vld [vmem:[#allocation358_spill] sm:$0xff] }
 0xea3   :  { %24383 = vmatmul.mubr.msk.f32.gmra.mrb[10].mxu0 %vm12012_vm15, %v36507_v17 }
 0xea4   :  { %24384 = vmatprep.mubr.msk.f32.mxu0 %vm12045_vm8, %v36507_v17  ;;  %v23181_v6 = vsub.f32 %v34964_v60, %v23180_v52  ;;  %v23186_v32 = vand.u32 4294901760, %v34989_v48 }
 0xea6   :  { %v23182_v26 = vand.u32 4294901760, %v23181_v6  ;;  %v23187_v46 = vsub.f32 %v34989_v48, %v23186_v32  ;;  %v27363_v6 = vld [vmem:[#allocation2 + $0x10] sm:$0xff] }
 0xea7   :  { %24385 = vmatmul.mubr.msk.f32.gmra.mrb[12].mxu0 %vm12044_vm9, %v36507_v17 }
 0xea8   :  { %24386 = vmatprep.mubr.msk.f32.mxu0 %vm12077_vm10, %v36507_v17  ;;  %25907 = vmatpush1.bf16.xpose.msra.mxu0 %v36726_v51  ;;  %v35017_v51 = vsub.f32 %v23970_v21, %v23970_v21  ;;  %v23188_v5 = vand.u32 4294901760, %v23187_v46  ;;  %v27364_v46 = vld [vmem:[#allocation2 + $0x18] sm:$0xff] }
 0xea9   :  { %25909 = vmatprep.subr.bf16.mxu0 %v36739_v23 }
 0xeaa   :  { %v23201_v9 = vand.u32 4294901760, %v35017_v51 }
 0xeab   :  { %24387 = vmatmul.mubr.msk.f32.gmra.mrb[14].mxu0 %vm12076_vm1, %v36507_v17 }
 0xeac   :  { %24388 = vmatprep.mubr.msk.f32.mxu0 %vm11981_vm12, %v36507_v17  ;;  %v23202_v20 = vsub.f32 %v35017_v51, %v23201_v9  ;;  %vm36755_vm12 = vcmask 261120  }
 0xeae   :  { %v23203_v56 = vand.u32 4294901760, %v23202_v20 }
 0xeaf   :  { %24389 = vmatmul.mubr.msk.f32.vlgmr.msra.gmra.mrb[8].mxu0 %vm11980_vm7, %v36507_v17  ;;  %vm36756_vm7 = vmmov %vm36755_vm12 }
 0xeb0   :  { %24390 = vmatprep.mubr.msk.f32.mxu0 %vm12013_vm14, %v36507_v17  ;;  %25911 = vmatpush1.bf16.xpose.msra.mxu0 %v36740_v45  ;;  %vm36758_vm14 = vmmov %vm36756_vm7 }
 0xeb1   :  { %25913 = vmatprep.subr.bf16.mxu0 %v36741_v24 }
 0xeb3   :  { %24391 = vmatmul.mubr.msk.f32.gmra.mrb[10].mxu0 %vm12012_vm15, %v36507_v17  ;;  %vm36759_vm15 = vmmov %vm36756_vm7 }
 0xeb4   :  { %24392 = vmatprep.mubr.msk.f32.mxu0 %vm12045_vm8, %v36507_v17  ;;  %vm36760_vm8 = vmmov %vm36756_vm7 }
 0xeb7   :  { %24393 = vmatmul.mubr.msk.f32.gmra.mrb[12].mxu0 %vm12044_vm9, %v36507_v17  ;;  %vm36761_vm9 = vmmov %vm36756_vm7 }
 0xeb8   :  { %24394 = vmatprep.mubr.msk.f32.mxu0 %vm12077_vm10, %v36507_v17  ;;  %25915 = vmatpush1.bf16.xpose.msra.mxu0 %v36742_v12  ;;  %vm36762_vm10 = vmmov %vm36756_vm7 }
 0xeb9   :  { %25917 = vmatprep.subr.bf16.mxu0 %v36743_v4 }
 0xebb   :  { %24395 = vmatmul.mubr.msk.f32.gmra.mrb[14].mxu0 %vm12076_vm1, %v36507_v17 }
 0xebc   :  { %23183 = vmatprep.mubr.f32.mxu0 %v23182_v26 }
 0xebf   :  { %23189 = vmatmul.mubr.f32.vlgmr.msra.gmra.mrb[8].mxu0 %v23188_v5 }
 0xec0   :  { %23198 = vmatprep.mubr.f32.mxu0 %v23197_v11  ;;  %25919 = vmatpush1.bf16.xpose.msra.mxu0 %v36744_v33 }
 0xec1   :  { %25921 = vmatprep.subr.bf16.mxu0 %v36745_v42 }
 0xec3   :  { %23204 = vmatmul.mubr.f32.gmra.mrb[10].mxu0 %v23203_v56 }
 0xec4   :  { %23213 = vmatprep.mubr.f32.mxu0 %v23212_v49 }
 0xec7   :  { %23219 = vmatmul.mubr.f32.gmra.mrb[12].mxu0 %v23218_v22 }
 0xec8   :  { %23228 = vmatprep.mubr.f32.mxu0 %v23227_v38  ;;  %25923 = vmatpush1.bf16.xpose.msra.mxu0 %v36746_v34 }
 0xec9   :  { %25925 = vmatprep.subr.bf16.mxu0 %v36747_v44 }
 0xecb   :  { %23234 = vmatmul.mubr.f32.gmra.mrb[14].mxu0 %v23233_v27 }
 0xecc   :  { %24396 = vmatprep.mubr.msk.f32.mxu0 %vm11983_vm4, %v36507_v17 }
 0xecf   :  { %24397 = vmatmul.mubr.msk.f32.vlgmr.msra.gmra.mrb[8].mxu0 %vm11982_vm0, %v36507_v17 }
 0xed0   :  { %24398 = vmatprep.mubr.msk.f32.mxu0 %vm12015_vm6, %v36507_v17  ;;  %25927 = vmatpush1.bf16.xpose.msra.mxu0 %v36748_v47 }
 0xed1   :  { %25929 = vmatprep.subr.bf16.mxu0 %v36749_v13 }
 0xed3   :  { %24399 = vmatmul.mubr.msk.f32.gmra.mrb[10].mxu0 %vm12014_vm3, %v36507_v17 }
 0xed4   :  { %24400 = vmatprep.mubr.msk.f32.mxu0 %vm12047_vm2, %v36507_v17 }
 0xed7   :  { %24401 = vmatmul.mubr.msk.f32.gmra.mrb[12].mxu0 %vm12046_vm11, %v36507_v17 }
 0xed8   :  { %24402 = vmatprep.mubr.msk.f32.mxu0 %vm12079_vm13, %v36507_v17  ;;  %25931 = vmatpush1.bf16.xpose.msra.mxu0 %v36750_v3 }
 0xed9   :  { %25933 = vmatprep.subr.bf16.mxu0 %v36739_v23 }
 0xedb   :  { %24403 = vmatmul.mubr.msk.f32.gmra.mrb[14].mxu0 %vm12078_vm5, %v36507_v17 }
 0xedc   :  { %23454 = vmatprep.mubr.f32.mxu0 %v34964_v60  ;;  %v27361_v60 = vld [vmem:[#allocation2] sm:$0xff] }
 0xedf   :  { %23457 = vmatmul.mubr.f32.vlgmr.msra.gmra.mrb[8].mxu0 %v34989_v48 }
 0xee0   :  { %23463 = vmatprep.mubr.f32.mxu0 %v34991_v37  ;;  %25935 = vmatpush1.bf16.xpose.msra.mxu0 %v36740_v45 }
 0xee1   :  { %25937 = vmatprep.subr.bf16.mxu0 %v36741_v24 }
 0xee3   :  { %23466 = vmatmul.mubr.f32.gmra.mrb[10].mxu0 %v35017_v51 }
 0xee4   :  { %23472 = vmatprep.mubr.f32.mxu0 %v35020_v2  ;;  %v36757_v2 = vld [vmem:[#allocation63_spill] sm:$0xff] }
 0xee7   :  { %23475 = vmatmul.mubr.f32.gmra.mrb[12].mxu0 %v35046_v43 }
 0xee8   :  { %23481 = vmatprep.mubr.f32.mxu0 %v35052_v29  ;;  %25939 = vmatpush1.bf16.xpose.msra.mxu0 %v36742_v12 }
 0xee9   :  { %25941 = vmatprep.subr.bf16.mxu0 %v36751_v54 }
 0xeeb   :  { %23484 = vmatmul.mubr.f32.gmra.mrb[14].mxu0 %v23230_v28 }
 0xeec   :  { %23564 = vmatprep.mubr.f32.mxu0 %v23180_v52 }
 0xeef   :  { %23568 = vmatmul.mubr.f32.vlgmr.msra.gmra.mrb[8].mxu0 %v23186_v32 }
 0xef0   :  { %23575 = vmatprep.mubr.f32.mxu0 %v23195_v18  ;;  %25943 = vmatpush1.bf16.xpose.msra.mxu0 %v36752_v58 }
 0xef1   :  { %25945 = vmatprep.subr.bf16.mxu0 %v36753_v35 }
 0xef3   :  { %23579 = vmatmul.mubr.f32.gmra.mrb[10].mxu0 %v23201_v9 }
 0xef4   :  { %23586 = vmatprep.mubr.f32.mxu0 %v23210_v1 }
 0xef7   :  { %23590 = vmatmul.mubr.f32.gmra.mrb[12].mxu0 %v23216_v61 }
 0xef8   :  { %23597 = vmatprep.mubr.f32.mxu0 %v23225_v63  ;;  %25947 = vmatpush1.bf16.xpose.msra.mxu0 %v36754_v62 }
 0xef9   :  { %25949 = vmatprep.subr.bf16.mxu0 %v36739_v23 }
 0xefb   :  { %23601 = vmatmul.mubr.f32.gmra.mrb[14].mxu0 %v23231_v50 }
 0xefc   :  { %24404 = vmatprep.mubr.msk.f32.mxu0 %vm11983_vm4, %v36507_v17 }
 0xeff   :  { %24405 = vmatmul.mubr.msk.f32.vlgmr.msra.gmra.mrb[8].mxu0 %vm11982_vm0, %v36507_v17 }
 0xf00   :  { %24406 = vmatprep.mubr.msk.f32.mxu0 %vm12015_vm6, %v36507_v17  ;;  %25951 = vmatpush1.bf16.xpose.msra.mxu0 %v36740_v45 }
 0xf01   :  { %25953 = vmatprep.subr.bf16.mxu0 %v36741_v24 }
 0xf03   :  { %24407 = vmatmul.mubr.msk.f32.gmra.mrb[10].mxu0 %vm12014_vm3, %v36507_v17 }
 0xf04   :  { %24408 = vmatprep.mubr.msk.f32.mxu0 %vm12047_vm2, %v36507_v17 }
 0xf07   :  { %24409 = vmatmul.mubr.msk.f32.gmra.mrb[12].mxu0 %vm12046_vm11, %v36507_v17 }
 0xf08   :  { %24410 = vmatprep.mubr.msk.f32.mxu0 %vm12079_vm13, %v36507_v17  ;;  %25955 = vmatpush1.bf16.xpose.msra.mxu0 %v36742_v12 }
 0xf0b   :  { %24411 = vmatmul.mubr.msk.f32.gmra.mrb[14].mxu0 %vm12078_vm5, %v36507_v17 }
 0xf0c   :  { %24412 = vmatprep.mubr.msk.f32.mxu0 %vm11983_vm4, %v36507_v17 }
 0xf0f   :  { %24413 = vmatmul.mubr.msk.f32.vlgmr.msra.gmra.mrb[8].mxu0 %vm11982_vm0, %v36507_v17 }
 0xf10   :  { %24414 = vmatprep.mubr.msk.f32.mxu0 %vm12015_vm6, %v36507_v17 }
 0xf13   :  { %24415 = vmatmul.mubr.msk.f32.gmra.mrb[10].mxu0 %vm12014_vm3, %v36507_v17 }
 0xf14   :  { %24416 = vmatprep.mubr.msk.f32.mxu0 %vm12047_vm2, %v36507_v17 }
 0xf17   :  { %24417 = vmatmul.mubr.msk.f32.gmra.mrb[12].mxu0 %vm12046_vm11, %v36507_v17 }
 0xf18   :  { %24418 = vmatprep.mubr.msk.f32.mxu0 %vm12079_vm13, %v36507_v17 }
 0xf1b   :  { %24419 = vmatmul.mubr.msk.f32.gmra.mrb[14].mxu0 %vm12078_vm5, %v36507_v17 }
 0xfe2   :  { %v23799_v0 = vpop.f32.mrb[8].mxu0 }
 0xfe3   :  { %v25964_v14 = vadd.f32 %v23799_v0, %v32054_v8  ;;  %v23801_v23 = vpop.f32.mrb[9].mxu0 }
 0xfe5   :  { %v23824_v40 = vsub.f32 %v25964_v14, %v27361_v60 }
 0xfe6   :  { %v23806_v45 = vpop.f32.mrb[10].mxu0 }
 0xfe7   :  { %v23828_v24 = vadd.f32 %v27361_v60, %v23824_v40  ;;  %v25965_v59 = vadd.f32 %v23806_v45, %v32145_v39  ;;  %v23808_v52 = vpop.f32.mrb[11].mxu0 }
 0xfe9   :  { %v23847_v48 = vsub.f32 %v27361_v60, %v23828_v24  ;;  %23832 = vst.msk [vmem:[#allocation7] sm:$0xff] %vm36755_vm12, %v23828_v24  ;;  %v23825_v37 = vsub.f32 %v25965_v59, %v27362_v15 }
 0xfea   :  { %v23813_v21 = vpop.f32.mrb[12].mxu0 }
 0xfeb   :  { %v23829_v55 = vadd.f32 %v27362_v15, %v23825_v37  ;;  %v25966_v57 = vadd.f32 %v23813_v21, %v32238_v19  ;;  %v23815_v7 = vpop.f32.mrb[13].mxu0  ;;  %v23855_v17 = vmul.f32 %v23847_v48, %v23847_v48 }
 0xfed   :  { %v23848_v8 = vsub.f32 %v27362_v15, %v23829_v55  ;;  %23833 = vst.msk [vmem:[#allocation7 + $0x8] sm:$0xff] %vm36756_vm7, %v23829_v55  ;;  %v23826_v32 = vsub.f32 %v25966_v57, %v27363_v6  ;;  %v23871_v12 = vsel %vm36758_vm14, %v23855_v17, 0.0 }
 0xfee   :  { %v23820_v51 = vpop.f32.mrb[14].mxu0 }
 0xfef   :  { %v23856_v18 = vmul.f32 %v23848_v8, %v23848_v8  ;;  %v23830_v39 = vadd.f32 %v27363_v6, %v23826_v32  ;;  %v25967_v31 = vadd.f32 %v23820_v51, %v36757_v2  ;;  %v23822_v36 = vpop.f32.mrb[15].mxu0 }
 0xff1   :  { %v23872_v26 = vsel %vm36759_vm15, %v23856_v18, 0.0  ;;  %v23849_v19 = vsub.f32 %v27363_v6, %v23830_v39  ;;  %23834 = vst.msk [vmem:[#allocation7 + $0x10] sm:$0xff] %vm36760_vm8, %v23830_v39  ;;  %v23827_v4 = vsub.f32 %v25967_v31, %v27364_v46 }
 0xff2   :  { %v23873_v9 = vadd.f32 %v23872_v26, %v23871_v12 }
 0xff3   :  { %v23857_v43 = vmul.f32 %v23849_v19, %v23849_v19  ;;  %v23831_v53 = vadd.f32 %v27364_v46, %v23827_v4 }
 0xff5   :  { %v23874_v1 = vsel %vm36761_vm9, %v23857_v43, 0.0  ;;  %v23850_v29 = vsub.f32 %v27364_v46, %v23831_v53  ;;  %23835 = vst.msk [vmem:[#allocation7 + $0x18] sm:$0xff] %vm36762_vm10, %v23831_v53 }
 0xff6   :  { %v23875_v10 = vadd.f32 %v23874_v1, %v23873_v9 }
 0xff7   :  { %27420 = shalt.err (!%p27417_p6)
}
 0xff8   :  { %s27421_s16 = scalar_lea.hbm %s35232_s2, 512 }
 0xff9   :  { %p27422_p7 = scmp.ne.s32.totalorder %s35232_s2, %s27421_s16  ;;  %p27425_p8 = scmp.lt.u32.totalorder %s27421_s16, %s35232_s2 }
 0xffb   :  { %p27427_p9 = pnand %p27425_p8, %p27422_p7 }
 0xffd   :  { %27430 = shalt.err (!%p27427_p9)
}
 0xffe   :  { %23897 = dma.vmem_to_hbm [thread:$0]  %s23892_s12, 512, %s35232_s2, [#allocation4], %s27438_s22, %s27438_s22, %s27439_s23   ;;  %v23858_v5 = vmul.f32 %v23850_v29, %v23850_v29  ;;  %vm36763_vm1 = vmmov %vm36756_vm7  ;;  %vm23884_vm4 = vcmask 253952  }
0x1000   :  { %v23876_v20 = vsel %vm36763_vm1, %v23858_v5, 0.0 }
0x1001   :  { %v23877_v61 = vadd.f32 %v23876_v20, %v23875_v10 }
0x1003   :  { %v23878_v28 = vrot.slane %v23877_v61, 4 }
0x1005   :  { %v23879_v11 = vadd.f32 %v23878_v28, %v23877_v61 }
0x1007   :  { %v23880_v25 = vrot.slane %v23879_v11, 2 }
0x1009   :  { %v23881_v63 = vadd.f32 %v23880_v25, %v23879_v11 }
0x100b   :  { %v23882_v33 = vrot.slane %v23881_v63, 1 }
0x100d   :  { %v23883_v56 = vadd.f32 %v23882_v33, %v23881_v63 }
0x100f   :  { %23885 = vst.msk [vmem:[%s35233_s3] sm:$0x1] %vm23884_vm4, %v23883_v56 }
0x1010   :  { %27435 = dma.done.wait [#allocation4], 512  }
0x1011   :  { %27436 = vsyncadd [#allocation4], 4294966784 }
0x1012   :  { %23905 = vsyncpa [#allocation3], 1 }
0x1013   :  { %23906 = vsyncpa [#allocation6], 1 }
0x1014   :  { %23907 = vsyncpa [#allocation4], 1 }

</bundles_post_ra>
